<compile_context>
chip_gen: v5e
topology: v5e:2x2
jax: 0.10.0
libtpu: 0.0.40
codegen_flags: <defaults>
</compile_context>

<pallas_src>
import numpy as np

import jax
import jax.numpy as jnp
from jax import lax
from jax.experimental import pallas as pl
from jax.experimental.pallas import tpu as pltpu

BN_EPS = 1e-5


# ------------------------------ small helpers --------------------------------

def _round_up(x, m):
    return ((x + m - 1) // m) * m


def _tap_offsets(H, W):
    """Flat-index offsets of the 27 taps of a 3x3x3 'same' conv (tap-major)."""
    offs = []
    for kd in range(3):
        for kh in range(3):
            for kw in range(3):
                offs.append((kd - 1) * H * W + (kh - 1) * W + (kw - 1))
    return offs


def _tap_masks(D, H, W):
    """(27, D*H*W) 0/1 validity masks (zero-pad boundary) for each tap."""
    d = np.arange(D)[:, None, None]
    h = np.arange(H)[None, :, None]
    w = np.arange(W)[None, None, :]
    rows = []
    for kd in range(3):
        for kh in range(3):
            for kw in range(3):
                valid = ((d + kd - 1 >= 0) & (d + kd - 1 < D)
                         & (h + kh - 1 >= 0) & (h + kh - 1 < H)
                         & (w + kw - 1 >= 0) & (w + kw - 1 < W))
                rows.append(np.broadcast_to(valid, (D, H, W)).reshape(-1))
    return jnp.asarray(np.stack(rows, 0), dtype=jnp.bfloat16)


# ------------------------------ Pallas kernel --------------------------------

def _make_kernel(D, H, W, C2, C1, Cmid, Cout):
    """Builds the fused double-partial-conv kernel for one batch element."""
    P = D * H * W
    Cin = C2 + C1
    # Margin so every shifted tap load stays in-bounds; rounded to 128 lanes so
    # the interior stores are lane-aligned (only the tap loads are unaligned).
    margin = _round_up(H * W + W + 1, 128)
    offs = _tap_offsets(H, W)
    slide1 = float(Cin * 27)
    slide2 = float(Cmid * 27)
    bf16 = jnp.bfloat16

    def im2col(xext_ref, patches_ref, tapm_ref, cplus):
        # xext_ref: (cplus, P + 2*margin) bf16 with zeroed margins.
        # patches_ref: (27*cplus, P) bf16, fully overwritten every step.
        for t, off in enumerate(offs):
            slab = xext_ref[:, pl.ds(margin + off, P)]        # (cplus, P)
            valid = tapm_ref[pl.ds(t, 1), :]                  # (1, P) 0/1
            patches_ref[pl.ds(t * cplus, cplus), :] = slab * valid

    def kernel(x2_ref, m2_ref, x1_ref, m1_ref, tapm_ref, w1_ref, w2_ref,
               s1_ref, b1_ref, s2_ref, b2_ref,
               out_ref, um_ref,
               xext1_ref, patches1_ref, xext2_ref, patches2_ref):
        # Zero the margin scratches every step (only the margins matter; the
        # interior is overwritten below).  Per-step init keeps the grid axis
        # free of cross-step state so "parallel" splitting stays legal.
        xext1_ref[...] = jnp.zeros_like(xext1_ref)
        xext2_ref[...] = jnp.zeros_like(xext2_ref)

        x2 = x2_ref[0]                                        # (C2, P) f32
        m2 = m2_ref[0]
        x1 = x1_ref[0]                                        # (C1, P) f32
        m1 = m1_ref[0]

        # channel concat [x2, x1] (== torch.cat([x2, x1], dim=1)) is just two
        # row-block stores; the extra row carries the per-voxel mask count.
        xext1_ref[pl.ds(0, C2), pl.ds(margin, P)] = (x2 * m2).astype(bf16)
        xext1_ref[pl.ds(C2, C1), pl.ds(margin, P)] = (x1 * m1).astype(bf16)
        mcnt = (jnp.sum(m2, axis=0, keepdims=True)
                + jnp.sum(m1, axis=0, keepdims=True))         # (1, P) f32
        xext1_ref[pl.ds(Cin, 1), pl.ds(margin, P)] = mcnt.astype(bf16)

        # ---- layer 1: one bf16 matmul -> conv result + mask update_sum -----
        im2col(xext1_ref, patches1_ref, tapm_ref, Cin + 1)
        res1 = jnp.dot(w1_ref[...], patches1_ref[...],
                       preferred_element_type=jnp.float32)    # (rows1, P) f32
        conv1 = res1[:Cmid, :]
        msum1 = res1[Cmid:Cmid + 1, :]
        um1 = jnp.clip(msum1, 0.0, 1.0)                       # update_mask 1
        ratio1 = slide1 * pl.reciprocal(msum1 + 1e-8, approx=True)
        h1 = conv1 * (ratio1 * um1)
        h1 = h1 * s1_ref[...] + b1_ref[...]                   # folded eval BN
        h1 = h1 * jax.nn.sigmoid(h1)                          # SiLU, (Cmid, P)

        # ---- layer 2: mask is a per-voxel scalar (same for all channels) ---
        xext2_ref[pl.ds(0, Cmid), pl.ds(margin, P)] = (h1 * um1).astype(bf16)
        xext2_ref[pl.ds(Cmid, 1), pl.ds(margin, P)] = (
            um1 * float(Cmid)).astype(bf16)
        im2col(xext2_ref, patches2_ref, tapm_ref, Cmid + 1)
        res2 = jnp.dot(w2_ref[...], patches2_ref[...],
                       preferred_element_type=jnp.float32)    # (rows2, P) f32
        conv2 = res2[:Cout, :]
        msum2 = res2[Cout:Cout + 1, :]
        um2 = jnp.clip(msum2, 0.0, 1.0)                       # update_mask 2
        ratio2 = slide2 * pl.reciprocal(msum2 + 1e-8, approx=True)
        h2 = conv2 * (ratio2 * um2)
        h2 = h2 * s2_ref[...] + b2_ref[...]
        h2 = h2 * jax.nn.sigmoid(h2)                          # (Cout, P)

        out_ref[0] = h2                                       # lane-dense store
        um_ref[0] = um2                                       # one value / voxel

    return kernel, margin


def _fused_double_partial_conv(x2f, m2f, x1f, m1f, tap_mask,
                               w1, w2, s1, b1, s2, b2, D, H, W):
    """x2f/m2f: (N,C2,P); x1f/m1f: (N,C1,P) -> ((N,Cout,P), (N,1,P))."""
    N, C2, P = x2f.shape
    C1 = x1f.shape[1]
    Cin = C1 + C2
    Cmid = s1.shape[0]
    Cout = s2.shape[0]
    R1, K1 = w1.shape
    R2, K2 = w2.shape
    kernel, margin = _make_kernel(D, H, W, C2, C1, Cmid, Cout)
    const2 = lambda n: (0, 0)

    return pl.pallas_call(
        kernel,
        out_shape=(jax.ShapeDtypeStruct((N, Cout, P), jnp.float32),
                   jax.ShapeDtypeStruct((N, 1, P), jnp.float32)),
        grid_spec=pltpu.PrefetchScalarGridSpec(
            num_scalar_prefetch=0,
            grid=(N,),
            in_specs=[
                pl.BlockSpec((1, C2, P), lambda n: (n, 0, 0)),
                pl.BlockSpec((1, C2, P), lambda n: (n, 0, 0)),
                pl.BlockSpec((1, C1, P), lambda n: (n, 0, 0)),
                pl.BlockSpec((1, C1, P), lambda n: (n, 0, 0)),
                pl.BlockSpec((27, P), const2),     # tap boundary masks
                pl.BlockSpec((R1, K1), const2),    # layer-1 big weight (bf16)
                pl.BlockSpec((R2, K2), const2),    # layer-2 big weight (bf16)
                pl.BlockSpec((Cmid, 1), const2),   # folded BN1 scale
                pl.BlockSpec((Cmid, 1), const2),   # folded BN1 shift
                pl.BlockSpec((Cout, 1), const2),   # folded BN2 scale
                pl.BlockSpec((Cout, 1), const2),   # folded BN2 shift
            ],
            out_specs=(
                pl.BlockSpec((1, Cout, P), lambda n: (n, 0, 0)),
                pl.BlockSpec((1, 1, P), lambda n: (n, 0, 0)),
            ),
            scratch_shapes=[
                pltpu.VMEM((Cin + 1, P + 2 * margin), jnp.bfloat16),   # xext1
                pltpu.VMEM((27 * (Cin + 1), P), jnp.bfloat16),         # patches1
                pltpu.VMEM((Cmid + 1, P + 2 * margin), jnp.bfloat16),  # xext2
                pltpu.VMEM((27 * (Cmid + 1), P), jnp.bfloat16),        # patches2
            ]),
        compiler_params=pltpu.CompilerParams(
            dimension_semantics=("parallel",),
            # Safe on all of v5e/v6e (128 MiB) and v7x (64 MiB physical).
            vmem_limit_bytes=48 * 1024 * 1024),
    )(x2f, m2f, x1f, m1f, tap_mask, w1, w2, s1, b1, s2, b2)


# ----------------------------- parameter setup -------------------------------

def _fold_bn(gamma, beta, running_mean, running_var):
    scale = gamma / jnp.sqrt(running_var + BN_EPS)
    return scale, beta - running_mean * scale


def _build_big_weight(w_torch):
    """(Cout, Cin, 3, 3, 3) torch conv weight -> bf16 (rows_pad, 27*(Cin+1)).

    Row j < Cout holds the conv weights of output channel j; row Cout holds a
    1.0 on every mask column so the same matmul also emits the update_sum.
    Column tap*(Cin+1)+c is input channel c of tap (kd,kh,kw), tap-major.
    Rows are sublane-padded (multiple of 8) with zeros.
    """
    cout, cin = int(w_torch.shape[0]), int(w_torch.shape[1])
    rows = _round_up(cout + 1, 8)
    wf = jnp.transpose(w_torch, (2, 3, 4, 1, 0)).reshape(27, cin, cout)
    cols = jnp.zeros((27, cin + 1, rows), jnp.float32)
    cols = cols.at[:, :cin, :cout].set(wf)
    cols = cols.at[:, cin, cout].set(1.0)
    big = jnp.transpose(cols, (2, 0, 1)).reshape(rows, 27 * (cin + 1))
    return big.astype(jnp.bfloat16)


def init_params(key, in_channels, out_channels):
    """Random torch-layout weights + eval-mode BN stats (folded scale/shift)."""
    mid = in_channels // 2
    ks = jax.random.split(key, 8)
    w1 = 0.1 * jax.random.normal(ks[0], (mid, in_channels, 3, 3, 3), jnp.float32)
    w2 = 0.1 * jax.random.normal(ks[1], (out_channels, mid, 3, 3, 3), jnp.float32)
    g1 = 1.0 + 0.1 * jax.random.normal(ks[2], (mid,), jnp.float32)
    b1 = 0.1 * jax.random.normal(ks[3], (mid,), jnp.float32)
    rm1 = 0.05 * jax.random.normal(ks[4], (mid,), jnp.float32)
    rv1 = jnp.abs(1.0 + 0.1 * jax.random.normal(ks[5], (mid,), jnp.float32))
    g2 = 1.0 + 0.1 * jax.random.normal(ks[6], (out_channels,), jnp.float32)
    b2 = 0.1 * jax.random.normal(ks[7], (out_channels,), jnp.float32)
    rm2 = jnp.zeros((out_channels,), jnp.float32)
    rv2 = jnp.ones((out_channels,), jnp.float32)
    s1, sh1 = _fold_bn(g1, b1, rm1, rv1)
    s2, sh2 = _fold_bn(g2, b2, rm2, rv2)
    return {"w1_t": w1, "w2_t": w2,
            "scale1": s1, "shift1": sh1, "scale2": s2, "shift2": sh2}


def prepare_kernel_params(raw):
    mid = raw["w1_t"].shape[0]
    cout = raw["w2_t"].shape[0]
    return {
        "w1": _build_big_weight(raw["w1_t"]),
        "w2": _build_big_weight(raw["w2_t"]),
        "scale1": raw["scale1"].reshape(mid, 1),
        "shift1": raw["shift1"].reshape(mid, 1),
        "scale2": raw["scale2"].reshape(cout, 1),
        "shift2": raw["shift2"].reshape(cout, 1),
    }


# ------------------------------- forward pass --------------------------------

def _nearest_up2(t):
    """Nearest-neighbour x2 upsample of NCDHW (single broadcast+reshape)."""
    N, C, d, h, w = t.shape
    t = jnp.broadcast_to(t[:, :, :, None, :, None, :, None],
                         (N, C, d, 2, h, 2, w, 2))
    return t.reshape(N, C, 2 * d, 2 * h, 2 * w)


@jax.jit
def inpainting_up3d_forward(kparams, x1, mask1, x2, mask2):
    """Inputs in PyTorch NCDHW; returns (x, mask) in NCDHW."""
    x1u, m1u = _nearest_up2(x1), _nearest_up2(mask1)
    dZ = x2.shape[2] - x1u.shape[2]
    dY = x2.shape[3] - x1u.shape[3]
    dX = x2.shape[4] - x1u.shape[4]
    pad = ((0, 0), (0, 0), (dZ // 2, dZ - dZ // 2),
           (dY // 2, dY - dY // 2), (dX // 2, dX - dX // 2))
    x1u, m1u = jnp.pad(x1u, pad), jnp.pad(m1u, pad)

    N, C2, D, H, W = x2.shape
    C1 = x1u.shape[1]
    P = D * H * W
    Cout = kparams["scale2"].shape[0]

    # Channels-major with flattened voxels: free reshapes of contiguous NCDHW.
    x2f = x2.reshape(N, C2, P)
    m2f = mask2.reshape(N, C2, P)
    x1f = x1u.reshape(N, C1, P)
    m1f = m1u.reshape(N, C1, P)
    tap_mask = _tap_masks(D, H, W)            # compile-time constant

    out, um = _fused_double_partial_conv(
        x2f, m2f, x1f, m1f, tap_mask,
        kparams["w1"], kparams["w2"],
        kparams["scale1"], kparams["shift1"],
        kparams["scale2"], kparams["shift2"], D, H, W)

    out = out.reshape(N, Cout, D, H, W)       # already channels-major: free
    # PyTorch returns a Cout-channel mask whose channels are all identical;
    # keep that contract (consumers should prefer the 1-channel `um` form).
    mask_out = jnp.broadcast_to(um.reshape(N, 1, D, H, W), (N, Cout, D, H, W))
    return out, mask_out


# ----------------------------- pure-JAX reference ----------------------------

def _ref_partial_conv(x, m, w_t, matmul_dtype):
    dn = lax.conv_dimension_numbers(x.shape, w_t.shape, ("NCDHW", "OIDHW", "NCDHW"))
    xm = (x * m).astype(matmul_dtype)
    wc = w_t.astype(matmul_dtype)
    raw = lax.conv_general_dilated(xm, wc, (1, 1, 1), [(1, 1)] * 3,
                                   dimension_numbers=dn,
                                   preferred_element_type=jnp.float32)
    upd = lax.conv_general_dilated(m.astype(matmul_dtype), jnp.ones_like(wc),
                                   (1, 1, 1), [(1, 1)] * 3,
                                   dimension_numbers=dn,
                                   preferred_element_type=jnp.float32)
    slide = w_t.shape[1] * 27
    ratio = slide / (upd + 1e-8)
    um = jnp.clip(upd, 0.0, 1.0)
    return raw * ratio * um, um


def _ref_forward(raw_params, x1, m1, x2, m2, matmul_dtype=jnp.bfloat16):
    """Pure-JAX NCDHW reference of InpaintingUp3D (eval-mode BN).  Matmul
    operands use `matmul_dtype` to mirror the kernel's bf16 MXU path; the
    accumulation and epilogue stay f32."""
    x1u, m1u = _nearest_up2(x1), _nearest_up2(m1)
    dZ = x2.shape[2] - x1u.shape[2]
    dY = x2.shape[3] - x1u.shape[3]
    dX = x2.shape[4] - x1u.shape[4]
    pad = ((0, 0), (0, 0), (dZ // 2, dZ - dZ // 2),
           (dY // 2, dY - dY // 2), (dX // 2, dX - dX // 2))
    x1u, m1u = jnp.pad(x1u, pad), jnp.pad(m1u, pad)
    x = jnp.concatenate([x2, x1u], axis=1)
    m = jnp.concatenate([m2, m1u], axis=1)

    def bn_silu(h, s, b):
        h = h * s.reshape(1, -1, 1, 1, 1) + b.reshape(1, -1, 1, 1, 1)
        return h * jax.nn.sigmoid(h)

    h, um = _ref_partial_conv(x, m, raw_params["w1_t"], matmul_dtype)
    h = bn_silu(h, raw_params["scale1"], raw_params["shift1"])
    h, um = _ref_partial_conv(h, um, raw_params["w2_t"], matmul_dtype)
    h = bn_silu(h, raw_params["scale2"], raw_params["shift2"])
    return h, um


# ----------------------------------- main -------------------------------------

if __name__ == "__main__":
    in_channels, out_channels = 8, 8   # concat(x2, x1) has in_channels channels
    c1 = in_channels // 2              # channels of x1 (deeper feature map)
    c2 = in_channels - c1              # channels of x2 (skip connection)
    N, D1 = 2, 4                       # x1 spatial 4 -> upsampled to 8
    D2 = 2 * D1                        # x2 spatial 8

    key = jax.random.PRNGKey(0)
    kp, kx1, km1, kx2, km2 = jax.random.split(key, 5)
    raw_params = init_params(kp, in_channels, out_channels)
    kparams = prepare_kernel_params(raw_params)

    x1 = jax.random.normal(kx1, (N, c1, D1, D1, D1), jnp.float32)
    mask1 = jax.random.bernoulli(km1, 0.7, (N, c1, D1, D1, D1)).astype(jnp.float32)
    x2 = jax.random.normal(kx2, (N, c2, D2, D2, D2), jnp.float32)
    mask2 = jax.random.bernoulli(km2, 0.7, (N, c2, D2, D2, D2)).astype(jnp.float32)

    out_x, out_mask = inpainting_up3d_forward(kparams, x1, mask1, x2, mask2)
    jax.block_until_ready((out_x, out_mask))

    assert out_x.shape == (N, out_channels, D2, D2, D2), out_x.shape
    assert out_mask.shape == (N, out_channels, D2, D2, D2), out_mask.shape
    assert bool(jnp.all(jnp.isfinite(out_x)))

    # Correctness vs a pure-JAX PartialConv3d port (bf16 matmul operands to
    # mirror the kernel's MXU path, f32 accumulation / epilogue).
    ref_x, ref_mask = _ref_forward(raw_params, x1, mask1, x2, mask2)
    err_x = float(jnp.max(jnp.abs(out_x - ref_x)))
    err_m = float(jnp.max(jnp.abs(out_mask - ref_mask)))
    # 5e-2 absorbs bf16 summation-order differences and the approx reciprocal.
    assert err_x < 5e-2, f"activation mismatch: {err_x}"
    assert err_m < 1e-3, f"mask mismatch: {err_m}"

    print("KERNEL_OK")
</pallas_src>

<mosaic_0001>
module attributes {stable_mosaic.version = 11 : i64} {
  func.func @kernel(%arg0: i32, %arg1: memref<1x4x512xf32, #tpu.memory_space<vmem>>, %arg2: memref<1x4x512xf32, #tpu.memory_space<vmem>>, %arg3: memref<1x4x512xf32, #tpu.memory_space<vmem>>, %arg4: memref<1x4x512xf32, #tpu.memory_space<vmem>>, %arg5: memref<27x512xbf16, #tpu.memory_space<vmem>>, %arg6: memref<8x243xbf16, #tpu.memory_space<vmem>>, %arg7: memref<16x135xbf16, #tpu.memory_space<vmem>>, %arg8: memref<4x1xf32, #tpu.memory_space<vmem>>, %arg9: memref<4x1xf32, #tpu.memory_space<vmem>>, %arg10: memref<8x1xf32, #tpu.memory_space<vmem>>, %arg11: memref<8x1xf32, #tpu.memory_space<vmem>>, %arg12: memref<1x8x512xf32, #tpu.memory_space<vmem>>, %arg13: memref<1x1x512xf32, #tpu.memory_space<vmem>>, %arg14: memref<9x768xbf16, #tpu.memory_space<vmem>>, %arg15: memref<243x512xbf16, #tpu.memory_space<vmem>>, %arg16: memref<5x768xbf16, #tpu.memory_space<vmem>>, %arg17: memref<135x512xbf16, #tpu.memory_space<vmem>>) attributes {dimension_semantics = [#tpu.dimension_semantics<parallel>], iteration_bounds = array<i64: 2>, scalar_prefetch = 0 : i64, scratch_operands = 4 : i64, tpu.core_type = #tpu.core_type<tc>, window_params = [{transform_indices = @transform_0, window_bounds = array<i64: 1, 4, 512>}, {transform_indices = @transform_1, window_bounds = array<i64: 1, 4, 512>}, {transform_indices = @transform_2, window_bounds = array<i64: 1, 4, 512>}, {transform_indices = @transform_3, window_bounds = array<i64: 1, 4, 512>}, {pipeline_mode = #tpu.pipeline_mode<synchronous>, transform_indices = @transform_4, window_bounds = array<i64: 27, 512>}, {pipeline_mode = #tpu.pipeline_mode<synchronous>, transform_indices = @transform_5, window_bounds = array<i64: 8, 243>}, {pipeline_mode = #tpu.pipeline_mode<synchronous>, transform_indices = @transform_6, window_bounds = array<i64: 16, 135>}, {pipeline_mode = #tpu.pipeline_mode<synchronous>, transform_indices = @transform_7, window_bounds = array<i64: 4, 1>}, {pipeline_mode = #tpu.pipeline_mode<synchronous>, transform_indices = @transform_8, window_bounds = array<i64: 4, 1>}, {pipeline_mode = #tpu.pipeline_mode<synchronous>, transform_indices = @transform_9, window_bounds = array<i64: 8, 1>}, {pipeline_mode = #tpu.pipeline_mode<synchronous>, transform_indices = @transform_10, window_bounds = array<i64: 8, 1>}, {transform_indices = @transform_11, window_bounds = array<i64: 1, 8, 512>}, {transform_indices = @transform_12, window_bounds = array<i64: 1, 1, 512>}]} {
    %cst = arith.constant 0.000000e+00 : bf16
    %0 = vector.broadcast %cst : bf16 to vector<9x768xbf16>
    %c0 = arith.constant 0 : index
    %c0_0 = arith.constant 0 : index
    %1 = vector.load %arg14[%c0, %c0_0] : memref<9x768xbf16, #tpu.memory_space<vmem>>, vector<9x768xbf16>
    tpu.vector_store %arg14[%c0, %c0_0], %0 {strides = array<i32>} : memref<9x768xbf16, #tpu.memory_space<vmem>>, vector<9x768xbf16>,
    %cst_1 = arith.constant 0.000000e+00 : bf16
    %2 = vector.broadcast %cst_1 : bf16 to vector<5x768xbf16>
    %c0_2 = arith.constant 0 : index
    %c0_3 = arith.constant 0 : index
    %3 = vector.load %arg16[%c0_2, %c0_3] : memref<5x768xbf16, #tpu.memory_space<vmem>>, vector<5x768xbf16>
    tpu.vector_store %arg16[%c0_2, %c0_3], %2 {strides = array<i32>} : memref<5x768xbf16, #tpu.memory_space<vmem>>, vector<5x768xbf16>,
    %c0_4 = arith.constant 0 : index
    %c0_5 = arith.constant 0 : index
    %c0_6 = arith.constant 0 : index
    %4 = vector.load %arg1[%c0_4, %c0_5, %c0_6] : memref<1x4x512xf32, #tpu.memory_space<vmem>>, vector<1x4x512xf32>
    %5 = vector.shape_cast %4 : vector<1x4x512xf32> to vector<4x512xf32>
    %c0_7 = arith.constant 0 : index
    %c0_8 = arith.constant 0 : index
    %c0_9 = arith.constant 0 : index
    %6 = vector.load %arg2[%c0_7, %c0_8, %c0_9] : memref<1x4x512xf32, #tpu.memory_space<vmem>>, vector<1x4x512xf32>
    %7 = vector.shape_cast %6 : vector<1x4x512xf32> to vector<4x512xf32>
    %c0_10 = arith.constant 0 : index
    %c0_11 = arith.constant 0 : index
    %c0_12 = arith.constant 0 : index
    %8 = vector.load %arg3[%c0_10, %c0_11, %c0_12] : memref<1x4x512xf32, #tpu.memory_space<vmem>>, vector<1x4x512xf32>
    %9 = vector.shape_cast %8 : vector<1x4x512xf32> to vector<4x512xf32>
    %c0_13 = arith.constant 0 : index
    %c0_14 = arith.constant 0 : index
    %c0_15 = arith.constant 0 : index
    %10 = vector.load %arg4[%c0_13, %c0_14, %c0_15] : memref<1x4x512xf32, #tpu.memory_space<vmem>>, vector<1x4x512xf32>
    %11 = vector.shape_cast %10 : vector<1x4x512xf32> to vector<4x512xf32>
    %12 = arith.mulf %5, %7 : vector<4x512xf32>
    %13 = arith.truncf %12 : vector<4x512xf32> to vector<4x512xbf16>
    %c0_16 = arith.constant 0 : index
    %c128 = arith.constant 128 : index
    %14 = vector.load %arg14[%c0_16, %c128] : memref<9x768xbf16, #tpu.memory_space<vmem>>, vector<4x512xbf16>
    tpu.vector_store %arg14[%c0_16, %c128], %13 {strides = array<i32>} : memref<9x768xbf16, #tpu.memory_space<vmem>>, vector<4x512xbf16>,
    %15 = arith.mulf %9, %11 : vector<4x512xf32>
    %16 = arith.truncf %15 : vector<4x512xf32> to vector<4x512xbf16>
    %c4 = arith.constant 4 : index
    %c128_17 = arith.constant 128 : index
    %17 = vector.load %arg14[%c4, %c128_17] : memref<9x768xbf16, #tpu.memory_space<vmem>>, vector<4x512xbf16>
    tpu.vector_store %arg14[%c4, %c128_17], %16 {strides = array<i32>} : memref<9x768xbf16, #tpu.memory_space<vmem>>, vector<4x512xbf16>,
    %cst_18 = arith.constant dense<0.000000e+00> : vector<512xf32>
    %18 = vector.multi_reduction <add>, %7, %cst_18 [0] : vector<4x512xf32> to vector<512xf32>
    %19 = vector.shape_cast %18 : vector<512xf32> to vector<1x512xf32>
    %cst_19 = arith.constant dense<0.000000e+00> : vector<512xf32>
    %20 = vector.multi_reduction <add>, %11, %cst_19 [0] : vector<4x512xf32> to vector<512xf32>
    %21 = vector.shape_cast %20 : vector<512xf32> to vector<1x512xf32>
    %22 = arith.addf %19, %21 : vector<1x512xf32>
    %23 = arith.truncf %22 : vector<1x512xf32> to vector<1x512xbf16>
    %c8 = arith.constant 8 : index
    %c128_20 = arith.constant 128 : index
    %24 = vector.load %arg14[%c8, %c128_20] : memref<9x768xbf16, #tpu.memory_space<vmem>>, vector<1x512xbf16>
    tpu.vector_store %arg14[%c8, %c128_20], %23 {strides = array<i32>} : memref<9x768xbf16, #tpu.memory_space<vmem>>, vector<1x512xbf16>,
    %c0_21 = arith.constant 0 : index
    %c55 = arith.constant 55 : index
    %25 = vector.load %arg14[%c0_21, %c55] : memref<9x768xbf16, #tpu.memory_space<vmem>>, vector<9x512xbf16>
    %c0_22 = arith.constant 0 : index
    %c0_23 = arith.constant 0 : index
    %26 = vector.load %arg5[%c0_22, %c0_23] : memref<27x512xbf16, #tpu.memory_space<vmem>>, vector<1x512xbf16>
    %27 = vector.broadcast %26 : vector<1x512xbf16> to vector<9x512xbf16>
    %28 = arith.mulf %25, %27 : vector<9x512xbf16>
    %c0_24 = arith.constant 0 : index
    %c0_25 = arith.constant 0 : index
    %29 = vector.load %arg15[%c0_24, %c0_25] : memref<243x512xbf16, #tpu.memory_space<vmem>>, vector<9x512xbf16>
    tpu.vector_store %arg15[%c0_24, %c0_25], %28 {strides = array<i32>} : memref<243x512xbf16, #tpu.memory_space<vmem>>, vector<9x512xbf16>,
    %c0_26 = arith.constant 0 : index
    %c56 = arith.constant 56 : index
    %30 = vector.load %arg14[%c0_26, %c56] : memref<9x768xbf16, #tpu.memory_space<vmem>>, vector<9x512xbf16>
    %c1 = arith.constant 1 : index
    %c0_27 = arith.constant 0 : index
    %31 = vector.load %arg5[%c1, %c0_27] : memref<27x512xbf16, #tpu.memory_space<vmem>>, vector<1x512xbf16>
    %32 = vector.broadcast %31 : vector<1x512xbf16> to vector<9x512xbf16>
    %33 = arith.mulf %30, %32 : vector<9x512xbf16>
    %c9 = arith.constant 9 : index
    %c0_28 = arith.constant 0 : index
    %34 = vector.load %arg15[%c9, %c0_28] : memref<243x512xbf16, #tpu.memory_space<vmem>>, vector<9x512xbf16>
    tpu.vector_store %arg15[%c9, %c0_28], %33 {strides = array<i32>} : memref<243x512xbf16, #tpu.memory_space<vmem>>, vector<9x512xbf16>,
    %c0_29 = arith.constant 0 : index
    %c57 = arith.constant 57 : index
    %35 = vector.load %arg14[%c0_29, %c57] : memref<9x768xbf16, #tpu.memory_space<vmem>>, vector<9x512xbf16>
    %c2 = arith.constant 2 : index
    %c0_30 = arith.constant 0 : index
    %36 = vector.load %arg5[%c2, %c0_30] : memref<27x512xbf16, #tpu.memory_space<vmem>>, vector<1x512xbf16>
    %37 = vector.broadcast %36 : vector<1x512xbf16> to vector<9x512xbf16>
    %38 = arith.mulf %35, %37 : vector<9x512xbf16>
    %c18 = arith.constant 18 : index
    %c0_31 = arith.constant 0 : index
    %39 = vector.load %arg15[%c18, %c0_31] : memref<243x512xbf16, #tpu.memory_space<vmem>>, vector<9x512xbf16>
    tpu.vector_store %arg15[%c18, %c0_31], %38 {strides = array<i32>} : memref<243x512xbf16, #tpu.memory_space<vmem>>, vector<9x512xbf16>,
    %c0_32 = arith.constant 0 : index
    %c63 = arith.constant 63 : index
    %40 = vector.load %arg14[%c0_32, %c63] : memref<9x768xbf16, #tpu.memory_space<vmem>>, vector<9x512xbf16>
    %c3 = arith.constant 3 : index
    %c0_33 = arith.constant 0 : index
    %41 = vector.load %arg5[%c3, %c0_33] : memref<27x512xbf16, #tpu.memory_space<vmem>>, vector<1x512xbf16>
    %42 = vector.broadcast %41 : vector<1x512xbf16> to vector<9x512xbf16>
    %43 = arith.mulf %40, %42 : vector<9x512xbf16>
    %c27 = arith.constant 27 : index
    %c0_34 = arith.constant 0 : index
    %44 = vector.load %arg15[%c27, %c0_34] : memref<243x512xbf16, #tpu.memory_space<vmem>>, vector<9x512xbf16>
    tpu.vector_store %arg15[%c27, %c0_34], %43 {strides = array<i32>} : memref<243x512xbf16, #tpu.memory_space<vmem>>, vector<9x512xbf16>,
    %c0_35 = arith.constant 0 : index
    %c64 = arith.constant 64 : index
    %45 = vector.load %arg14[%c0_35, %c64] : memref<9x768xbf16, #tpu.memory_space<vmem>>, vector<9x512xbf16>
    %c4_36 = arith.constant 4 : index
    %c0_37 = arith.constant 0 : index
    %46 = vector.load %arg5[%c4_36, %c0_37] : memref<27x512xbf16, #tpu.memory_space<vmem>>, vector<1x512xbf16>
    %47 = vector.broadcast %46 : vector<1x512xbf16> to vector<9x512xbf16>
    %48 = arith.mulf %45, %47 : vector<9x512xbf16>
    %c36 = arith.constant 36 : index
    %c0_38 = arith.constant 0 : index
    %49 = vector.load %arg15[%c36, %c0_38] : memref<243x512xbf16, #tpu.memory_space<vmem>>, vector<9x512xbf16>
    tpu.vector_store %arg15[%c36, %c0_38], %48 {strides = array<i32>} : memref<243x512xbf16, #tpu.memory_space<vmem>>, vector<9x512xbf16>,
    %c0_39 = arith.constant 0 : index
    %c65 = arith.constant 65 : index
    %50 = vector.load %arg14[%c0_39, %c65] : memref<9x768xbf16, #tpu.memory_space<vmem>>, vector<9x512xbf16>
    %c5 = arith.constant 5 : index
    %c0_40 = arith.constant 0 : index
    %51 = vector.load %arg5[%c5, %c0_40] : memref<27x512xbf16, #tpu.memory_space<vmem>>, vector<1x512xbf16>
    %52 = vector.broadcast %51 : vector<1x512xbf16> to vector<9x512xbf16>
    %53 = arith.mulf %50, %52 : vector<9x512xbf16>
    %c45 = arith.constant 45 : index
    %c0_41 = arith.constant 0 : index
    %54 = vector.load %arg15[%c45, %c0_41] : memref<243x512xbf16, #tpu.memory_space<vmem>>, vector<9x512xbf16>
    tpu.vector_store %arg15[%c45, %c0_41], %53 {strides = array<i32>} : memref<243x512xbf16, #tpu.memory_space<vmem>>, vector<9x512xbf16>,
    %c0_42 = arith.constant 0 : index
    %c71 = arith.constant 71 : index
    %55 = vector.load %arg14[%c0_42, %c71] : memref<9x768xbf16, #tpu.memory_space<vmem>>, vector<9x512xbf16>
    %c6 = arith.constant 6 : index
    %c0_43 = arith.constant 0 : index
    %56 = vector.load %arg5[%c6, %c0_43] : memref<27x512xbf16, #tpu.memory_space<vmem>>, vector<1x512xbf16>
    %57 = vector.broadcast %56 : vector<1x512xbf16> to vector<9x512xbf16>
    %58 = arith.mulf %55, %57 : vector<9x512xbf16>
    %c54 = arith.constant 54 : index
    %c0_44 = arith.constant 0 : index
    %59 = vector.load %arg15[%c54, %c0_44] : memref<243x512xbf16, #tpu.memory_space<vmem>>, vector<9x512xbf16>
    tpu.vector_store %arg15[%c54, %c0_44], %58 {strides = array<i32>} : memref<243x512xbf16, #tpu.memory_space<vmem>>, vector<9x512xbf16>,
    %c0_45 = arith.constant 0 : index
    %c72 = arith.constant 72 : index
    %60 = vector.load %arg14[%c0_45, %c72] : memref<9x768xbf16, #tpu.memory_space<vmem>>, vector<9x512xbf16>
    %c7 = arith.constant 7 : index
    %c0_46 = arith.constant 0 : index
    %61 = vector.load %arg5[%c7, %c0_46] : memref<27x512xbf16, #tpu.memory_space<vmem>>, vector<1x512xbf16>
    %62 = vector.broadcast %61 : vector<1x512xbf16> to vector<9x512xbf16>
    %63 = arith.mulf %60, %62 : vector<9x512xbf16>
    %c63_47 = arith.constant 63 : index
    %c0_48 = arith.constant 0 : index
    %64 = vector.load %arg15[%c63_47, %c0_48] : memref<243x512xbf16, #tpu.memory_space<vmem>>, vector<9x512xbf16>
    tpu.vector_store %arg15[%c63_47, %c0_48], %63 {strides = array<i32>} : memref<243x512xbf16, #tpu.memory_space<vmem>>, vector<9x512xbf16>,
    %c0_49 = arith.constant 0 : index
    %c73 = arith.constant 73 : index
    %65 = vector.load %arg14[%c0_49, %c73] : memref<9x768xbf16, #tpu.memory_space<vmem>>, vector<9x512xbf16>
    %c8_50 = arith.constant 8 : index
    %c0_51 = arith.constant 0 : index
    %66 = vector.load %arg5[%c8_50, %c0_51] : memref<27x512xbf16, #tpu.memory_space<vmem>>, vector<1x512xbf16>
    %67 = vector.broadcast %66 : vector<1x512xbf16> to vector<9x512xbf16>
    %68 = arith.mulf %65, %67 : vector<9x512xbf16>
    %c72_52 = arith.constant 72 : index
    %c0_53 = arith.constant 0 : index
    %69 = vector.load %arg15[%c72_52, %c0_53] : memref<243x512xbf16, #tpu.memory_space<vmem>>, vector<9x512xbf16>
    tpu.vector_store %arg15[%c72_52, %c0_53], %68 {strides = array<i32>} : memref<243x512xbf16, #tpu.memory_space<vmem>>, vector<9x512xbf16>,
    %c0_54 = arith.constant 0 : index
    %c119 = arith.constant 119 : index
    %70 = vector.load %arg14[%c0_54, %c119] : memref<9x768xbf16, #tpu.memory_space<vmem>>, vector<9x512xbf16>
    %c9_55 = arith.constant 9 : index
    %c0_56 = arith.constant 0 : index
    %71 = vector.load %arg5[%c9_55, %c0_56] : memref<27x512xbf16, #tpu.memory_space<vmem>>, vector<1x512xbf16>
    %72 = vector.broadcast %71 : vector<1x512xbf16> to vector<9x512xbf16>
    %73 = arith.mulf %70, %72 : vector<9x512xbf16>
    %c81 = arith.constant 81 : index
    %c0_57 = arith.constant 0 : index
    %74 = vector.load %arg15[%c81, %c0_57] : memref<243x512xbf16, #tpu.memory_space<vmem>>, vector<9x512xbf16>
    tpu.vector_store %arg15[%c81, %c0_57], %73 {strides = array<i32>} : memref<243x512xbf16, #tpu.memory_space<vmem>>, vector<9x512xbf16>,
    %c0_58 = arith.constant 0 : index
    %c120 = arith.constant 120 : index
    %75 = vector.load %arg14[%c0_58, %c120] : memref<9x768xbf16, #tpu.memory_space<vmem>>, vector<9x512xbf16>
    %c10 = arith.constant 10 : index
    %c0_59 = arith.constant 0 : index
    %76 = vector.load %arg5[%c10, %c0_59] : memref<27x512xbf16, #tpu.memory_space<vmem>>, vector<1x512xbf16>
    %77 = vector.broadcast %76 : vector<1x512xbf16> to vector<9x512xbf16>
    %78 = arith.mulf %75, %77 : vector<9x512xbf16>
    %c90 = arith.constant 90 : index
    %c0_60 = arith.constant 0 : index
    %79 = vector.load %arg15[%c90, %c0_60] : memref<243x512xbf16, #tpu.memory_space<vmem>>, vector<9x512xbf16>
    tpu.vector_store %arg15[%c90, %c0_60], %78 {strides = array<i32>} : memref<243x512xbf16, #tpu.memory_space<vmem>>, vector<9x512xbf16>,
    %c0_61 = arith.constant 0 : index
    %c121 = arith.constant 121 : index
    %80 = vector.load %arg14[%c0_61, %c121] : memref<9x768xbf16, #tpu.memory_space<vmem>>, vector<9x512xbf16>
    %c11 = arith.constant 11 : index
    %c0_62 = arith.constant 0 : index
    %81 = vector.load %arg5[%c11, %c0_62] : memref<27x512xbf16, #tpu.memory_space<vmem>>, vector<1x512xbf16>
    %82 = vector.broadcast %81 : vector<1x512xbf16> to vector<9x512xbf16>
    %83 = arith.mulf %80, %82 : vector<9x512xbf16>
    %c99 = arith.constant 99 : index
    %c0_63 = arith.constant 0 : index
    %84 = vector.load %arg15[%c99, %c0_63] : memref<243x512xbf16, #tpu.memory_space<vmem>>, vector<9x512xbf16>
    tpu.vector_store %arg15[%c99, %c0_63], %83 {strides = array<i32>} : memref<243x512xbf16, #tpu.memory_space<vmem>>, vector<9x512xbf16>,
    %c0_64 = arith.constant 0 : index
    %c127 = arith.constant 127 : index
    %85 = vector.load %arg14[%c0_64, %c127] : memref<9x768xbf16, #tpu.memory_space<vmem>>, vector<9x512xbf16>
    %c12 = arith.constant 12 : index
    %c0_65 = arith.constant 0 : index
    %86 = vector.load %arg5[%c12, %c0_65] : memref<27x512xbf16, #tpu.memory_space<vmem>>, vector<1x512xbf16>
    %87 = vector.broadcast %86 : vector<1x512xbf16> to vector<9x512xbf16>
    %88 = arith.mulf %85, %87 : vector<9x512xbf16>
    %c108 = arith.constant 108 : index
    %c0_66 = arith.constant 0 : index
    %89 = vector.load %arg15[%c108, %c0_66] : memref<243x512xbf16, #tpu.memory_space<vmem>>, vector<9x512xbf16>
    tpu.vector_store %arg15[%c108, %c0_66], %88 {strides = array<i32>} : memref<243x512xbf16, #tpu.memory_space<vmem>>, vector<9x512xbf16>,
    %c0_67 = arith.constant 0 : index
    %c128_68 = arith.constant 128 : index
    %90 = vector.load %arg14[%c0_67, %c128_68] : memref<9x768xbf16, #tpu.memory_space<vmem>>, vector<9x512xbf16>
    %c13 = arith.constant 13 : index
    %c0_69 = arith.constant 0 : index
    %91 = vector.load %arg5[%c13, %c0_69] : memref<27x512xbf16, #tpu.memory_space<vmem>>, vector<1x512xbf16>
    %92 = vector.broadcast %91 : vector<1x512xbf16> to vector<9x512xbf16>
    %93 = arith.mulf %90, %92 : vector<9x512xbf16>
    %c117 = arith.constant 117 : index
    %c0_70 = arith.constant 0 : index
    %94 = vector.load %arg15[%c117, %c0_70] : memref<243x512xbf16, #tpu.memory_space<vmem>>, vector<9x512xbf16>
    tpu.vector_store %arg15[%c117, %c0_70], %93 {strides = array<i32>} : memref<243x512xbf16, #tpu.memory_space<vmem>>, vector<9x512xbf16>,
    %c0_71 = arith.constant 0 : index
    %c129 = arith.constant 129 : index
    %95 = vector.load %arg14[%c0_71, %c129] : memref<9x768xbf16, #tpu.memory_space<vmem>>, vector<9x512xbf16>
    %c14 = arith.constant 14 : index
    %c0_72 = arith.constant 0 : index
    %96 = vector.load %arg5[%c14, %c0_72] : memref<27x512xbf16, #tpu.memory_space<vmem>>, vector<1x512xbf16>
    %97 = vector.broadcast %96 : vector<1x512xbf16> to vector<9x512xbf16>
    %98 = arith.mulf %95, %97 : vector<9x512xbf16>
    %c126 = arith.constant 126 : index
    %c0_73 = arith.constant 0 : index
    %99 = vector.load %arg15[%c126, %c0_73] : memref<243x512xbf16, #tpu.memory_space<vmem>>, vector<9x512xbf16>
    tpu.vector_store %arg15[%c126, %c0_73], %98 {strides = array<i32>} : memref<243x512xbf16, #tpu.memory_space<vmem>>, vector<9x512xbf16>,
    %c0_74 = arith.constant 0 : index
    %c135 = arith.constant 135 : index
    %100 = vector.load %arg14[%c0_74, %c135] : memref<9x768xbf16, #tpu.memory_space<vmem>>, vector<9x512xbf16>
    %c15 = arith.constant 15 : index
    %c0_75 = arith.constant 0 : index
    %101 = vector.load %arg5[%c15, %c0_75] : memref<27x512xbf16, #tpu.memory_space<vmem>>, vector<1x512xbf16>
    %102 = vector.broadcast %101 : vector<1x512xbf16> to vector<9x512xbf16>
    %103 = arith.mulf %100, %102 : vector<9x512xbf16>
    %c135_76 = arith.constant 135 : index
    %c0_77 = arith.constant 0 : index
    %104 = vector.load %arg15[%c135_76, %c0_77] : memref<243x512xbf16, #tpu.memory_space<vmem>>, vector<9x512xbf16>
    tpu.vector_store %arg15[%c135_76, %c0_77], %103 {strides = array<i32>} : memref<243x512xbf16, #tpu.memory_space<vmem>>, vector<9x512xbf16>,
    %c0_78 = arith.constant 0 : index
    %c136 = arith.constant 136 : index
    %105 = vector.load %arg14[%c0_78, %c136] : memref<9x768xbf16, #tpu.memory_space<vmem>>, vector<9x512xbf16>
    %c16 = arith.constant 16 : index
    %c0_79 = arith.constant 0 : index
    %106 = vector.load %arg5[%c16, %c0_79] : memref<27x512xbf16, #tpu.memory_space<vmem>>, vector<1x512xbf16>
    %107 = vector.broadcast %106 : vector<1x512xbf16> to vector<9x512xbf16>
    %108 = arith.mulf %105, %107 : vector<9x512xbf16>
    %c144 = arith.constant 144 : index
    %c0_80 = arith.constant 0 : index
    %109 = vector.load %arg15[%c144, %c0_80] : memref<243x512xbf16, #tpu.memory_space<vmem>>, vector<9x512xbf16>
    tpu.vector_store %arg15[%c144, %c0_80], %108 {strides = array<i32>} : memref<243x512xbf16, #tpu.memory_space<vmem>>, vector<9x512xbf16>,
    %c0_81 = arith.constant 0 : index
    %c137 = arith.constant 137 : index
    %110 = vector.load %arg14[%c0_81, %c137] : memref<9x768xbf16, #tpu.memory_space<vmem>>, vector<9x512xbf16>
    %c17 = arith.constant 17 : index
    %c0_82 = arith.constant 0 : index
    %111 = vector.load %arg5[%c17, %c0_82] : memref<27x512xbf16, #tpu.memory_space<vmem>>, vector<1x512xbf16>
    %112 = vector.broadcast %111 : vector<1x512xbf16> to vector<9x512xbf16>
    %113 = arith.mulf %110, %112 : vector<9x512xbf16>
    %c153 = arith.constant 153 : index
    %c0_83 = arith.constant 0 : index
    %114 = vector.load %arg15[%c153, %c0_83] : memref<243x512xbf16, #tpu.memory_space<vmem>>, vector<9x512xbf16>
    tpu.vector_store %arg15[%c153, %c0_83], %113 {strides = array<i32>} : memref<243x512xbf16, #tpu.memory_space<vmem>>, vector<9x512xbf16>,
    %c0_84 = arith.constant 0 : index
    %c183 = arith.constant 183 : index
    %115 = vector.load %arg14[%c0_84, %c183] : memref<9x768xbf16, #tpu.memory_space<vmem>>, vector<9x512xbf16>
    %c18_85 = arith.constant 18 : index
    %c0_86 = arith.constant 0 : index
    %116 = vector.load %arg5[%c18_85, %c0_86] : memref<27x512xbf16, #tpu.memory_space<vmem>>, vector<1x512xbf16>
    %117 = vector.broadcast %116 : vector<1x512xbf16> to vector<9x512xbf16>
    %118 = arith.mulf %115, %117 : vector<9x512xbf16>
    %c162 = arith.constant 162 : index
    %c0_87 = arith.constant 0 : index
    %119 = vector.load %arg15[%c162, %c0_87] : memref<243x512xbf16, #tpu.memory_space<vmem>>, vector<9x512xbf16>
    tpu.vector_store %arg15[%c162, %c0_87], %118 {strides = array<i32>} : memref<243x512xbf16, #tpu.memory_space<vmem>>, vector<9x512xbf16>,
    %c0_88 = arith.constant 0 : index
    %c184 = arith.constant 184 : index
    %120 = vector.load %arg14[%c0_88, %c184] : memref<9x768xbf16, #tpu.memory_space<vmem>>, vector<9x512xbf16>
    %c19 = arith.constant 19 : index
    %c0_89 = arith.constant 0 : index
    %121 = vector.load %arg5[%c19, %c0_89] : memref<27x512xbf16, #tpu.memory_space<vmem>>, vector<1x512xbf16>
    %122 = vector.broadcast %121 : vector<1x512xbf16> to vector<9x512xbf16>
    %123 = arith.mulf %120, %122 : vector<9x512xbf16>
    %c171 = arith.constant 171 : index
    %c0_90 = arith.constant 0 : index
    %124 = vector.load %arg15[%c171, %c0_90] : memref<243x512xbf16, #tpu.memory_space<vmem>>, vector<9x512xbf16>
    tpu.vector_store %arg15[%c171, %c0_90], %123 {strides = array<i32>} : memref<243x512xbf16, #tpu.memory_space<vmem>>, vector<9x512xbf16>,
    %c0_91 = arith.constant 0 : index
    %c185 = arith.constant 185 : index
    %125 = vector.load %arg14[%c0_91, %c185] : memref<9x768xbf16, #tpu.memory_space<vmem>>, vector<9x512xbf16>
    %c20 = arith.constant 20 : index
    %c0_92 = arith.constant 0 : index
    %126 = vector.load %arg5[%c20, %c0_92] : memref<27x512xbf16, #tpu.memory_space<vmem>>, vector<1x512xbf16>
    %127 = vector.broadcast %126 : vector<1x512xbf16> to vector<9x512xbf16>
    %128 = arith.mulf %125, %127 : vector<9x512xbf16>
    %c180 = arith.constant 180 : index
    %c0_93 = arith.constant 0 : index
    %129 = vector.load %arg15[%c180, %c0_93] : memref<243x512xbf16, #tpu.memory_space<vmem>>, vector<9x512xbf16>
    tpu.vector_store %arg15[%c180, %c0_93], %128 {strides = array<i32>} : memref<243x512xbf16, #tpu.memory_space<vmem>>, vector<9x512xbf16>,
    %c0_94 = arith.constant 0 : index
    %c191 = arith.constant 191 : index
    %130 = vector.load %arg14[%c0_94, %c191] : memref<9x768xbf16, #tpu.memory_space<vmem>>, vector<9x512xbf16>
    %c21 = arith.constant 21 : index
    %c0_95 = arith.constant 0 : index
    %131 = vector.load %arg5[%c21, %c0_95] : memref<27x512xbf16, #tpu.memory_space<vmem>>, vector<1x512xbf16>
    %132 = vector.broadcast %131 : vector<1x512xbf16> to vector<9x512xbf16>
    %133 = arith.mulf %130, %132 : vector<9x512xbf16>
    %c189 = arith.constant 189 : index
    %c0_96 = arith.constant 0 : index
    %134 = vector.load %arg15[%c189, %c0_96] : memref<243x512xbf16, #tpu.memory_space<vmem>>, vector<9x512xbf16>
    tpu.vector_store %arg15[%c189, %c0_96], %133 {strides = array<i32>} : memref<243x512xbf16, #tpu.memory_space<vmem>>, vector<9x512xbf16>,
    %c0_97 = arith.constant 0 : index
    %c192 = arith.constant 192 : index
    %135 = vector.load %arg14[%c0_97, %c192] : memref<9x768xbf16, #tpu.memory_space<vmem>>, vector<9x512xbf16>
    %c22 = arith.constant 22 : index
    %c0_98 = arith.constant 0 : index
    %136 = vector.load %arg5[%c22, %c0_98] : memref<27x512xbf16, #tpu.memory_space<vmem>>, vector<1x512xbf16>
    %137 = vector.broadcast %136 : vector<1x512xbf16> to vector<9x512xbf16>
    %138 = arith.mulf %135, %137 : vector<9x512xbf16>
    %c198 = arith.constant 198 : index
    %c0_99 = arith.constant 0 : index
    %139 = vector.load %arg15[%c198, %c0_99] : memref<243x512xbf16, #tpu.memory_space<vmem>>, vector<9x512xbf16>
    tpu.vector_store %arg15[%c198, %c0_99], %138 {strides = array<i32>} : memref<243x512xbf16, #tpu.memory_space<vmem>>, vector<9x512xbf16>,
    %c0_100 = arith.constant 0 : index
    %c193 = arith.constant 193 : index
    %140 = vector.load %arg14[%c0_100, %c193] : memref<9x768xbf16, #tpu.memory_space<vmem>>, vector<9x512xbf16>
    %c23 = arith.constant 23 : index
    %c0_101 = arith.constant 0 : index
    %141 = vector.load %arg5[%c23, %c0_101] : memref<27x512xbf16, #tpu.memory_space<vmem>>, vector<1x512xbf16>
    %142 = vector.broadcast %141 : vector<1x512xbf16> to vector<9x512xbf16>
    %143 = arith.mulf %140, %142 : vector<9x512xbf16>
    %c207 = arith.constant 207 : index
    %c0_102 = arith.constant 0 : index
    %144 = vector.load %arg15[%c207, %c0_102] : memref<243x512xbf16, #tpu.memory_space<vmem>>, vector<9x512xbf16>
    tpu.vector_store %arg15[%c207, %c0_102], %143 {strides = array<i32>} : memref<243x512xbf16, #tpu.memory_space<vmem>>, vector<9x512xbf16>,
    %c0_103 = arith.constant 0 : index
    %c199 = arith.constant 199 : index
    %145 = vector.load %arg14[%c0_103, %c199] : memref<9x768xbf16, #tpu.memory_space<vmem>>, vector<9x512xbf16>
    %c24 = arith.constant 24 : index
    %c0_104 = arith.constant 0 : index
    %146 = vector.load %arg5[%c24, %c0_104] : memref<27x512xbf16, #tpu.memory_space<vmem>>, vector<1x512xbf16>
    %147 = vector.broadcast %146 : vector<1x512xbf16> to vector<9x512xbf16>
    %148 = arith.mulf %145, %147 : vector<9x512xbf16>
    %c216 = arith.constant 216 : index
    %c0_105 = arith.constant 0 : index
    %149 = vector.load %arg15[%c216, %c0_105] : memref<243x512xbf16, #tpu.memory_space<vmem>>, vector<9x512xbf16>
    tpu.vector_store %arg15[%c216, %c0_105], %148 {strides = array<i32>} : memref<243x512xbf16, #tpu.memory_space<vmem>>, vector<9x512xbf16>,
    %c0_106 = arith.constant 0 : index
    %c200 = arith.constant 200 : index
    %150 = vector.load %arg14[%c0_106, %c200] : memref<9x768xbf16, #tpu.memory_space<vmem>>, vector<9x512xbf16>
    %c25 = arith.constant 25 : index
    %c0_107 = arith.constant 0 : index
    %151 = vector.load %arg5[%c25, %c0_107] : memref<27x512xbf16, #tpu.memory_space<vmem>>, vector<1x512xbf16>
    %152 = vector.broadcast %151 : vector<1x512xbf16> to vector<9x512xbf16>
    %153 = arith.mulf %150, %152 : vector<9x512xbf16>
    %c225 = arith.constant 225 : index
    %c0_108 = arith.constant 0 : index
    %154 = vector.load %arg15[%c225, %c0_108] : memref<243x512xbf16, #tpu.memory_space<vmem>>, vector<9x512xbf16>
    tpu.vector_store %arg15[%c225, %c0_108], %153 {strides = array<i32>} : memref<243x512xbf16, #tpu.memory_space<vmem>>, vector<9x512xbf16>,
    %c0_109 = arith.constant 0 : index
    %c201 = arith.constant 201 : index
    %155 = vector.load %arg14[%c0_109, %c201] : memref<9x768xbf16, #tpu.memory_space<vmem>>, vector<9x512xbf16>
    %c26 = arith.constant 26 : index
    %c0_110 = arith.constant 0 : index
    %156 = vector.load %arg5[%c26, %c0_110] : memref<27x512xbf16, #tpu.memory_space<vmem>>, vector<1x512xbf16>
    %157 = vector.broadcast %156 : vector<1x512xbf16> to vector<9x512xbf16>
    %158 = arith.mulf %155, %157 : vector<9x512xbf16>
    %c234 = arith.constant 234 : index
    %c0_111 = arith.constant 0 : index
    %159 = vector.load %arg15[%c234, %c0_111] : memref<243x512xbf16, #tpu.memory_space<vmem>>, vector<9x512xbf16>
    tpu.vector_store %arg15[%c234, %c0_111], %158 {strides = array<i32>} : memref<243x512xbf16, #tpu.memory_space<vmem>>, vector<9x512xbf16>,
    %c0_112 = arith.constant 0 : index
    %c0_113 = arith.constant 0 : index
    %160 = vector.load %arg6[%c0_112, %c0_113] : memref<8x243xbf16, #tpu.memory_space<vmem>>, vector<8x243xbf16>
    %c0_114 = arith.constant 0 : index
    %c0_115 = arith.constant 0 : index
    %161 = vector.load %arg15[%c0_114, %c0_115] : memref<243x512xbf16, #tpu.memory_space<vmem>>, vector<243x512xbf16>
    %cst_116 = arith.constant dense<0.000000e+00> : vector<8x512xf32>
    %162 = tpu.matmul %160, %161, %cst_116 {dimension_numbers = #tpu.dot_dimension_numbers<[1], [0], [0], [1], [0, 0, 1, 1], [], []>} : vector<8x243xbf16>, vector<243x512xbf16>, vector<8x512xf32> -> vector<8x512xf32>
    %163 = vector.extract_strided_slice %162 {offsets = [0, 0], sizes = [4, 512], strides = [1, 1]} : vector<8x512xf32> to vector<4x512xf32>
    %164 = vector.extract_strided_slice %162 {offsets = [4, 0], sizes = [1, 512], strides = [1, 1]} : vector<8x512xf32> to vector<1x512xf32>
    %cst_117 = arith.constant 0.000000e+00 : f32
    %cst_118 = arith.constant 1.000000e+00 : f32
    %165 = vector.broadcast %cst_117 : f32 to vector<1x512xf32>
    %166 = arith.maximumf %165, %164 : vector<1x512xf32>
    %167 = vector.broadcast %cst_118 : f32 to vector<1x512xf32>
    %168 = arith.minimumf %167, %166 : vector<1x512xf32>
    %cst_119 = arith.constant 9.99999993E-9 : f32
    %169 = vector.broadcast %cst_119 : f32 to vector<1x512xf32>
    %170 = arith.addf %164, %169 : vector<1x512xf32>
    %171 = tpu.reciprocal %170 {approx = true} : vector<1x512xf32> -> vector<1x512xf32>
    %cst_120 = arith.constant 2.160000e+02 : f32
    %172 = vector.broadcast %cst_120 : f32 to vector<1x512xf32>
    %173 = arith.mulf %172, %171 : vector<1x512xf32>
    %174 = arith.mulf %173, %168 : vector<1x512xf32>
    %175 = vector.broadcast %174 : vector<1x512xf32> to vector<4x512xf32>
    %176 = arith.mulf %163, %175 : vector<4x512xf32>
    %c0_121 = arith.constant 0 : index
    %c0_122 = arith.constant 0 : index
    %177 = vector.load %arg8[%c0_121, %c0_122] : memref<4x1xf32, #tpu.memory_space<vmem>>, vector<4x1xf32>
    %178 = vector.broadcast %177 : vector<4x1xf32> to vector<4x512xf32>
    %179 = arith.mulf %176, %178 : vector<4x512xf32>
    %c0_123 = arith.constant 0 : index
    %c0_124 = arith.constant 0 : index
    %180 = vector.load %arg9[%c0_123, %c0_124] : memref<4x1xf32, #tpu.memory_space<vmem>>, vector<4x1xf32>
    %181 = vector.broadcast %180 : vector<4x1xf32> to vector<4x512xf32>
    %182 = arith.addf %179, %181 : vector<4x512xf32>
    %183 = arith.negf %182 : vector<4x512xf32>
    %184 = math.exp %183 : vector<4x512xf32>
    %cst_125 = arith.constant 1.000000e+00 : f32
    %185 = vector.broadcast %cst_125 : f32 to vector<4x512xf32>
    %186 = arith.addf %185, %184 : vector<4x512xf32>
    %187 = arith.divf %185, %186 : vector<4x512xf32>
    %188 = arith.mulf %182, %187 : vector<4x512xf32>
    %189 = vector.broadcast %168 : vector<1x512xf32> to vector<4x512xf32>
    %190 = arith.mulf %188, %189 : vector<4x512xf32>
    %191 = arith.truncf %190 : vector<4x512xf32> to vector<4x512xbf16>
    %c0_126 = arith.constant 0 : index
    %c128_127 = arith.constant 128 : index
    %192 = vector.load %arg16[%c0_126, %c128_127] : memref<5x768xbf16, #tpu.memory_space<vmem>>, vector<4x512xbf16>
    tpu.vector_store %arg16[%c0_126, %c128_127], %191 {strides = array<i32>} : memref<5x768xbf16, #tpu.memory_space<vmem>>, vector<4x512xbf16>,
    %cst_128 = arith.constant 4.000000e+00 : f32
    %193 = vector.broadcast %cst_128 : f32 to vector<1x512xf32>
    %194 = arith.mulf %168, %193 : vector<1x512xf32>
    %195 = arith.truncf %194 : vector<1x512xf32> to vector<1x512xbf16>
    %c4_129 = arith.constant 4 : index
    %c128_130 = arith.constant 128 : index
    %196 = vector.load %arg16[%c4_129, %c128_130] : memref<5x768xbf16, #tpu.memory_space<vmem>>, vector<1x512xbf16>
    tpu.vector_store %arg16[%c4_129, %c128_130], %195 {strides = array<i32>} : memref<5x768xbf16, #tpu.memory_space<vmem>>, vector<1x512xbf16>,
    %c0_131 = arith.constant 0 : index
    %c55_132 = arith.constant 55 : index
    %197 = vector.load %arg16[%c0_131, %c55_132] : memref<5x768xbf16, #tpu.memory_space<vmem>>, vector<5x512xbf16>
    %c0_133 = arith.constant 0 : index
    %c0_134 = arith.constant 0 : index
    %198 = vector.load %arg5[%c0_133, %c0_134] : memref<27x512xbf16, #tpu.memory_space<vmem>>, vector<1x512xbf16>
    %199 = vector.broadcast %198 : vector<1x512xbf16> to vector<5x512xbf16>
    %200 = arith.mulf %197, %199 : vector<5x512xbf16>
    %c0_135 = arith.constant 0 : index
    %c0_136 = arith.constant 0 : index
    %201 = vector.load %arg17[%c0_135, %c0_136] : memref<135x512xbf16, #tpu.memory_space<vmem>>, vector<5x512xbf16>
    tpu.vector_store %arg17[%c0_135, %c0_136], %200 {strides = array<i32>} : memref<135x512xbf16, #tpu.memory_space<vmem>>, vector<5x512xbf16>,
    %c0_137 = arith.constant 0 : index
    %c56_138 = arith.constant 56 : index
    %202 = vector.load %arg16[%c0_137, %c56_138] : memref<5x768xbf16, #tpu.memory_space<vmem>>, vector<5x512xbf16>
    %c1_139 = arith.constant 1 : index
    %c0_140 = arith.constant 0 : index
    %203 = vector.load %arg5[%c1_139, %c0_140] : memref<27x512xbf16, #tpu.memory_space<vmem>>, vector<1x512xbf16>
    %204 = vector.broadcast %203 : vector<1x512xbf16> to vector<5x512xbf16>
    %205 = arith.mulf %202, %204 : vector<5x512xbf16>
    %c5_141 = arith.constant 5 : index
    %c0_142 = arith.constant 0 : index
    %206 = vector.load %arg17[%c5_141, %c0_142] : memref<135x512xbf16, #tpu.memory_space<vmem>>, vector<5x512xbf16>
    tpu.vector_store %arg17[%c5_141, %c0_142], %205 {strides = array<i32>} : memref<135x512xbf16, #tpu.memory_space<vmem>>, vector<5x512xbf16>,
    %c0_143 = arith.constant 0 : index
    %c57_144 = arith.constant 57 : index
    %207 = vector.load %arg16[%c0_143, %c57_144] : memref<5x768xbf16, #tpu.memory_space<vmem>>, vector<5x512xbf16>
    %c2_145 = arith.constant 2 : index
    %c0_146 = arith.constant 0 : index
    %208 = vector.load %arg5[%c2_145, %c0_146] : memref<27x512xbf16, #tpu.memory_space<vmem>>, vector<1x512xbf16>
    %209 = vector.broadcast %208 : vector<1x512xbf16> to vector<5x512xbf16>
    %210 = arith.mulf %207, %209 : vector<5x512xbf16>
    %c10_147 = arith.constant 10 : index
    %c0_148 = arith.constant 0 : index
    %211 = vector.load %arg17[%c10_147, %c0_148] : memref<135x512xbf16, #tpu.memory_space<vmem>>, vector<5x512xbf16>
    tpu.vector_store %arg17[%c10_147, %c0_148], %210 {strides = array<i32>} : memref<135x512xbf16, #tpu.memory_space<vmem>>, vector<5x512xbf16>,
    %c0_149 = arith.constant 0 : index
    %c63_150 = arith.constant 63 : index
    %212 = vector.load %arg16[%c0_149, %c63_150] : memref<5x768xbf16, #tpu.memory_space<vmem>>, vector<5x512xbf16>
    %c3_151 = arith.constant 3 : index
    %c0_152 = arith.constant 0 : index
    %213 = vector.load %arg5[%c3_151, %c0_152] : memref<27x512xbf16, #tpu.memory_space<vmem>>, vector<1x512xbf16>
    %214 = vector.broadcast %213 : vector<1x512xbf16> to vector<5x512xbf16>
    %215 = arith.mulf %212, %214 : vector<5x512xbf16>
    %c15_153 = arith.constant 15 : index
    %c0_154 = arith.constant 0 : index
    %216 = vector.load %arg17[%c15_153, %c0_154] : memref<135x512xbf16, #tpu.memory_space<vmem>>, vector<5x512xbf16>
    tpu.vector_store %arg17[%c15_153, %c0_154], %215 {strides = array<i32>} : memref<135x512xbf16, #tpu.memory_space<vmem>>, vector<5x512xbf16>,
    %c0_155 = arith.constant 0 : index
    %c64_156 = arith.constant 64 : index
    %217 = vector.load %arg16[%c0_155, %c64_156] : memref<5x768xbf16, #tpu.memory_space<vmem>>, vector<5x512xbf16>
    %c4_157 = arith.constant 4 : index
    %c0_158 = arith.constant 0 : index
    %218 = vector.load %arg5[%c4_157, %c0_158] : memref<27x512xbf16, #tpu.memory_space<vmem>>, vector<1x512xbf16>
    %219 = vector.broadcast %218 : vector<1x512xbf16> to vector<5x512xbf16>
    %220 = arith.mulf %217, %219 : vector<5x512xbf16>
    %c20_159 = arith.constant 20 : index
    %c0_160 = arith.constant 0 : index
    %221 = vector.load %arg17[%c20_159, %c0_160] : memref<135x512xbf16, #tpu.memory_space<vmem>>, vector<5x512xbf16>
    tpu.vector_store %arg17[%c20_159, %c0_160], %220 {strides = array<i32>} : memref<135x512xbf16, #tpu.memory_space<vmem>>, vector<5x512xbf16>,
    %c0_161 = arith.constant 0 : index
    %c65_162 = arith.constant 65 : index
    %222 = vector.load %arg16[%c0_161, %c65_162] : memref<5x768xbf16, #tpu.memory_space<vmem>>, vector<5x512xbf16>
    %c5_163 = arith.constant 5 : index
    %c0_164 = arith.constant 0 : index
    %223 = vector.load %arg5[%c5_163, %c0_164] : memref<27x512xbf16, #tpu.memory_space<vmem>>, vector<1x512xbf16>
    %224 = vector.broadcast %223 : vector<1x512xbf16> to vector<5x512xbf16>
    %225 = arith.mulf %222, %224 : vector<5x512xbf16>
    %c25_165 = arith.constant 25 : index
    %c0_166 = arith.constant 0 : index
    %226 = vector.load %arg17[%c25_165, %c0_166] : memref<135x512xbf16, #tpu.memory_space<vmem>>, vector<5x512xbf16>
    tpu.vector_store %arg17[%c25_165, %c0_166], %225 {strides = array<i32>} : memref<135x512xbf16, #tpu.memory_space<vmem>>, vector<5x512xbf16>,
    %c0_167 = arith.constant 0 : index
    %c71_168 = arith.constant 71 : index
    %227 = vector.load %arg16[%c0_167, %c71_168] : memref<5x768xbf16, #tpu.memory_space<vmem>>, vector<5x512xbf16>
    %c6_169 = arith.constant 6 : index
    %c0_170 = arith.constant 0 : index
    %228 = vector.load %arg5[%c6_169, %c0_170] : memref<27x512xbf16, #tpu.memory_space<vmem>>, vector<1x512xbf16>
    %229 = vector.broadcast %228 : vector<1x512xbf16> to vector<5x512xbf16>
    %230 = arith.mulf %227, %229 : vector<5x512xbf16>
    %c30 = arith.constant 30 : index
    %c0_171 = arith.constant 0 : index
    %231 = vector.load %arg17[%c30, %c0_171] : memref<135x512xbf16, #tpu.memory_space<vmem>>, vector<5x512xbf16>
    tpu.vector_store %arg17[%c30, %c0_171], %230 {strides = array<i32>} : memref<135x512xbf16, #tpu.memory_space<vmem>>, vector<5x512xbf16>,
    %c0_172 = arith.constant 0 : index
    %c72_173 = arith.constant 72 : index
    %232 = vector.load %arg16[%c0_172, %c72_173] : memref<5x768xbf16, #tpu.memory_space<vmem>>, vector<5x512xbf16>
    %c7_174 = arith.constant 7 : index
    %c0_175 = arith.constant 0 : index
    %233 = vector.load %arg5[%c7_174, %c0_175] : memref<27x512xbf16, #tpu.memory_space<vmem>>, vector<1x512xbf16>
    %234 = vector.broadcast %233 : vector<1x512xbf16> to vector<5x512xbf16>
    %235 = arith.mulf %232, %234 : vector<5x512xbf16>
    %c35 = arith.constant 35 : index
    %c0_176 = arith.constant 0 : index
    %236 = vector.load %arg17[%c35, %c0_176] : memref<135x512xbf16, #tpu.memory_space<vmem>>, vector<5x512xbf16>
    tpu.vector_store %arg17[%c35, %c0_176], %235 {strides = array<i32>} : memref<135x512xbf16, #tpu.memory_space<vmem>>, vector<5x512xbf16>,
    %c0_177 = arith.constant 0 : index
    %c73_178 = arith.constant 73 : index
    %237 = vector.load %arg16[%c0_177, %c73_178] : memref<5x768xbf16, #tpu.memory_space<vmem>>, vector<5x512xbf16>
    %c8_179 = arith.constant 8 : index
    %c0_180 = arith.constant 0 : index
    %238 = vector.load %arg5[%c8_179, %c0_180] : memref<27x512xbf16, #tpu.memory_space<vmem>>, vector<1x512xbf16>
    %239 = vector.broadcast %238 : vector<1x512xbf16> to vector<5x512xbf16>
    %240 = arith.mulf %237, %239 : vector<5x512xbf16>
    %c40 = arith.constant 40 : index
    %c0_181 = arith.constant 0 : index
    %241 = vector.load %arg17[%c40, %c0_181] : memref<135x512xbf16, #tpu.memory_space<vmem>>, vector<5x512xbf16>
    tpu.vector_store %arg17[%c40, %c0_181], %240 {strides = array<i32>} : memref<135x512xbf16, #tpu.memory_space<vmem>>, vector<5x512xbf16>,
    %c0_182 = arith.constant 0 : index
    %c119_183 = arith.constant 119 : index
    %242 = vector.load %arg16[%c0_182, %c119_183] : memref<5x768xbf16, #tpu.memory_space<vmem>>, vector<5x512xbf16>
    %c9_184 = arith.constant 9 : index
    %c0_185 = arith.constant 0 : index
    %243 = vector.load %arg5[%c9_184, %c0_185] : memref<27x512xbf16, #tpu.memory_space<vmem>>, vector<1x512xbf16>
    %244 = vector.broadcast %243 : vector<1x512xbf16> to vector<5x512xbf16>
    %245 = arith.mulf %242, %244 : vector<5x512xbf16>
    %c45_186 = arith.constant 45 : index
    %c0_187 = arith.constant 0 : index
    %246 = vector.load %arg17[%c45_186, %c0_187] : memref<135x512xbf16, #tpu.memory_space<vmem>>, vector<5x512xbf16>
    tpu.vector_store %arg17[%c45_186, %c0_187], %245 {strides = array<i32>} : memref<135x512xbf16, #tpu.memory_space<vmem>>, vector<5x512xbf16>,
    %c0_188 = arith.constant 0 : index
    %c120_189 = arith.constant 120 : index
    %247 = vector.load %arg16[%c0_188, %c120_189] : memref<5x768xbf16, #tpu.memory_space<vmem>>, vector<5x512xbf16>
    %c10_190 = arith.constant 10 : index
    %c0_191 = arith.constant 0 : index
    %248 = vector.load %arg5[%c10_190, %c0_191] : memref<27x512xbf16, #tpu.memory_space<vmem>>, vector<1x512xbf16>
    %249 = vector.broadcast %248 : vector<1x512xbf16> to vector<5x512xbf16>
    %250 = arith.mulf %247, %249 : vector<5x512xbf16>
    %c50 = arith.constant 50 : index
    %c0_192 = arith.constant 0 : index
    %251 = vector.load %arg17[%c50, %c0_192] : memref<135x512xbf16, #tpu.memory_space<vmem>>, vector<5x512xbf16>
    tpu.vector_store %arg17[%c50, %c0_192], %250 {strides = array<i32>} : memref<135x512xbf16, #tpu.memory_space<vmem>>, vector<5x512xbf16>,
    %c0_193 = arith.constant 0 : index
    %c121_194 = arith.constant 121 : index
    %252 = vector.load %arg16[%c0_193, %c121_194] : memref<5x768xbf16, #tpu.memory_space<vmem>>, vector<5x512xbf16>
    %c11_195 = arith.constant 11 : index
    %c0_196 = arith.constant 0 : index
    %253 = vector.load %arg5[%c11_195, %c0_196] : memref<27x512xbf16, #tpu.memory_space<vmem>>, vector<1x512xbf16>
    %254 = vector.broadcast %253 : vector<1x512xbf16> to vector<5x512xbf16>
    %255 = arith.mulf %252, %254 : vector<5x512xbf16>
    %c55_197 = arith.constant 55 : index
    %c0_198 = arith.constant 0 : index
    %256 = vector.load %arg17[%c55_197, %c0_198] : memref<135x512xbf16, #tpu.memory_space<vmem>>, vector<5x512xbf16>
    tpu.vector_store %arg17[%c55_197, %c0_198], %255 {strides = array<i32>} : memref<135x512xbf16, #tpu.memory_space<vmem>>, vector<5x512xbf16>,
    %c0_199 = arith.constant 0 : index
    %c127_200 = arith.constant 127 : index
    %257 = vector.load %arg16[%c0_199, %c127_200] : memref<5x768xbf16, #tpu.memory_space<vmem>>, vector<5x512xbf16>
    %c12_201 = arith.constant 12 : index
    %c0_202 = arith.constant 0 : index
    %258 = vector.load %arg5[%c12_201, %c0_202] : memref<27x512xbf16, #tpu.memory_space<vmem>>, vector<1x512xbf16>
    %259 = vector.broadcast %258 : vector<1x512xbf16> to vector<5x512xbf16>
    %260 = arith.mulf %257, %259 : vector<5x512xbf16>
    %c60 = arith.constant 60 : index
    %c0_203 = arith.constant 0 : index
    %261 = vector.load %arg17[%c60, %c0_203] : memref<135x512xbf16, #tpu.memory_space<vmem>>, vector<5x512xbf16>
    tpu.vector_store %arg17[%c60, %c0_203], %260 {strides = array<i32>} : memref<135x512xbf16, #tpu.memory_space<vmem>>, vector<5x512xbf16>,
    %c0_204 = arith.constant 0 : index
    %c128_205 = arith.constant 128 : index
    %262 = vector.load %arg16[%c0_204, %c128_205] : memref<5x768xbf16, #tpu.memory_space<vmem>>, vector<5x512xbf16>
    %c13_206 = arith.constant 13 : index
    %c0_207 = arith.constant 0 : index
    %263 = vector.load %arg5[%c13_206, %c0_207] : memref<27x512xbf16, #tpu.memory_space<vmem>>, vector<1x512xbf16>
    %264 = vector.broadcast %263 : vector<1x512xbf16> to vector<5x512xbf16>
    %265 = arith.mulf %262, %264 : vector<5x512xbf16>
    %c65_208 = arith.constant 65 : index
    %c0_209 = arith.constant 0 : index
    %266 = vector.load %arg17[%c65_208, %c0_209] : memref<135x512xbf16, #tpu.memory_space<vmem>>, vector<5x512xbf16>
    tpu.vector_store %arg17[%c65_208, %c0_209], %265 {strides = array<i32>} : memref<135x512xbf16, #tpu.memory_space<vmem>>, vector<5x512xbf16>,
    %c0_210 = arith.constant 0 : index
    %c129_211 = arith.constant 129 : index
    %267 = vector.load %arg16[%c0_210, %c129_211] : memref<5x768xbf16, #tpu.memory_space<vmem>>, vector<5x512xbf16>
    %c14_212 = arith.constant 14 : index
    %c0_213 = arith.constant 0 : index
    %268 = vector.load %arg5[%c14_212, %c0_213] : memref<27x512xbf16, #tpu.memory_space<vmem>>, vector<1x512xbf16>
    %269 = vector.broadcast %268 : vector<1x512xbf16> to vector<5x512xbf16>
    %270 = arith.mulf %267, %269 : vector<5x512xbf16>
    %c70 = arith.constant 70 : index
    %c0_214 = arith.constant 0 : index
    %271 = vector.load %arg17[%c70, %c0_214] : memref<135x512xbf16, #tpu.memory_space<vmem>>, vector<5x512xbf16>
    tpu.vector_store %arg17[%c70, %c0_214], %270 {strides = array<i32>} : memref<135x512xbf16, #tpu.memory_space<vmem>>, vector<5x512xbf16>,
    %c0_215 = arith.constant 0 : index
    %c135_216 = arith.constant 135 : index
    %272 = vector.load %arg16[%c0_215, %c135_216] : memref<5x768xbf16, #tpu.memory_space<vmem>>, vector<5x512xbf16>
    %c15_217 = arith.constant 15 : index
    %c0_218 = arith.constant 0 : index
    %273 = vector.load %arg5[%c15_217, %c0_218] : memref<27x512xbf16, #tpu.memory_space<vmem>>, vector<1x512xbf16>
    %274 = vector.broadcast %273 : vector<1x512xbf16> to vector<5x512xbf16>
    %275 = arith.mulf %272, %274 : vector<5x512xbf16>
    %c75 = arith.constant 75 : index
    %c0_219 = arith.constant 0 : index
    %276 = vector.load %arg17[%c75, %c0_219] : memref<135x512xbf16, #tpu.memory_space<vmem>>, vector<5x512xbf16>
    tpu.vector_store %arg17[%c75, %c0_219], %275 {strides = array<i32>} : memref<135x512xbf16, #tpu.memory_space<vmem>>, vector<5x512xbf16>,
    %c0_220 = arith.constant 0 : index
    %c136_221 = arith.constant 136 : index
    %277 = vector.load %arg16[%c0_220, %c136_221] : memref<5x768xbf16, #tpu.memory_space<vmem>>, vector<5x512xbf16>
    %c16_222 = arith.constant 16 : index
    %c0_223 = arith.constant 0 : index
    %278 = vector.load %arg5[%c16_222, %c0_223] : memref<27x512xbf16, #tpu.memory_space<vmem>>, vector<1x512xbf16>
    %279 = vector.broadcast %278 : vector<1x512xbf16> to vector<5x512xbf16>
    %280 = arith.mulf %277, %279 : vector<5x512xbf16>
    %c80 = arith.constant 80 : index
    %c0_224 = arith.constant 0 : index
    %281 = vector.load %arg17[%c80, %c0_224] : memref<135x512xbf16, #tpu.memory_space<vmem>>, vector<5x512xbf16>
    tpu.vector_store %arg17[%c80, %c0_224], %280 {strides = array<i32>} : memref<135x512xbf16, #tpu.memory_space<vmem>>, vector<5x512xbf16>,
    %c0_225 = arith.constant 0 : index
    %c137_226 = arith.constant 137 : index
    %282 = vector.load %arg16[%c0_225, %c137_226] : memref<5x768xbf16, #tpu.memory_space<vmem>>, vector<5x512xbf16>
    %c17_227 = arith.constant 17 : index
    %c0_228 = arith.constant 0 : index
    %283 = vector.load %arg5[%c17_227, %c0_228] : memref<27x512xbf16, #tpu.memory_space<vmem>>, vector<1x512xbf16>
    %284 = vector.broadcast %283 : vector<1x512xbf16> to vector<5x512xbf16>
    %285 = arith.mulf %282, %284 : vector<5x512xbf16>
    %c85 = arith.constant 85 : index
    %c0_229 = arith.constant 0 : index
    %286 = vector.load %arg17[%c85, %c0_229] : memref<135x512xbf16, #tpu.memory_space<vmem>>, vector<5x512xbf16>
    tpu.vector_store %arg17[%c85, %c0_229], %285 {strides = array<i32>} : memref<135x512xbf16, #tpu.memory_space<vmem>>, vector<5x512xbf16>,
    %c0_230 = arith.constant 0 : index
    %c183_231 = arith.constant 183 : index
    %287 = vector.load %arg16[%c0_230, %c183_231] : memref<5x768xbf16, #tpu.memory_space<vmem>>, vector<5x512xbf16>
    %c18_232 = arith.constant 18 : index
    %c0_233 = arith.constant 0 : index
    %288 = vector.load %arg5[%c18_232, %c0_233] : memref<27x512xbf16, #tpu.memory_space<vmem>>, vector<1x512xbf16>
    %289 = vector.broadcast %288 : vector<1x512xbf16> to vector<5x512xbf16>
    %290 = arith.mulf %287, %289 : vector<5x512xbf16>
    %c90_234 = arith.constant 90 : index
    %c0_235 = arith.constant 0 : index
    %291 = vector.load %arg17[%c90_234, %c0_235] : memref<135x512xbf16, #tpu.memory_space<vmem>>, vector<5x512xbf16>
    tpu.vector_store %arg17[%c90_234, %c0_235], %290 {strides = array<i32>} : memref<135x512xbf16, #tpu.memory_space<vmem>>, vector<5x512xbf16>,
    %c0_236 = arith.constant 0 : index
    %c184_237 = arith.constant 184 : index
    %292 = vector.load %arg16[%c0_236, %c184_237] : memref<5x768xbf16, #tpu.memory_space<vmem>>, vector<5x512xbf16>
    %c19_238 = arith.constant 19 : index
    %c0_239 = arith.constant 0 : index
    %293 = vector.load %arg5[%c19_238, %c0_239] : memref<27x512xbf16, #tpu.memory_space<vmem>>, vector<1x512xbf16>
    %294 = vector.broadcast %293 : vector<1x512xbf16> to vector<5x512xbf16>
    %295 = arith.mulf %292, %294 : vector<5x512xbf16>
    %c95 = arith.constant 95 : index
    %c0_240 = arith.constant 0 : index
    %296 = vector.load %arg17[%c95, %c0_240] : memref<135x512xbf16, #tpu.memory_space<vmem>>, vector<5x512xbf16>
    tpu.vector_store %arg17[%c95, %c0_240], %295 {strides = array<i32>} : memref<135x512xbf16, #tpu.memory_space<vmem>>, vector<5x512xbf16>,
    %c0_241 = arith.constant 0 : index
    %c185_242 = arith.constant 185 : index
    %297 = vector.load %arg16[%c0_241, %c185_242] : memref<5x768xbf16, #tpu.memory_space<vmem>>, vector<5x512xbf16>
    %c20_243 = arith.constant 20 : index
    %c0_244 = arith.constant 0 : index
    %298 = vector.load %arg5[%c20_243, %c0_244] : memref<27x512xbf16, #tpu.memory_space<vmem>>, vector<1x512xbf16>
    %299 = vector.broadcast %298 : vector<1x512xbf16> to vector<5x512xbf16>
    %300 = arith.mulf %297, %299 : vector<5x512xbf16>
    %c100 = arith.constant 100 : index
    %c0_245 = arith.constant 0 : index
    %301 = vector.load %arg17[%c100, %c0_245] : memref<135x512xbf16, #tpu.memory_space<vmem>>, vector<5x512xbf16>
    tpu.vector_store %arg17[%c100, %c0_245], %300 {strides = array<i32>} : memref<135x512xbf16, #tpu.memory_space<vmem>>, vector<5x512xbf16>,
    %c0_246 = arith.constant 0 : index
    %c191_247 = arith.constant 191 : index
    %302 = vector.load %arg16[%c0_246, %c191_247] : memref<5x768xbf16, #tpu.memory_space<vmem>>, vector<5x512xbf16>
    %c21_248 = arith.constant 21 : index
    %c0_249 = arith.constant 0 : index
    %303 = vector.load %arg5[%c21_248, %c0_249] : memref<27x512xbf16, #tpu.memory_space<vmem>>, vector<1x512xbf16>
    %304 = vector.broadcast %303 : vector<1x512xbf16> to vector<5x512xbf16>
    %305 = arith.mulf %302, %304 : vector<5x512xbf16>
    %c105 = arith.constant 105 : index
    %c0_250 = arith.constant 0 : index
    %306 = vector.load %arg17[%c105, %c0_250] : memref<135x512xbf16, #tpu.memory_space<vmem>>, vector<5x512xbf16>
    tpu.vector_store %arg17[%c105, %c0_250], %305 {strides = array<i32>} : memref<135x512xbf16, #tpu.memory_space<vmem>>, vector<5x512xbf16>,
    %c0_251 = arith.constant 0 : index
    %c192_252 = arith.constant 192 : index
    %307 = vector.load %arg16[%c0_251, %c192_252] : memref<5x768xbf16, #tpu.memory_space<vmem>>, vector<5x512xbf16>
    %c22_253 = arith.constant 22 : index
    %c0_254 = arith.constant 0 : index
    %308 = vector.load %arg5[%c22_253, %c0_254] : memref<27x512xbf16, #tpu.memory_space<vmem>>, vector<1x512xbf16>
    %309 = vector.broadcast %308 : vector<1x512xbf16> to vector<5x512xbf16>
    %310 = arith.mulf %307, %309 : vector<5x512xbf16>
    %c110 = arith.constant 110 : index
    %c0_255 = arith.constant 0 : index
    %311 = vector.load %arg17[%c110, %c0_255] : memref<135x512xbf16, #tpu.memory_space<vmem>>, vector<5x512xbf16>
    tpu.vector_store %arg17[%c110, %c0_255], %310 {strides = array<i32>} : memref<135x512xbf16, #tpu.memory_space<vmem>>, vector<5x512xbf16>,
    %c0_256 = arith.constant 0 : index
    %c193_257 = arith.constant 193 : index
    %312 = vector.load %arg16[%c0_256, %c193_257] : memref<5x768xbf16, #tpu.memory_space<vmem>>, vector<5x512xbf16>
    %c23_258 = arith.constant 23 : index
    %c0_259 = arith.constant 0 : index
    %313 = vector.load %arg5[%c23_258, %c0_259] : memref<27x512xbf16, #tpu.memory_space<vmem>>, vector<1x512xbf16>
    %314 = vector.broadcast %313 : vector<1x512xbf16> to vector<5x512xbf16>
    %315 = arith.mulf %312, %314 : vector<5x512xbf16>
    %c115 = arith.constant 115 : index
    %c0_260 = arith.constant 0 : index
    %316 = vector.load %arg17[%c115, %c0_260] : memref<135x512xbf16, #tpu.memory_space<vmem>>, vector<5x512xbf16>
    tpu.vector_store %arg17[%c115, %c0_260], %315 {strides = array<i32>} : memref<135x512xbf16, #tpu.memory_space<vmem>>, vector<5x512xbf16>,
    %c0_261 = arith.constant 0 : index
    %c199_262 = arith.constant 199 : index
    %317 = vector.load %arg16[%c0_261, %c199_262] : memref<5x768xbf16, #tpu.memory_space<vmem>>, vector<5x512xbf16>
    %c24_263 = arith.constant 24 : index
    %c0_264 = arith.constant 0 : index
    %318 = vector.load %arg5[%c24_263, %c0_264] : memref<27x512xbf16, #tpu.memory_space<vmem>>, vector<1x512xbf16>
    %319 = vector.broadcast %318 : vector<1x512xbf16> to vector<5x512xbf16>
    %320 = arith.mulf %317, %319 : vector<5x512xbf16>
    %c120_265 = arith.constant 120 : index
    %c0_266 = arith.constant 0 : index
    %321 = vector.load %arg17[%c120_265, %c0_266] : memref<135x512xbf16, #tpu.memory_space<vmem>>, vector<5x512xbf16>
    tpu.vector_store %arg17[%c120_265, %c0_266], %320 {strides = array<i32>} : memref<135x512xbf16, #tpu.memory_space<vmem>>, vector<5x512xbf16>,
    %c0_267 = arith.constant 0 : index
    %c200_268 = arith.constant 200 : index
    %322 = vector.load %arg16[%c0_267, %c200_268] : memref<5x768xbf16, #tpu.memory_space<vmem>>, vector<5x512xbf16>
    %c25_269 = arith.constant 25 : index
    %c0_270 = arith.constant 0 : index
    %323 = vector.load %arg5[%c25_269, %c0_270] : memref<27x512xbf16, #tpu.memory_space<vmem>>, vector<1x512xbf16>
    %324 = vector.broadcast %323 : vector<1x512xbf16> to vector<5x512xbf16>
    %325 = arith.mulf %322, %324 : vector<5x512xbf16>
    %c125 = arith.constant 125 : index
    %c0_271 = arith.constant 0 : index
    %326 = vector.load %arg17[%c125, %c0_271] : memref<135x512xbf16, #tpu.memory_space<vmem>>, vector<5x512xbf16>
    tpu.vector_store %arg17[%c125, %c0_271], %325 {strides = array<i32>} : memref<135x512xbf16, #tpu.memory_space<vmem>>, vector<5x512xbf16>,
    %c0_272 = arith.constant 0 : index
    %c201_273 = arith.constant 201 : index
    %327 = vector.load %arg16[%c0_272, %c201_273] : memref<5x768xbf16, #tpu.memory_space<vmem>>, vector<5x512xbf16>
    %c26_274 = arith.constant 26 : index
    %c0_275 = arith.constant 0 : index
    %328 = vector.load %arg5[%c26_274, %c0_275] : memref<27x512xbf16, #tpu.memory_space<vmem>>, vector<1x512xbf16>
    %329 = vector.broadcast %328 : vector<1x512xbf16> to vector<5x512xbf16>
    %330 = arith.mulf %327, %329 : vector<5x512xbf16>
    %c130 = arith.constant 130 : index
    %c0_276 = arith.constant 0 : index
    %331 = vector.load %arg17[%c130, %c0_276] : memref<135x512xbf16, #tpu.memory_space<vmem>>, vector<5x512xbf16>
    tpu.vector_store %arg17[%c130, %c0_276], %330 {strides = array<i32>} : memref<135x512xbf16, #tpu.memory_space<vmem>>, vector<5x512xbf16>,
    %c0_277 = arith.constant 0 : index
    %c0_278 = arith.constant 0 : index
    %332 = vector.load %arg7[%c0_277, %c0_278] : memref<16x135xbf16, #tpu.memory_space<vmem>>, vector<16x135xbf16>
    %c0_279 = arith.constant 0 : index
    %c0_280 = arith.constant 0 : index
    %333 = vector.load %arg17[%c0_279, %c0_280] : memref<135x512xbf16, #tpu.memory_space<vmem>>, vector<135x512xbf16>
    %cst_281 = arith.constant dense<0.000000e+00> : vector<16x512xf32>
    %334 = tpu.matmul %332, %333, %cst_281 {dimension_numbers = #tpu.dot_dimension_numbers<[1], [0], [0], [1], [0, 0, 1, 1], [], []>} : vector<16x135xbf16>, vector<135x512xbf16>, vector<16x512xf32> -> vector<16x512xf32>
    %335 = vector.extract_strided_slice %334 {offsets = [0, 0], sizes = [8, 512], strides = [1, 1]} : vector<16x512xf32> to vector<8x512xf32>
    %336 = vector.extract_strided_slice %334 {offsets = [8, 0], sizes = [1, 512], strides = [1, 1]} : vector<16x512xf32> to vector<1x512xf32>
    %cst_282 = arith.constant 0.000000e+00 : f32
    %cst_283 = arith.constant 1.000000e+00 : f32
    %337 = vector.broadcast %cst_282 : f32 to vector<1x512xf32>
    %338 = arith.maximumf %337, %336 : vector<1x512xf32>
    %339 = vector.broadcast %cst_283 : f32 to vector<1x512xf32>
    %340 = arith.minimumf %339, %338 : vector<1x512xf32>
    %cst_284 = arith.constant 9.99999993E-9 : f32
    %341 = vector.broadcast %cst_284 : f32 to vector<1x512xf32>
    %342 = arith.addf %336, %341 : vector<1x512xf32>
    %343 = tpu.reciprocal %342 {approx = true} : vector<1x512xf32> -> vector<1x512xf32>
    %cst_285 = arith.constant 1.080000e+02 : f32
    %344 = vector.broadcast %cst_285 : f32 to vector<1x512xf32>
    %345 = arith.mulf %344, %343 : vector<1x512xf32>
    %346 = arith.mulf %345, %340 : vector<1x512xf32>
    %347 = vector.broadcast %346 : vector<1x512xf32> to vector<8x512xf32>
    %348 = arith.mulf %335, %347 : vector<8x512xf32>
    %c0_286 = arith.constant 0 : index
    %c0_287 = arith.constant 0 : index
    %349 = vector.load %arg10[%c0_286, %c0_287] : memref<8x1xf32, #tpu.memory_space<vmem>>, vector<8x1xf32>
    %350 = vector.broadcast %349 : vector<8x1xf32> to vector<8x512xf32>
    %351 = arith.mulf %348, %350 : vector<8x512xf32>
    %c0_288 = arith.constant 0 : index
    %c0_289 = arith.constant 0 : index
    %352 = vector.load %arg11[%c0_288, %c0_289] : memref<8x1xf32, #tpu.memory_space<vmem>>, vector<8x1xf32>
    %353 = vector.broadcast %352 : vector<8x1xf32> to vector<8x512xf32>
    %354 = arith.addf %351, %353 : vector<8x512xf32>
    %355 = arith.negf %354 : vector<8x512xf32>
    %356 = math.exp %355 : vector<8x512xf32>
    %cst_290 = arith.constant 1.000000e+00 : f32
    %357 = vector.broadcast %cst_290 : f32 to vector<8x512xf32>
    %358 = arith.addf %357, %356 : vector<8x512xf32>
    %359 = arith.divf %357, %358 : vector<8x512xf32>
    %360 = arith.mulf %354, %359 : vector<8x512xf32>
    %c0_291 = arith.constant 0 : index
    %c0_292 = arith.constant 0 : index
    %c0_293 = arith.constant 0 : index
    %361 = vector.load %arg12[%c0_291, %c0_292, %c0_293] : memref<1x8x512xf32, #tpu.memory_space<vmem>>, vector<1x8x512xf32>
    %362 = vector.shape_cast %361 : vector<1x8x512xf32> to vector<8x512xf32>
    %363 = vector.shape_cast %360 : vector<8x512xf32> to vector<1x8x512xf32>
    tpu.vector_store %arg12[%c0_291, %c0_292, %c0_293], %363 {strides = array<i32>} : memref<1x8x512xf32, #tpu.memory_space<vmem>>, vector<1x8x512xf32>,
    %c0_294 = arith.constant 0 : index
    %c0_295 = arith.constant 0 : index
    %c0_296 = arith.constant 0 : index
    %364 = vector.load %arg13[%c0_294, %c0_295, %c0_296] : memref<1x1x512xf32, #tpu.memory_space<vmem>>, vector<1x1x512xf32>
    %365 = vector.shape_cast %364 : vector<1x1x512xf32> to vector<1x512xf32>
    %366 = vector.shape_cast %340 : vector<1x512xf32> to vector<1x1x512xf32>
    tpu.vector_store %arg13[%c0_294, %c0_295, %c0_296], %366 {strides = array<i32>} : memref<1x1x512xf32, #tpu.memory_space<vmem>>, vector<1x1x512xf32>,
    return
  }
  func.func @transform_0(%arg0: i32) -> (i32, i32, i32) {
    %c0_i32 = arith.constant 0 : i32
    %c0_i32_0 = arith.constant 0 : i32
    %c0_i32_1 = arith.constant 0 : i32
    return %arg0, %c0_i32, %c0_i32_0 : i32, i32, i32
  }
  func.func @transform_1(%arg0: i32) -> (i32, i32, i32) {
    %c0_i32 = arith.constant 0 : i32
    %c0_i32_0 = arith.constant 0 : i32
    %c0_i32_1 = arith.constant 0 : i32
    return %arg0, %c0_i32, %c0_i32_0 : i32, i32, i32
  }
  func.func @transform_2(%arg0: i32) -> (i32, i32, i32) {
    %c0_i32 = arith.constant 0 : i32
    %c0_i32_0 = arith.constant 0 : i32
    %c0_i32_1 = arith.constant 0 : i32
    return %arg0, %c0_i32, %c0_i32_0 : i32, i32, i32
  }
  func.func @transform_3(%arg0: i32) -> (i32, i32, i32) {
    %c0_i32 = arith.constant 0 : i32
    %c0_i32_0 = arith.constant 0 : i32
    %c0_i32_1 = arith.constant 0 : i32
    return %arg0, %c0_i32, %c0_i32_0 : i32, i32, i32
  }
  func.func @transform_4(%arg0: i32) -> (i32, i32) {
    %c0_i32 = arith.constant 0 : i32
    %c0_i32_0 = arith.constant 0 : i32
    %c0_i32_1 = arith.constant 0 : i32
    return %c0_i32, %c0_i32_0 : i32, i32
  }
  func.func @transform_5(%arg0: i32) -> (i32, i32) {
    %c0_i32 = arith.constant 0 : i32
    %c0_i32_0 = arith.constant 0 : i32
    %c0_i32_1 = arith.constant 0 : i32
    return %c0_i32, %c0_i32_0 : i32, i32
  }
  func.func @transform_6(%arg0: i32) -> (i32, i32) {
    %c0_i32 = arith.constant 0 : i32
    %c0_i32_0 = arith.constant 0 : i32
    %c0_i32_1 = arith.constant 0 : i32
    return %c0_i32, %c0_i32_0 : i32, i32
  }
  func.func @transform_7(%arg0: i32) -> (i32, i32) {
    %c0_i32 = arith.constant 0 : i32
    %c0_i32_0 = arith.constant 0 : i32
    %c0_i32_1 = arith.constant 0 : i32
    return %c0_i32, %c0_i32_0 : i32, i32
  }
  func.func @transform_8(%arg0: i32) -> (i32, i32) {
    %c0_i32 = arith.constant 0 : i32
    %c0_i32_0 = arith.constant 0 : i32
    %c0_i32_1 = arith.constant 0 : i32
    return %c0_i32, %c0_i32_0 : i32, i32
  }
  func.func @transform_9(%arg0: i32) -> (i32, i32) {
    %c0_i32 = arith.constant 0 : i32
    %c0_i32_0 = arith.constant 0 : i32
    %c0_i32_1 = arith.constant 0 : i32
    return %c0_i32, %c0_i32_0 : i32, i32
  }
  func.func @transform_10(%arg0: i32) -> (i32, i32) {
    %c0_i32 = arith.constant 0 : i32
    %c0_i32_0 = arith.constant 0 : i32
    %c0_i32_1 = arith.constant 0 : i32
    return %c0_i32, %c0_i32_0 : i32, i32
  }
  func.func @transform_11(%arg0: i32) -> (i32, i32, i32) {
    %c0_i32 = arith.constant 0 : i32
    %c0_i32_0 = arith.constant 0 : i32
    %c0_i32_1 = arith.constant 0 : i32
    return %arg0, %c0_i32, %c0_i32_0 : i32, i32, i32
  }
  func.func @transform_12(%arg0: i32) -> (i32, i32, i32) {
    %c0_i32 = arith.constant 0 : i32
    %c0_i32_0 = arith.constant 0 : i32
    %c0_i32_1 = arith.constant 0 : i32
    return %arg0, %c0_i32, %c0_i32_0 : i32, i32, i32
  }
}

</mosaic_0001>

<bundles_post_ra>
// kernel: inpainting_up3d_forward.1
= control target key start
LH: loop header
LB: loop body
LE: loop exit
PB: predicated region body
PF: predicated region fallthrough
CT: control target
= control target key end

     0   :  { %s10329_s21 = smov 0   ;;  %s13553_s0 = inlined_call_operand.vmem [shape: f32[2,4,512], index: 0, kind: input, shape index: {}]   ;;  %s13554_s1 = inlined_call_operand.vmem [shape: f32[2,4,512], index: 1, kind: input, shape index: {}]   ;;  %s13555_s2 = inlined_call_operand.vmem [shape: f32[2,4,512], index: 2, kind: input, shape index: {}]   ;;  %s13556_s3 = inlined_call_operand.vmem [shape: f32[2,4,512], index: 3, kind: input, shape index: {}]   ;;  %s13557_s4 = inlined_call_operand.vmem [shape: bf16[27,512], index: 4, kind: input, shape index: {}]   ;;  %s13558_s5 = inlined_call_operand.vmem [shape: bf16[8,243], index: 5, kind: input, shape index: {}]   ;;  %s13559_s6 = inlined_call_operand.vmem [shape: bf16[16,135], index: 6, kind: input, shape index: {}]   ;;  %s13560_s7 = inlined_call_operand.vmem [shape: f32[4,1], index: 7, kind: input, shape index: {}]   ;;  %s13561_s8 = inlined_call_operand.vmem [shape: f32[4,1], index: 8, kind: input, shape index: {}]   ;;  %s13562_s9 = inlined_call_operand.vmem [shape: f32[8,1], index: 9, kind: input, shape index: {}]   ;;  %s13563_s10 = inlined_call_operand.vmem [shape: f32[8,1], index: 10, kind: input, shape index: {}]   ;;  %s13564_s11 = inlined_call_operand.vmem [shape: f32[2,8,512], index: 11, kind: output, shape index: {0}]   ;;  %s13565_s12 = inlined_call_operand.vmem [shape: f32[2,1,512], index: 12, kind: output, shape index: {1}]  }
   0x1   :  { %13668 = sst [smem:[#allocation6_spill]] %s13553_s0 }
   0x2   :  { %13669 = sst [smem:[#allocation7_spill]] %s13554_s1 }
   0x3   :  { %13670 = sst [smem:[#allocation8_spill]] %s13555_s2 }
   0x4   :  { %13671 = sst [smem:[#allocation9_spill]] %s13556_s3 }
   0x5   :  { %13672 = sst [smem:[#allocation10_spill]] %s13558_s5 }
   0x6 LB: > { %s9093_s22 = sadd.s32 4294967295, %s10243_s21   ;;  %p9097_p0 = scmp.ge.s32.totalorder %s10243_s21, 1  ;;  %s10243_s21 = sphi %s10329_s21, %s23_s21  }
   0x7   : > { %p395_p1 = scmp.lt.s32.totalorder %s10243_s21, 3 }
   0x9   : > { %p396_p2 = pnand %p9097_p0, %p395_p1 }
   0xa   : > { %s13648_s23 = smov (!%p396_p2), 55   ;;  %s13616_s24 = smov (!%p396_p2), 57  }
   0xb   : > { %399 = sbr.rel (%p396_p2) target bundleno = 5362 (0x14f2), region = 64  ;;  %s13612_s27 = smov (!%p396_p2), 63  }
   0xc   : > { %p10373_p3 = scmp.lt.s32.totalorder (!%p396_p2), %s9093_s22, 1  ;;  %s13652_s17 = smov (!%p396_p2), 56  }
   0xd   : > { %s13607_s18 = smov (!%p396_p2), 65   ;;  %s13674_s0 = sld [smem:[#allocation6_spill]] (!%p396_p2) }
   0xe   : > { %s13675_s1 = sld [smem:[#allocation7_spill]] (!%p396_p2)  ;;  %s13614_s19 = smov (!%p396_p2), 71  }
   0xf   : > { %s13676_s2 = sld [smem:[#allocation8_spill]] (!%p396_p2)  ;;  %s13602_s15 = smov (!%p396_p2), 64  }
  0x10   : > { %v674_v0 = vld [vmem:[%s13557_s4] sm:$0x11]  ;;  %v977_v1 = vld [vmem:[%s13557_s4] sm:$0x22]  ;;  %v675_v6 = vld [vmem:[%s13557_s4 + $0x8] sm:$0x11] }
  0x11   : > { %v678_v2 = vunpack.c.l.b16 %v674_v0  ;;  %v679_v3 = vunpack.c.h.b16 %v674_v0  ;;  %v981_v4 = vunpack.c.l.b16 %v977_v1  ;;  %v982_v5 = vunpack.c.h.b16 %v977_v1  ;;  %v1128_v7 = vld [vmem:[%s13557_s4 + $0x8] sm:$0x22]  ;;  %v806_v36 = vld [vmem:[%s13557_s4 + $0x8] sm:$0x11]  ;;  %v1449_v41 = vld [vmem:[%s13557_s4] sm:$0x44] }
  0x12   : > { %v680_v8 = vunpack.c.l.b16 %v675_v6  ;;  %v681_v9 = vunpack.c.h.b16 %v675_v6  ;;  %v1133_v10 = vunpack.c.l.b16 %v1128_v7  ;;  %v1134_v11 = vunpack.c.h.b16 %v1128_v7  ;;  %v1127_v46 = vld [vmem:[%s13557_s4] sm:$0x22]  ;;  %v1629_v51 = vld [vmem:[%s13557_s4 + $0x8] sm:$0x88]  ;;  %s14166_s22 = smov (!%p10373_p3, %s9093_s22), 1  ;;  %s13677_s3 = sld [smem:[#allocation9_spill]] }
  0x13   : > { %v682_v12 = vpack.c.b16 %v678_v2, %v678_v2  ;;  %v683_v13 = vpack.c.b16 %v679_v3, %v679_v3  ;;  %v985_v14 = vpack.c.b16 %v981_v4, %v981_v4  ;;  %v986_v15 = vpack.c.b16 %v982_v5, %v982_v5  ;;  %s10395_s25 = sshll.u32 %s14166_s22, 4  ;;  %s13643_s30 = smov 119  }
  0x14   : > { %v684_v16 = vpack.c.b16 %v680_v8, %v680_v8  ;;  %v685_v17 = vpack.c.b16 %v681_v9, %v681_v9  ;;  %v1137_v18 = vpack.c.b16 %v1133_v10, %v1133_v10  ;;  %v1138_v19 = vpack.c.b16 %v1134_v11, %v1134_v11  ;;  %s10404_s13 = scalar_lea.vmem %s13674_s0, %s10395_s25  ;;  %s10410_s16 = scalar_lea.vmem %s13675_s1, %s10395_s25 }
  0x15   : > { %v687_v20 = vpack.i.b16 %v682_v12, %v682_v12  ;;  %v691_v21 = vpack.i.b16 %v683_v13, %v683_v13  ;;  %v990_v22 = vpack.i.b16 %v985_v14, %v985_v14  ;;  %v994_v23 = vpack.i.b16 %v986_v15, %v986_v15  ;;  %s10421_s28 = scalar_lea.vmem %s13676_s2, %s10395_s25  ;;  %s13639_s29 = smov 120  }
  0x16   : > { %v695_v24 = vpack.i.b16 %v684_v16, %v684_v16  ;;  %v699_v25 = vpack.i.b16 %v685_v17, %v685_v17  ;;  %v1150_v26 = vshrl.u32 %v1137_v18, 16  ;;  %v1155_v27 = vshrl.u32 %v1138_v19, 16  ;;  %s13631_s20 = smov 127   ;;  %s13814_s26 = smov 71  }
  0x17   : > { %v689_v28 = vperm.slane %v687_v20, 0  ;;  %v693_v29 = vperm.slane %v691_v21, 0  ;;  %v992_v30 = vperm.slane %v990_v22, 1  ;;  %v996_v31 = vperm.slane %v994_v23, 1  ;;  %v1307_v23 = vld [vmem:[%s13557_s4 + $0x8] sm:$0x44] }
  0x18   : > { %v697_v32 = vperm.slane %v695_v24, 0  ;;  %v701_v33 = vperm.slane %v699_v25, 0  ;;  %v1151_v34 = vpack.i.b16 %v1150_v26, %v1150_v26  ;;  %v1156_v35 = vpack.i.b16 %v1155_v27, %v1155_v27  ;;  %v805_v27 = vld [vmem:[%s13557_s4] sm:$0x11]  ;;  %s10427_s14 = scalar_lea.vmem %s13677_s3, %s10395_s25  ;;  %s13650_s25 = smov 73  }
  0x19   : > { %v712_v37 = vunpack.c.l.bf16 %v689_v28  ;;  %v713_v38 = vunpack.c.l.bf16 %v693_v29  ;;  %v1015_v39 = vunpack.c.l.bf16 %v992_v30  ;;  %v1016_v40 = vunpack.c.l.bf16 %v996_v31  ;;  %s13889_s5 = sld [smem:[#allocation10_spill]]  ;;  %s14010_s0 = smov 56  }
  0x1a   : > { %v714_v42 = vunpack.c.l.bf16 %v697_v32  ;;  %v715_v43 = vunpack.c.l.bf16 %v701_v33  ;;  %v1153_v44 = vperm.slane %v1151_v34, 1  ;;  %v1158_v45 = vperm.slane %v1156_v35, 1  ;;  %s9108_s1 = sshll.u32 %s14166_s22, 2 }
  0x1b   : > { %v9629_v47 = vpack.i.bf16 %v713_v38, %v712_v37  ;;  %v9649_v48 = vpack.i.bf16 %v1016_v40, %v1015_v39  ;;  %v811_v49 = vunpack.c.l.b16 %v806_v36  ;;  %v812_v50 = vunpack.c.h.b16 %v806_v36  ;;  %v1628_v37 = vld [vmem:[%s13557_s4] sm:$0x88] }
  0x1c   : > { %v9634_v52 = vpack.i.bf16 %v715_v43, %v714_v42  ;;  %v1171_v53 = vunpack.c.l.bf16 %v1153_v44  ;;  %v1172_v54 = vunpack.c.l.bf16 %v1158_v45  ;;  %v1453_v55 = vunpack.c.l.b16 %v1449_v41  ;;  %v978_v42 = vld [vmem:[%s13557_s4 + $0x8] sm:$0x22] }
  0x1d   : > { %9630 = vrot.lane.b32.xlu0 %v9629_v47, %s13648_s23  ;;  %9650 = vrot.lane.b32.xlu1 %v9649_v48, %s13616_s24  ;;  %v815_v56 = vpack.c.b16 %v811_v49, %v811_v49  ;;  %v816_v57 = vpack.c.b16 %v812_v50, %v812_v50  ;;  %v1454_v58 = vunpack.c.h.b16 %v1449_v41  ;;  %v1131_v59 = vunpack.c.l.b16 %v1127_v46 }
  0x1e   : > { %v9664_v60 = vpack.i.bf16 %v1172_v54, %v1171_v53  ;;  %v1457_v61 = vpack.c.b16 %v1453_v55, %v1453_v55  ;;  %v1132_v62 = vunpack.c.h.b16 %v1127_v46  ;;  %v1634_v63 = vunpack.c.l.b16 %v1629_v51 }
  0x1f   : > { %v828_v0 = vshrl.u32 %v815_v56, 16  ;;  %v833_v1 = vshrl.u32 %v816_v57, 16  ;;  %v1458_v2 = vpack.c.b16 %v1454_v58, %v1454_v58  ;;  %v1135_v3 = vpack.c.b16 %v1131_v59, %v1131_v59 }
  0x20   : > { %v1462_v4 = vshrl.u32 %v1457_v61, 16  ;;  %v1136_v5 = vpack.c.b16 %v1132_v62, %v1132_v62  ;;  %v1635_v6 = vunpack.c.h.b16 %v1629_v51  ;;  %v1638_v7 = vpack.c.b16 %v1634_v63, %v1634_v63  ;;  %v1306_v61 = vld [vmem:[%s13557_s4] sm:$0x44] }
  0x21   : > { %v829_v8 = vpack.i.b16 %v828_v0, %v828_v0  ;;  %v834_v9 = vpack.i.b16 %v833_v1, %v833_v1  ;;  %v1467_v10 = vshrl.u32 %v1458_v2, 16  ;;  %v1140_v11 = vshrl.u32 %v1135_v3, 16 }
  0x22   : > { %v1463_v12 = vpack.i.b16 %v1462_v4, %v1462_v4  ;;  %v1145_v13 = vshrl.u32 %v1136_v5, 16  ;;  %v1639_v14 = vpack.c.b16 %v1635_v6, %v1635_v6  ;;  %v1649_v15 = vpack.i.b16 %v1638_v7, %v1638_v7 }
  0x23   : > { %v831_v16 = vperm.slane %v829_v8, 0  ;;  %v836_v17 = vperm.slane %v834_v9, 0  ;;  %v1468_v18 = vpack.i.b16 %v1467_v10, %v1467_v10  ;;  %v1141_v19 = vpack.i.b16 %v1140_v11, %v1140_v11  ;;  %v1450_v10 = vld [vmem:[%s13557_s4 + $0x8] sm:$0x44] }
  0x24   : > { %v1465_v20 = vperm.slane %v1463_v12, 2  ;;  %v1146_v21 = vpack.i.b16 %v1145_v13, %v1145_v13  ;;  %v1653_v22 = vpack.i.b16 %v1639_v14, %v1639_v14  ;;  %v1651_v30 = vperm.slane %v1649_v15, 3 }
  0x25   : > { %9635 = vrot.lane.b32.xlu0 %v9634_v52, %s13648_s23  ;;  %9665 = vrot.lane.b32.xlu1 %v9664_v60, %s13612_s27  ;;  %v849_v24 = vunpack.c.l.bf16 %v831_v16  ;;  %v850_v25 = vunpack.c.l.bf16 %v836_v17  ;;  %v1470_v26 = vperm.slane %v1468_v18, 2  ;;  %v1143_v29 = vperm.slane %v1141_v19, 1 }
  0x26   : > { %v1491_v28 = vunpack.c.l.bf16 %v1465_v20  ;;  %v1148_v32 = vperm.slane %v1146_v21, 1  ;;  %v1655_v33 = vperm.slane %v1653_v22, 3  ;;  %v1312_v34 = vunpack.c.l.b16 %v1307_v23  ;;  %v521_v21 = vld [vmem:[%s10404_s13] sm:$0xff] }
  0x27   : > { %v1492_v31 = vunpack.c.l.bf16 %v1470_v26  ;;  %v1313_v35 = vunpack.c.h.b16 %v1307_v23  ;;  %v809_v36 = vunpack.c.l.b16 %v805_v27  ;;  %v9644_v38 = vpack.i.bf16 %v850_v25, %v849_v24  ;;  %v523_v22 = vld [vmem:[%s10410_s16] sm:$0xff] }
  0x28   : > { %v1316_v40 = vpack.c.b16 %v1312_v34, %v1312_v34  ;;  %v810_v41 = vunpack.c.h.b16 %v805_v27  ;;  %v1169_v43 = vunpack.c.l.bf16 %v1143_v29  ;;  %v1668_v44 = vunpack.c.l.bf16 %v1651_v30 }
  0x29   : > { %v9679_v39 = vpack.i.bf16 %v1492_v31, %v1491_v28  ;;  %v1317_v45 = vpack.c.b16 %v1313_v35, %v1313_v35  ;;  %v813_v46 = vpack.c.b16 %v809_v36, %v809_v36  ;;  %v1170_v47 = vunpack.c.l.bf16 %v1148_v32 }
  0x2a   : > { %v1669_v48 = vunpack.c.l.bf16 %v1655_v33  ;;  %v814_v49 = vpack.c.b16 %v810_v41, %v810_v41  ;;  %v1632_v50 = vunpack.c.l.b16 %v1628_v37  ;;  %v1327_v51 = vpack.i.b16 %v1316_v40, %v1316_v40 }
  0x2b   : > { %v818_v52 = vshrl.u32 %v813_v46, 16  ;;  %v983_v53 = vunpack.c.l.b16 %v978_v42  ;;  %v984_v54 = vunpack.c.h.b16 %v978_v42  ;;  %v1331_v55 = vpack.i.b16 %v1317_v45, %v1317_v45  ;;  %v525_v42 = vld [vmem:[%s10421_s28] sm:$0xff]  ;;  %v524_v45 = vld [vmem:[%s10410_s16 + $0x8] sm:$0xff]  ;;  %s13635_s16 = smov 121  }
  0x2c   : > { %v823_v56 = vshrl.u32 %v814_v49, 16  ;;  %v1633_v57 = vunpack.c.h.b16 %v1628_v37  ;;  %v9659_v62 = vpack.i.bf16 %v1170_v47, %v1169_v43  ;;  %v9694_v63 = vpack.i.bf16 %v1669_v48, %v1668_v44  ;;  %v527_v43 = vld [vmem:[%s10427_s14] sm:$0xff]  ;;  %v522_v44 = vld [vmem:[%s10404_s13 + $0x8] sm:$0xff]  ;;  %s13645_s13 = smov 72  }
  0x2d   : > { %9645 = vrot.lane.b32.xlu0 %v9644_v38, %s13652_s17  ;;  %9680 = vrot.lane.b32.xlu1 %v9679_v39, %s13607_s18  ;;  %v819_v58 = vpack.i.b16 %v818_v52, %v818_v52  ;;  %v987_v59 = vpack.c.b16 %v983_v53, %v983_v53  ;;  %v988_v60 = vpack.c.b16 %v984_v54, %v984_v54  ;;  %v1329_v2 = vperm.slane %v1327_v51, 2 }
  0x2e   : > { %v824_v0 = vpack.i.b16 %v823_v56, %v823_v56  ;;  %v1636_v1 = vpack.c.b16 %v1632_v50, %v1632_v50  ;;  %v1333_v6 = vperm.slane %v1331_v55, 2  ;;  %v1637_v8 = vpack.c.b16 %v1633_v57, %v1633_v57 }
  0x2f   : > { %v821_v3 = vperm.slane %v819_v58, 0  ;;  %v998_v4 = vpack.i.b16 %v987_v59, %v987_v59  ;;  %v1002_v5 = vpack.i.b16 %v988_v60, %v988_v60  ;;  %v1310_v9 = vunpack.c.l.b16 %v1306_v61  ;;  %v526_v60 = vld [vmem:[%s10421_s28 + $0x8] sm:$0xff]  ;;  %s13641_s28 = smov 9  }
  0x30   : > { %v826_v7 = vperm.slane %v824_v0, 0  ;;  %v1311_v15 = vunpack.c.h.b16 %v1306_v61  ;;  %v1346_v17 = vunpack.c.l.bf16 %v1329_v2  ;;  %v1641_v18 = vpack.i.b16 %v1636_v1, %v1636_v1  ;;  %v528_v61 = vld [vmem:[%s10427_s14 + $0x8] sm:$0xff]  ;;  %s13637_s14 = smov 8  }
  0x31   : > { %v847_v11 = vunpack.c.l.bf16 %v821_v3  ;;  %v1000_v12 = vperm.slane %v998_v4, 1  ;;  %v1004_v13 = vperm.slane %v1002_v5, 1  ;;  %v1314_v16 = vpack.c.b16 %v1310_v9, %v1310_v9 }
  0x32   : > { %v848_v14 = vunpack.c.l.bf16 %v826_v7  ;;  %v1455_v19 = vunpack.c.l.b16 %v1450_v10  ;;  %v1456_v20 = vunpack.c.h.b16 %v1450_v10  ;;  %v1347_v23 = vunpack.c.l.bf16 %v1333_v6 }
  0x33   : > { %v1645_v25 = vpack.i.b16 %v1637_v8, %v1637_v8  ;;  %v1315_v26 = vpack.c.b16 %v1311_v15, %v1311_v15  ;;  %v1017_v27 = vunpack.c.l.bf16 %v1000_v12  ;;  %v1018_v28 = vunpack.c.l.bf16 %v1004_v13 }
  0x34   : > { %v9639_v24 = vpack.i.bf16 %v848_v14, %v847_v11  ;;  %v1319_v29 = vpack.i.b16 %v1314_v16, %v1314_v16  ;;  %v1459_v31 = vpack.c.b16 %v1455_v19, %v1455_v19  ;;  %v1460_v32 = vpack.c.b16 %v1456_v20, %v1456_v20 }
  0x35   : > { %9660 = vrot.lane.b32.xlu0 %v9659_v62, %s13612_s27  ;;  %9695 = vrot.lane.b32.xlu1 %v9694_v63, %s13614_s19  ;;  %v1323_v30 = vpack.i.b16 %v1315_v26, %v1315_v26  ;;  %v529_v33 = vmul.f32 %v523_v22, %v521_v21  ;;  %v9674_v34 = vpack.i.bf16 %v1347_v23, %v1346_v17  ;;  %v1643_v35 = vperm.slane %v1641_v18, 3 }
  0x36   : > { %9640 = vrot.lane.b32.xlu2 %v9639_v24, %s13652_s17  ;;  %v1647_v36 = vperm.slane %v1645_v25, 3  ;;  %v1321_v37 = vperm.slane %v1319_v29, 2  ;;  %v9654_v38 = vpack.i.bf16 %v1018_v28, %v1017_v27  ;;  %v1472_v40 = vshrl.u32 %v1459_v31, 16  ;;  %v496_v28 = vld [vmem:[#allocation2 + $0x18] sm:$0x11] }
  0x37   : > { %533 = vst [vmem:[#allocation1] ss:$2 sm:$0xff] %v529_v33  ;;  %v1325_v39 = vperm.slane %v1323_v30, 2  ;;  %v1477_v41 = vshrl.u32 %v1460_v32, 16  ;;  %v1666_v46 = vunpack.c.l.bf16 %v1643_v35  ;;  %v548_v48 = vmul.f32 %v527_v43, %v525_v42  ;;  %v499_v29 = vld [vmem:[#allocation2 + $0x20] sm:$0x11] }
  0x38   : > { %v1667_v47 = vunpack.c.l.bf16 %v1647_v36  ;;  %v530_v49 = vmul.f32 %v524_v45, %v522_v44  ;;  %v1344_v50 = vunpack.c.l.bf16 %v1321_v37  ;;  %v1473_v52 = vpack.i.b16 %v1472_v40, %v1472_v40 }
  0x39   : > { %v1345_v51 = vunpack.c.l.bf16 %v1325_v39  ;;  %v1478_v53 = vpack.i.b16 %v1477_v41, %v1477_v41  ;;  %v549_v62 = vmul.f32 %v528_v61, %v526_v60  ;;  %vm13623_vm0 = vcmask 1043456  }
  0x3a   : > { %535 = vst [vmem:[#allocation1 + $0x10] ss:$2 sm:$0xff] %v530_v49  ;;  %v9689_v56 = vpack.i.bf16 %v1667_v47, %v1666_v46  ;;  %v1475_v58 = vperm.slane %v1473_v52, 2  ;;  %vm13569_vm1 = vcmask 1040384   ;;  %vm490_vm2 = vsmask.f32 256 }
  0x3b   : > { %v9669_v57 = vpack.i.bf16 %v1345_v51, %v1344_v50  ;;  %v1480_v59 = vperm.slane %v1478_v53, 2  ;;  %vm492_vm3 = vcmask 1044484   ;;  %vm493_vm4 = vsmask.f32 4352  ;;  %vm491_vm5 = vmand %vm13569_vm1, %vm490_vm2 }
  0x3c   : > { %v1493_v1 = vunpack.c.l.bf16 %v1475_v58  ;;  %vm494_vm6 = vmand %vm492_vm3, %vm493_vm4  ;;  %v13678_v30 = vmov 0  ;;  %vm13570_vm8 = vcmask 449536   ;;  %vm13572_vm9 = vcmask 465920  }
  0x3d   : > { %9675 = vrot.lane.b32.xlu0 %v9674_v34, %s13602_s15  ;;  %v1494_v2 = vunpack.c.l.bf16 %v1480_v59  ;;  %vm10463_vm7 = vmor %vm494_vm6, %vm491_vm5  ;;  %vm13588_vm10 = vcmask 523264   ;;  %vm13571_vm11 = vcmask 457728   ;;  %vm13577_vm12 = vcmask 515072  }
  0x3e   : > { %9655 = vrot.lane.b32.xlu2 %v9654_v38, %s13616_s24  ;;  %v10435_v54 = vld.sshfl [vmem:[#allocation1] sm:$0xff pattern:$0x75316420]  ;;  %v10437_v55 = vld.sshfl [vmem:[#allocation1 + $0x8] sm:$0xff pattern:$0x75316420]  ;;  %vm10705_vm15 = vmor %vm13569_vm1, %vm492_vm3 }
  0x3f   : > { %552 = vst [vmem:[#allocation1] ss:$2 sm:$0xff] %v548_v48  ;;  %v9684_v5 = vpack.i.bf16 %v1494_v2, %v1493_v1  ;;  %v13679_v30 = vsel %vm10463_vm7, 4294967295, %v13678_v30  ;;  %v497_v35 = vsel %vm10463_vm7, 0, %v496_v28  ;;  %v500_v36 = vsel %vm10463_vm7, 0, %v499_v29 }
  0x40   : > { %498 = vst [vmem:[#allocation2 + $0x18] sm:$0x11] %v497_v35  ;;  %vm13578_vm13 = vcmask 580608   ;;  %vm13575_vm14 = vcmask 531456   ;;  %vm13574_vm3 = vcmask 1041408   ;;  %vm1111_vm4 = vcmask 1045508  }
  0x41   : > { %v10442_v63 = vld.sshfl [vmem:[#allocation1 + $0x10] sm:$0xff pattern:$0x75316420]  ;;  %v10444_v0 = vld.sshfl [vmem:[#allocation1 + $0x18] sm:$0xff pattern:$0x75316420]  ;;  %vm10769_vm5 = vmor %vm13574_vm3, %vm1111_vm4 }
  0x42   : > { %554 = vst [vmem:[#allocation1 + $0x10] ss:$2 sm:$0xff] %v549_v62  ;;  %vm13573_vm6 = vcmask 1042432   ;;  %vm13583_vm1 = vcmask 1046532  }
  0x43   : > { %501 = vst [vmem:[#allocation2 + $0x20] sm:$0x11] %v500_v36 }
  0x45   : > { %9690 = vrot.lane.b32.xlu0 %v9689_v56, %s13614_s19 }
  0x46   : > { %9670 = vrot.lane.b32.xlu2 %v9669_v57, %s13602_s15  ;;  %v10447_v3 = vld.sshfl [vmem:[#allocation1] sm:$0xff pattern:$0x75316420]  ;;  %v10449_v4 = vld.sshfl [vmem:[#allocation1 + $0x8] sm:$0xff pattern:$0x75316420] }
  0x47   : > { %575 = vst [vmem:[#allocation1] ss:$2 sm:$0xff] %v523_v22  ;;  %v563_v58 = vpack.c.bf16 %v10449_v4, %v10447_v3 }
  0x49   : > { %v10451_v6 = vld.sshfl [vmem:[#allocation1 + $0x10] sm:$0xff pattern:$0x75316420]  ;;  %v10453_v7 = vld.sshfl [vmem:[#allocation1 + $0x18] sm:$0xff pattern:$0x75316420] }
  0x4a   : > { %577 = vst [vmem:[#allocation1 + $0x10] ss:$2 sm:$0xff] %v524_v45 }
  0x4e   : > { %9685 = vrot.lane.b32.xlu2 %v9684_v5, %s13607_s18  ;;  %v578_v8 = vld.sshfl [vmem:[#allocation1] sm:$0xff pattern:$0x75316420]  ;;  %v579_v9 = vld.sshfl [vmem:[#allocation1 + $0x8] sm:$0xff pattern:$0x75316420]  ;;  %v544_v5 = vpack.c.bf16 %v10437_v55, %v10435_v54 }
  0x4f   : > { %617 = vst [vmem:[#allocation1] ss:$2 sm:$0xff] %v527_v43  ;;  %v587_v10 = vsel %vm13623_vm0, %v578_v8, 0.0  ;;  %v594_v11 = vsel %vm13623_vm0, %v579_v9, 0.0  ;;  %v10252_v8 = vmov 0   ;;  %v567_v9 = vrot.slane %v563_v58, 6 }
  0x50   : > { %v588_v13 = vrot.slane %v587_v10, 4  ;;  %v595_v14 = vrot.slane %v594_v11, 4  ;;  %486 = vst [vmem:[#allocation2] sm:$0xff] %v10252_v8  ;;  %9919 = vset.pattern.permute.xlu1 %v10252_v8  ;;  %9920 = vset.pattern.permute.xlu2 %v10252_v8 }
  0x51   : > { %v580_v12 = vld.sshfl [vmem:[#allocation1 + $0x10] sm:$0xff pattern:$0x75316420]  ;;  %v581_v15 = vld.sshfl [vmem:[#allocation1 + $0x18] sm:$0xff pattern:$0x75316420]  ;;  %10181 = vset.pattern.permute.xlu0 %v10252_v8 }
  0x52   : > { %v589_v18 = vadd.f32 %v588_v13, %v587_v10  ;;  %v596_v19 = vadd.f32 %v595_v14, %v594_v11  ;;  %619 = vst [vmem:[#allocation1 + $0x10] ss:$2 sm:$0xff] %v528_v61  ;;  %v601_v37 = vsel %vm13623_vm0, %v580_v12, 0.0  ;;  %v608_v38 = vsel %vm13623_vm0, %v581_v15, 0.0  ;;  %v502_v10 = vld [vmem:[#allocation2 + $0x28] sm:$0x11] }
  0x53   : > { %v602_v43 = vrot.slane %v601_v37, 4  ;;  %v609_v44 = vrot.slane %v608_v38, 4  ;;  %v662_v13 = vld [vmem:[#allocation2 + $0x1c] sm:$0x11]  ;;  %487 = vst [vmem:[#allocation2 + $0x8] sm:$0xff] %v10252_v8  ;;  %v503_v54 = vsel %vm10463_vm7, 0, %v502_v10 }
  0x54   : > { %v590_v24 = vrot.slane %v589_v18, 2  ;;  %v597_v25 = vrot.slane %v596_v19, 2  ;;  %488 = vst [vmem:[#allocation2 + $0x10] sm:$0xff] %v10252_v8 }
  0x55   : > { %v603_v50 = vadd.f32 %v602_v43, %v601_v37  ;;  %v610_v51 = vadd.f32 %v609_v44, %v608_v38  ;;  %546 = vst [vmem:[#allocation2 + $0x4] sm:$0x33] %v544_v5 }
  0x56   : > { %v620_v16 = vld.sshfl [vmem:[#allocation1] sm:$0xff pattern:$0x75316420]  ;;  %v621_v17 = vld.sshfl [vmem:[#allocation1 + $0x8] sm:$0xff pattern:$0x75316420]  ;;  %v591_v31 = vadd.f32 %v590_v24, %v589_v18  ;;  %v598_v32 = vadd.f32 %v597_v25, %v596_v19  ;;  %v564_v18 = vpack.c.bf16 %v10453_v7, %v10451_v6 }
  0x57   : > { %v628_v20 = vsel %vm13623_vm0, %v620_v16, 0.0  ;;  %v635_v21 = vsel %vm13623_vm0, %v621_v17, 0.0  ;;  %v604_v60 = vrot.slane %v603_v50, 2  ;;  %v611_v61 = vrot.slane %v610_v51, 2  ;;  %571 = vst [vmem:[#allocation2 + $0x4] sm:$0xcc] %v567_v9 }
  0x58   : > { %v629_v22 = vrot.slane %v628_v20, 4  ;;  %v636_v23 = vrot.slane %v635_v21, 4  ;;  %v592_v39 = vrot.slane %v591_v31, 1  ;;  %v599_v40 = vrot.slane %v598_v32, 1  ;;  %504 = vst [vmem:[#allocation2 + $0x28] sm:$0x11] %v503_v54 }
  0x59   : > { %v622_v49 = vld.sshfl [vmem:[#allocation1 + $0x10] sm:$0xff pattern:$0x75316420]  ;;  %v623_v52 = vld.sshfl [vmem:[#allocation1 + $0x18] sm:$0xff pattern:$0x75316420]  ;;  %v605_v11 = vadd.f32 %v604_v60, %v603_v50  ;;  %v612_v3 = vadd.f32 %v611_v61, %v610_v51 }
  0x5a   : > { %v630_v26 = vadd.f32 %v629_v22, %v628_v20  ;;  %v637_v27 = vadd.f32 %v636_v23, %v635_v21  ;;  %v593_v45 = vadd.f32 %v592_v39, %v591_v31  ;;  %v600_v46 = vadd.f32 %v599_v40, %v598_v32 }
  0x5b   : > { %v642_v53 = vsel %vm13623_vm0, %v622_v49, 0.0  ;;  %v649_v62 = vsel %vm13623_vm0, %v623_v52, 0.0  ;;  %v606_v15 = vrot.slane %v605_v11, 1  ;;  %v613_v19 = vrot.slane %v612_v3, 1 }
  0x5c   : > { %v631_v33 = vrot.slane %v630_v26, 2  ;;  %v638_v34 = vrot.slane %v637_v27, 2  ;;  %v643_v59 = vrot.slane %v642_v53, 4  ;;  %v650_v14 = vrot.slane %v649_v62, 4 }
  0x5d   : > { %v607_v22 = vadd.f32 %v606_v15, %v605_v11  ;;  %v545_v23 = vpack.c.bf16 %v10444_v0, %v10442_v63  ;;  %v568_v24 = vrot.slane %v564_v18, 6 }
  0x5e   : > { %v632_v41 = vadd.f32 %v631_v33, %v630_v26  ;;  %v639_v42 = vadd.f32 %v638_v34, %v637_v27  ;;  %v644_v4 = vadd.f32 %v643_v59, %v642_v53  ;;  %v651_v17 = vadd.f32 %v650_v14, %v649_v62 }
  0x5f   : > { %547 = vst [vmem:[#allocation2 + $0xc] sm:$0x33] %v545_v23  ;;  %v614_v27 = vadd.f32 %v613_v19, %v612_v3  ;;  %v665_v6 = vld [vmem:[#allocation2 + $0x24] sm:$0x11] }
  0x60   : > { %v633_v47 = vrot.slane %v632_v41, 1  ;;  %v640_v48 = vrot.slane %v639_v42, 1  ;;  %v645_v55 = vrot.slane %v644_v4, 2  ;;  %v652_v21 = vrot.slane %v651_v17, 2  ;;  %572 = vst [vmem:[#allocation2 + $0xc] sm:$0xcc] %v568_v24 }
  0x62   : > { %v634_v56 = vadd.f32 %v633_v47, %v632_v41  ;;  %v641_v57 = vadd.f32 %v640_v48, %v639_v42  ;;  %v646_v20 = vadd.f32 %v645_v55, %v644_v4  ;;  %v653_v26 = vadd.f32 %v652_v21, %v651_v17 }
  0x64   : > { %v656_v1 = vadd.f32 %v634_v56, %v593_v45  ;;  %v657_v2 = vadd.f32 %v641_v57, %v600_v46  ;;  %v647_v25 = vrot.slane %v646_v20, 1  ;;  %v654_v29 = vrot.slane %v653_v26, 1  ;;  %v799_v46 = vld [vmem:[#allocation2] sm:$0xff] }
  0x65   : > { %v10495_v57 = vunpack.c.l.bf16 %v799_v46  ;;  %v10497_v58 = vunpack.c.h.bf16 %v799_v46 }
  0x66   : > { %v660_v12 = vpack.c.bf16 %v657_v2, %v656_v1  ;;  %v648_v28 = vadd.f32 %v647_v25, %v646_v20  ;;  %v655_v31 = vadd.f32 %v654_v29, %v653_v26 }
  0x67   : > { %v670_v0 = vld [vmem:[#allocation2 + $0x10] sm:$0xf]  ;;  %v1122_v4 = vld [vmem:[#allocation2 + $0x8] sm:$0xff] }
  0x68   : > { %v663_v16 = vsel %vm10463_vm7, %v660_v12, %v662_v13  ;;  %v658_v32 = vadd.f32 %v648_v28, %v607_v22  ;;  %v659_v33 = vadd.f32 %v655_v31, %v614_v27  ;;  %v706_v40 = vunpack.c.l.bf16 %v670_v0  ;;  %v973_v5 = vld [vmem:[#allocation2 + $0x10] sm:$0xf] }
  0x69   : > { %664 = vst [vmem:[#allocation2 + $0x1c] sm:$0x11] %v663_v16  ;;  %v1009_v3 = vunpack.c.l.bf16 %v973_v5  ;;  %v10513_v55 = vunpack.c.h.bf16 %v1122_v4  ;;  %v10515_v17 = vunpack.c.l.bf16 %v1122_v4  ;;  %v1624_v21 = vld [vmem:[#allocation2 + $0x10] sm:$0xf] }
  0x6a   : > { %v661_v7 = vpack.c.bf16 %v659_v33, %v658_v32  ;;  %v1660_v24 = vunpack.c.l.bf16 %v1624_v21  ;;  %v1302_v29 = vld [vmem:[#allocation2 + $0x10] sm:$0xf] }
  0x6c   : > { %v666_v34 = vsel %vm10463_vm7, %v661_v7, %v665_v6 }
  0x6d   : > { %667 = vst [vmem:[#allocation2 + $0x24] sm:$0x11] %v666_v34 }
  0x70   : > { %v671_v43 = vld [vmem:[#allocation2 + $0x18] sm:$0x11] }
  0x71   : > { %v707_v53 = vunpack.c.l.bf16 %v671_v43  ;;  %v708_v56 = vunpack.c.h.bf16 %v671_v43  ;;  %v10541_v43 = vld [vmem:[#allocation2 + $0x18] sm:$0x11] }
  0x74   : > { %v673_v63 = vld [vmem:[#allocation2 + $0x28] sm:$0x1]  ;;  %v672_v38 = vld [vmem:[#allocation2 + $0x20] sm:$0x11] }
  0x75   : > { %v711_v39 = vunpack.c.l.bf16 %v673_v63  ;;  %v709_v47 = vunpack.c.l.bf16 %v672_v38  ;;  %v710_v48 = vunpack.c.h.bf16 %v672_v38 }
  0x8f   : > { %v9631_v35 = vpop.permute.xlu0 %9630  ;;  %v10489_v36 = vpop.permute.xlu1 %9650 }
  0x90   : > { %v10491_v37 = vpop.permute.xlu2 %9640  ;;  %v9633_v49 = vunpack.i.h.bf16 %v9631_v35  ;;  %v9632_v50 = vunpack.i.l.bf16 %v9631_v35  ;;  %v9653_v6 = vunpack.i.h.bf16 %v10489_v36  ;;  %v1338_v35 = vunpack.c.l.bf16 %v1302_v29 }
  0x91   : > { %v10537_v63 = vunpack.i.l.bf16 %v10489_v36  ;;  %v13568_v21 = vunpack.i.h.bf16 %v10491_v37 }
  0x92   : > { %v729_v9 = vsel %vm13570_vm8, %v9632_v50, %v9633_v49  ;;  %v742_v13 = vmul.f32 %v9632_v50, %v707_v53  ;;  %v737_v16 = vmul.f32 %v9632_v50, %v10495_v57  ;;  %v1010_v53 = vunpack.c.l.bf16 %v10541_v43 }
  0x93   : > { %v743_v15 = vmul.f32 %v729_v9, %v708_v56  ;;  %v738_v54 = vmul.f32 %v10497_v58, %v729_v9  ;;  %v10571_v56 = vld [vmem:[#allocation2 + $0x10] sm:$0xf]  ;;  %v975_v9 = vld [vmem:[#allocation2 + $0x20] sm:$0x11] }
  0x95   : > { %v750_v18 = vpack.c.bf16 %v743_v15, %v742_v13  ;;  %v747_v19 = vpack.c.bf16 %v738_v54, %v737_v16 }
  0x97   : > { %v9636_v41 = vpop.permute.xlu0 %9635  ;;  %v10493_v42 = vpop.permute.xlu1 %9665 }
  0x98   : > { %v9638_v44 = vunpack.i.h.bf16 %v9636_v41  ;;  %v9637_v45 = vunpack.i.l.bf16 %v9636_v41  ;;  %v9656_v8 = vpop.permute.xlu2 %9655 }
  0x99   : > { %v10509_v14 = vunpack.i.h.bf16 %v9656_v8  ;;  %v9657_v7 = vunpack.i.l.bf16 %v9656_v8 }
  0x9a   : > { %v746_v51 = vmul.f32 %v9638_v44, %v711_v39  ;;  %v741_v52 = vmul.f32 %v9638_v44, %v706_v40  ;;  %v730_v59 = vsel %vm13570_vm8, %v9633_v49, %v9637_v45  ;;  %v731_v60 = vsel %vm13570_vm8, %v9637_v45, %v9638_v44  ;;  %v10560_v49 = vld [vmem:[#allocation2 + $0x10] sm:$0xf] }
  0x9b   : > { %v744_v1 = vmul.f32 %v730_v59, %v709_v47  ;;  %v745_v2 = vmul.f32 %v731_v60, %v710_v48  ;;  %v1044_v20 = vmul.f32 %v10509_v14, %v1009_v3  ;;  %v739_v26 = vmul.f32 %v10515_v17, %v730_v59 }
  0x9c   : > { %v752_v61 = vpack.c.bf16 %v746_v51, %v746_v51  ;;  %v749_v62 = vpack.c.bf16 %v741_v52, %v741_v52  ;;  %v740_v27 = vmul.f32 %v10513_v55, %v731_v60  ;;  %v10544_v44 = vsel %vm13572_vm9, %v9653_v6, %v9657_v7 }
  0x9d   : > { %v751_v10 = vpack.c.bf16 %v745_v2, %v744_v1  ;;  %v1052_v28 = vpack.c.bf16 %v1044_v20, %v1044_v20  ;;  %v10548_v45 = vsel %vm13572_vm9, %v9657_v7, %v10509_v14  ;;  %v10568_v52 = vsel %vm13572_vm9, %v10537_v63, %v9653_v6  ;;  %v976_v2 = vld [vmem:[#allocation2 + $0x28] sm:$0x1]  ;;  %v10618_v7 = vld [vmem:[#allocation2 + $0x10] sm:$0xf] }
  0x9e   : > { %769 = vrot.lane.b32.xlu1 %v752_v61, %s13650_s25  ;;  %763 = vrot.lane.b32.xlu2 %v749_v62, %s13650_s25  ;;  %v748_v31 = vpack.c.bf16 %v740_v27, %v739_v26  ;;  %v1042_v60 = vmul.f32 %v10544_v44, %v10515_v17  ;;  %v1043_v61 = vmul.f32 %v10513_v55, %v10548_v45  ;;  %v1014_v20 = vunpack.c.l.bf16 %v976_v2 }
  0x9f   : > { %v10504_v11 = vpop.permute.xlu0 %9645  ;;  %v10506_v12 = vpop.permute.xlu1 %9680  ;;  %767 = vrot.lane.b32.xlu0 %v751_v10, %s13650_s25  ;;  %v10529_v32 = vrot.slane %v1052_v28, 7  ;;  %v1040_v10 = vmul.f32 %v10537_v63, %v10495_v57  ;;  %v1041_v13 = vmul.f32 %v10568_v52, %v10497_v58  ;;  %v10607_v28 = vld [vmem:[#allocation2 + $0x18] sm:$0x11]  ;;  %vm1112_vm8 = vsmask.f32 5376 }
  0xa0   : > { %v9671_v34 = vpop.permute.xlu2 %9670  ;;  %v9647_v5 = vunpack.i.l.bf16 %v10504_v11  ;;  %vm10814_vm9 = vmand %vm1111_vm4, %vm1112_vm8 }
  0xa1   : > { %v9673_v38 = vunpack.i.h.bf16 %v9671_v34  ;;  %v10577_v62 = vunpack.i.l.bf16 %v9671_v34  ;;  %v1050_v29 = vpack.c.bf16 %v1041_v13, %v1040_v10 }
  0xa3   : > { %v10604_v26 = vsel %vm13588_vm10, %v10577_v62, %v9673_v38  ;;  %v10641_v10 = vrot.slane %v1050_v29, 7  ;;  %v10668_v29 = vunpack.i.l.bf16 %v10506_v12 }
  0xa6   : > { %765 = vrot.lane.b32.xlu2 %v750_v18, %s13650_s25  ;;  %759 = vrot.lane.b32.xlu1 %v747_v19, %s13650_s25  ;;  %v1051_v19 = vpack.c.bf16 %v1043_v61, %v1042_v60  ;;  %v1011_v60 = vunpack.c.h.bf16 %v10541_v43 }
  0xa7   : > { %v10520_v22 = vpop.permute.xlu0 %9660  ;;  %v10522_v23 = vpop.permute.xlu1 %9695 }
  0xa8   : > { %v10525_v25 = vunpack.i.h.bf16 %v10522_v23  ;;  %v9697_v4 = vunpack.i.l.bf16 %v10522_v23  ;;  %v1012_v23 = vunpack.c.l.bf16 %v975_v9  ;;  %v13566_v27 = vunpack.i.h.bf16 %v10520_v22 }
  0xa9   : > { %v10616_v6 = vunpack.i.l.bf16 %v10520_v22 }
  0xaa   : > { %v1695_v33 = vmul.f32 %v10525_v25, %v1660_v24  ;;  %v10598_v24 = vunpack.i.l.bf16 %v10491_v37 }
  0xac   : > { %v1703_v41 = vpack.c.bf16 %v1695_v33, %v1695_v33  ;;  %v10654_v43 = vsel %vm13571_vm11, %v10598_v24, %v13568_v21  ;;  %v10719_v21 = vunpack.i.h.bf16 %v10504_v11 }
  0xae   : > { %761 = vrot.lane.b32.xlu1 %v748_v31, %s13650_s25  ;;  %1079 = vrot.lane.b32.xlu2 %v10529_v32, %s13614_s19  ;;  %v10550_v46 = vrot.slane %v1703_v41, 5  ;;  %v1370_v41 = vmul.f32 %v10604_v26, %v10497_v58 }
  0xaf   : > { %v9676_v0 = vpop.permute.xlu0 %9675 }
  0xb0   : > { %v10539_v39 = vunpack.i.h.bf16 %v9676_v0  ;;  %v9677_v40 = vunpack.i.l.bf16 %v9676_v0  ;;  %v10627_v0 = vsel %vm13578_vm13, %v9697_v4, %v10525_v25 }
  0xb2   : > { %v1373_v36 = vmul.f32 %v10539_v39, %v1338_v35  ;;  %v10554_v47 = vsel %vm13588_vm10, %v9673_v38, %v9677_v40  ;;  %v10558_v48 = vsel %vm13588_vm10, %v9677_v40, %v10539_v39  ;;  %v10629_v38 = vrot.slane %v1051_v19, 7 }
  0xb3   : > { %v1371_v50 = vmul.f32 %v10554_v47, %v10515_v17  ;;  %v1372_v51 = vmul.f32 %v10558_v48, %v10513_v55  ;;  %v1369_v40 = vmul.f32 %v10577_v62, %v10495_v57 }
  0xb4   : > { %v1381_v59 = vpack.c.bf16 %v1373_v36, %v1373_v36  ;;  %v1049_v36 = vmul.f32 %v10509_v14, %v1014_v20  ;;  %v1694_v14 = vmul.f32 %v10627_v0, %v10513_v55  ;;  %v13567_v20 = vunpack.i.h.bf16 %v10506_v12 }
  0xb5   : > { %v1380_v1 = vpack.c.bf16 %v1372_v51, %v1371_v50  ;;  %v1339_v50 = vunpack.c.l.bf16 %v10607_v28  ;;  %v1304_v51 = vld [vmem:[#allocation2 + $0x20] sm:$0x11]  ;;  %v1069_v11 = vrot.slane %v10629_v38, 4 }
  0xb6   : > { %1730 = vrot.lane.b32.xlu1 %v10550_v46, %s13616_s24  ;;  %v10582_v8 = vrot.slane %v1381_v59, 6  ;;  %v1013_v59 = vunpack.c.h.bf16 %v975_v9  ;;  %v10660_v9 = vsel %vm13577_vm12, %v10616_v6, %v13566_v27  ;;  %v1072_v27 = vrot.slane %v10529_v32, 4 }
  0xb7   : > { %v9691_v15 = vpop.permute.xlu0 %9690  ;;  %v10590_v16 = vrot.slane %v1380_v1, 6  ;;  %v1305_v1 = vld [vmem:[#allocation2 + $0x28] sm:$0x1]  ;;  %v10701_v3 = vsel %vm13575_vm14, %v10668_v29, %v13567_v20 }
  0xb8   : > { %v9693_v54 = vunpack.i.h.bf16 %v9691_v15  ;;  %v10592_v18 = vunpack.i.l.bf16 %v9691_v15  ;;  %1408 = vrot.lane.b32.xlu0 %v10582_v8, %s13602_s15  ;;  %v1343_v19 = vunpack.c.l.bf16 %v1305_v1  ;;  %v10680_v1 = vmul.f32 %v10598_v24, %v10495_v57 }
  0xb9   : > { %1406 = vrot.lane.b32.xlu2 %v10590_v16, %s13602_s15 }
  0xba   : > { %v10611_v31 = vsel %vm13578_vm13, %v10592_v18, %v9693_v54  ;;  %v1691_v33 = vmul.f32 %v10592_v18, %v10495_v57  ;;  %v10623_v35 = vsel %vm13578_vm13, %v9693_v54, %v9697_v4  ;;  %v10648_v4 = vmul.f32 %v10537_v63, %v1010_v53 }
  0xbb   : > { %v1692_v34 = vmul.f32 %v10611_v31, %v10497_v58  ;;  %v1693_v13 = vmul.f32 %v10623_v35, %v10515_v17  ;;  %v1341_v54 = vunpack.c.l.bf16 %v1304_v51  ;;  %v1379_v63 = vpack.c.bf16 %v1370_v41, %v1369_v40 }
  0xbc   : > { %v1055_v53 = vpack.c.bf16 %v1049_v36, %v1049_v36  ;;  %v1195_v40 = vmul.f32 %v10660_v9, %v10497_v58  ;;  %v1342_v41 = vunpack.c.h.bf16 %v1304_v51  ;;  %v1625_v51 = vld [vmem:[#allocation2 + $0x18] sm:$0x11]  ;;  %v1378_v32 = vmul.f32 %v10539_v39, %v1343_v19 }
  0xbd   : > { %v1701_v61 = vpack.c.bf16 %v1692_v34, %v1691_v33  ;;  %v1047_v33 = vmul.f32 %v10544_v44, %v1012_v23  ;;  %v1048_v34 = vmul.f32 %v10548_v45, %v1013_v59  ;;  %v1702_v36 = vpack.c.bf16 %v1694_v14, %v1693_v13 }
  0xbe   : > { %1077 = vrot.lane.b32.xlu1 %v10629_v38, %s13614_s19  ;;  %v10684_v44 = vmul.f32 %v10654_v43, %v10497_v58  ;;  %v10687_v45 = vmul.f32 %v10568_v52, %v1011_v60  ;;  %v1340_v23 = vunpack.c.h.bf16 %v10607_v28  ;;  %v10691_v59 = vunpack.i.h.bf16 %v10493_v42 }
  0xbf   : > { %v10662_v15 = vrot.slane %v1701_v61, 5  ;;  %v1194_v61 = vmul.f32 %v10616_v6, %v10495_v57  ;;  %v10694_v13 = vrot.slane %v1379_v63, 6  ;;  %v1073_v14 = vrot.slane %v1055_v53, 7 }
  0xc0   : > { %1075 = vrot.lane.b32.xlu0 %v10641_v10, %s13614_s19  ;;  %v13680_v52 = vmov 0  ;;  %v1054_v28 = vpack.c.bf16 %v1048_v34, %v1047_v33  ;;  %v1376_v60 = vmul.f32 %v10554_v47, %v1341_v54  ;;  %v1377_v63 = vmul.f32 %v10558_v48, %v1342_v41  ;;  %v1626_v34 = vld [vmem:[#allocation2 + $0x20] sm:$0x11] }
  0xc1   : > { %1726 = vrot.lane.b32.xlu2 %v10662_v15, %s13616_s24  ;;  %v13681_v52 = vsel %vm10705_vm15, 4294967295, %v13680_v52  ;;  %v10714_v53 = vrot.slane %v1702_v36, 5  ;;  %v10716_v20 = vpack.c.bf16 %v1195_v40, %v1194_v61  ;;  %v1661_v2 = vunpack.c.l.bf16 %v1625_v51 }
  0xc2   : > { %v1053_v39 = vpack.c.bf16 %v10687_v45, %v10648_v4  ;;  %v1516_v47 = vmul.f32 %v10668_v29, %v10495_v57  ;;  %v1517_v48 = vmul.f32 %v10701_v3, %v10497_v58  ;;  %v1374_v54 = vmul.f32 %v10577_v62, %v1339_v50 }
  0xc3   : > { %v1074_v19 = vsel %vm10705_vm15, %v1072_v27, %v1073_v14  ;;  %v1375_v33 = vmul.f32 %v10604_v26, %v1340_v23  ;;  %v1070_v4 = vrot.slane %v1054_v28, 7  ;;  %v1384_v57 = vpack.c.bf16 %v1378_v32, %v1378_v32  ;;  %v10745_v27 = vpop.permute.xlu2 %9685 }
  0xc4   : > { %v13682_v58 = vunpack.i.l.bf16 %v10493_v42  ;;  %v13683_v50 = vunpack.c.l.bf16 %v10560_v49  ;;  %v1662_v38 = vunpack.c.h.bf16 %v1625_v51  ;;  %v1383_v40 = vpack.c.bf16 %v1377_v63, %v1376_v60 }
  0xc5   : > { %v13684_v26 = vunpack.i.h.bf16 %v10491_v37  ;;  %v1401_v36 = vrot.slane %v10582_v8, 4  ;;  %v13685_v45 = vunpack.c.l.bf16 %v10571_v56  ;;  %v1398_v49 = vrot.slane %v10590_v16, 4 }
  0xc6   : > { %1404 = vrot.lane.b32.xlu1 %v10694_v13, %s13602_s15  ;;  %v10740_v62 = vsel %vm13577_vm12, %v13682_v58, %v10691_v59  ;;  %v1198_v61 = vmul.f32 %v10691_v59, %v13683_v50  ;;  %v1664_v14 = vunpack.c.h.bf16 %v1626_v34  ;;  %v10757_v28 = vpack.c.bf16 %v1517_v48, %v1516_v47 }
  0xc7   : > { %v10750_v41 = vsel %vm13571_vm11, %v13684_v26, %v9647_v5  ;;  %v876_v23 = vmul.f32 %v10719_v21, %v13685_v45  ;;  %v10760_v51 = vunpack.i.h.bf16 %v10745_v27  ;;  %v1071_v37 = vsel %vm10705_vm15, %v1069_v11, %v1070_v4 }
  0xc8   : > { %1728 = vrot.lane.b32.xlu0 %v10714_v53, %s13616_s24  ;;  %v1402_v32 = vrot.slane %v1384_v57, 6  ;;  %v1382_v60 = vpack.c.bf16 %v1375_v33, %v1374_v54  ;;  %v1696_v8 = vmul.f32 %v10592_v18, %v1661_v2  ;;  %v1697_v63 = vmul.f32 %v10611_v31, %v1662_v38 }
  0xc9   : > { %1085 = vrot.lane.b32.xlu2 %v1074_v19, %s13614_s19  ;;  %v1663_v56 = vunpack.c.l.bf16 %v1626_v34  ;;  %v13686_v16 = vmov 0  ;;  %v1399_v47 = vrot.slane %v1383_v40, 6  ;;  %v10775_v48 = vsel %vm13571_vm11, %v9647_v5, %v10719_v21  ;;  %vm10807_vm11 = vmor %vm13573_vm6, %vm13583_vm1 }
  0xca   : > { %v13687_v16 = vsel %vm10769_vm5, 4294967295, %v13686_v16  ;;  %v13688_v54 = vunpack.c.l.bf16 %v10618_v7  ;;  %v1403_v31 = vsel %vm10769_vm5, %v1401_v36, %v1402_v32  ;;  %v1206_v2 = vpack.c.bf16 %v1198_v61, %v1198_v61  ;;  %v1627_v61 = vld [vmem:[#allocation2 + $0x28] sm:$0x1] }
  0xcb   : > { %v9687_v19 = vunpack.i.l.bf16 %v10745_v27  ;;  %v1066_v11 = vrot.slane %v10641_v10, 4  ;;  %v1395_v33 = vrot.slane %v10694_v13, 4  ;;  %v1400_v5 = vsel %vm10769_vm5, %v1398_v49, %v1399_v47  ;;  %v804_v10 = vld [vmem:[#allocation2 + $0x28] sm:$0x1] }
  0xcc   : > { %v1520_v18 = vmul.f32 %v10760_v51, %v13688_v54  ;;  %v1699_v34 = vmul.f32 %v10627_v0, %v1664_v14  ;;  %v1396_v7 = vrot.slane %v1382_v60, 6  ;;  %v1067_v4 = vrot.slane %v1053_v39, 7 }
  0xcd   : > { %v1698_v57 = vmul.f32 %v10623_v35, %v1663_v56  ;;  %v1704_v58 = vpack.c.bf16 %v1697_v63, %v1696_v8  ;;  %v884_v50 = vpack.c.bf16 %v876_v23, %v876_v23  ;;  %v874_v13 = vmul.f32 %v10750_v41, %v10515_v17 }
  0xce   : > { %1083 = vrot.lane.b32.xlu1 %v1071_v37, %s13614_s19  ;;  %v875_v27 = vmul.f32 %v10513_v55, %v10775_v48  ;;  %v1229_v38 = vshrl.u32 %v1206_v2, 16  ;;  %v1528_v0 = vpack.c.bf16 %v1520_v18, %v1520_v18  ;;  %v13689_v40 = vunpack.i.h.bf16 %v10506_v12 }
  0xcf   : > { %v1717_v35 = vrot.slane %v10662_v15, 4  ;;  %v1232_v26 = vshll.u32 %v1206_v2, 16  ;;  %v1397_v36 = vsel %vm10769_vm5, %v1395_v33, %v1396_v7  ;;  %v1068_v45 = vsel %vm10705_vm15, %v1066_v11, %v1067_v4 }
  0xd0   : > { %1414 = vrot.lane.b32.xlu0 %v1403_v31, %s13602_s15  ;;  %v10798_v39 = vsel %vm13575_vm14, %v13689_v40, %v9687_v19  ;;  %v13690_v23 = vmov 0  ;;  %v846_v12 = vunpack.c.l.bf16 %v804_v10  ;;  %v1665_v49 = vunpack.c.l.bf16 %v1627_v61 }
  0xd1   : > { %1412 = vrot.lane.b32.xlu2 %v1400_v5, %s13602_s15  ;;  %v13691_v23 = vsel %vm10807_vm11, 4294967295, %v13690_v23  ;;  %v1720_v14 = vrot.slane %v10714_v53, 4  ;;  %v1718_v15 = vrot.slane %v1704_v58, 5  ;;  %v905_v37 = vshrl.u32 %v884_v50, 16 }
  0xd2   : > { %v1705_v32 = vpack.c.bf16 %v1699_v34, %v1698_v57  ;;  %v1231_v8 = vrot.slane %v1229_v38, 6  ;;  %v1551_v63 = vshrl.u32 %v1528_v0, 16  ;;  %v1554_v56 = vshll.u32 %v1528_v0, 16 }
  0xd3   : > { %v1700_v47 = vmul.f32 %v10525_v25, %v1665_v49  ;;  %v1719_v53 = vsel %vm10807_vm11, %v1717_v35, %v1718_v15  ;;  %v1234_v54 = vrot.slane %v1232_v26, 7  ;;  %vm1109_vm6 = vsmask.f32 1280  ;;  %v802_v26 = vld [vmem:[#allocation2 + $0x18] sm:$0x11] }
  0xd4   : > { %v1721_v18 = vrot.slane %v1705_v32, 5  ;;  %v13694_v31 = vunpack.i.l.bf16 %v10493_v42  ;;  %v13695_v2 = vunpack.i.h.bf16 %v10520_v22  ;;  %v10831_v33 = vsel %vm13575_vm14, %v9687_v19, %v10760_v51  ;;  %vm1110_vm8 = vmand %vm13574_vm3, %vm1109_vm6 }
  0xd5   : > { %v1723_v25 = vrot.slane %v10550_v46, 4  ;;  %v1706_v5 = vpack.c.bf16 %v1700_v47, %v1700_v47  ;;  %v1518_v42 = vmul.f32 %v10798_v39, %v10515_v17  ;;  %v907_v34 = vrot.slane %v905_v37, 7  ;;  %vm10843_vm4 = vmor %vm10814_vm9, %vm1110_vm8 }
  0xd6   : > { %1410 = vrot.lane.b32.xlu1 %v1397_v36, %s13602_s15  ;;  %v10827_v11 = vsel %vm13577_vm12, %v13695_v2, %v13694_v31  ;;  %v882_v22 = vpack.c.bf16 %v10684_v44, %v10680_v1  ;;  %v13696_v19 = vmov 0  ;;  %v10849_v46 = vsel %vm10807_vm11, %v1720_v14, %v1721_v18  ;;  %s13633_s15 = smov 7  }
  0xd7   : > { %v13697_v19 = vsel %vm10843_vm4, 4294967295, %v13696_v19  ;;  %v1553_v7 = vrot.slane %v1551_v63, 5  ;;  %v1556_v4 = vrot.slane %v1554_v56, 6  ;;  %v883_v57 = vpack.c.bf16 %v875_v27, %v874_v13 }
  0xd8   : > { %1081 = vrot.lane.b32.xlu0 %v1068_v45, %s13614_s19  ;;  %v1724_v58 = vrot.slane %v1706_v5, 5  ;;  %v1519_v10 = vmul.f32 %v10831_v33, %v10513_v55  ;;  %v10853_v61 = vor.u32 %v1234_v54, %v1231_v8  ;;  %v908_v1 = vshll.u32 %v884_v50, 16  ;;  %v1126_v54 = vld [vmem:[#allocation2 + $0x28] sm:$0x1]  ;;  %v803_v5 = vld [vmem:[#allocation2 + $0x20] sm:$0x11] }
  0xd9   : > { %1732 = vrot.lane.b32.xlu2 %v1719_v53, %s13616_s24  ;;  %v881_v44 = vmul.f32 %v10719_v21, %v846_v12  ;;  %v1197_v38 = vmul.f32 %v10740_v62, %v10513_v55  ;;  %v1196_v0 = vmul.f32 %v10827_v11, %v10515_v17  ;;  %v891_v27 = vshrl.u32 %v882_v22, 16  ;;  %s13822_s19 = smov 63  }
  0xda   : > { %v10862_v40 = vsel %vm10807_vm11, %v1723_v25, %v1724_v58  ;;  %v910_v13 = vor.u32 %v908_v1, %v907_v34  ;;  %v10866_v35 = vor.u32 %v1556_v4, %v1553_v7  ;;  %v898_v50 = vshrl.u32 %v883_v57, 16  ;;  %v1448_v7 = vld [vmem:[#allocation2 + $0x28] sm:$0x1]  ;;  %v1125_v4 = vld [vmem:[#allocation2 + $0x20] sm:$0x11] }
  0xdb   : > { %v894_v55 = vshll.u32 %v882_v22, 16  ;;  %v887_v21 = vpack.c.bf16 %v881_v44, %v881_v44  ;;  %v1527_v36 = vpack.c.bf16 %v1519_v10, %v1518_v42  ;;  %v1205_v17 = vpack.c.bf16 %v1197_v38, %v1196_v0 }
  0xdc   : > { %v10871_v45 = vrot.slane %v891_v27, 7  ;;  %v842_v12 = vunpack.c.l.bf16 %v802_v26  ;;  %vm888_vm9 = vsmask.f32 4368  ;;  %v921_v49 = vrot.slane %v907_v34, 4 }
  0xdd   : > { %v10873_v14 = vrot.slane %v898_v50, 7  ;;  %v923_v37 = vshll.u32 %v887_v21, 16  ;;  %v1543_v32 = vshrl.u32 %v1527_v36, 16  ;;  %v1546_v60 = vshll.u32 %v1527_v36, 16  ;;  %vm10878_vm8 = vmor %vm490_vm2, %vm888_vm9 }
  0xde   : > { %1258 = vrot.lane.b32.xlu1 %v10853_v61, %s13607_s18  ;;  %v896_v15 = vor.u32 %v894_v55, %v10871_v45  ;;  %v901_v8 = vshll.u32 %v883_v57, 16  ;;  %v1221_v63 = vshrl.u32 %v1205_v17, 16  ;;  %v1224_v56 = vshll.u32 %v1205_v17, 16 }
  0xdf   : > { %v843_v47 = vunpack.c.h.bf16 %v802_v26  ;;  %v925_v18 = vsel %vm10878_vm8, %v921_v49, %v923_v37  ;;  %v1213_v2 = vshrl.u32 %v10716_v20, 16  ;;  %v1216_v25 = vshll.u32 %v10716_v20, 16  ;;  %v1447_v26 = vld [vmem:[#allocation2 + $0x20] sm:$0x11] }
  0xe0   : > { %930 = vrot.lane.b32.xlu0 %v910_v13, %s13645_s13  ;;  %v903_v31 = vor.u32 %v901_v8, %v10873_v14  ;;  %v877_v42 = vmul.f32 %v10598_v24, %v842_v12  ;;  %v1545_v34 = vrot.slane %v1543_v32, 5  ;;  %v1548_v22 = vrot.slane %v1546_v60, 6  ;;  %v1446_v60 = vld [vmem:[#allocation2 + $0x18] sm:$0x11] }
  0xe1   : > { %1580 = vrot.lane.b32.xlu2 %v10866_v35, %s13612_s27  ;;  %v1223_v57 = vrot.slane %v1221_v63, 6  ;;  %v1226_v58 = vrot.slane %v1224_v56, 7  ;;  %v878_v10 = vmul.f32 %v10654_v43, %v843_v47  ;;  %v1168_v1 = vunpack.c.l.bf16 %v1126_v54  ;;  %v1124_v63 = vld [vmem:[#allocation2 + $0x18] sm:$0x11] }
  0xe2   : > { %v844_v44 = vunpack.c.l.bf16 %v803_v5  ;;  %v845_v38 = vunpack.c.h.bf16 %v803_v5  ;;  %v1215_v0 = vrot.slane %v1213_v2, 6  ;;  %v1218_v20 = vrot.slane %v1216_v25, 7 }
  0xe3   : > { %v1490_v13 = vunpack.c.l.bf16 %v1448_v7  ;;  %v1167_v27 = vunpack.c.h.bf16 %v1125_v4  ;;  %v10891_v24 = vor.u32 %v1548_v22, %v1545_v34  ;;  %v1166_v50 = vunpack.c.l.bf16 %v1125_v4 }
  0xe4   : > { %v10893_v55 = vor.u32 %v1226_v58, %v1223_v57  ;;  %v885_v21 = vpack.c.bf16 %v878_v10, %v877_v42  ;;  %v1203_v36 = vmul.f32 %v10691_v59, %v1168_v1  ;;  %v1535_v43 = vshrl.u32 %v10757_v28, 16 }
  0xe5   : > { %v1538_v17 = vshll.u32 %v10757_v28, 16  ;;  %v879_v12 = vmul.f32 %v10750_v41, %v844_v44  ;;  %v880_v49 = vmul.f32 %v10775_v48, %v845_v38  ;;  %v1525_v37 = vmul.f32 %v10760_v51, %v1490_v13 }
  0xe6   : > { %926 = vrot.lane.b32.xlu1 %v896_v15, %s13645_s13  ;;  %v10902_v15 = vor.u32 %v1218_v20, %v1215_v0  ;;  %v1202_v32 = vmul.f32 %v10740_v62, %v1167_v27  ;;  %v1488_v8 = vunpack.c.l.bf16 %v1447_v26  ;;  %v1489_v59 = vunpack.c.h.bf16 %v1447_v26 }
  0xe7   : > { %v1201_v56 = vmul.f32 %v10827_v11, %v1166_v50  ;;  %v911_v41 = vrot.slane %v10871_v45, 4  ;;  %v913_v28 = vshll.u32 %v885_v21, 16  ;;  %v1209_v48 = vpack.c.bf16 %v1203_v36, %v1203_v36 }
  0xe8   : > { %936 = vrot.lane.b32.xlu0 %v925_v18, %s13645_s13  ;;  %v1537_v47 = vrot.slane %v1535_v43, 5  ;;  %v1540_v51 = vrot.slane %v1538_v17, 6  ;;  %v886_v54 = vpack.c.bf16 %v880_v49, %v879_v12  ;;  %v1486_v62 = vunpack.c.l.bf16 %v1446_v60 }
  0xe9   : > { %928 = vrot.lane.b32.xlu2 %v903_v31, %s13645_s13  ;;  %v1487_v18 = vunpack.c.h.bf16 %v1446_v60  ;;  %v1531_v31 = vpack.c.bf16 %v1525_v37, %v1525_v37  ;;  %v1164_v2 = vunpack.c.l.bf16 %v1124_v63  ;;  %v1165_v25 = vunpack.c.h.bf16 %v1124_v63 }
  0xea   : > { %v1523_v5 = vmul.f32 %v10798_v39, %v1488_v8  ;;  %v916_v42 = vrot.slane %v10873_v14, 4  ;;  %v1524_v11 = vmul.f32 %v10831_v33, %v1489_v59  ;;  %v915_v34 = vsel %vm10878_vm8, %v911_v41, %v913_v28 }
  0xeb   : > { %v1250_v45 = vshll.u32 %v1209_v48, 16  ;;  %v1208_v22 = vpack.c.bf16 %v1202_v32, %v1201_v56  ;;  %v10918_v7 = vor.u32 %v1540_v51, %v1537_v47  ;;  %v918_v4 = vshll.u32 %v886_v54, 16 }
  0xec   : > { %v1521_v57 = vmul.f32 %v10668_v29, %v1486_v62  ;;  %v1522_v58 = vmul.f32 %v10701_v3, %v1487_v18  ;;  %v1572_v10 = vshll.u32 %v1531_v31, 16  ;;  %v1199_v39 = vmul.f32 %v10616_v6, %v1164_v2  ;;  %v1776_v6 = vld [vmem:[%s13557_s4] sm:$0x88] }
  0xed   : > { %v1248_v14 = vrot.slane %v10853_v61, 4  ;;  %v920_v1 = vsel %vm10878_vm8, %v916_v42, %v918_v4  ;;  %vm1210_vm2 = vsmask.f32 5392  ;;  %v1200_v44 = vmul.f32 %v10660_v9, %v1165_v25  ;;  %v1777_v61 = vld [vmem:[%s13557_s4 + $0x8] sm:$0x88] }
  0xee   : > { %1578 = vrot.lane.b32.xlu1 %v10891_v24, %s13612_s27  ;;  %v1252_v29 = vrot.slane %v1250_v45, 7  ;;  %v1244_v3 = vshll.u32 %v1208_v22, 16  ;;  %v1530_v38 = vpack.c.bf16 %v1524_v11, %v1523_v5  ;;  %v1570_v0 = vrot.slane %v10866_v35, 4  ;;  %vm10942_vm14 = vmor %vm1109_vm6, %vm1210_vm2 }
  0xef   : > { %v1242_v20 = vrot.slane %v10893_v55, 4  ;;  %v1780_v13 = vunpack.c.l.b16 %v1776_v6  ;;  %v1781_v27 = vunpack.c.h.b16 %v1776_v6  ;;  %vm13585_vm9 = vsmask.f32 2304 }
  0xf0   : > { %1256 = vrot.lane.b32.xlu0 %v10893_v55, %s13607_s18  ;;  %vm1532_vm3 = vsmask.f32 6416  ;;  %v1574_v9 = vrot.slane %v1572_v10, 6  ;;  %v1529_v50 = vpack.c.bf16 %v1522_v58, %v1521_v57  ;;  %v13700_v26 = vmov 0 }
  0xf1   : > { %1254 = vrot.lane.b32.xlu2 %v10902_v15, %s13607_s18  ;;  %v13701_v26 = vsel %vm10942_vm14, 4294967295, %v13700_v26  ;;  %v1784_v21 = vpack.c.b16 %v1780_v13, %v1780_v13  ;;  %v1785_v36 = vpack.c.b16 %v1781_v27, %v1781_v27  ;;  %v1782_v43 = vunpack.c.l.b16 %v1777_v61  ;;  %vm10953_vm6 = vmor %vm13585_vm9, %vm1532_vm3  ;;  %v796_v13 = vld [vmem:[#allocation3 + $0x18] sm:$0x11] }
  0xf2   : > { %v1783_v17 = vunpack.c.h.b16 %v1777_v61  ;;  %v1253_v35 = vsel %vm10942_vm14, %v1248_v14, %v1252_v29  ;;  %v1246_v55 = vrot.slane %v1244_v3, 7  ;;  %v1566_v12 = vshll.u32 %v1530_v38, 16 }
  0xf3   : > { %v1207_v49 = vpack.c.bf16 %v1200_v44, %v1199_v39  ;;  %v1789_v37 = vshrl.u32 %v1784_v21, 16  ;;  %v1794_v32 = vshrl.u32 %v1785_v36, 16  ;;  %v13702_v8 = vmov 0 }
  0xf4   : > { %v1247_v60 = vsel %vm10942_vm14, %v1242_v20, %v1246_v55  ;;  %v13703_v8 = vsel %vm10953_vm6, 4294967295, %v13702_v8  ;;  %v1560_v59 = vshll.u32 %v1529_v50, 16  ;;  %v1575_v63 = vsel %vm10953_vm6, %v1570_v0, %v1574_v9  ;;  %v793_v20 = vld [vmem:[#allocation3 + $0x10] sm:$0x11] }
  0xf5   : > { %v1786_v56 = vpack.c.b16 %v1782_v43, %v1782_v43  ;;  %v1787_v41 = vpack.c.b16 %v1783_v17, %v1783_v17  ;;  %v1564_v28 = vrot.slane %v10891_v24, 4  ;;  %v1568_v47 = vrot.slane %v1566_v12, 6 }
  0xf6   : > { %932 = vrot.lane.b32.xlu1 %v915_v34, %s13645_s13  ;;  %v1790_v51 = vpack.i.b16 %v1789_v37, %v1789_v37  ;;  %v1795_v54 = vpack.i.b16 %v1794_v32, %v1794_v32  ;;  %v1238_v62 = vshll.u32 %v1207_v49, 16  ;;  %v1558_v18 = vrot.slane %v10918_v7, 4 }
  0xf7   : > { %v1562_v31 = vrot.slane %v1560_v59, 6  ;;  %v1236_v2 = vrot.slane %v10902_v15, 4  ;;  %v1799_v25 = vshrl.u32 %v1786_v56, 16  ;;  %v1804_v5 = vshrl.u32 %v1787_v41, 16 }
  0xf8   : > { %v10924_v33 = vpop.permute.xlu2 %763  ;;  %1576 = vrot.lane.b32.xlu0 %v10918_v7, %s13612_s27  ;;  %v1569_v42 = vsel %vm10953_vm6, %v1564_v28, %v1568_v47  ;;  %v1792_v11 = vperm.slane %v1790_v51, 3  ;;  %v1797_v34 = vperm.slane %v1795_v54, 3  ;;  %v1240_v24 = vrot.slane %v1238_v62, 7 }
  0xf9   : > { %934 = vrot.lane.b32.xlu2 %v920_v1, %s13645_s13  ;;  %v1563_v45 = vsel %vm10953_vm6, %v1558_v18, %v1562_v31  ;;  %v1800_v7 = vpack.i.b16 %v1799_v25, %v1799_v25  ;;  %v1805_v15 = vpack.i.b16 %v1804_v5, %v1804_v5  ;;  %vm13576_vm3 = vcmask 596992  }
  0xfa   : > { %v1241_v22 = vsel %vm10942_vm14, %v1236_v2, %v1240_v24  ;;  %v1818_v57 = vunpack.c.l.bf16 %v1792_v11  ;;  %v1819_v58 = vunpack.c.l.bf16 %v1797_v34  ;;  %v773_v55 = vrot.slane %v10924_v33, 4 }
  0xfb   : > { %v1802_v10 = vperm.slane %v1800_v7, 3  ;;  %v1807_v39 = vperm.slane %v1805_v15, 3  ;;  %vm13584_vm2 = vsmask.f32 6400  ;;  %vm13706_vm6 = vcmask 1042432  }
  0xfc   : > { %v9699_v14 = vpack.i.bf16 %v1819_v58, %v1818_v57  ;;  %vm507_vm11 = vmand %vm13706_vm6, %vm13585_vm9  ;;  %vm13589_vm6 = vcmask 1047556   ;;  %vm13604_vm9 = vcmask 588800   ;;  %vm1289_vm5 = vsmask.f32 7958 }
  0xfd   : > { %v1820_v44 = vunpack.c.l.bf16 %v1802_v10  ;;  %v1821_v29 = vunpack.c.l.bf16 %v1807_v39 }
  0xfe   : > { %1264 = vrot.lane.b32.xlu1 %v1253_v35, %s13607_s18 }
  0xff   : > { %v9704_v27 = vpack.i.bf16 %v1821_v29, %v1820_v44 }
 0x100   : > { %1262 = vrot.lane.b32.xlu0 %v1247_v60, %s13607_s18  ;;  %v766_v48 = vpop.permute.xlu2 %765 }
 0x101   : > { %1586 = vrot.lane.b32.xlu2 %v1575_v63, %s13612_s27  ;;  %v774_v6 = vrot.slane %v766_v48, 4 }
 0x106   : > { %1584 = vrot.lane.b32.xlu1 %v1569_v42, %s13612_s27 }
 0x108   : > { %1582 = vrot.lane.b32.xlu0 %v1563_v45, %s13612_s27  ;;  %v1080_v4 = vpop.permute.xlu2 %1079  ;;  %s13980_s27 = smov 119  }
 0x109   : > { %1260 = vrot.lane.b32.xlu2 %v1241_v22, %s13607_s18  ;;  %v1089_v62 = vrot.slane %v1080_v4, 4  ;;  %s13629_s18 = smov 1  }
 0x10e   : > { %1736 = vrot.lane.b32.xlu1 %v10862_v40, %s13616_s24 }
 0x110   : > { %v770_v1 = vpop.permute.xlu1 %769  ;;  %1734 = vrot.lane.b32.xlu0 %v10849_v46, %s13616_s24  ;;  %s13806_s24 = smov 57  }
 0x111   : > { %v776_v3 = vrot.slane %v770_v1, 4  ;;  %9700 = vrot.lane.b32.xlu2 %v9699_v14, %s13645_s13  ;;  %v768_v38 = vpop.permute.xlu0 %767 }
 0x112   : > { %v775_v61 = vrot.slane %v768_v38, 4 }
 0x113   : > { %v1407_v0 = vpop.permute.xlu2 %1406 }
 0x114   : > { %v783_v9 = vsel %vm13623_vm0, %v774_v6, %v775_v61  ;;  %v785_v40 = vsel %vm13623_vm0, %v775_v61, %v776_v3  ;;  %v1417_v28 = vrot.slane %v1407_v0, 4  ;;  %v1118_v6 = vld [vmem:[#allocation3 + $0x38] sm:$0x33] }
 0x115   : > { %v784_v50 = vsel %vm13576_vm3, %v766_v48, %v783_v9  ;;  %v786_v46 = vsel %vm13576_vm3, %v768_v38, %v785_v40  ;;  %v13707_v9 = vmov 0 }
 0x116   : > { %v794_v21 = vsel %vm10463_vm7, %v784_v50, %v793_v20  ;;  %v797_v36 = vsel %vm10463_vm7, %v786_v46, %v796_v13  ;;  %v1440_v50 = vld [vmem:[#allocation3 + $0x58] sm:$0x77] }
 0x117   : > { %795 = vst [vmem:[#allocation3 + $0x10] sm:$0x11] %v794_v21 }
 0x118   : > { %9705 = vrot.lane.b32.xlu0 %v9704_v27, %s13645_s13  ;;  %v760_v43 = vpop.permute.xlu1 %759  ;;  %798 = vst [vmem:[#allocation3 + $0x18] sm:$0x11] %v797_v36 }
 0x119   : > { %v771_v12 = vrot.slane %v760_v43, 4 }
 0x11b   : > { %v1727_v17 = vpop.permute.xlu2 %1726 }
 0x11c   : > { %v1738_v15 = vrot.slane %v1727_v17, 4 }
 0x120   : > { %v762_v35 = vpop.permute.xlu1 %761 }
 0x121   : > { %v772_v49 = vrot.slane %v762_v35, 4 }
 0x123   : > { %v778_v37 = vsel %vm13623_vm0, %v771_v12, %v772_v49  ;;  %v781_v32 = vsel %vm13623_vm0, %v772_v49, %v773_v55  ;;  %v1086_v60 = vpop.permute.xlu2 %1085  ;;  %v1437_v55 = vld [vmem:[#allocation3 + $0x50] sm:$0x77] }
 0x124   : > { %v780_v59 = vsel %vm13576_vm3, %v760_v43, %v778_v37  ;;  %v782_v63 = vsel %vm13576_vm3, %v762_v35, %v781_v32  ;;  %vm13704_vm3 = vcmask 465920   ;;  %v1092_v3 = vrot.slane %v1086_v60, 4 }
 0x125   : > { %791 = vst [vmem:[#allocation3] sm:$0xff] %v780_v59  ;;  %vm13705_vm12 = vmmov %vm13704_vm3  ;;  %v1115_v59 = vld [vmem:[#allocation3 + $0x30] sm:$0x33] }
 0x126   : > { %792 = vst [vmem:[#allocation3 + $0x8] sm:$0xff] %v782_v63 }
 0x128   : > { %v1731_v56 = vpop.permute.xlu1 %1730 }
 0x129   : > { %v1740_v45 = vrot.slane %v1731_v56, 4 }
 0x12a   : > { %v1409_v41 = vpop.permute.xlu0 %1408 }
 0x12b   : > { %v1418_v48 = vrot.slane %v1409_v41, 4  ;;  %v1413_v47 = vpop.permute.xlu2 %1412 }
 0x12d   : > { %v1425_v33 = vsel %vm13623_vm0, %v1417_v28, %v1418_v48 }
 0x12e   : > { %v1426_v51 = vsel %vm13588_vm10, %v1407_v0, %v1425_v33  ;;  %v1420_v0 = vrot.slane %v1413_v47, 4 }
 0x12f   : > { %1436 = vst [vmem:[#allocation3 + $0x48] sm:$0xcc] %v1426_v51 }
 0x130   : > { %v1078_v54 = vpop.permute.xlu1 %1077 }
 0x131   : > { %v1088_v18 = vrot.slane %v1078_v54, 4 }
 0x132   : > { %v1076_v31 = vpop.permute.xlu0 %1075 }
 0x133   : > { %v1096_v2 = vsel %vm13623_vm0, %v1088_v18, %v1089_v62  ;;  %v1087_v25 = vrot.slane %v1076_v31, 4  ;;  %v10995_v5 = vpop.permute.xlu2 %1732 }
 0x134   : > { %v1097_v42 = vsel %vm13578_vm13, %v1078_v54, %v1096_v2 }
 0x135   : > { %1107 = vst [vmem:[#allocation3 + $0x28] sm:$0xee] %v1097_v42  ;;  %v1093_v11 = vsel %vm13623_vm0, %v1087_v25, %v1088_v18 }
 0x136   : > { %v1095_v34 = vsel %vm13578_vm13, %v1076_v31, %v1093_v11  ;;  %vm510_vm13 = vmand %vm13583_vm1, %vm13584_vm2  ;;  %v966_v31 = vld [vmem:[#allocation3 + $0x18] sm:$0xff] }
 0x137   : > { %1106 = vst [vmem:[#allocation3 + $0x20] sm:$0xee] %v1095_v34 }
 0x138   : > { %v1405_v24 = vpop.permute.xlu1 %1404 }
 0x139   : > { %v1416_v22 = vrot.slane %v1405_v24, 4 }
 0x13a   : > { %v1729_v7 = vpop.permute.xlu0 %1728 }
 0x13b   : > { %v1422_v4 = vsel %vm13623_vm0, %v1416_v22, %v1417_v28  ;;  %v1739_v57 = vrot.slane %v1729_v7, 4  ;;  %v11001_v58 = vpop.permute.xlu2 %1580 }
 0x13c   : > { %v1424_v10 = vsel %vm13588_vm10, %v1405_v24, %v1422_v4 }
 0x13d   : > { %1435 = vst [vmem:[#allocation3 + $0x40] sm:$0xcc] %v1424_v10  ;;  %v1744_v39 = vsel %vm13623_vm0, %v1738_v15, %v1739_v57  ;;  %v1747_v14 = vsel %vm13623_vm0, %v1739_v57, %v1740_v45  ;;  %v963_v15 = vld [vmem:[#allocation3 + $0x10] sm:$0xff] }
 0x13e   : > { %v1746_v1 = vsel %vm13704_vm3, %v1727_v17, %v1744_v39  ;;  %v1748_v44 = vsel %vm13705_vm12, %v1729_v7, %v1747_v14  ;;  %vm11013_vm3 = vmor %vm510_vm13, %vm507_vm11  ;;  %vm13709_vm12 = vcmask 580608   ;;  %vm13587_vm11 = vsmask.f32 7938 }
 0x13f   : > { %1757 = vst [vmem:[#allocation3 + $0x60] sm:$0x88] %v1746_v1  ;;  %v13708_v9 = vsel %vm11013_vm3, 4294967295, %v13707_v9  ;;  %vm13710_vm13 = vmmov %vm13709_vm12  ;;  %v1590_v1 = vrot.slane %v11001_v58, 4 }
 0x140   : > { %1758 = vst [vmem:[#allocation3 + $0x68] sm:$0x88] %v1748_v44  ;;  %v1084_v29 = vpop.permute.xlu1 %1083  ;;  %vm958_vm1 = vmand %vm13623_vm0, %vm13587_vm11  ;;  %vm1608_vm11 = vsmask.f32 7946 }
 0x141   : > { %v1091_v38 = vrot.slane %v1084_v29, 4 }
 0x142   : > { %v1415_v61 = vpop.permute.xlu0 %1414 }
 0x143   : > { %v1100_v20 = vsel %vm13623_vm0, %v1091_v38, %v1092_v3  ;;  %v1421_v13 = vrot.slane %v1415_v61, 4  ;;  %v929_v27 = vpop.permute.xlu2 %928  ;;  %v13714_v3 = vmov 0 }
 0x144   : > { %v1101_v40 = vsel %vm13709_vm12, %v1084_v29, %v1100_v20  ;;  %vm13586_vm12 = vsmask.f32 7954  ;;  %v939_v33 = vrot.slane %v929_v27, 4 }
 0x145   : > { %v1119_v46 = vsel %vm10843_vm4, %v1101_v40, %v1118_v6  ;;  %v1429_v21 = vsel %vm13623_vm0, %v1420_v0, %v1421_v13  ;;  %vm961_vm2 = vmand %vm13589_vm6, %vm13586_vm12  ;;  %vm1607_vm12 = vcmask 1043458   ;;  %vm1286_vm6 = vsmask.f32 7942 }
 0x146   : > { %1120 = vst [vmem:[#allocation3 + $0x38] sm:$0x33] %v1119_v46  ;;  %v1430_v36 = vsel %vm13588_vm10, %v1413_v47, %v1429_v21 }
 0x147   : > { %v1441_v43 = vsel %vm11013_vm3, %v1430_v36, %v1440_v50 }
 0x148   : > { %1442 = vst [vmem:[#allocation3 + $0x58] sm:$0x77] %v1441_v43  ;;  %v1411_v17 = vpop.permute.xlu1 %1410 }
 0x149   : > { %v1419_v35 = vrot.slane %v1411_v17, 4 }
 0x14a   : > { %v1082_v12 = vpop.permute.xlu0 %1081 }
 0x14b   : > { %v1427_v49 = vsel %vm13623_vm0, %v1419_v35, %v1420_v0  ;;  %v1090_v37 = vrot.slane %v1082_v12, 4  ;;  %v11025_v32 = vpop.permute.xlu2 %1254  ;;  %v13721_v35 = vmov 0 }
 0x14c   : > { %v1428_v60 = vsel %vm13588_vm10, %v1411_v17, %v1427_v49  ;;  %vm1288_vm10 = vcmask 1047557   ;;  %v1266_v29 = vrot.slane %v11025_v32, 4  ;;  %v1770_v49 = vld [vmem:[#allocation2] sm:$0xff] }
 0x14d   : > { %v1438_v63 = vsel %vm11013_vm3, %v1428_v60, %v1437_v55  ;;  %v1098_v56 = vsel %vm13623_vm0, %v1090_v37, %v1091_v38  ;;  %vm1609_vm3 = vmand %vm1607_vm12, %vm1608_vm11  ;;  %vm1761_vm12 = vsmask.f32 7424  ;;  %v1295_v17 = vld [vmem:[#allocation3 + $0x38] sm:$0xee]  ;;  %v1773_v37 = vld [vmem:[#allocation2 + $0x18] sm:$0x11] }
 0x14e   : > { %1439 = vst [vmem:[#allocation3 + $0x50] sm:$0x77] %v1438_v63  ;;  %v1099_v41 = vsel %vm13710_vm13, %v1082_v12, %v1098_v56  ;;  %vm11040_vm13 = vmor %vm961_vm2, %vm958_vm1  ;;  %vm1611_vm1 = vsmask.f32 7962  ;;  %vm1285_vm2 = vcmask 1043457   ;;  %v11097_v56 = vunpack.c.l.bf16 %v1770_v49 }
 0x14f   : > { %v1116_v28 = vsel %vm10843_vm4, %v1099_v41, %v1115_v59  ;;  %vm13713_vm4 = vcmask 1047558   ;;  %vm1287_vm15 = vmand %vm1285_vm2, %vm1286_vm6  ;;  %v1617_v58 = vld [vmem:[#allocation3 + $0x58] sm:$0xcc]  ;;  %vm13718_vm6 = vcmask 515072   ;;  %v1955_v59 = vld [vmem:[%s13557_s4 + $0x10] sm:$0x11]  ;;  %v11099_v41 = vunpack.c.h.bf16 %v1770_v49 }
 0x150   : > { %1117 = vst [vmem:[#allocation3 + $0x30] sm:$0x33] %v1116_v28  ;;  %v1259_v48 = vpop.permute.xlu1 %1258  ;;  %vm1612_vm14 = vmand %vm13713_vm4, %vm1611_vm1  ;;  %v1813_v28 = vunpack.c.l.bf16 %v1773_v37 }
 0x151   : > { %vm1290_vm7 = vmand %vm1288_vm10, %vm1289_vm5  ;;  %v1268_v6 = vrot.slane %v1259_v48, 4  ;;  %vm1759_vm5 = vsmask.f32 3328 }
 0x152   : > { %v931_v47 = vpop.permute.xlu0 %930  ;;  %vm11063_vm11 = vmor %vm1612_vm14, %vm1609_vm3 }
 0x153   : > { %v940_v51 = vrot.slane %v931_v47, 4  ;;  %v11038_v54 = vpop.permute.xlu2 %934  ;;  %v13715_v3 = vsel %vm11063_vm11, 4294967295, %v13714_v3  ;;  %vm11068_vm4 = vmor %vm1290_vm7, %vm1287_vm15  ;;  %vm13719_vm15 = vcmask 531456  }
 0x154   : > { %v942_v24 = vrot.slane %v11038_v54, 4  ;;  %vm5739_vm14 = vmand %vm1285_vm2, %vm1759_vm5  ;;  %vm1859_vm2 = vsmask.f32 7440 }
 0x155   : > { %v947_v18 = vsel %vm13623_vm0, %v939_v33, %v940_v51  ;;  %vm5740_vm7 = vmand %vm1288_vm10, %vm1761_vm12 }
 0x156   : > { %v948_v2 = vsel %vm13604_vm9, %v929_v27, %v947_v18  ;;  %vm13720_vm3 = vmmov %vm13719_vm15 }
 0x157   : > { %v967_v25 = vsel %vm11040_vm13, %v948_v2, %v966_v31  ;;  %v1292_v43 = vld [vmem:[#allocation3 + $0x30] sm:$0xee]  ;;  %vm11086_vm1 = vmor %vm5740_vm7, %vm5739_vm14 }
 0x158   : > { %968 = vst [vmem:[#allocation3 + $0x18] sm:$0xff] %v967_v25  ;;  %v927_v42 = vpop.permute.xlu1 %926  ;;  %v13722_v35 = vsel %vm11086_vm1, 4294967295, %v13721_v35  ;;  %v1960_v25 = vunpack.c.h.b16 %v1955_v59  ;;  %vm13723_vm10 = vmmov %vm13718_vm6  ;;  %vm13755_vm1 = vcmask 7168  }
 0x159   : > { %v938_v11 = vrot.slane %v927_v42, 4  ;;  %vm13725_vm14 = vmmov %vm13720_vm3 }
 0x15a   : > { %v937_v34 = vpop.permute.xlu0 %936  ;;  %vm11126_vm7 = vmor %vm1759_vm5, %vm1859_vm2  ;;  %vm13730_vm2 = vcmask 1047556  }
 0x15b   : > { %v944_v45 = vsel %vm13623_vm0, %v938_v11, %v939_v33  ;;  %v943_v22 = vrot.slane %v937_v34, 4  ;;  %v11050_v7 = vpop.permute.xlu2 %1586  ;;  %v1814_v33 = vunpack.c.h.bf16 %v1773_v37  ;;  %v1614_v34 = vld [vmem:[#allocation3 + $0x50] sm:$0xcc] }
 0x15c   : > { %v946_v4 = vsel %vm13604_vm9, %v927_v42, %v944_v45 }
 0x15d   : > { %v964_v57 = vsel %vm11040_vm13, %v946_v4, %v963_v15  ;;  %v951_v10 = vsel %vm13623_vm0, %v942_v24, %v943_v22 }
 0x15e   : > { %965 = vst [vmem:[#allocation3 + $0x10] sm:$0xff] %v964_v57  ;;  %v952_v39 = vsel %vm13604_vm9, %v11038_v54, %v951_v10  ;;  %v1959_v54 = vunpack.c.l.b16 %v1955_v59  ;;  %v1593_v59 = vrot.slane %v11050_v7, 4 }
 0x15f   : > { %970 = vst [vmem:[#allocation3 + $0x28] sm:$0x11] %v952_v39 }
 0x160   : > { %v1579_v14 = vpop.permute.xlu1 %1578  ;;  %v1963_v39 = vpack.c.b16 %v1959_v54, %v1959_v54 }
 0x161   : > { %v1589_v44 = vrot.slane %v1579_v14, 4 }
 0x162   : > { %v1257_v38 = vpop.permute.xlu0 %1256 }
 0x163   : > { %v1597_v61 = vsel %vm13623_vm0, %v1589_v44, %v1590_v1  ;;  %v1267_v20 = vrot.slane %v1257_v38, 4  ;;  %v11072_v13 = vpop.permute.xlu2 %1260 }
 0x164   : > { %v1598_v27 = vsel %vm13718_vm6, %v1579_v14, %v1597_v61  ;;  %v1964_v14 = vpack.c.b16 %v1960_v25, %v1960_v25  ;;  %vm13724_vm6 = vmmov %vm13720_vm3 }
 0x165   : > { %v1618_v40 = vsel %vm11063_vm11, %v1598_v27, %v1617_v58  ;;  %v1272_v50 = vsel %vm13623_vm0, %v1266_v29, %v1267_v20  ;;  %v1275_v46 = vsel %vm13623_vm0, %v1267_v20, %v1268_v6  ;;  %v1269_v29 = vrot.slane %v11072_v13, 4 }
 0x166   : > { %1619 = vst [vmem:[#allocation3 + $0x58] sm:$0xcc] %v1618_v40  ;;  %v1274_v21 = vsel %vm13719_vm15, %v11025_v32, %v1272_v50  ;;  %v1276_v36 = vsel %vm13720_vm3, %v1257_v38, %v1275_v46  ;;  %v1968_v40 = vpack.i.b16 %v1963_v39, %v1963_v39  ;;  %v1972_v50 = vpack.i.b16 %v1964_v14, %v1964_v14  ;;  %vm13728_vm15 = vmmov %vm13723_vm10  ;;  %v1764_v14 = vld [vmem:[#allocation3 + $0x70] sm:$0xff] }
 0x167   : > { %v1293_v55 = vsel %vm11068_vm4, %v1274_v21, %v1292_v43  ;;  %v1296_v12 = vsel %vm11068_vm4, %v1276_v36, %v1295_v17  ;;  %vm13729_vm3 = vmmov %vm13723_vm10 }
 0x168   : > { %1294 = vst [vmem:[#allocation3 + $0x30] sm:$0xee] %v1293_v55  ;;  %v933_v60 = vpop.permute.xlu1 %932 }
 0x169   : > { %1297 = vst [vmem:[#allocation3 + $0x38] sm:$0xee] %v1296_v12  ;;  %v941_v32 = vrot.slane %v933_v60, 4 }
 0x16a   : > { %v1577_v63 = vpop.permute.xlu0 %1576 }
 0x16b   : > { %v949_v48 = vsel %vm13623_vm0, %v941_v32, %v942_v24  ;;  %v1588_v47 = vrot.slane %v1577_v63, 4  ;;  %v11102_v51 = vpop.permute.xlu2 %9700  ;;  %v1974_v32 = vperm.slane %v1972_v50, 0 }
 0x16c   : > { %v950_v18 = vsel %vm13604_vm9, %v933_v60, %v949_v48  ;;  %v9703_v31 = vunpack.i.h.bf16 %v11102_v51  ;;  %v9702_v2 = vunpack.i.l.bf16 %v11102_v51  ;;  %v1970_v60 = vperm.slane %v1968_v40, 0  ;;  %v1771_v40 = vld [vmem:[#allocation2 + $0x8] sm:$0xff] }
 0x16d   : > { %969 = vst [vmem:[#allocation3 + $0x20] sm:$0x11] %v950_v18  ;;  %v1594_v42 = vsel %vm13623_vm0, %v1588_v47, %v1589_v44  ;;  %v1994_v7 = vunpack.c.l.bf16 %v1974_v32 }
 0x16e   : > { %v1596_v11 = vsel %vm13723_vm10, %v1577_v63, %v1594_v42  ;;  %v1835_v24 = vsel %vm13604_vm9, %v9702_v2, %v9703_v31  ;;  %v1843_v45 = vmul.f32 %v9702_v2, %v11097_v56  ;;  %v1848_v22 = vmul.f32 %v9702_v2, %v1813_v28  ;;  %vm1760_vm10 = vmand %vm13623_vm0, %vm1759_vm5 }
 0x16f   : > { %v1615_v15 = vsel %vm11063_vm11, %v1596_v11, %v1614_v34  ;;  %v1844_v4 = vmul.f32 %v1835_v24, %v11099_v41  ;;  %v1849_v57 = vmul.f32 %v1835_v24, %v1814_v33  ;;  %v1993_v25 = vunpack.c.l.bf16 %v1970_v60 }
 0x170   : > { %1616 = vst [vmem:[#allocation3 + $0x50] sm:$0xcc] %v1615_v15  ;;  %v1265_v10 = vpop.permute.xlu1 %1264  ;;  %vm13733_vm5 = vcmask 465920  }
 0x171   : > { %v1853_v1 = vpack.c.bf16 %v1844_v4, %v1843_v45  ;;  %v1856_v44 = vpack.c.bf16 %v1849_v57, %v1848_v22  ;;  %v1271_v6 = vrot.slane %v1265_v10, 4  ;;  %v9719_v45 = vpack.i.bf16 %v1994_v7, %v1993_v25 }
 0x172   : > { %v1263_v38 = vpop.permute.xlu0 %1262  ;;  %v1741_v4 = vrot.slane %v10995_v5, 4 }
 0x173   : > { %v1270_v61 = vrot.slane %v1263_v38, 4  ;;  %v1862_v20 = vshll.u32 %v1853_v1, 16  ;;  %v1873_v58 = vshrl.u32 %v1853_v1, 16  ;;  %v1879_v27 = vshll.u32 %v1856_v44, 16  ;;  %v1767_v1 = vld [vmem:[#allocation3 + $0x78] sm:$0xff] }
 0x175   : > { %v1277_v46 = vsel %vm13623_vm0, %v1269_v29, %v1270_v61  ;;  %v1279_v21 = vsel %vm13623_vm0, %v1270_v61, %v1271_v6  ;;  %v11119_v36 = vrot.slane %v1862_v20, 5  ;;  %v1875_v43 = vrot.slane %v1873_v58, 4  ;;  %v1772_v20 = vld [vmem:[#allocation2 + $0x10] sm:$0xf] }
 0x176   : > { %v1278_v17 = vsel %vm13724_vm6, %v11072_v13, %v1277_v46  ;;  %v1280_v55 = vsel %vm13725_vm14, %v1263_v38, %v1279_v21  ;;  %v1881_v48 = vrot.slane %v1879_v27, 5  ;;  %v3549_v13 = vld [vmem:[%s13557_s4 + $0x20] sm:$0x22]  ;;  %vm1762_vm6 = vmand %vm13730_vm2, %vm1761_vm12  ;;  %v1774_v46 = vld [vmem:[#allocation2 + $0x20] sm:$0x11]  ;;  %v1812_v21 = vunpack.c.l.bf16 %v1772_v20 }
 0x177   : > { %1298 = vst [vmem:[#allocation3 + $0x40] sm:$0x33] %v1278_v17  ;;  %v1876_v12 = vor.u32 %v1875_v43, %v11119_v36  ;;  %v3553_v42 = vunpack.c.l.b16 %v3549_v13  ;;  %vm11146_vm14 = vmor %vm1762_vm6, %vm1760_vm10  ;;  %v1775_v43 = vld [vmem:[#allocation2 + $0x28] sm:$0x1]  ;;  %v11160_v17 = vunpack.c.l.bf16 %v1771_v40  ;;  %v1815_v60 = vunpack.c.l.bf16 %v1774_v46 }
 0x178   : > { %1299 = vst [vmem:[#allocation3 + $0x48] sm:$0x33] %v1280_v55  ;;  %v1585_v49 = vpop.permute.xlu1 %1584  ;;  %vm13734_vm12 = vmmov %vm13733_vm5  ;;  %v11162_v55 = vunpack.c.h.bf16 %v1771_v40  ;;  %vm1935_vm10 = vsmask.f32 7950  ;;  %vm1937_vm2 = vcmask 1047559  }
 0x179   : > { %v1592_v63 = vrot.slane %v1585_v49, 4  ;;  %v1877_v28 = vrot.slane %v1876_v12, 4  ;;  %v3557_v22 = vpack.c.b16 %v3553_v42, %v3553_v42  ;;  %vm1938_vm6 = vsmask.f32 7966 }
 0x17a   : > { %v1583_v47 = vpop.permute.xlu0 %1582 }
 0x17b   : > { %v1601_v33 = vsel %vm13623_vm0, %v1592_v63, %v1593_v59  ;;  %v1591_v54 = vrot.slane %v1583_v47, 4  ;;  %v1882_v18 = vsel %vm11126_vm7, %v1877_v28, %v1881_v48  ;;  %v3562_v44 = vshrl.u32 %v3557_v22, 16 }
 0x17c   : > { %v1602_v2 = vsel %vm13728_vm15, %v1585_v49, %v1601_v33  ;;  %1909 = vrot.lane.b32.xlu0 %v1882_v18, %s13652_s17  ;;  %v1817_v59 = vunpack.c.l.bf16 %v1775_v43  ;;  %v1816_v28 = vunpack.c.h.bf16 %v1774_v46  ;;  %vm13735_vm15 = vcmask 596992  }
 0x17d   : > { %1621 = vst [vmem:[#allocation3 + $0x68] sm:$0x77] %v1602_v2  ;;  %v1599_v11 = vsel %vm13623_vm0, %v1591_v54, %v1592_v63  ;;  %v3563_v50 = vpack.i.b16 %v3562_v44, %v3562_v44  ;;  %v1956_v63 = vld [vmem:[%s13557_s4 + $0x18] sm:$0x11] }
 0x17e   : > { %v1600_v34 = vsel %vm13729_vm3, %v1583_v47, %v1599_v11  ;;  %v1961_v2 = vunpack.c.l.b16 %v1956_v63  ;;  %v1962_v11 = vunpack.c.h.b16 %v1956_v63  ;;  %vm1934_vm3 = vcmask 1043459  }
 0x17f   : > { %1620 = vst [vmem:[#allocation3 + $0x60] sm:$0x77] %v1600_v34  ;;  %v3565_v32 = vperm.slane %v3563_v50, 1 }
 0x180   : > { %v1737_v24 = vpop.permute.xlu1 %1736  ;;  %v1966_v44 = vpack.c.b16 %v1962_v11, %v1962_v11  ;;  %v1952_v11 = vld [vmem:[#allocation2 + $0x18] sm:$0x11] }
 0x181   : > { %v1743_v57 = vrot.slane %v1737_v24, 4  ;;  %v3591_v25 = vunpack.c.l.bf16 %v3565_v32 }
 0x182   : > { %v1735_v15 = vpop.permute.xlu0 %1734  ;;  %v1980_v40 = vpack.i.b16 %v1966_v44, %v1966_v44 }
 0x183   : > { %v1742_v10 = vrot.slane %v1735_v15, 4 }
 0x184   : > { %9720 = vrot.lane.b32.xlu0 %v9719_v45, %s13650_s25 }
 0x185   : > { %v1749_v29 = vsel %vm13623_vm0, %v1741_v4, %v1742_v10  ;;  %v1751_v38 = vsel %vm13623_vm0, %v1742_v10, %v1743_v57  ;;  %v1965_v57 = vpack.c.b16 %v1961_v2, %v1961_v2 }
 0x186   : > { %v1750_v6 = vsel %vm13733_vm5, %v10995_v5, %v1749_v29  ;;  %v1752_v61 = vsel %vm13734_vm12, %v1735_v15, %v1751_v38  ;;  %vm1936_vm5 = vmand %vm1934_vm3, %vm1935_vm10  ;;  %vm13738_vm3 = vcmask 457728  }
 0x187   : > { %v1765_v58 = vsel %vm11146_vm14, %v1750_v6, %v1764_v14  ;;  %v1768_v27 = vsel %vm11146_vm14, %v1752_v61, %v1767_v1  ;;  %vm1939_vm12 = vmand %vm1937_vm2, %vm1938_vm6 }
 0x188   : > { %1766 = vst [vmem:[#allocation3 + $0x70] sm:$0xff] %v1765_v58  ;;  %vm13739_vm10 = vmmov %vm13738_vm3 }
 0x189   : > { %1769 = vst [vmem:[#allocation3 + $0x78] sm:$0xff] %v1768_v27  ;;  %v1976_v27 = vpack.i.b16 %v1965_v57, %v1965_v57  ;;  %vm13740_vm2 = vmmov %vm13738_vm3 }
 0x18a   : > { %v9706_v5 = vpop.permute.xlu0 %9705  ;;  %vm13741_vm6 = vmmov %vm13740_vm2 }
 0x18b   : > { %v9708_v12 = vunpack.i.h.bf16 %v9706_v5  ;;  %v9707_v49 = vunpack.i.l.bf16 %v9706_v5  ;;  %v1978_v5 = vperm.slane %v1976_v27, 0 }
 0x18d   : > { %v1847_v48 = vmul.f32 %v9708_v12, %v1812_v21  ;;  %v1836_v13 = vsel %vm13604_vm9, %v9703_v31, %v9707_v49  ;;  %v1837_v47 = vsel %vm13604_vm9, %v9707_v49, %v9708_v12  ;;  %v1852_v42 = vmul.f32 %v9708_v12, %v1817_v59 }
 0x18e   : > { %v1845_v33 = vmul.f32 %v1836_v13, %v11160_v17  ;;  %v1846_v54 = vmul.f32 %v1837_v47, %v11162_v55  ;;  %v1850_v34 = vmul.f32 %v1836_v13, %v1815_v60  ;;  %v1851_v24 = vmul.f32 %v1837_v47, %v1816_v28 }
 0x18f   : > { %v1855_v18 = vpack.c.bf16 %v1847_v48, %v1847_v48  ;;  %v1858_v14 = vpack.c.bf16 %v1852_v42, %v1852_v42  ;;  %v1982_v12 = vperm.slane %v1980_v40, 0  ;;  %v1995_v32 = vunpack.c.l.bf16 %v1978_v5  ;;  %v2085_v48 = vld [vmem:[%s13557_s4 + $0x10] sm:$0x11] }
 0x190   : > { %v1854_v7 = vpack.c.bf16 %v1846_v54, %v1845_v33  ;;  %v1857_v38 = vpack.c.bf16 %v1851_v24, %v1850_v34  ;;  %v2089_v13 = vunpack.c.l.b16 %v2085_v48  ;;  %v2090_v47 = vunpack.c.h.b16 %v2085_v48 }
 0x191   : > { %v1870_v45 = vshll.u32 %v1855_v18, 16  ;;  %v1893_v22 = vshrl.u32 %v1855_v18, 16  ;;  %v1899_v58 = vshll.u32 %v1858_v14, 16  ;;  %v1996_v59 = vunpack.c.l.bf16 %v1982_v12 }
 0x192   : > { %v1866_v15 = vshll.u32 %v1854_v7, 16  ;;  %v1883_v51 = vshrl.u32 %v1854_v7, 16  ;;  %v1889_v50 = vshll.u32 %v1857_v38, 16  ;;  %v2093_v54 = vpack.c.b16 %v2089_v13, %v2089_v13 }
 0x193   : > { %v1872_v4 = vrot.slane %v1870_v45, 5  ;;  %v1895_v31 = vrot.slane %v1893_v22, 4  ;;  %v1901_v43 = vrot.slane %v1899_v58, 5  ;;  %v9724_v63 = vpack.i.bf16 %v1996_v59, %v1995_v32 }
 0x194   : > { %v1868_v10 = vrot.slane %v1866_v15, 5  ;;  %v1885_v1 = vrot.slane %v1883_v51, 4  ;;  %v1891_v49 = vrot.slane %v1889_v50, 5  ;;  %v2098_v24 = vshrl.u32 %v2093_v54, 16 }
 0x195   : > { %v9714_v29 = vpack.i.bf16 %v3591_v25, %v1872_v4  ;;  %v1896_v61 = vor.u32 %v1895_v31, %v1872_v4  ;;  %v2094_v25 = vpack.c.b16 %v2090_v47, %v2090_v47  ;;  %v1988_v15 = vunpack.c.l.bf16 %v1952_v11 }
 0x196   : > { %v9709_v6 = vpack.i.bf16 %v1868_v10, %v11119_v36  ;;  %v1886_v20 = vor.u32 %v1885_v1, %v1868_v10  ;;  %v1989_v51 = vunpack.c.h.bf16 %v1952_v11  ;;  %v2099_v4 = vpack.i.b16 %v2098_v24, %v2098_v24  ;;  %v1951_v24 = vld [vmem:[#allocation2 + $0x10] sm:$0xf] }
 0x197   : > { %9715 = vrot.lane.b32.xlu2 %v9714_v29, %s13652_s17  ;;  %v1897_v46 = vrot.slane %v1896_v61, 4  ;;  %v2103_v45 = vshrl.u32 %v2094_v25, 16  ;;  %v2086_v25 = vld [vmem:[%s13557_s4 + $0x18] sm:$0x11]  ;;  %vm13611_vm9 = vcmask 64512  }
 0x198   : > { %9710 = vrot.lane.b32.xlu1 %v9709_v6, %s13652_s17  ;;  %v1887_v21 = vrot.slane %v1886_v20, 4  ;;  %v2101_v14 = vperm.slane %v2099_v4, 0 }
 0x199   : > { %v1902_v60 = vsel %vm11126_vm7, %v1897_v46, %v1901_v43  ;;  %v2104_v31 = vpack.i.b16 %v2103_v45, %v2103_v45  ;;  %v13736_v43 = vmov 0  ;;  %v2091_v45 = vunpack.c.l.b16 %v2086_v25 }
 0x19a   : > { %v1892_v36 = vsel %vm11126_vm7, %v1887_v21, %v1891_v49  ;;  %v2127_v38 = vunpack.c.l.bf16 %v2101_v14  ;;  %v1954_v14 = vld [vmem:[#allocation2 + $0x28] sm:$0x1] }
 0x19b   : > { %v2106_v1 = vperm.slane %v2104_v31, 0  ;;  %v2095_v4 = vpack.c.b16 %v2091_v45, %v2091_v45 }
 0x19d   : > { %v2128_v6 = vunpack.c.l.bf16 %v2106_v1 }
 0x19f   : > { %1913 = vrot.lane.b32.xlu2 %v1902_v60, %s13652_s17  ;;  %v9729_v58 = vpack.i.bf16 %v2128_v6, %v2127_v38  ;;  %v1941_v60 = vld [vmem:[#allocation3 + $0x70] sm:$0x88]  ;;  %v1953_v38 = vld [vmem:[#allocation2 + $0x20] sm:$0x11] }
 0x1a0   : > { %1911 = vrot.lane.b32.xlu1 %v1892_v36, %s13652_s17  ;;  %v1944_v36 = vld [vmem:[#allocation3 + $0x78] sm:$0x88] }
 0x1a8   : > { %9725 = vrot.lane.b32.xlu1 %v9724_v63, %s13650_s25 }
 0x1ee   : > { %v11183_v28 = vpop.permute.xlu0 %1909 }
 0x1ef   : > { %v1918_v13 = vrot.slane %v11183_v28, 4 }
 0x1f1   : > { %v11198_v29 = vpop.permute.xlu2 %9715 }
 0x1f2   : > { %v9717_v61 = vunpack.i.l.bf16 %v11198_v29 }
 0x1f4   : > { %v1917_v50 = vrot.slane %v9717_v61, 4 }
 0x1f6   : > { %v11188_v33 = vpop.permute.xlu0 %9720 }
 0x1f7   : > { %v9723_v18 = vunpack.i.h.bf16 %v11188_v33  ;;  %v9722_v2 = vunpack.i.l.bf16 %v11188_v33 }
 0x1f9   : > { %v2010_v7 = vsel %vm13735_vm15, %v9722_v2, %v9723_v18  ;;  %v2018_v42 = vmul.f32 %v9722_v2, %v11097_v56  ;;  %v2023_v57 = vmul.f32 %v9722_v2, %v1988_v15  ;;  %vm11202_vm15 = vmor %vm1939_vm12, %vm1936_vm5  ;;  %v1914_v49 = vpop.permute.xlu2 %1913  ;;  %v1987_v15 = vunpack.c.l.bf16 %v1951_v24  ;;  %v2082_v24 = vld [vmem:[#allocation2 + $0x18] sm:$0x11] }
 0x1fa   : > { %v2019_v34 = vmul.f32 %v2010_v7, %v11099_v41  ;;  %v2024_v10 = vmul.f32 %v2010_v7, %v1989_v51  ;;  %v13737_v43 = vsel %vm11202_vm15, 4294967295, %v13736_v43  ;;  %v1920_v54 = vrot.slane %v1914_v49, 4 }
 0x1fb   : > { %vm13742_vm5 = vcmask 596992  }
 0x1fc   : > { %v2028_v22 = vpack.c.bf16 %v2019_v34, %v2018_v42  ;;  %v2031_v44 = vpack.c.bf16 %v2024_v10, %v2023_v57  ;;  %vm13743_vm12 = vmmov %vm13742_vm5 }
 0x1fe   : > { %2040 = vrot.lane.b32.xlu2 %v2028_v22, %s13648_s23  ;;  %v2092_v22 = vunpack.c.h.b16 %v2086_v25 }
 0x200   : > { %v2096_v31 = vpack.c.b16 %v2092_v22, %v2092_v22 }
 0x206   : > { %2046 = vrot.lane.b32.xlu2 %v2031_v44, %s13648_s23 }
 0x20a   : > { %v9711_v20 = vpop.permute.xlu1 %9710 }
 0x20b   : > { %v9713_v27 = vunpack.i.h.bf16 %v9711_v20  ;;  %v9712_v40 = vunpack.i.l.bf16 %v9711_v20  ;;  %v2108_v20 = vshrl.u32 %v2095_v4, 16  ;;  %v2122_v4 = vunpack.c.l.bf16 %v2082_v24 }
 0x20d   : > { %v1916_v46 = vrot.slane %v9713_v27, 4  ;;  %v1915_v21 = vrot.slane %v9712_v40, 4  ;;  %v2109_v33 = vpack.i.b16 %v2108_v20, %v2108_v20 }
 0x20e   : > { %9730 = vrot.lane.b32.xlu2 %v9729_v58, %s13643_s30  ;;  %v2113_v58 = vshrl.u32 %v2096_v31, 16  ;;  %v2123_v31 = vunpack.c.h.bf16 %v2082_v24 }
 0x20f   : > { %v1924_v5 = vsel %vm13623_vm0, %v1916_v46, %v1917_v50  ;;  %v1921_v12 = vsel %vm13623_vm0, %v1915_v21, %v1916_v46  ;;  %v1990_v46 = vunpack.c.l.bf16 %v1953_v38  ;;  %v1991_v21 = vunpack.c.h.bf16 %v1953_v38 }
 0x210   : > { %v1925_v32 = vsel %vm13738_vm3, %v9713_v27, %v1924_v5  ;;  %v1923_v59 = vsel %vm13739_vm10, %v9712_v40, %v1921_v12  ;;  %v1992_v40 = vunpack.c.l.bf16 %v1954_v14  ;;  %vm13605_vm3 = vcmask 973824  }
 0x211   : > { %v1945_v63 = vsel %vm11202_vm15, %v1925_v32, %v1944_v36  ;;  %v1942_v48 = vsel %vm11202_vm15, %v1923_v59, %v1941_v60  ;;  %v2111_v60 = vperm.slane %v2109_v33, 0  ;;  %vm13744_vm10 = vcmask 449536  }
 0x212   : > { %1946 = vst [vmem:[#allocation3 + $0x78] sm:$0x88] %v1945_v63  ;;  %v1912_v47 = vpop.permute.xlu1 %1911 }
 0x213   : > { %1943 = vst [vmem:[#allocation3 + $0x70] sm:$0x88] %v1942_v48  ;;  %v1919_v2 = vrot.slane %v1912_v47, 4  ;;  %v2129_v63 = vunpack.c.l.bf16 %v2111_v60 }
 0x215   : > { %v1926_v7 = vsel %vm13623_vm0, %v1918_v13, %v1919_v2  ;;  %v1928_v42 = vsel %vm13623_vm0, %v1919_v2, %v1920_v54 }
 0x216   : > { %v1927_v11 = vsel %vm13740_vm2, %v11183_v28, %v1926_v7  ;;  %v1929_v34 = vsel %vm13741_vm6, %v1912_v47, %v1928_v42  ;;  %vm13745_vm2 = vmmov %vm13744_vm10 }
 0x217   : > { %1947 = vst [vmem:[#allocation3 + $0x80] sm:$0xff] %v1927_v11  ;;  %vm13746_vm6 = vmmov %vm13745_vm2 }
 0x218   : > { %1948 = vst [vmem:[#allocation3 + $0x88] sm:$0xff] %v1929_v34  ;;  %v2249_v34 = vld [vmem:[%s13557_s4 + $0x10] sm:$0x22] }
 0x21a   : > { %v9726_v51 = vpop.permute.xlu1 %9725 }
 0x21b   : > { %v9728_v57 = vunpack.i.h.bf16 %v9726_v51  ;;  %v9727_v10 = vunpack.i.l.bf16 %v9726_v51  ;;  %v2254_v51 = vunpack.c.h.b16 %v2249_v34 }
 0x21d   : > { %v2022_v1 = vmul.f32 %v9728_v57, %v1987_v15  ;;  %v2011_v44 = vsel %vm13742_vm5, %v9723_v18, %v9727_v10  ;;  %v2012_v28 = vsel %vm13743_vm12, %v9727_v10, %v9728_v57  ;;  %v2114_v18 = vpack.i.b16 %v2113_v58, %v2113_v58  ;;  %vm13747_vm5 = vmmov %vm13745_vm2 }
 0x21e   : > { %v2020_v6 = vmul.f32 %v2011_v44, %v11160_v17  ;;  %v2021_v61 = vmul.f32 %v2012_v28, %v11162_v55  ;;  %v2027_v5 = vmul.f32 %v9728_v57, %v1992_v40  ;;  %v2025_v12 = vmul.f32 %v2011_v44, %v1990_v46 }
 0x21f   : > { %v2030_v27 = vpack.c.bf16 %v2022_v1, %v2022_v1  ;;  %v2026_v49 = vmul.f32 %v2012_v28, %v1991_v21  ;;  %v2116_v36 = vperm.slane %v2114_v18, 0  ;;  %v2253_v15 = vunpack.c.l.b16 %v2249_v34 }
 0x220   : > { %v2029_v50 = vpack.c.bf16 %v2021_v61, %v2020_v6  ;;  %v2033_v32 = vpack.c.bf16 %v2027_v5, %v2027_v5  ;;  %v2258_v44 = vpack.c.b16 %v2254_v51, %v2254_v51  ;;  %vm13748_vm12 = vnez %v13679_v30 }
 0x221   : > { %2044 = vrot.lane.b32.xlu1 %v2030_v27, %s13648_s23  ;;  %v2032_v59 = vpack.c.bf16 %v2026_v49, %v2025_v12  ;;  %v2130_v48 = vunpack.c.l.bf16 %v2116_v36  ;;  %v2257_v1 = vpack.c.b16 %v2253_v15, %v2253_v15 }
 0x222   : > { %2042 = vrot.lane.b32.xlu0 %v2029_v50, %s13648_s23  ;;  %v2266_v20 = vpack.i.b16 %v2258_v44, %v2258_v44 }
 0x223   : > { %v9734_v13 = vpack.i.bf16 %v2130_v48, %v2129_v63  ;;  %v2262_v61 = vpack.i.b16 %v2257_v1, %v2257_v1 }
 0x224   : > { %v2268_v50 = vperm.slane %v2266_v20, 1  ;;  %v2084_v20 = vld [vmem:[#allocation2 + $0x28] sm:$0x1] }
 0x225   : > { %v2264_v40 = vperm.slane %v2262_v61, 1 }
 0x226   : > { %v2288_v18 = vunpack.c.l.bf16 %v2268_v50 }
 0x227   : > { %v2287_v33 = vunpack.c.l.bf16 %v2264_v40  ;;  %v2083_v40 = vld [vmem:[#allocation2 + $0x20] sm:$0x11] }
 0x229   : > { %2050 = vrot.lane.b32.xlu1 %v2033_v32, %s13648_s23  ;;  %v9739_v5 = vpack.i.bf16 %v2288_v18, %v2287_v33  ;;  %v2126_v33 = vunpack.c.l.bf16 %v2084_v20 }
 0x22a   : > { %2048 = vrot.lane.b32.xlu0 %v2032_v59, %s13648_s23 }
 0x232   : > { %9735 = vrot.lane.b32.xlu0 %v9734_v13, %s13643_s30 }
 0x258   : > { %v2041_v47 = vpop.permute.xlu2 %2040 }
 0x259   : > { %v2052_v36 = vrot.slane %v2041_v47, 4 }
 0x260   : > { %v2047_v54 = vpop.permute.xlu2 %2046 }
 0x261   : > { %v2055_v34 = vrot.slane %v2047_v54, 4 }
 0x268   : > { %v11235_v2 = vpop.permute.xlu2 %9730 }
 0x269   : > { %v9733_v25 = vunpack.i.h.bf16 %v11235_v2  ;;  %v9732_v7 = vunpack.i.l.bf16 %v11235_v2 }
 0x26b   : > { %v2144_v42 = vsel %vm13605_vm3, %v9732_v7, %v9733_v25  ;;  %v2152_v11 = vmul.f32 %v9732_v7, %v11097_v56  ;;  %v2157_v28 = vmul.f32 %v9732_v7, %v2122_v4 }
 0x26c   : > { %v2153_v45 = vmul.f32 %v2144_v42, %v11099_v41  ;;  %v2158_v38 = vmul.f32 %v2144_v42, %v2123_v31 }
 0x26e   : > { %v2162_v22 = vpack.c.bf16 %v2153_v45, %v2152_v11  ;;  %v2165_v58 = vpack.c.bf16 %v2158_v38, %v2157_v28  ;;  %v2073_v45 = vld [vmem:[#allocation3 + $0xa0] sm:$0x11]  ;;  %v2250_v38 = vld [vmem:[%s13557_s4 + $0x18] sm:$0x22] }
 0x26f   : > { %v2256_v18 = vunpack.c.h.b16 %v2250_v38 }
 0x270   : > { %v2169_v57 = vshrl.u32 %v2162_v22, 16  ;;  %v2172_v14 = vshll.u32 %v2162_v22, 16  ;;  %v2191_v46 = vshll.u32 %v2165_v58, 16  ;;  %v2076_v22 = vld [vmem:[#allocation3 + $0xa8] sm:$0x11] }
 0x272   : > { %v2171_v10 = vrot.slane %v2169_v57, 7 }
 0x274   : > { %v2174_v6 = vor.u32 %v2172_v14, %v2171_v10  ;;  %v2189_v27 = vrot.slane %v2171_v10, 4 }
 0x276   : > { %2204 = vrot.lane.b32.xlu1 %v2174_v6, %s13641_s28  ;;  %v2193_v21 = vsel %vm10878_vm8, %v2189_v27, %v2191_v46  ;;  %v2255_v46 = vunpack.c.l.b16 %v2250_v38 }
 0x27e   : > { %2210 = vrot.lane.b32.xlu1 %v2193_v21, %s13641_s28 }
 0x286   : > { %9740 = vrot.lane.b32.xlu1 %v9739_v5, %s13639_s29 }
 0x293   : > { %v2045_v12 = vpop.permute.xlu1 %2044 }
 0x294   : > { %v2054_v49 = vrot.slane %v2045_v12, 4  ;;  %v2043_v60 = vpop.permute.xlu0 %2042 }
 0x295   : > { %v2053_v32 = vrot.slane %v2043_v60, 4 }
 0x297   : > { %v2058_v59 = vsel %vm13623_vm0, %v2052_v36, %v2053_v32  ;;  %v2061_v63 = vsel %vm13623_vm0, %v2053_v32, %v2054_v49  ;;  %v2124_v49 = vunpack.c.l.bf16 %v2083_v40 }
 0x298   : > { %v2060_v48 = vsel %vm13744_vm10, %v2041_v47, %v2058_v59  ;;  %v2062_v13 = vsel %vm13745_vm2, %v2043_v60, %v2061_v63  ;;  %v2081_v47 = vld [vmem:[#allocation2 + $0x10] sm:$0xf]  ;;  %v2125_v60 = vunpack.c.h.bf16 %v2083_v40  ;;  %vm13606_vm10 = vcmask 982016  }
 0x299   : > { %2071 = vst [vmem:[#allocation3 + $0x90] sm:$0xff] %v2060_v48  ;;  %v2121_v14 = vunpack.c.l.bf16 %v2081_v47  ;;  %v2260_v48 = vpack.c.b16 %v2256_v18, %v2256_v18  ;;  %vm13749_vm2 = vnez %v13681_v52 }
 0x29a   : > { %2072 = vst [vmem:[#allocation3 + $0x98] sm:$0xff] %v2062_v13 }
 0x29b   : > { %v2051_v7 = vpop.permute.xlu1 %2050 }
 0x29c   : > { %v2057_v42 = vrot.slane %v2051_v7, 4  ;;  %v2049_v11 = vpop.permute.xlu0 %2048 }
 0x29d   : > { %v2056_v24 = vrot.slane %v2049_v11, 4 }
 0x29f   : > { %v2063_v15 = vsel %vm13623_vm0, %v2055_v34, %v2056_v24  ;;  %v2065_v51 = vsel %vm13623_vm0, %v2056_v24, %v2057_v42 }
 0x2a0   : > { %v2064_v4 = vsel %vm13746_vm6, %v2047_v54, %v2063_v15  ;;  %v2066_v31 = vsel %vm13747_vm5, %v2049_v11, %v2065_v51  ;;  %vm13609_vm6 = vcmask 72704   ;;  %vm13610_vm5 = vcmask 990208  }
 0x2a1   : > { %v2074_v57 = vsel %vm13748_vm12, %v2064_v4, %v2073_v45  ;;  %v2077_v10 = vsel %vm13748_vm12, %v2066_v31, %v2076_v22  ;;  %v2274_v45 = vpack.i.b16 %v2260_v48, %v2260_v48 }
 0x2a2   : > { %2075 = vst [vmem:[#allocation3 + $0xa0] sm:$0x11] %v2074_v57 }
 0x2a3   : > { %2078 = vst [vmem:[#allocation3 + $0xa8] sm:$0x11] %v2077_v10  ;;  %v2276_v47 = vperm.slane %v2274_v45, 1 }
 0x2a4   : > { %v9736_v1 = vpop.permute.xlu0 %9735 }
 0x2a5   : > { %v9738_v44 = vunpack.i.h.bf16 %v9736_v1  ;;  %v9737_v28 = vunpack.i.l.bf16 %v9736_v1 }
 0x2a7   : > { %v2156_v54 = vmul.f32 %v9738_v44, %v2121_v14  ;;  %v2145_v6 = vsel %vm13605_vm3, %v9733_v25, %v9737_v28  ;;  %v2146_v61 = vsel %vm13605_vm3, %v9737_v28, %v9738_v44  ;;  %v2259_v25 = vpack.c.b16 %v2255_v46, %v2255_v46 }
 0x2a8   : > { %v2154_v58 = vmul.f32 %v2145_v6, %v11160_v17  ;;  %v2155_v27 = vmul.f32 %v2146_v61, %v11162_v55  ;;  %v2161_v63 = vmul.f32 %v9738_v44, %v2126_v33  ;;  %v2159_v7 = vmul.f32 %v2145_v6, %v2124_v49  ;;  %v2391_v6 = vld [vmem:[%s13557_s4 + $0x10] sm:$0x22] }
 0x2a9   : > { %v2164_v50 = vpack.c.bf16 %v2156_v54, %v2156_v54  ;;  %v2160_v42 = vmul.f32 %v2146_v61, %v2125_v60  ;;  %v2270_v24 = vpack.i.b16 %v2259_v25, %v2259_v25  ;;  %v2290_v44 = vunpack.c.l.bf16 %v2276_v47 }
 0x2aa   : > { %v2163_v21 = vpack.c.bf16 %v2155_v27, %v2154_v58  ;;  %v2167_v34 = vpack.c.bf16 %v2161_v63, %v2161_v63  ;;  %v2395_v61 = vunpack.c.l.b16 %v2391_v6  ;;  %v2396_v20 = vunpack.c.h.b16 %v2391_v6  ;;  %v2246_v58 = vld [vmem:[#allocation2 + $0x18] sm:$0x11]  ;;  %v2245_v6 = vld [vmem:[#allocation2 + $0x10] sm:$0xf] }
 0x2ab   : > { %v2183_v5 = vshrl.u32 %v2164_v50, 16  ;;  %v2186_v12 = vshll.u32 %v2164_v50, 16  ;;  %v2166_v22 = vpack.c.bf16 %v2160_v42, %v2159_v7  ;;  %v2272_v31 = vperm.slane %v2270_v24, 1 }
 0x2ac   : > { %v2176_v2 = vshrl.u32 %v2163_v21, 16  ;;  %v2179_v59 = vshll.u32 %v2163_v21, 16  ;;  %v2201_v4 = vshll.u32 %v2167_v34, 16  ;;  %v2399_v46 = vpack.c.b16 %v2395_v61, %v2395_v61  ;;  %v2248_v61 = vld [vmem:[#allocation2 + $0x28] sm:$0x1] }
 0x2ad   : > { %v2185_v36 = vrot.slane %v2183_v5, 7  ;;  %v2196_v57 = vshll.u32 %v2166_v22, 16  ;;  %v2289_v1 = vunpack.c.l.bf16 %v2272_v31  ;;  %v2400_v21 = vpack.c.b16 %v2396_v20, %v2396_v20  ;;  %v2235_v31 = vld [vmem:[#allocation3 + $0xa0] sm:$0xff] }
 0x2ae   : > { %v2178_v32 = vrot.slane %v2176_v2, 7  ;;  %v2282_v33 = vunpack.c.l.bf16 %v2246_v58  ;;  %v2283_v18 = vunpack.c.h.bf16 %v2246_v58  ;;  %v2404_v2 = vshrl.u32 %v2399_v46, 16  ;;  %v2247_v46 = vld [vmem:[#allocation2 + $0x20] sm:$0x11] }
 0x2af   : > { %v2188_v13 = vor.u32 %v2186_v12, %v2185_v36  ;;  %v2199_v15 = vrot.slane %v2185_v36, 4  ;;  %v9744_v28 = vpack.i.bf16 %v2290_v44, %v2289_v1  ;;  %v2409_v36 = vshrl.u32 %v2400_v21, 16 }
 0x2b0   : > { %v2181_v11 = vor.u32 %v2179_v59, %v2178_v32  ;;  %v2194_v51 = vrot.slane %v2178_v32, 4  ;;  %v2405_v63 = vpack.i.b16 %v2404_v2, %v2404_v2  ;;  %vm13750_vm3 = vnez %v13701_v26 }
 0x2b1   : > { %2208 = vrot.lane.b32.xlu0 %v2188_v13, %s13641_s28  ;;  %v2203_v10 = vsel %vm10878_vm8, %v2199_v15, %v2201_v4  ;;  %v2410_v48 = vpack.i.b16 %v2409_v36, %v2409_v36  ;;  %v2285_v36 = vunpack.c.h.bf16 %v2247_v46 }
 0x2b2   : > { %2206 = vrot.lane.b32.xlu2 %v2181_v11, %s13641_s28  ;;  %v2198_v14 = vsel %vm10878_vm8, %v2194_v51, %v2196_v57  ;;  %v2407_v42 = vperm.slane %v2405_v63, 1 }
 0x2b3   : > { %v2412_v11 = vperm.slane %v2410_v48, 1 }
 0x2b5   : > { %v2434_v24 = vunpack.c.l.bf16 %v2412_v11 }
 0x2b9   : > { %2214 = vrot.lane.b32.xlu0 %v2203_v10, %s13641_s28 }
 0x2ba   : > { %2212 = vrot.lane.b32.xlu2 %v2198_v14, %s13641_s28 }
 0x2c2   : > { %9745 = vrot.lane.b32.xlu2 %v9744_v28, %s13639_s29  ;;  %v2392_v28 = vld [vmem:[%s13557_s4 + $0x18] sm:$0x22] }
 0x2c3   : > { %v2397_v20 = vunpack.c.l.b16 %v2392_v28  ;;  %v2398_v58 = vunpack.c.h.b16 %v2392_v28 }
 0x2e8   : > { %v2205_v38 = vpop.permute.xlu1 %2204 }
 0x2e9   : > { %v2216_v22 = vrot.slane %v2205_v38, 4 }
 0x2f0   : > { %v2211_v54 = vpop.permute.xlu1 %2210 }
 0x2f1   : > { %v2219_v14 = vrot.slane %v2211_v54, 4 }
 0x2f8   : > { %v11285_v27 = vpop.permute.xlu1 %9740 }
 0x2f9   : > { %v9743_v40 = vunpack.i.h.bf16 %v11285_v27  ;;  %v9742_v50 = vunpack.i.l.bf16 %v11285_v27 }
 0x2fb   : > { %v2304_v5 = vsel %vm13606_vm10, %v9742_v50, %v9743_v40  ;;  %v2312_v12 = vmul.f32 %v9742_v50, %v11097_v56  ;;  %v2317_v25 = vmul.f32 %v9742_v50, %v2282_v33  ;;  %v2281_v50 = vunpack.c.l.bf16 %v2245_v6 }
 0x2fc   : > { %v2313_v49 = vmul.f32 %v2304_v5, %v11099_v41  ;;  %v2318_v32 = vmul.f32 %v2304_v5, %v2283_v18  ;;  %v2433_v41 = vunpack.c.l.bf16 %v2407_v42  ;;  %v2286_v33 = vunpack.c.l.bf16 %v2248_v61 }
 0x2fe   : > { %v2322_v60 = vpack.c.bf16 %v2313_v49, %v2312_v12  ;;  %v2325_v13 = vpack.c.bf16 %v2318_v32, %v2317_v25  ;;  %v9749_v51 = vpack.i.bf16 %v2434_v24, %v2433_v41  ;;  %v2284_v12 = vunpack.c.l.bf16 %v2247_v46 }
 0x2ff   : > { %v2401_v49 = vpack.c.b16 %v2397_v20, %v2397_v20 }
 0x300   : > { %v2334_v59 = vrot.slane %v2322_v60, 7  ;;  %v2338_v34 = vrot.slane %v2325_v13, 7  ;;  %v2402_v60 = vpack.c.b16 %v2398_v58, %v2398_v58 }
 0x302   : > { %2346 = vrot.lane.b32.xlu0 %v2334_v59, %s13637_s14  ;;  %v2337_v7 = vrot.slane %v2334_v59, 4  ;;  %v2419_v42 = vshrl.u32 %v2402_v60, 16  ;;  %v11335_v60 = vld [vmem:[#allocation2] sm:$0xff] }
 0x304   : > { %v2339_v56 = vsel %vm13749_vm2, %v2337_v7, %v2338_v34  ;;  %v2414_v7 = vshrl.u32 %v2401_v49, 16 }
 0x30a   : > { %2352 = vrot.lane.b32.xlu0 %v2339_v56, %s13637_s14 }
 0x30c   : > { %v2207_v45 = vpop.permute.xlu2 %2206 }
 0x30d   : > { %v2217_v15 = vrot.slane %v2207_v45, 4 }
 0x30f   : > { %v2222_v4 = vsel %vm13623_vm0, %v2216_v22, %v2217_v15 }
 0x310   : > { %v2224_v47 = vsel %vm13609_vm6, %v2205_v38, %v2222_v4  ;;  %v2420_v4 = vpack.i.b16 %v2419_v42, %v2419_v42 }
 0x311   : > { %v2236_v57 = vsel %vm11040_vm13, %v2224_v47, %v2235_v31  ;;  %v2238_v31 = vld [vmem:[#allocation3 + $0xa8] sm:$0xff] }
 0x312   : > { %2237 = vst [vmem:[#allocation3 + $0xa0] sm:$0xff] %v2236_v57  ;;  %9750 = vrot.lane.b32.xlu0 %v9749_v51, %s13635_s16  ;;  %v2415_v51 = vpack.i.b16 %v2414_v7, %v2414_v7  ;;  %v2422_v61 = vperm.slane %v2420_v4, 1 }
 0x314   : > { %v11303_v10 = vpop.permute.xlu2 %2212  ;;  %v2417_v6 = vperm.slane %v2415_v51, 1 }
 0x315   : > { %v2220_v1 = vrot.slane %v11303_v10, 4 }
 0x317   : > { %v2227_v44 = vsel %vm13623_vm0, %v2219_v14, %v2220_v1 }
 0x318   : > { %v2228_v38 = vsel %vm13609_vm6, %v2211_v54, %v2227_v44 }
 0x319   : > { %2241 = vst [vmem:[#allocation3 + $0xb0] sm:$0x11] %v2228_v38 }
 0x31c   : > { %v9746_v21 = vpop.permute.xlu2 %9745 }
 0x31d   : > { %v9748_v18 = vunpack.i.h.bf16 %v9746_v21  ;;  %v9747_v5 = vunpack.i.l.bf16 %v9746_v21  ;;  %v2435_v21 = vunpack.c.l.bf16 %v2417_v6 }
 0x31f   : > { %v2316_v2 = vmul.f32 %v9748_v18, %v2281_v50  ;;  %v2305_v54 = vsel %vm13606_vm10, %v9743_v40, %v9747_v5  ;;  %v2306_v25 = vsel %vm13606_vm10, %v9747_v5, %v9748_v18  ;;  %v2321_v63 = vmul.f32 %v9748_v18, %v2286_v33 }
 0x320   : > { %v2314_v32 = vmul.f32 %v2305_v54, %v11160_v17  ;;  %v2315_v59 = vmul.f32 %v2306_v25, %v11162_v55  ;;  %v2319_v56 = vmul.f32 %v2305_v54, %v2284_v12  ;;  %v2320_v41 = vmul.f32 %v2306_v25, %v2285_v36  ;;  %v2388_v36 = vld [vmem:[#allocation2 + $0x18] sm:$0x11] }
 0x321   : > { %v2324_v48 = vpack.c.bf16 %v2316_v2, %v2316_v2  ;;  %v2327_v27 = vpack.c.bf16 %v2321_v63, %v2321_v63  ;;  %v2436_v33 = vunpack.c.l.bf16 %v2422_v61  ;;  %v2423_v2 = vunpack.c.l.bf16 %v11335_v60 }
 0x322   : > { %v2323_v13 = vpack.c.bf16 %v2315_v59, %v2314_v32  ;;  %v2326_v57 = vpack.c.bf16 %v2320_v41, %v2319_v56  ;;  %v2428_v32 = vunpack.c.l.bf16 %v2388_v36  ;;  %v2429_v59 = vunpack.c.h.bf16 %v2388_v36 }
 0x323   : > { %v2209_v11 = vpop.permute.xlu0 %2208  ;;  %v2336_v34 = vrot.slane %v2324_v48, 7  ;;  %v2344_v28 = vrot.slane %v2327_v27, 7  ;;  %v9754_v5 = vpack.i.bf16 %v2436_v33, %v2435_v21  ;;  %vm13751_vm10 = vnez %v13697_v19 }
 0x324   : > { %v2218_v24 = vrot.slane %v2209_v11, 4  ;;  %v2335_v22 = vrot.slane %v2323_v13, 7  ;;  %v2341_v58 = vrot.slane %v2326_v57, 7  ;;  %v2561_v13 = vld [vmem:[%s13557_s4 + $0x10] sm:$0x44] }
 0x325   : > { %2350 = vrot.lane.b32.xlu2 %v2336_v34, %s13637_s14  ;;  %v2343_v44 = vrot.slane %v2336_v34, 4  ;;  %v2565_v11 = vunpack.c.l.b16 %v2561_v13  ;;  %v2566_v34 = vunpack.c.h.b16 %v2561_v13 }
 0x326   : > { %v2225_v40 = vsel %vm13623_vm0, %v2217_v15, %v2218_v24  ;;  %2348 = vrot.lane.b32.xlu1 %v2335_v22, %s13637_s14  ;;  %v2340_v38 = vrot.slane %v2335_v22, 4 }
 0x327   : > { %v2226_v47 = vsel %vm13609_vm6, %v2207_v45, %v2225_v40  ;;  %v2345_v50 = vsel %vm13749_vm2, %v2343_v44, %v2344_v28  ;;  %v2569_v51 = vpack.c.b16 %v2565_v11, %v2565_v11  ;;  %v2570_v4 = vpack.c.b16 %v2566_v34, %v2566_v34  ;;  %v2382_v11 = vld [vmem:[#allocation3 + $0xc8] sm:$0x33] }
 0x328   : > { %v2239_v14 = vsel %vm11040_vm13, %v2226_v47, %v2238_v31  ;;  %v2342_v45 = vsel %vm13749_vm2, %v2340_v38, %v2341_v58 }
 0x329   : > { %2240 = vst [vmem:[#allocation3 + $0xa8] sm:$0xff] %v2239_v14  ;;  %v2574_v57 = vpack.i.b16 %v2569_v51, %v2569_v51  ;;  %v2578_v14 = vpack.i.b16 %v2570_v4, %v2570_v4  ;;  %v2390_v4 = vld [vmem:[#allocation2 + $0x28] sm:$0x1] }
 0x32b   : > { %v2215_v20 = vpop.permute.xlu0 %2214  ;;  %v2576_v6 = vperm.slane %v2574_v57, 2  ;;  %v2580_v61 = vperm.slane %v2578_v14, 2 }
 0x32c   : > { %v2221_v15 = vrot.slane %v2215_v20, 4 }
 0x32d   : > { %2356 = vrot.lane.b32.xlu2 %v2345_v50, %s13637_s14  ;;  %v2599_v21 = vunpack.c.l.bf16 %v2576_v6  ;;  %v2600_v33 = vunpack.c.l.bf16 %v2580_v61 }
 0x32e   : > { %v2229_v46 = vsel %vm13623_vm0, %v2220_v1, %v2221_v15  ;;  %2354 = vrot.lane.b32.xlu1 %v2342_v45, %s13637_s14  ;;  %v2424_v1 = vunpack.c.h.bf16 %v11335_v60 }
 0x32f   : > { %v2230_v18 = vsel %vm13609_vm6, %v11303_v10, %v2229_v46  ;;  %vm13618_vm6 = vcmask 1039360  }
 0x330   : > { %2242 = vst [vmem:[#allocation3 + $0xb8] sm:$0x11] %v2230_v18 }
 0x336   : > { %9755 = vrot.lane.b32.xlu1 %v9754_v5, %s13635_s16 }
 0x374   : > { %v2347_v12 = vpop.permute.xlu0 %2346 }
 0x375   : > { %v2358_v15 = vrot.slane %v2347_v12, 4 }
 0x37c   : > { %v11333_v49 = vpop.permute.xlu0 %2352 }
 0x37f   : > { %v2351_v28 = vpop.permute.xlu2 %2350 }
 0x380   : > { %v2360_v50 = vrot.slane %v2351_v28, 4 }
 0x384   : > { %v11339_v54 = vpop.permute.xlu0 %9750 }
 0x385   : > { %v9753_v25 = vunpack.i.h.bf16 %v11339_v54  ;;  %v9752_v10 = vunpack.i.l.bf16 %v11339_v54 }
 0x387   : > { %v2450_v63 = vsel %vm13610_vm5, %v9752_v10, %v9753_v25  ;;  %v2458_v48 = vmul.f32 %v9752_v10, %v2423_v2  ;;  %v2463_v56 = vmul.f32 %v9752_v10, %v2428_v32  ;;  %v2357_v32 = vpop.permute.xlu2 %2356 }
 0x388   : > { %v2459_v7 = vmul.f32 %v2450_v63, %v2424_v1  ;;  %v2464_v41 = vmul.f32 %v2450_v63, %v2429_v59  ;;  %v9759_v59 = vpack.i.bf16 %v2600_v33, %v2599_v21  ;;  %v2363_v13 = vrot.slane %v2357_v32, 4 }
 0x38a   : > { %v2468_v42 = vpack.c.bf16 %v2459_v7, %v2458_v48  ;;  %v2471_v31 = vpack.c.bf16 %v2464_v41, %v2463_v56  ;;  %v2361_v48 = vrot.slane %v11333_v49, 4 }
 0x38c   : > { %v2475_v24 = vshrl.u32 %v2468_v42, 16  ;;  %v2478_v22 = vshll.u32 %v2468_v42, 16  ;;  %v2500_v44 = vshll.u32 %v2471_v31, 16  ;;  %v2379_v42 = vld [vmem:[#allocation3 + $0xc0] sm:$0x33] }
 0x38e   : > { %v2477_v27 = vrot.slane %v2475_v24, 6  ;;  %v2480_v40 = vrot.slane %v2478_v22, 7  ;;  %v2502_v20 = vrot.slane %v2500_v44, 7  ;;  %v2387_v24 = vld [vmem:[#allocation2 + $0x10] sm:$0xf]  ;;  %v2432_v44 = vunpack.c.l.bf16 %v2390_v4 }
 0x38f   : > { %v2427_v51 = vunpack.c.l.bf16 %v2387_v24 }
 0x390   : > { %v2481_v47 = vor.u32 %v2480_v40, %v2477_v27  ;;  %v2389_v40 = vld [vmem:[#allocation2 + $0x20] sm:$0x11] }
 0x391   : > { %v2430_v14 = vunpack.c.l.bf16 %v2389_v40  ;;  %v2431_v28 = vunpack.c.h.bf16 %v2389_v40 }
 0x392   : > { %2516 = vrot.lane.b32.xlu2 %v2481_v47, %s13633_s15  ;;  %v2498_v38 = vrot.slane %v2481_v47, 4 }
 0x394   : > { %v2503_v46 = vsel %vm13750_vm3, %v2498_v38, %v2502_v20 }
 0x398   : > { %v2349_v58 = vpop.permute.xlu1 %2348 }
 0x399   : > { %v2359_v45 = vrot.slane %v2349_v58, 4 }
 0x39a   : > { %2522 = vrot.lane.b32.xlu2 %v2503_v46, %s13633_s15 }
 0x39b   : > { %v2364_v18 = vsel %vm13623_vm0, %v2358_v15, %v2359_v45  ;;  %v2367_v5 = vsel %vm13623_vm0, %v2359_v45, %v2360_v50 }
 0x39c   : > { %v2366_v36 = vsel %vm13611_vm9, %v2347_v12, %v2364_v18  ;;  %v2368_v10 = vsel %vm13611_vm9, %v2349_v58, %v2367_v5 }
 0x39d   : > { %2377 = vst [vmem:[#allocation3 + $0xb0] sm:$0xee] %v2366_v36 }
 0x39e   : > { %2378 = vst [vmem:[#allocation3 + $0xb8] sm:$0xee] %v2368_v10 }
 0x3a0   : > { %v2355_v63 = vpop.permute.xlu1 %2354 }
 0x3a1   : > { %v2362_v7 = vrot.slane %v2355_v63, 4 }
 0x3a2   : > { %9760 = vrot.lane.b32.xlu2 %v9759_v59, %s13631_s20 }
 0x3a3   : > { %v2369_v34 = vsel %vm13623_vm0, %v2361_v48, %v2362_v7  ;;  %v2371_v12 = vsel %vm13623_vm0, %v2362_v7, %v2363_v13 }
 0x3a4   : > { %v2370_v56 = vsel %vm13611_vm9, %v11333_v49, %v2369_v34  ;;  %v2372_v41 = vsel %vm13611_vm9, %v2355_v63, %v2371_v12  ;;  %v2562_v49 = vld [vmem:[%s13557_s4 + $0x18] sm:$0x44]  ;;  %vm13619_vm9 = vcmask 56320  }
 0x3a5   : > { %v2380_v22 = vsel %vm13751_vm10, %v2370_v56, %v2379_v42  ;;  %v2383_v27 = vsel %vm13751_vm10, %v2372_v41, %v2382_v11  ;;  %v2567_v50 = vunpack.c.l.b16 %v2562_v49  ;;  %v2568_v21 = vunpack.c.h.b16 %v2562_v49 }
 0x3a6   : > { %2381 = vst [vmem:[#allocation3 + $0xc0] sm:$0x33] %v2380_v22 }
 0x3a7   : > { %2384 = vst [vmem:[#allocation3 + $0xc8] sm:$0x33] %v2383_v27 }
 0x3a8   : > { %v9756_v31 = vpop.permute.xlu1 %9755 }
 0x3a9   : > { %v9758_v47 = vunpack.i.h.bf16 %v9756_v31  ;;  %v9757_v57 = vunpack.i.l.bf16 %v9756_v31 }
 0x3ab   : > { %v2462_v38 = vmul.f32 %v9758_v47, %v2427_v51  ;;  %v2451_v6 = vsel %vm13610_vm5, %v9753_v25, %v9757_v57  ;;  %v2452_v61 = vsel %vm13610_vm5, %v9757_v57, %v9758_v47  ;;  %v2467_v46 = vmul.f32 %v9758_v47, %v2432_v44 }
 0x3ac   : > { %v2460_v20 = vmul.f32 %v2451_v6, %v11160_v17  ;;  %v2461_v58 = vmul.f32 %v2452_v61, %v11162_v55  ;;  %v2465_v33 = vmul.f32 %v2451_v6, %v2430_v14  ;;  %v2466_v18 = vmul.f32 %v2452_v61, %v2431_v28  ;;  %v2803_v28 = vld [vmem:[%s13557_s4 + $0x10] sm:$0x88] }
 0x3ad   : > { %v2470_v15 = vpack.c.bf16 %v2462_v38, %v2462_v38  ;;  %v2571_v25 = vpack.c.b16 %v2567_v50, %v2567_v50  ;;  %v2473_v13 = vpack.c.bf16 %v2467_v46, %v2467_v46  ;;  %v2572_v17 = vpack.c.b16 %v2568_v21, %v2568_v21  ;;  %v2558_v38 = vld [vmem:[#allocation2 + $0x18] sm:$0x11] }
 0x3ae   : > { %v2469_v45 = vpack.c.bf16 %v2461_v58, %v2460_v20  ;;  %v2472_v55 = vpack.c.bf16 %v2466_v18, %v2465_v33  ;;  %v2807_v58 = vunpack.c.l.b16 %v2803_v28  ;;  %v2594_v50 = vunpack.c.l.bf16 %v2558_v38 }
 0x3af   : > { %v2491_v5 = vshrl.u32 %v2470_v15, 16  ;;  %v2494_v36 = vshll.u32 %v2470_v15, 16  ;;  %v2512_v11 = vshll.u32 %v2473_v13, 16  ;;  %v2582_v34 = vpack.i.b16 %v2571_v25, %v2571_v25 }
 0x3b0   : > { %v2483_v10 = vshrl.u32 %v2469_v45, 16  ;;  %v2486_v32 = vshll.u32 %v2469_v45, 16  ;;  %v2586_v12 = vpack.i.b16 %v2572_v17, %v2572_v17  ;;  %v2506_v56 = vshll.u32 %v2472_v55, 16 }
 0x3b1   : > { %v2493_v54 = vrot.slane %v2491_v5, 6  ;;  %v2496_v59 = vrot.slane %v2494_v36, 7  ;;  %v2514_v22 = vrot.slane %v2512_v11, 7  ;;  %v2584_v27 = vperm.slane %v2582_v34, 2 }
 0x3b2   : > { %v2485_v63 = vrot.slane %v2483_v10, 6  ;;  %v2488_v48 = vrot.slane %v2486_v32, 7  ;;  %v2588_v40 = vperm.slane %v2586_v12, 2  ;;  %v2508_v51 = vrot.slane %v2506_v56, 7 }
 0x3b3   : > { %v2497_v7 = vor.u32 %v2496_v59, %v2493_v54  ;;  %v2601_v47 = vunpack.c.l.bf16 %v2584_v27  ;;  %v2808_v15 = vunpack.c.h.b16 %v2803_v28  ;;  %v2595_v45 = vunpack.c.h.bf16 %v2558_v38  ;;  %v2550_v27 = vld [vmem:[#allocation3 + $0xc8] sm:$0xee] }
 0x3b4   : > { %v2489_v42 = vor.u32 %v2488_v48, %v2485_v63  ;;  %v2602_v57 = vunpack.c.l.bf16 %v2588_v40  ;;  %v2811_v5 = vpack.c.b16 %v2807_v58, %v2807_v58  ;;  %vm13752_vm5 = vnez %v13687_v16 }
 0x3b5   : > { %2520 = vrot.lane.b32.xlu1 %v2497_v7, %s13633_s15  ;;  %v2510_v41 = vrot.slane %v2497_v7, 4  ;;  %v2812_v36 = vpack.c.b16 %v2808_v15, %v2808_v15 }
 0x3b6   : > { %2518 = vrot.lane.b32.xlu0 %v2489_v42, %s13633_s15  ;;  %v2504_v24 = vrot.slane %v2489_v42, 4  ;;  %v9764_v14 = vpack.i.bf16 %v2602_v57, %v2601_v47  ;;  %v2816_v59 = vpack.i.b16 %v2811_v5, %v2811_v5 }
 0x3b7   : > { %v2515_v4 = vsel %vm13750_vm3, %v2510_v41, %v2514_v22  ;;  %v2820_v25 = vpack.i.b16 %v2812_v36, %v2812_v36  ;;  %v2547_v22 = vld [vmem:[#allocation3 + $0xc0] sm:$0xee] }
 0x3b8   : > { %v2509_v31 = vsel %vm13750_vm3, %v2504_v24, %v2508_v51  ;;  %v2818_v13 = vperm.slane %v2816_v59, 3 }
 0x3b9   : > { %v2822_v17 = vperm.slane %v2820_v25, 3 }
 0x3bd   : > { %2526 = vrot.lane.b32.xlu1 %v2515_v4, %s13633_s15 }
 0x3be   : > { %2524 = vrot.lane.b32.xlu0 %v2509_v31, %s13633_s15 }
 0x3c6   : > { %9765 = vrot.lane.b32.xlu0 %v9764_v14, %s13631_s20 }
 0x3ec   : > { %v2517_v44 = vpop.permute.xlu2 %2516 }
 0x3ed   : > { %v2528_v12 = vrot.slane %v2517_v44, 4 }
 0x3f4   : > { %v2523_v49 = vpop.permute.xlu2 %2522 }
 0x3f5   : > { %v2531_v28 = vrot.slane %v2523_v49, 4 }
 0x3fc   : > { %v11393_v6 = vpop.permute.xlu2 %9760 }
 0x3fd   : > { %v9763_v61 = vunpack.i.h.bf16 %v11393_v6  ;;  %v9762_v20 = vunpack.i.l.bf16 %v11393_v6 }
 0x3ff   : > { %v2616_v46 = vsel %vm13618_vm6, %v9762_v20, %v9763_v61  ;;  %v2624_v21 = vmul.f32 %v9762_v20, %v2423_v2  ;;  %v2629_v10 = vmul.f32 %v9762_v20, %v2594_v50  ;;  %v2841_v2 = vunpack.c.l.bf16 %v2818_v13  ;;  %v11421_v50 = vld [vmem:[#allocation2 + $0x10] sm:$0xff]  }
 0x400   : > { %v2625_v33 = vmul.f32 %v2616_v46, %v2424_v1  ;;  %v2630_v32 = vmul.f32 %v2616_v46, %v2595_v45  ;;  %v2842_v1 = vunpack.c.l.bf16 %v2822_v17  ;;  %v2556_v45 = vld [vmem:[#allocation2 + $0x8] sm:$0xff] }
 0x401   : > { %v2560_v46 = vld [vmem:[#allocation2 + $0x28] sm:$0x1]  ;;  %v2591_v36 = vunpack.c.l.bf16 %v2556_v45 }
 0x402   : > { %v2634_v18 = vpack.c.bf16 %v2625_v33, %v2624_v21  ;;  %v2637_v63 = vpack.c.bf16 %v2630_v32, %v2629_v10  ;;  %v9769_v55 = vpack.i.bf16 %v2842_v1, %v2841_v2  ;;  %v2593_v21 = vunpack.c.l.bf16 %v11421_v50  ;;  %v2559_v33 = vld [vmem:[#allocation2 + $0x20] sm:$0x11] }
 0x403   : > { %v2592_v10 = vunpack.c.h.bf16 %v2556_v45  ;;  %v2598_v32 = vunpack.c.l.bf16 %v2560_v46  ;;  %v2596_v59 = vunpack.c.l.bf16 %v2559_v33  ;;  %v2597_v13 = vunpack.c.h.bf16 %v2559_v33  ;;  %v2701_v45 = vld [vmem:[%s13557_s4 + $0x10] sm:$0x44]  ;;  %v2945_v46 = vld [vmem:[%s13557_s4 + $0x10] sm:$0x88] }
 0x404   : > { %v2646_v54 = vrot.slane %v2634_v18, 6  ;;  %v2650_v7 = vrot.slane %v2637_v63, 6  ;;  %v2804_v18 = vld [vmem:[%s13557_s4 + $0x18] sm:$0x88]  ;;  %v2706_v33 = vunpack.c.h.b16 %v2701_v45 }
 0x405   : > { %v2809_v25 = vunpack.c.l.b16 %v2804_v18  ;;  %v2810_v63 = vunpack.c.h.b16 %v2804_v18  ;;  %v2797_v18 = vld [vmem:[#allocation2 + $0x4] sm:$0xff] }
 0x406   : > { %2658 = vrot.lane.b32.xlu1 %v2646_v54, %s13629_s18  ;;  %v2649_v48 = vrot.slane %v2646_v54, 4 }
 0x408   : > { %v2651_v60 = vsel %vm13752_vm5, %v2649_v48, %v2650_v7 }
 0x40e   : > { %2664 = vrot.lane.b32.xlu1 %v2651_v60, %s13629_s18 }
 0x416   : > { %9770 = vrot.lane.b32.xlu1 %v9769_v55, %s13629_s18 }
 0x427   : > { %v2521_v42 = vpop.permute.xlu1 %2520 }
 0x428   : > { %v2530_v11 = vrot.slane %v2521_v42, 4  ;;  %v2519_v34 = vpop.permute.xlu0 %2518 }
 0x429   : > { %v2529_v56 = vrot.slane %v2519_v34, 4 }
 0x42b   : > { %v2534_v41 = vsel %vm13623_vm0, %v2528_v12, %v2529_v56  ;;  %v2537_v24 = vsel %vm13623_vm0, %v2529_v56, %v2530_v11  ;;  %v2813_v11 = vpack.c.b16 %v2809_v25, %v2809_v25 }
 0x42c   : > { %v2536_v40 = vsel %vm13619_vm9, %v2517_v44, %v2534_v41  ;;  %v2538_v51 = vsel %vm13619_vm9, %v2519_v34, %v2537_v24  ;;  %v2814_v34 = vpack.c.b16 %v2810_v63, %v2810_v63 }
 0x42d   : > { %v2548_v4 = vsel %vm11068_vm4, %v2536_v40, %v2547_v22  ;;  %v2551_v31 = vsel %vm11068_vm4, %v2538_v51, %v2550_v27  ;;  %v2824_v6 = vpack.i.b16 %v2813_v11, %v2813_v11 }
 0x42e   : > { %2549 = vst [vmem:[#allocation3 + $0xc0] sm:$0xee] %v2548_v4 }
 0x42f   : > { %2552 = vst [vmem:[#allocation3 + $0xc8] sm:$0xee] %v2551_v31  ;;  %v2527_v47 = vpop.permute.xlu1 %2526  ;;  %v2826_v31 = vperm.slane %v2824_v6, 3 }
 0x430   : > { %v2533_v57 = vrot.slane %v2527_v47, 4  ;;  %v2525_v14 = vpop.permute.xlu0 %2524 }
 0x431   : > { %v2532_v38 = vrot.slane %v2525_v14, 4 }
 0x433   : > { %v2539_v20 = vsel %vm13623_vm0, %v2531_v28, %v2532_v38  ;;  %v2541_v58 = vsel %vm13623_vm0, %v2532_v38, %v2533_v57  ;;  %v2843_v38 = vunpack.c.l.bf16 %v2826_v31 }
 0x434   : > { %v2540_v44 = vsel %vm13619_vm9, %v2523_v49, %v2539_v20  ;;  %v2542_v15 = vsel %vm13619_vm9, %v2525_v14, %v2541_v58  ;;  %vm13753_vm9 = vnez %v13691_v23 }
 0x435   : > { %2553 = vst [vmem:[#allocation3 + $0xd0] sm:$0x33] %v2540_v44 }
 0x436   : > { %2554 = vst [vmem:[#allocation3 + $0xd8] sm:$0x33] %v2542_v15 }
 0x438   : > { %v9766_v5 = vpop.permute.xlu0 %9765 }
 0x439   : > { %v9768_v49 = vunpack.i.h.bf16 %v9766_v5  ;;  %v9767_v54 = vunpack.i.l.bf16 %v9766_v5 }
 0x43b   : > { %v2628_v48 = vmul.f32 %v9768_v49, %v2593_v21  ;;  %v2617_v17 = vsel %vm13618_vm6, %v9763_v61, %v9767_v54  ;;  %v2618_v7 = vsel %vm13618_vm6, %v9767_v54, %v9768_v49  ;;  %v2633_v1 = vmul.f32 %v9768_v49, %v2598_v32  ;;  %v2800_v49 = vld [vmem:[#allocation2 + $0x1c] sm:$0x11] }
 0x43c   : > { %v2626_v60 = vmul.f32 %v2617_v17, %v2591_v36  ;;  %v2627_v2 = vmul.f32 %v2618_v7, %v2592_v10  ;;  %v2631_v56 = vmul.f32 %v2617_v17, %v2596_v59  ;;  %v2632_v41 = vmul.f32 %v2618_v7, %v2597_v13  ;;  %v2699_v13 = vld [vmem:[#allocation2 + $0x1c] sm:$0x11] }
 0x43d   : > { %v2636_v55 = vpack.c.bf16 %v2628_v48, %v2628_v48  ;;  %v2639_v22 = vpack.c.bf16 %v2633_v1, %v2633_v1  ;;  %v2828_v61 = vpack.i.b16 %v2814_v34, %v2814_v34  ;;  %v2705_v21 = vunpack.c.l.b16 %v2701_v45 }
 0x43e   : > { %v2635_v42 = vpack.c.bf16 %v2627_v2, %v2626_v60  ;;  %v2638_v27 = vpack.c.bf16 %v2632_v41, %v2631_v56  ;;  %v2710_v36 = vpack.c.b16 %v2706_v33, %v2706_v33  ;;  %v2949_v10 = vunpack.c.l.b16 %v2945_v46 }
 0x43f   : > { %v2648_v12 = vrot.slane %v2636_v55, 6  ;;  %v2656_v51 = vrot.slane %v2639_v22, 6  ;;  %v2830_v47 = vperm.slane %v2828_v61, 3  ;;  %v2709_v5 = vpack.c.b16 %v2705_v21, %v2705_v21 }
 0x440   : > { %v2647_v24 = vrot.slane %v2635_v42, 6  ;;  %v2653_v57 = vrot.slane %v2638_v27, 6  ;;  %v2950_v32 = vunpack.c.h.b16 %v2945_v46  ;;  %v11450_v54 = vunpack.c.l.bf16 %v2797_v18 }
 0x441   : > { %2662 = vrot.lane.b32.xlu0 %v2648_v12, %s13629_s18  ;;  %v2655_v40 = vrot.slane %v2648_v12, 4  ;;  %v2844_v20 = vunpack.c.l.bf16 %v2830_v47  ;;  %v2714_v59 = vshrl.u32 %v2709_v5, 16  ;;  %v2719_v25 = vshrl.u32 %v2710_v36, 16 }
 0x442   : > { %2660 = vrot.lane.b32.xlu2 %v2647_v24, %s13629_s18  ;;  %v2652_v4 = vrot.slane %v2647_v24, 4  ;;  %vm13620_vm6 = vcmask 7168   ;;  %v11454_v48 = vunpack.c.h.bf16 %v2797_v18  ;;  %v2836_v1 = vunpack.c.l.bf16 %v2800_v49 }
 0x443   : > { %v2657_v14 = vsel %vm13752_vm5, %v2655_v40, %v2656_v51  ;;  %v9774_v58 = vpack.i.bf16 %v2844_v20, %v2843_v38  ;;  %v2715_v60 = vpack.i.b16 %v2714_v59, %v2714_v59  ;;  %v2720_v2 = vpack.i.b16 %v2719_v25, %v2719_v25 }
 0x444   : > { %v2654_v28 = vsel %vm13752_vm5, %v2652_v4, %v2653_v57  ;;  %v2837_v55 = vunpack.c.h.bf16 %v2800_v49  ;;  %v2953_v42 = vpack.c.b16 %v2949_v10, %v2949_v10  ;;  %v2954_v11 = vpack.c.b16 %v2950_v32, %v2950_v32 }
 0x445   : > { %v2717_v56 = vperm.slane %v2715_v60, 2  ;;  %v2737_v41 = vunpack.c.l.bf16 %v2699_v13  ;;  %v2722_v22 = vperm.slane %v2720_v2, 2  ;;  %v2738_v6 = vunpack.c.h.bf16 %v2699_v13 }
 0x446   : > { %v2958_v51 = vshrl.u32 %v2953_v42, 16  ;;  %v2963_v4 = vshrl.u32 %v2954_v11, 16  ;;  %vm13756_vm5 = vnez %v13708_v9 }
 0x447   : > { %v2741_v61 = vunpack.c.l.bf16 %v2717_v56  ;;  %v2742_v47 = vunpack.c.l.bf16 %v2722_v22 }
 0x448   : > { %v2964_v45 = vpack.i.b16 %v2963_v4, %v2963_v4 }
 0x449   : > { %2668 = vrot.lane.b32.xlu0 %v2657_v14, %s13629_s18  ;;  %v2745_v57 = vmul.f32 %v11450_v54, %v2741_v61  ;;  %v2749_v14 = vmul.f32 %v2741_v61, %v2737_v41  ;;  %v2746_v38 = vmul.f32 %v11454_v48, %v2742_v47  ;;  %v2750_v20 = vmul.f32 %v2742_v47, %v2738_v6 }
 0x44a   : > { %2666 = vrot.lane.b32.xlu2 %v2654_v28, %s13629_s18  ;;  %v2966_v49 = vperm.slane %v2964_v45, 3 }
 0x44b   : > { %v2753_v21 = vpack.c.bf16 %v2746_v38, %v2745_v57  ;;  %v2755_v33 = vpack.c.bf16 %v2750_v20, %v2749_v14 }
 0x44c   : > { %v2988_v42 = vunpack.c.l.bf16 %v2966_v49 }
 0x44d   : > { %v2758_v5 = vshrl.u32 %v2753_v21, 16  ;;  %v2761_v36 = vshll.u32 %v2753_v21, 16  ;;  %v2775_v10 = vshll.u32 %v2755_v33, 16 }
 0x44f   : > { %v2760_v25 = vrot.slane %v2758_v5, 5  ;;  %v2763_v13 = vrot.slane %v2761_v36, 6  ;;  %v2777_v2 = vrot.slane %v2775_v10, 6  ;;  %v2691_v10 = vld [vmem:[#allocation3 + $0xe0] sm:$0x77] }
 0x451   : > { %v11468_v60 = vor.u32 %v2763_v13, %v2760_v25 }
 0x452   : > { %9775 = vrot.lane.b32.xlu2 %v9774_v58, %s13629_s18  ;;  %v2959_v58 = vpack.i.b16 %v2958_v51, %v2958_v51  ;;  %s13829_s18 = smov 64  }
 0x454   : > { %v2961_v32 = vperm.slane %v2959_v58, 3 }
 0x478   : > { %v11440_v44 = vpop.permute.xlu1 %2658 }
 0x479   : > { %v2670_v22 = vrot.slane %v11440_v44, 4 }
 0x480   : > { %v11442_v15 = vpop.permute.xlu1 %2664 }
 0x488   : > { %v11452_v63 = vpop.permute.xlu1 %9770 }
 0x489   : > { %v9773_v17 = vunpack.i.h.bf16 %v11452_v63  ;;  %v9772_v7 = vunpack.i.l.bf16 %v11452_v63 }
 0x48b   : > { %v2858_v34 = vsel %vm13620_vm6, %v9772_v7, %v9773_v17  ;;  %v2866_v12 = vmul.f32 %v9772_v7, %v11450_v54  ;;  %v2871_v27 = vmul.f32 %v9772_v7, %v2836_v1  ;;  %v2702_v1 = vld [vmem:[%s13557_s4 + $0x18] sm:$0x44]  ;;  %vm13754_vm6 = vnez %v13703_v8  ;;  %v4022_v8 = vld [vmem:[#allocation2 + $0x1c] sm:$0x11] }
 0x48c   : > { %v2867_v24 = vmul.f32 %v2858_v34, %v11454_v48  ;;  %v2872_v31 = vmul.f32 %v2858_v34, %v2837_v55  ;;  %v2987_v55 = vunpack.c.l.bf16 %v2961_v32  ;;  %v2707_v11 = vunpack.c.l.b16 %v2702_v1 }
 0x48d   : > { %v2708_v34 = vunpack.c.h.b16 %v2702_v1 }
 0x48e   : > { %v2876_v40 = vpack.c.bf16 %v2867_v24, %v2866_v12  ;;  %v2879_v46 = vpack.c.bf16 %v2872_v31, %v2871_v27  ;;  %v2773_v12 = vrot.slane %v11468_v60, 4  ;;  %v2711_v41 = vpack.c.b16 %v2707_v11, %v2707_v11  ;;  %v2700_v31 = vld [vmem:[#allocation2 + $0x24] sm:$0x11] }
 0x48f   : > { %v2712_v24 = vpack.c.b16 %v2708_v34, %v2708_v34  ;;  %v9779_v27 = vpack.i.bf16 %v2988_v42, %v2987_v55  ;;  %v2739_v58 = vunpack.c.l.bf16 %v2700_v31  ;;  %v2740_v45 = vunpack.c.h.bf16 %v2700_v31 }
 0x490   : > { %v2888_v28 = vrot.slane %v2876_v40, 5  ;;  %v2892_v59 = vrot.slane %v2879_v46, 5  ;;  %v2778_v61 = vsel %vm13754_vm6, %v2773_v12, %v2777_v2  ;;  %v2724_v40 = vshrl.u32 %v2711_v41, 16  ;;  %v2801_v41 = vld [vmem:[#allocation2 + $0x24] sm:$0x11] }
 0x491   : > { %2795 = vst [vmem:[#allocation3 + $0xf0] sm:$0x77] %v2778_v61  ;;  %v2729_v51 = vshrl.u32 %v2712_v24, 16  ;;  %v2835_v12 = vunpack.c.h.bf16 %v11421_v50  ;;  %v2802_v24 = vld [vmem:[#allocation2 + $0x2c] sm:$0x1] }
 0x492   : > { %2900 = vrot.lane.b32.xlu0 %v2888_v28, %s13631_s20  ;;  %v2891_v18 = vrot.slane %v2888_v28, 4  ;;  %v2725_v57 = vpack.i.b16 %v2724_v40, %v2724_v40  ;;  %v2798_v28 = vld [vmem:[#allocation2 + $0xc] sm:$0xff]  ;;  %v2840_v40 = vunpack.c.l.bf16 %v2802_v24 }
 0x493   : > { %v2730_v14 = vpack.i.b16 %v2729_v51, %v2729_v51  ;;  %v11489_v21 = vunpack.c.l.bf16 %v2798_v28  ;;  %v11491_v33 = vunpack.c.h.bf16 %v2798_v28 }
 0x494   : > { %v2893_v7 = vsel %vm13753_vm9, %v2891_v18, %v2892_v59  ;;  %v2727_v38 = vperm.slane %v2725_v57, 2  ;;  %v2839_v57 = vunpack.c.h.bf16 %v2801_v41 }
 0x495   : > { %v2732_v20 = vperm.slane %v2730_v14, 2 }
 0x496   : > { %v2743_v18 = vunpack.c.l.bf16 %v2727_v38 }
 0x497   : > { %v2744_v5 = vunpack.c.l.bf16 %v2732_v20 }
 0x498   : > { %v2747_v32 = vmul.f32 %v11489_v21, %v2743_v18  ;;  %v2751_v59 = vmul.f32 %v2743_v18, %v2739_v58 }
 0x499   : > { %v2748_v49 = vmul.f32 %v11491_v33, %v2744_v5  ;;  %v2752_v25 = vmul.f32 %v2744_v5, %v2740_v45 }
 0x49a   : > { %2906 = vrot.lane.b32.xlu0 %v2893_v7, %s13631_s20 }
 0x49b   : > { %v2754_v2 = vpack.c.bf16 %v2748_v49, %v2747_v32  ;;  %v2756_v1 = vpack.c.bf16 %v2752_v25, %v2751_v59 }
 0x49c   : > { %v11475_v56 = vpop.permute.xlu2 %2660 }
 0x49d   : > { %v2671_v6 = vrot.slane %v11475_v56, 4  ;;  %v2766_v42 = vshrl.u32 %v2754_v2, 16  ;;  %v2769_v11 = vshll.u32 %v2754_v2, 16  ;;  %v2781_v34 = vshll.u32 %v2756_v1, 16 }
 0x49f   : > { %v2676_v4 = vsel %vm13623_vm0, %v2670_v22, %v2671_v6  ;;  %v2946_v22 = vld [vmem:[%s13557_s4 + $0x18] sm:$0x88]  ;;  %v2783_v14 = vrot.slane %v2781_v34, 6 }
 0x4a0   : > { %v2678_v47 = vsel %vm13755_vm1, %v11440_v44, %v2676_v4  ;;  %v2673_v44 = vrot.slane %v11442_v15, 4  ;;  %v2951_v31 = vunpack.c.l.b16 %v2946_v22  ;;  %v2952_v28 = vunpack.c.h.b16 %v2946_v22 }
 0x4a1   : > { %2689 = vst [vmem:[#allocation3 + $0xd0] sm:$0xcc] %v2678_v47  ;;  %v2838_v47 = vunpack.c.l.bf16 %v2801_v41 }
 0x4a2   : > { %9780 = vrot.lane.b32.xlu0 %v9779_v27, %s13633_s15  ;;  %v2768_v27 = vrot.slane %v2766_v42, 5  ;;  %v2955_v49 = vpack.c.b16 %v2951_v31, %v2951_v31 }
 0x4a4   : > { %v11487_v46 = vpop.permute.xlu2 %2666 }
 0x4a5   : > { %v2674_v36 = vrot.slane %v11487_v46, 4 }
 0x4a7   : > { %v2681_v13 = vsel %vm13623_vm0, %v2673_v44, %v2674_v36  ;;  %vm13757_vm0 = vmmov %vm13755_vm1 }
 0x4a8   : > { %v2682_v7 = vsel %vm13755_vm1, %v11442_v15, %v2681_v13  ;;  %v2771_v15 = vrot.slane %v2769_v11, 6  ;;  %v2956_v13 = vpack.c.b16 %v2952_v28, %v2952_v28 }
 0x4a9   : > { %v2692_v55 = vsel %vm13756_vm5, %v2682_v7, %v2691_v10 }
 0x4aa   : > { %2693 = vst [vmem:[#allocation3 + $0xe0] sm:$0x77] %v2692_v55  ;;  %v2772_v58 = vor.u32 %v2771_v15, %v2768_v27  ;;  %v2968_v55 = vshrl.u32 %v2955_v49, 16 }
 0x4ac   : > { %v9776_v61 = vpop.permute.xlu2 %9775  ;;  %v2779_v32 = vrot.slane %v2772_v58, 4  ;;  %v2969_v41 = vpack.i.b16 %v2968_v55, %v2968_v55 }
 0x4ad   : > { %v9778_v51 = vunpack.i.h.bf16 %v9776_v61  ;;  %v9777_v4 = vunpack.i.l.bf16 %v9776_v61 }
 0x4ae   : > { %v2784_v1 = vsel %vm13754_vm6, %v2779_v32, %v2783_v14  ;;  %v2694_v14 = vld [vmem:[#allocation3 + $0xe8] sm:$0x77] }
 0x4af   : > { %v2870_v38 = vmul.f32 %v9778_v51, %v2835_v12  ;;  %v2859_v50 = vsel %vm13755_vm1, %v9773_v17, %v9777_v4  ;;  %v2860_v20 = vsel %vm13757_vm0, %v9777_v4, %v9778_v51  ;;  %v2875_v5 = vmul.f32 %v9778_v51, %v2840_v40  ;;  %2796 = vst [vmem:[#allocation3 + $0xf8] sm:$0x77] %v2784_v1  ;;  %v2942_v32 = vld [vmem:[#allocation2 + $0x1c] sm:$0x11] }
 0x4b0   : > { %v2868_v45 = vmul.f32 %v2859_v50, %v11489_v21  ;;  %v2869_v18 = vmul.f32 %v2860_v20, %v11491_v33  ;;  %v2873_v25 = vmul.f32 %v2859_v50, %v2838_v47  ;;  %v2874_v2 = vmul.f32 %v2860_v20, %v2839_v57 }
 0x4b1   : > { %v2789_v44 = vld [vmem:[#allocation3 + $0xe0] sm:$0xcc]  ;;  %v2878_v10 = vpack.c.bf16 %v2870_v38, %v2870_v38  ;;  %v2881_v34 = vpack.c.bf16 %v2875_v5, %v2875_v5  ;;  %v2973_v12 = vshrl.u32 %v2956_v13, 16  ;;  %vm13758_vm0 = vcmask 1043456  }
 0x4b2   : > { %v2790_v59 = vsel %vm11063_vm11, %v11468_v60, %v2789_v44  ;;  %v2877_v63 = vpack.c.bf16 %v2869_v18, %v2868_v45  ;;  %v2880_v61 = vpack.c.bf16 %v2874_v2, %v2873_v25  ;;  %v2971_v51 = vperm.slane %v2969_v41, 3 }
 0x4b3   : > { %2791 = vst [vmem:[#allocation3 + $0xe0] sm:$0xcc] %v2790_v59  ;;  %v2663_v17 = vpop.permute.xlu0 %2662  ;;  %v2890_v7 = vrot.slane %v2878_v10, 5  ;;  %v2974_v24 = vpack.i.b16 %v2973_v12, %v2973_v12  ;;  %v2898_v15 = vrot.slane %v2881_v34, 5  ;;  %v2982_v49 = vunpack.c.l.bf16 %v2942_v32 }
 0x4b4   : > { %v2672_v42 = vrot.slane %v2663_v17, 4  ;;  %v2889_v11 = vrot.slane %v2877_v63, 5  ;;  %v2895_v47 = vrot.slane %v2880_v61, 5  ;;  %v2989_v38 = vunpack.c.l.bf16 %v2971_v51 }
 0x4b5   : > { %2904 = vrot.lane.b32.xlu2 %v2890_v7, %s13631_s20  ;;  %v2897_v27 = vrot.slane %v2890_v7, 4  ;;  %v2976_v4 = vperm.slane %v2974_v24, 3  ;;  %v2983_v59 = vunpack.c.h.bf16 %v2942_v32 }
 0x4b6   : > { %v2679_v60 = vsel %vm13758_vm0, %v2671_v6, %v2672_v42  ;;  %2902 = vrot.lane.b32.xlu1 %v2889_v11, %s13631_s20  ;;  %v2894_v40 = vrot.slane %v2889_v11, 4 }
 0x4b7   : > { %v2680_v22 = vsel %vm13755_vm1, %v11475_v56, %v2679_v60  ;;  %v2899_v6 = vsel %vm13753_vm9, %v2897_v27, %v2898_v15  ;;  %v2990_v50 = vunpack.c.l.bf16 %v2976_v4 }
 0x4b8   : > { %2690 = vst [vmem:[#allocation3 + $0xd8] sm:$0xcc] %v2680_v22  ;;  %v2896_v28 = vsel %vm13753_vm9, %v2894_v40, %v2895_v47  ;;  %vm13762_vm9 = vcmask 1039360  }
 0x4b9   : > { %v9784_v18 = vpack.i.bf16 %v2990_v50, %v2989_v38  ;;  %v6676_v38 = vld [vmem:[%s13557_s4 + $0x10] sm:$0x22] }
 0x4bb   : > { %v2669_v31 = vpop.permute.xlu0 %2668 }
 0x4bc   : > { %v2675_v57 = vrot.slane %v2669_v31, 4 }
 0x4bd   : > { %2910 = vrot.lane.b32.xlu2 %v2899_v6, %s13631_s20 }
 0x4be   : > { %v2683_v56 = vsel %vm13758_vm0, %v2674_v36, %v2675_v57  ;;  %2908 = vrot.lane.b32.xlu1 %v2896_v28, %s13631_s20  ;;  %vm13759_vm0 = vcmask 56320   ;;  %s13824_s20 = smov 65  }
 0x4bf   : > { %v2684_v20 = vsel %vm13755_vm1, %v11487_v46, %v2683_v56  ;;  %v3115_v46 = vld [vmem:[%s13557_s4 + $0x20] sm:$0x11]  ;;  %vm13760_vm1 = vcmask 1043456  }
 0x4c0   : > { %v2695_v45 = vsel %vm13756_vm5, %v2684_v20, %v2694_v14  ;;  %v3119_v17 = vunpack.c.l.b16 %v3115_v46  ;;  %v3120_v7 = vunpack.c.h.b16 %v3115_v46 }
 0x4c1   : > { %2696 = vst [vmem:[#allocation3 + $0xe8] sm:$0x77] %v2695_v45 }
 0x4c2   : > { %v3123_v11 = vpack.c.b16 %v3119_v17, %v3119_v17  ;;  %v3124_v34 = vpack.c.b16 %v3120_v7, %v3120_v7 }
 0x4c4   : > { %v3128_v22 = vpack.i.b16 %v3123_v11, %v3123_v11  ;;  %v3132_v61 = vpack.i.b16 %v3124_v34, %v3124_v34 }
 0x4c6   : > { %9785 = vrot.lane.b32.xlu1 %v9784_v18, %s13633_s15  ;;  %v3130_v4 = vperm.slane %v3128_v22, 0  ;;  %v3134_v31 = vperm.slane %v3132_v61, 0 }
 0x4c8   : > { %v2792_v5 = vld [vmem:[#allocation3 + $0xe8] sm:$0xcc]  ;;  %v3153_v28 = vunpack.c.l.bf16 %v3130_v4  ;;  %v3154_v56 = vunpack.c.l.bf16 %v3134_v31 }
 0x4c9   : > { %v2793_v44 = vsel %vm11063_vm11, %v2772_v58, %v2792_v5  ;;  %vm13763_vm11 = vmmov %vm13762_vm9 }
 0x4ca   : > { %2794 = vst [vmem:[#allocation3 + $0xe8] sm:$0xcc] %v2793_v44  ;;  %v9799_v5 = vpack.i.bf16 %v3154_v56, %v3153_v28  ;;  %v6680_v44 = vunpack.c.l.b16 %v6676_v38  ;;  %v2944_v28 = vld [vmem:[#allocation2 + $0x2c] sm:$0x1]  ;;  %v9207_v38 = vld [vmem:[#allocation3 + $0xc0] sm:$0xf] }
 0x4cc   : > { %v6684_v17 = vpack.c.b16 %v6680_v44, %v6680_v44  ;;  %v9530_v44 = vld [vmem:[#allocation3 + $0xac] sm:$0xf0] }
 0x4ce   : > { %v6689_v11 = vshrl.u32 %v6684_v17, 16 }
 0x504   : > { %v2901_v36 = vpop.permute.xlu0 %2900 }
 0x505   : > { %v2912_v20 = vrot.slane %v2901_v36, 4 }
 0x50c   : > { %v11542_v10 = vpop.permute.xlu0 %2906 }
 0x50f   : > { %v2905_v6 = vpop.permute.xlu2 %2904 }
 0x510   : > { %v2914_v45 = vrot.slane %v2905_v6, 4  ;;  %v6690_v6 = vpack.i.b16 %v6689_v11, %v6689_v11  ;;  %v9528_v11 = vld [vmem:[#allocation3 + $0xa4] sm:$0xf] }
 0x514   : > { %v11547_v25 = vpop.permute.xlu0 %9780 }
 0x515   : > { %v9783_v63 = vunpack.i.h.bf16 %v11547_v25  ;;  %v9782_v13 = vunpack.i.l.bf16 %v11547_v25 }
 0x517   : > { %v3004_v58 = vsel %vm13759_vm0, %v9782_v13, %v9783_v63  ;;  %v3012_v2 = vmul.f32 %v9782_v13, %v11450_v54  ;;  %v3017_v1 = vmul.f32 %v9782_v13, %v2982_v49  ;;  %vm13761_vm0 = vmmov %vm13760_vm1  ;;  %v2911_v13 = vpop.permute.xlu2 %2910 }
 0x518   : > { %v3013_v55 = vmul.f32 %v3004_v58, %v11454_v48  ;;  %v3018_v42 = vmul.f32 %v3004_v58, %v2983_v59  ;;  %v2915_v58 = vrot.slane %v11542_v10, 4 }
 0x51a   : > { %v3022_v12 = vpack.c.bf16 %v3013_v55, %v3012_v2  ;;  %v3025_v60 = vpack.c.bf16 %v3018_v42, %v3017_v1  ;;  %v2917_v2 = vrot.slane %v2911_v13, 4  ;;  %v2933_v55 = vld [vmem:[#allocation3 + $0x100] sm:$0xff]  ;;  %v2936_v42 = vld [vmem:[#allocation3 + $0x108] sm:$0xff]  ;;  %v3116_v13 = vld [vmem:[%s13557_s4 + $0x28] sm:$0x11] }
 0x51c   : > { %v3029_v41 = vshll.u32 %v3022_v12, 16  ;;  %v3040_v24 = vshrl.u32 %v3022_v12, 16  ;;  %v3046_v40 = vshll.u32 %v3025_v60, 16  ;;  %v9223_v12 = vld [vmem:[#allocation3 + $0xe0] sm:$0xf] }
 0x51d   : > { %v9536_v60 = vld [vmem:[#allocation3 + $0xe4] sm:$0xf] }
 0x51e   : > { %v11556_v27 = vrot.slane %v3029_v41, 5  ;;  %v3042_v15 = vrot.slane %v3040_v24, 4  ;;  %v3048_v57 = vrot.slane %v3046_v40, 5 }
 0x520   : > { %v3043_v51 = vor.u32 %v3042_v15, %v11556_v27  ;;  %v2941_v15 = vld [vmem:[#allocation2 + $0x14] sm:$0xf] }
 0x522   : > { %v3044_v47 = vrot.slane %v3043_v51, 4 }
 0x524   : > { %v3049_v14 = vsel %vm11126_vm7, %v3044_v47, %v3048_v57  ;;  %v9534_v47 = vld [vmem:[#allocation3 + $0xcc] sm:$0xf0]  ;;  %v9209_v57 = vld [vmem:[#allocation3 + $0xd0] sm:$0xf0] }
 0x525   : > { %3076 = vrot.lane.b32.xlu1 %v3049_v14, %s13635_s16  ;;  %v2981_v14 = vunpack.c.l.bf16 %v2941_v15 }
 0x528   : > { %v2903_v50 = vpop.permute.xlu1 %2902 }
 0x529   : > { %v2913_v18 = vrot.slane %v2903_v50, 4 }
 0x52b   : > { %v2918_v32 = vsel %vm13760_vm1, %v2912_v20, %v2913_v18  ;;  %v2921_v46 = vsel %vm13761_vm0, %v2913_v18, %v2914_v45  ;;  %vm13764_vm1 = vmmov %vm13761_vm0  ;;  %v9208_v18 = vor.u32 %v9534_v47, %v9207_v38 }
 0x52c   : > { %v2920_v49 = vsel %vm13762_vm9, %v2901_v36, %v2918_v32  ;;  %v2922_v59 = vsel %vm13763_vm11, %v2903_v50, %v2921_v46  ;;  %vm13765_vm11 = vmmov %vm13762_vm9  ;;  %v9532_v50 = vld [vmem:[#allocation3 + $0xc4] sm:$0xf]  ;;  %v9193_v46 = vld [vmem:[#allocation3 + $0xb0] sm:$0xf0] }
 0x52d   : > { %2931 = vst [vmem:[#allocation3 + $0xf0] sm:$0x88] %v2920_v49  ;;  %9800 = vrot.lane.b32.xlu1 %v9799_v5, %s13637_s14  ;;  %v9212_v5 = vor.u32 %v9532_v50, %v9209_v57  ;;  %v6692_v49 = vperm.slane %v6690_v6, 1  ;;  %v9524_v57 = vld [vmem:[#allocation3 + $0x84] sm:$0xf] }
 0x52e   : > { %2932 = vst [vmem:[#allocation3 + $0xf8] sm:$0x88] %v2922_v59  ;;  %v2986_v59 = vunpack.c.l.bf16 %v2944_v28 }
 0x530   : > { %v2909_v7 = vpop.permute.xlu1 %2908 }
 0x531   : > { %v2916_v1 = vrot.slane %v2909_v7, 4 }
 0x533   : > { %v2923_v34 = vsel %vm13764_vm1, %v2915_v58, %v2916_v1  ;;  %v2925_v36 = vsel %vm13761_vm0, %v2916_v1, %v2917_v2  ;;  %vm13766_vm1 = vcmask 56320  }
 0x534   : > { %v2924_v41 = vsel %vm13762_vm9, %v11542_v10, %v2923_v34  ;;  %v2926_v24 = vsel %vm13765_vm11, %v2909_v7, %v2925_v36  ;;  %v9538_v22 = vld [vmem:[#allocation3 + $0xec] sm:$0xf0]  ;;  %v9225_v61 = vld [vmem:[#allocation3 + $0xf0] sm:$0xf0]  ;;  %vm13767_vm0 = vmmov %vm13766_vm1  ;;  %v9196_v36 = vor.u32 %v9528_v11, %v9193_v46  ;;  %vm13768_vm9 = vcmask 64512  }
 0x535   : > { %v2934_v40 = vsel %vm11146_vm14, %v2924_v41, %v2933_v55  ;;  %v2937_v51 = vsel %vm11146_vm14, %v2926_v24, %v2936_v42  ;;  %v9224_v4 = vor.u32 %v9538_v22, %v9223_v12  ;;  %v9228_v31 = vor.u32 %v9536_v60, %v9225_v61  ;;  %v2943_v10 = vld [vmem:[#allocation2 + $0x24] sm:$0x11]  ;;  %v9191_v42 = vld [vmem:[#allocation3 + $0xa0] sm:$0xf]  ;;  %v9526_v12 = vld [vmem:[#allocation3 + $0x8c] sm:$0xf0] }
 0x536   : > { %2935 = vst [vmem:[#allocation3 + $0x100] sm:$0xff] %v2934_v40  ;;  %v2984_v32 = vunpack.c.l.bf16 %v2943_v10  ;;  %v2985_v17 = vunpack.c.h.bf16 %v2943_v10  ;;  %v9192_v34 = vor.u32 %v9530_v44, %v9191_v42  ;;  %v3121_v41 = vunpack.c.l.b16 %v3116_v13  ;;  %v9177_v24 = vld [vmem:[#allocation3 + $0x90] sm:$0xf0] }
 0x537   : > { %2938 = vst [vmem:[#allocation3 + $0x108] sm:$0xff] %v2937_v51  ;;  %5156 = vmatpush.bf16.msra.mxu0 %v9224_v4  ;;  %5182 = vmatpush.bf16.msra.mxu2 %v9228_v31  ;;  %v6713_v22 = vunpack.c.l.bf16 %v6692_v49  ;;  %v9175_v51 = vld [vmem:[#allocation3 + $0x80] sm:$0xf]  ;;  %vm13769_vm11 = vcmask 1043456  }
 0x538   : > { %v9786_v56 = vpop.permute.xlu1 %9785  ;;  %v9176_v47 = vor.u32 %v9526_v12, %v9175_v51  ;;  %v3125_v38 = vpack.c.b16 %v3121_v41, %v3121_v41  ;;  %v9518_v12 = vld [vmem:[#allocation3 + $0x4c] sm:$0xf0] }
 0x539   : > { %v9788_v20 = vunpack.i.h.bf16 %v9786_v56  ;;  %v9787_v45 = vunpack.i.l.bf16 %v9786_v56 }
 0x53a   : > { %v3136_v11 = vpack.i.b16 %v3125_v38, %v3125_v38 }
 0x53b   : > { %v3016_v7 = vmul.f32 %v9788_v20, %v2981_v14  ;;  %v3005_v58 = vsel %vm13766_vm1, %v9783_v63, %v9787_v45  ;;  %v3006_v2 = vsel %vm13767_vm0, %v9787_v45, %v9788_v20  ;;  %5157 = vmatpush.bf16.msra.mxu0 %v9208_v18  ;;  %5183 = vmatpush.bf16.msra.mxu2 %v9212_v5  ;;  %v3122_v63 = vunpack.c.h.b16 %v3116_v13  ;;  %v9522_v45 = vld [vmem:[#allocation3 + $0x6c] sm:$0xf0]  ;;  %v9161_v18 = vld [vmem:[#allocation3 + $0x70] sm:$0xf0]  ;;  %v9520_v13 = vld [vmem:[#allocation3 + $0x64] sm:$0xf] }
 0x53c   : > { %v3014_v1 = vmul.f32 %v3005_v58, %v11489_v21  ;;  %v3015_v55 = vmul.f32 %v3006_v2, %v11491_v33  ;;  %v3021_v61 = vmul.f32 %v9788_v20, %v2986_v59  ;;  %v3019_v15 = vmul.f32 %v3005_v58, %v2984_v32  ;;  %v9159_v59 = vld [vmem:[#allocation3 + $0x60] sm:$0xf]  ;;  %vm13771_vm0 = vmmov %vm13769_vm11 }
 0x53d   : > { %v3024_v60 = vpack.c.bf16 %v3016_v7, %v3016_v7  ;;  %v3020_v40 = vmul.f32 %v3006_v2, %v2985_v17  ;;  %v9180_v14 = vor.u32 %v9524_v57, %v9177_v24  ;;  %v3126_v44 = vpack.c.b16 %v3122_v63, %v3122_v63  ;;  %v9512_v63 = vld [vmem:[#allocation3 + $0x24] sm:$0xf] }
 0x53e   : > { %v3023_v25 = vpack.c.bf16 %v3015_v55, %v3014_v1  ;;  %v3027_v20 = vpack.c.bf16 %v3021_v61, %v3021_v61  ;;  %v9160_v7 = vor.u32 %v9522_v45, %v9159_v59  ;;  %v9164_v58 = vor.u32 %v9520_v13, %v9161_v18  ;;  %v9143_v1 = vld [vmem:[#allocation3 + $0x40] sm:$0xf]  ;;  %v9516_v55 = vld [vmem:[#allocation3 + $0x44] sm:$0xf]  ;;  %v9233_v45 = vld [vmem:[#allocation3 + $0xf8] sm:$0xf0] }
 0x53f   : > { %5158 = vmatpush.bf16.msra.mxu0 %v9192_v34  ;;  %5184 = vmatpush.bf16.msra.mxu2 %v9196_v36  ;;  %v3037_v4 = vshll.u32 %v3024_v60, 16  ;;  %v3060_v31 = vshrl.u32 %v3024_v60, 16  ;;  %v3026_v46 = vpack.c.bf16 %v3020_v40, %v3019_v15  ;;  %v3140_v34 = vpack.i.b16 %v3126_v44, %v3126_v44  ;;  %v9111_v18 = vld [vmem:[#allocation3] sm:$0xf] }
 0x540   : > { %v3033_v6 = vshll.u32 %v3023_v25, 16  ;;  %v3050_v10 = vshrl.u32 %v3023_v25, 16  ;;  %v3066_v42 = vshll.u32 %v3027_v20, 16  ;;  %v9144_v41 = vor.u32 %v9518_v12, %v9143_v1  ;;  %v9127_v25 = vld [vmem:[#allocation3 + $0x20] sm:$0xf] }
 0x541   : > { %v3039_v28 = vrot.slane %v3037_v4, 5  ;;  %v3062_v56 = vrot.slane %v3060_v31, 4  ;;  %v3056_v36 = vshll.u32 %v3026_v46, 16  ;;  %v3138_v15 = vperm.slane %v3136_v11, 0  ;;  %v9514_v31 = vld [vmem:[#allocation3 + $0x2c] sm:$0xf0] }
 0x542   : > { %v3035_v50 = vrot.slane %v3033_v6, 5  ;;  %v3052_v5 = vrot.slane %v3050_v10, 4  ;;  %v3068_v61 = vrot.slane %v3066_v42, 5  ;;  %v3142_v40 = vperm.slane %v3140_v34, 0  ;;  %v9508_v20 = vld [vmem:[#allocation3 + $0x4] sm:$0xf] }
 0x543   : > { %5159 = vmatpush.bf16.msra.mxu0 %v9176_v47  ;;  %5185 = vmatpush.bf16.msra.mxu2 %v9180_v14  ;;  %v9794_v32 = vpack.i.bf16 %v6713_v22, %v3039_v28  ;;  %v3063_v17 = vor.u32 %v3062_v56, %v3039_v28  ;;  %v3058_v51 = vrot.slane %v3056_v36, 5  ;;  %v9129_v47 = vld [vmem:[#allocation3 + $0x30] sm:$0xf0]  ;;  %v9128_v6 = vor.u32 %v9514_v31, %v9127_v25  ;;  %v9510_v14 = vld [vmem:[#allocation3 + $0xc] sm:$0xf0] }
 0x544   : > { %v9789_v49 = vpack.i.bf16 %v3035_v50, %v11556_v27  ;;  %v3053_v2 = vor.u32 %v3052_v5, %v3035_v50  ;;  %v9145_v27 = vld [vmem:[#allocation3 + $0x50] sm:$0xf0]  ;;  %v9132_v10 = vor.u32 %v9512_v63, %v9129_v47  ;;  %v3155_v56 = vunpack.c.l.bf16 %v3138_v15  ;;  %v9539_v50 = vld [vmem:[#allocation3 + $0xf4] sm:$0xf0]  ;;  %v9537_v46 = vld [vmem:[#allocation3 + $0xec] sm:$0xf] }
 0x545   : > { %9795 = vrot.lane.b32.xlu0 %v9794_v32, %s13635_s16  ;;  %v3064_v60 = vrot.slane %v3063_v17, 4  ;;  %v9148_v24 = vor.u32 %v9516_v55, %v9145_v27  ;;  %v9113_v28 = vld [vmem:[#allocation3 + $0x10] sm:$0xf0]  ;;  %v3156_v38 = vunpack.c.l.bf16 %v3142_v40  ;;  %v9112_v5 = vor.u32 %v9510_v14, %v9111_v18  ;;  %v9231_v32 = vld [vmem:[#allocation3 + $0xe8] sm:$0xf] }
 0x546   : > { %9790 = vrot.lane.b32.xlu2 %v9789_v49, %s13635_s16  ;;  %v3054_v22 = vrot.slane %v3053_v2, 4  ;;  %v9116_v44 = vor.u32 %v9508_v20, %v9113_v28  ;;  %v9232_v49 = vor.u32 %v9539_v50, %v9231_v32  ;;  %v9236_v59 = vor.u32 %v9537_v46, %v9233_v45  ;;  %v9535_v17 = vld [vmem:[#allocation3 + $0xd4] sm:$0xf0]  ;;  %v9533_v2 = vld [vmem:[#allocation3 + $0xcc] sm:$0xf] }
 0x547   : > { %5160 = vmatpush.bf16.msra.mxu0 %v9160_v7  ;;  %5186 = vmatpush.bf16.msra.mxu2 %v9164_v58  ;;  %v3069_v4 = vsel %vm11126_vm7, %v3064_v60, %v3068_v61  ;;  %v9804_v13 = vpack.i.bf16 %v3156_v38, %v3155_v56  ;;  %v9217_v7 = vld [vmem:[#allocation3 + $0xd8] sm:$0xf0]  ;;  %v9215_v58 = vld [vmem:[#allocation3 + $0xc8] sm:$0xf]  ;;  %v9531_v42 = vld [vmem:[#allocation3 + $0xb4] sm:$0xf0] }
 0x548   : > { %v3059_v57 = vsel %vm11126_vm7, %v3054_v22, %v3058_v51  ;;  %v9216_v1 = vor.u32 %v9535_v17, %v9215_v58  ;;  %v9220_v55 = vor.u32 %v9533_v2, %v9217_v7  ;;  %v9201_v11 = vld [vmem:[#allocation3 + $0xb8] sm:$0xf0]  ;;  %v9199_v34 = vld [vmem:[#allocation3 + $0xa8] sm:$0xf]  ;;  %v9529_v36 = vld [vmem:[#allocation3 + $0xac] sm:$0xf] }
 0x549   : > { %v9200_v12 = vor.u32 %v9531_v42, %v9199_v34  ;;  %v9204_v27 = vor.u32 %v9529_v36, %v9201_v11  ;;  %v9527_v60 = vld [vmem:[#allocation3 + $0x94] sm:$0xf0]  ;;  %v9525_v22 = vld [vmem:[#allocation3 + $0x8c] sm:$0xf]  ;;  %v9169_v15 = vld [vmem:[#allocation3 + $0x78] sm:$0xf0] }
 0x54a   : > { %v9523_v63 = vld [vmem:[#allocation3 + $0x74] sm:$0xf0]  ;;  %v9167_v40 = vld [vmem:[#allocation3 + $0x68] sm:$0xf]  ;;  %v9521_v51 = vld [vmem:[#allocation3 + $0x6c] sm:$0xf] }
 0x54b   : > { %5161 = vmatpush.bf16.msra.mxu0 %v9144_v41  ;;  %5187 = vmatpush.bf16.msra.mxu2 %v9148_v24  ;;  %v9185_v41 = vld [vmem:[#allocation3 + $0x98] sm:$0xf0]  ;;  %v9183_v24 = vld [vmem:[#allocation3 + $0x88] sm:$0xf]  ;;  %v9172_v31 = vor.u32 %v9521_v51, %v9169_v15  ;;  %v9515_v56 = vld [vmem:[#allocation3 + $0x34] sm:$0xf0] }
 0x54c   : > { %v9184_v25 = vor.u32 %v9527_v60, %v9183_v24  ;;  %v9188_v61 = vor.u32 %v9525_v22, %v9185_v41  ;;  %v9151_v47 = vld [vmem:[#allocation3 + $0x48] sm:$0xf]  ;;  %v9137_v38 = vld [vmem:[#allocation3 + $0x38] sm:$0xf0]  ;;  %v9513_v45 = vld [vmem:[#allocation3 + $0x2c] sm:$0xf] }
 0x54d   : > { %3080 = vrot.lane.b32.xlu0 %v3069_v4, %s13635_s16  ;;  %v9168_v4 = vor.u32 %v9523_v63, %v9167_v40  ;;  %v9135_v50 = vld [vmem:[#allocation3 + $0x28] sm:$0xf]  ;;  %v9140_v20 = vor.u32 %v9513_v45, %v9137_v38  ;;  %v9509_v46 = vld [vmem:[#allocation3 + $0xc] sm:$0xf]  ;;  %vm13770_vm1 = vcmask 990208  }
 0x54e   : > { %3078 = vrot.lane.b32.xlu2 %v3059_v57, %s13635_s16  ;;  %v9517_v57 = vld [vmem:[#allocation3 + $0x4c] sm:$0xf]  ;;  %v9136_v18 = vor.u32 %v9515_v56, %v9135_v50  ;;  %v9119_v32 = vld [vmem:[#allocation3 + $0x8] sm:$0xf]  ;;  %v3246_v45 = vld [vmem:[%s13557_s4 + $0x28] sm:$0x11] }
 0x54f   : > { %5162 = vmatpush.bf16.msra.mxu0 %v9128_v6  ;;  %5188 = vmatpush.bf16.msra.mxu2 %v9132_v10  ;;  %v9519_v6 = vld [vmem:[#allocation3 + $0x54] sm:$0xf0]  ;;  %v9153_v10 = vld [vmem:[#allocation3 + $0x58] sm:$0xf0]  ;;  %v3245_v2 = vld [vmem:[%s13557_s4 + $0x20] sm:$0x11] }
 0x550   : > { %v9152_v14 = vor.u32 %v9519_v6, %v9151_v47  ;;  %v9156_v28 = vor.u32 %v9517_v57, %v9153_v10  ;;  %v3249_v11 = vunpack.c.l.b16 %v3245_v2  ;;  %v3250_v34 = vunpack.c.h.b16 %v3245_v2  ;;  %v3112_v41 = vld [vmem:[#allocation2 + $0x1c] sm:$0x11]  ;;  %v3101_v47 = vld [vmem:[#allocation3 + $0x100] sm:$0x88]  ;;  %s14008_s16 = smov 7  }
 0x552   : > { %v3253_v24 = vpack.c.b16 %v3249_v11, %v3249_v11  ;;  %v3254_v63 = vpack.c.b16 %v3250_v34, %v3250_v34 }
 0x553   : > { %5163 = vmatpush.bf16.msra.mxu0 %v9112_v5  ;;  %5189 = vmatpush.bf16.msra.mxu2 %v9116_v44  ;;  %v9511_v5 = vld [vmem:[#allocation3 + $0x14] sm:$0xf0]  ;;  %v9121_v44 = vld [vmem:[#allocation3 + $0x18] sm:$0xf0] }
 0x554   : > { %v3258_v15 = vshrl.u32 %v3253_v24, 16  ;;  %v3263_v57 = vshrl.u32 %v3254_v63, 16 }
 0x556   : > { %9805 = vrot.lane.b32.xlu2 %v9804_v13, %s13637_s14  ;;  %v512_v13 = vld [vmem:[#allocation4] sm:$0x77]  ;;  %v3259_v10 = vpack.i.b16 %v3258_v15, %v3258_v15  ;;  %s13986_s14 = smov 120  }
 0x557   : > { %5208 = vmatpush.bf16.msrb.mxu0 %v9232_v49  ;;  %5234 = vmatpush.bf16.msrb.mxu2 %v9236_v59  ;;  %v9120_v49 = vor.u32 %v9511_v5, %v9119_v32  ;;  %v9124_v59 = vor.u32 %v9509_v46, %v9121_v44  ;;  %v513_v17 = vsel %vm13756_vm5, 0, %v512_v13  ;;  %v3111_v32 = vld [vmem:[#allocation2 + $0x14] sm:$0xf]  ;;  %v3251_v46 = vunpack.c.l.b16 %v3246_v45 }
 0x558   : > { %514 = vst [vmem:[#allocation4] sm:$0x77] %v513_v17 }
 0x55b   : > { %5209 = vmatpush.bf16.msrb.mxu0 %v9216_v1  ;;  %5235 = vmatpush.bf16.msrb.mxu2 %v9220_v55 }
 0x55f   : > { %5210 = vmatpush.bf16.msrb.mxu0 %v9200_v12  ;;  %5236 = vmatpush.bf16.msrb.mxu2 %v9204_v27 }
 0x563   : > { %5211 = vmatpush.bf16.msrb.mxu0 %v9184_v25  ;;  %5237 = vmatpush.bf16.msrb.mxu2 %v9188_v61 }
 0x567   : > { %5212 = vmatpush.bf16.msrb.mxu0 %v9168_v4  ;;  %5238 = vmatpush.bf16.msrb.mxu2 %v9172_v31  ;;  %v3148_v4 = vunpack.c.l.bf16 %v3112_v41  ;;  %v3149_v31 = vunpack.c.h.bf16 %v3112_v41 }
 0x56b   : > { %5213 = vmatpush.bf16.msrb.mxu0 %v9152_v14  ;;  %5239 = vmatpush.bf16.msrb.mxu2 %v9156_v28  ;;  %v3264_v14 = vpack.i.b16 %v3263_v57, %v3263_v57 }
 0x56d   : > { %v3266_v5 = vperm.slane %v3264_v14, 0 }
 0x56f   : > { %5214 = vmatpush.bf16.msrb.mxu0 %v9136_v18  ;;  %5240 = vmatpush.bf16.msrb.mxu2 %v9140_v20  ;;  %v3261_v20 = vperm.slane %v3259_v10, 0  ;;  %v3288_v17 = vunpack.c.l.bf16 %v3266_v5  ;;  %v3104_v5 = vld [vmem:[#allocation3 + $0x108] sm:$0x88] }
 0x571   : > { %v3287_v13 = vunpack.c.l.bf16 %v3261_v20 }
 0x573   : > { %5215 = vmatpush.bf16.msrb.mxu0 %v9120_v49  ;;  %5241 = vmatpush.bf16.msrb.mxu2 %v9124_v59  ;;  %v3252_v49 = vunpack.c.h.b16 %v3246_v45 }
 0x575   : > { %v3256_v11 = vpack.c.b16 %v3252_v49, %v3252_v49 }
 0x597   : > { %v3077_v7 = vpop.permute.xlu1 %3076 }
 0x598   : > { %v3085_v28 = vrot.slane %v3077_v7, 4 }
 0x59f   : > { %v9801_v58 = vpop.permute.xlu1 %9800 }
 0x5a0   : > { %v9803_v1 = vunpack.i.h.bf16 %v9801_v58  ;;  %v9802_v55 = vunpack.i.l.bf16 %v9801_v58  ;;  %v11604_v42 = vpop.permute.xlu2 %9790  ;;  %v3147_v58 = vunpack.c.l.bf16 %v3111_v32 }
 0x5a1   : > { %v9793_v36 = vunpack.i.h.bf16 %v11604_v42  ;;  %v9792_v12 = vunpack.i.l.bf16 %v11604_v42 }
 0x5a2   : > { %v3170_v27 = vsel %vm13768_vm9, %v9802_v55, %v9803_v1  ;;  %v3178_v60 = vmul.f32 %v9802_v55, %v11450_v54  ;;  %v3183_v38 = vmul.f32 %v9802_v55, %v3148_v4  ;;  %vm13772_vm9 = vmmov %vm13770_vm1  ;;  %v3255_v55 = vpack.c.b16 %v3251_v46, %v3251_v46 }
 0x5a3   : > { %v11612_v22 = vrot.slane %v9793_v36, 4  ;;  %v3082_v25 = vrot.slane %v9792_v12, 4  ;;  %v3179_v61 = vmul.f32 %v3170_v27, %v11454_v48  ;;  %v3184_v50 = vmul.f32 %v3170_v27, %v3149_v31  ;;  %v3114_v27 = vld [vmem:[#allocation2 + $0x2c] sm:$0x1] }
 0x5a4   : > { %v3268_v15 = vshrl.u32 %v3255_v55, 16  ;;  %v3152_v4 = vunpack.c.l.bf16 %v3114_v27 }
 0x5a5   : > { %v3088_v40 = vsel %vm13769_vm11, %v3082_v25, %v11612_v22  ;;  %v3188_v51 = vpack.c.bf16 %v3179_v61, %v3178_v60  ;;  %v3191_v59 = vpack.c.bf16 %v3184_v50, %v3183_v38  ;;  %v9809_v60 = vpack.i.bf16 %v3288_v17, %v3287_v13  ;;  %v3113_v25 = vld [vmem:[#allocation2 + $0x24] sm:$0x11] }
 0x5a6   : > { %v3090_v54 = vsel %vm13770_vm1, %v9792_v12, %v3088_v40  ;;  %vm13773_vm11 = vcmask 64512   ;;  %v3273_v40 = vshrl.u32 %v3256_v11, 16 }
 0x5a7   : > { %v3102_v6 = vsel %vm11202_vm15, %v3090_v54, %v3101_v47  ;;  %3200 = vrot.lane.b32.xlu0 %v3188_v51, %s13639_s29  ;;  %vm13774_vm1 = vmmov %vm13773_vm11  ;;  %v3150_v47 = vunpack.c.l.bf16 %v3113_v25  ;;  %v3151_v54 = vunpack.c.h.bf16 %v3113_v25 }
 0x5a8   : > { %3103 = vst [vmem:[#allocation3 + $0x100] sm:$0x88] %v3102_v6  ;;  %v11621_v48 = vpop.permute.xlu2 %3078  ;;  %v3269_v6 = vpack.i.b16 %v3268_v15, %v3268_v15  ;;  %v3274_v10 = vpack.i.b16 %v3273_v40, %v3273_v40  ;;  %v3242_v40 = vld [vmem:[#allocation2 + $0x1c] sm:$0x11] }
 0x5a9   : > { %v3086_v56 = vrot.slane %v11621_v48, 4 }
 0x5aa   : > { %v3276_v20 = vperm.slane %v3274_v10, 0 }
 0x5ab   : > { %v3093_v18 = vsel %vm13771_vm0, %v3085_v28, %v3086_v56 }
 0x5ac   : > { %v3094_v44 = vsel %vm13772_vm9, %v3077_v7, %v3093_v18  ;;  %v3271_v18 = vperm.slane %v3269_v6, 0  ;;  %v3290_v17 = vunpack.c.l.bf16 %v3276_v20 }
 0x5ad   : > { %3107 = vst [vmem:[#allocation3 + $0x110] sm:$0xff] %v3094_v44 }
 0x5af   : > { %3206 = vrot.lane.b32.xlu0 %v3191_v59, %s13639_s29 }
 0x5b0   : > { %v9806_v2 = vpop.permute.xlu2 %9805 }
 0x5b1   : > { %v9808_v34 = vunpack.i.h.bf16 %v9806_v2  ;;  %v9807_v12 = vunpack.i.l.bf16 %v9806_v2 }
 0x5b3   : > { %v3182_v41 = vmul.f32 %v9808_v34, %v3147_v58  ;;  %v3171_v7 = vsel %vm13773_vm11, %v9803_v1, %v9807_v12  ;;  %v3172_v24 = vsel %vm13774_vm1, %v9807_v12, %v9808_v34  ;;  %v3187_v14 = vmul.f32 %v9808_v34, %v3152_v4  ;;  %vm13775_vm11 = vmmov %vm13771_vm0  ;;  %v3239_v34 = vld [vmem:[#allocation2 + $0x4] sm:$0xff] }
 0x5b4   : > { %v3180_v61 = vmul.f32 %v3171_v7, %v11489_v21  ;;  %v3181_v63 = vmul.f32 %v3172_v24, %v11491_v33  ;;  %v3185_v38 = vmul.f32 %v3171_v7, %v3150_v47  ;;  %v3186_v50 = vmul.f32 %v3172_v24, %v3151_v54  ;;  %vm13776_vm1 = vmmov %vm13772_vm9 }
 0x5b5   : > { %v3190_v51 = vpack.c.bf16 %v3182_v41, %v3182_v41  ;;  %v3193_v32 = vpack.c.bf16 %v3187_v14, %v3187_v14  ;;  %v11657_v12 = vunpack.c.l.bf16 %v3239_v34  ;;  %v11659_v27 = vunpack.c.h.bf16 %v3239_v34  ;;  %v3241_v34 = vld [vmem:[#allocation2 + $0x14] sm:$0xf] }
 0x5b6   : > { %v3189_v31 = vpack.c.bf16 %v3181_v63, %v3180_v61  ;;  %v3192_v49 = vpack.c.bf16 %v3186_v50, %v3185_v38  ;;  %v3409_v61 = vld [vmem:[%s13557_s4 + $0x20] sm:$0x22]  ;;  %v3283_v38 = vunpack.c.h.bf16 %v3242_v40 }
 0x5b7   : > { %v11636_v57 = vpop.permute.xlu0 %9795  ;;  %9810 = vrot.lane.b32.xlu0 %v9809_v60, %s13641_s28  ;;  %3204 = vrot.lane.b32.xlu2 %v3190_v51, %s13639_s29  ;;  %v3414_v14 = vunpack.c.h.b16 %v3409_v61 }
 0x5b8   : > { %v9797_v1 = vunpack.i.l.bf16 %v11636_v57  ;;  %3202 = vrot.lane.b32.xlu1 %v3189_v31, %s13639_s29 }
 0x5ba   : > { %v3084_v28 = vrot.slane %v9797_v1, 4  ;;  %v3413_v1 = vunpack.c.l.b16 %v3409_v61 }
 0x5bc   : > { %v3091_v45 = vsel %vm13771_vm0, %v11612_v22, %v3084_v28  ;;  %v3289_v22 = vunpack.c.l.bf16 %v3271_v18  ;;  %vm13777_vm0 = vcmask 72704   ;;  %v3282_v28 = vunpack.c.l.bf16 %v3242_v40 }
 0x5bd   : > { %v3092_v44 = vsel %vm13772_vm9, %v9793_v36, %v3091_v45  ;;  %vm13778_vm9 = vmmov %vm13775_vm11 }
 0x5be   : > { %v3105_v46 = vsel %vm11202_vm15, %v3092_v44, %v3104_v5  ;;  %v9814_v58 = vpack.i.bf16 %v3290_v17, %v3289_v22  ;;  %v3417_v5 = vpack.c.b16 %v3413_v1, %v3413_v1  ;;  %v3236_v22 = vld [vmem:[#allocation3 + $0x138] sm:$0x11] }
 0x5bf   : > { %3106 = vst [vmem:[#allocation3 + $0x108] sm:$0x88] %v3105_v46  ;;  %v3081_v59 = vpop.permute.xlu0 %3080  ;;  %3210 = vrot.lane.b32.xlu2 %v3193_v32, %s13639_s29 }
 0x5c0   : > { %v3087_v13 = vrot.slane %v3081_v59, 4  ;;  %3208 = vrot.lane.b32.xlu1 %v3192_v49, %s13639_s29  ;;  %v3418_v49 = vpack.c.b16 %v3414_v14, %v3414_v14  ;;  %s13982_s29 = smov 9  }
 0x5c2   : > { %v3095_v42 = vsel %vm13775_vm11, %v3086_v56, %v3087_v13  ;;  %vm13779_vm11 = vmmov %vm13778_vm9  ;;  %v3233_v13 = vld [vmem:[#allocation3 + $0x130] sm:$0x11] }
 0x5c3   : > { %v3096_v36 = vsel %vm13776_vm1, %v11621_v48, %v3095_v42  ;;  %vm13780_vm1 = vcmask 982016  }
 0x5c4   : > { %3108 = vst [vmem:[#allocation3 + $0x118] sm:$0xff] %v3096_v36  ;;  %vm13781_vm15 = vmmov %vm13780_vm1 }
 0x5c8   : > { %9815 = vrot.lane.b32.xlu1 %v9814_v58, %s13641_s28  ;;  %s13996_s28 = smov 121  }
 0x611   : > { %v3205_v11 = vpop.permute.xlu2 %3204 }
 0x612   : > { %v3214_v48 = vrot.slane %v3205_v11, 4 }
 0x619   : > { %v3201_v2 = vpop.permute.xlu0 %3200  ;;  %v3211_v6 = vpop.permute.xlu2 %3210 }
 0x61a   : > { %v3212_v24 = vrot.slane %v3201_v2, 4  ;;  %v3217_v45 = vrot.slane %v3211_v6, 4  ;;  %v3244_v6 = vld [vmem:[#allocation2 + $0x2c] sm:$0x1] }
 0x621   : > { %v3207_v55 = vpop.permute.xlu0 %3206 }
 0x622   : > { %v3215_v18 = vrot.slane %v3207_v55, 4 }
 0x629   : > { %v11661_v60 = vpop.permute.xlu0 %9810 }
 0x62a   : > { %v9813_v41 = vunpack.i.h.bf16 %v11661_v60  ;;  %v9812_v56 = vunpack.i.l.bf16 %v11661_v60  ;;  %v3203_v7 = vpop.permute.xlu1 %3202 }
 0x62b   : > { %v3213_v25 = vrot.slane %v3203_v7, 4 }
 0x62c   : > { %v3304_v63 = vsel %vm13777_vm0, %v9812_v56, %v9813_v41  ;;  %v3312_v15 = vmul.f32 %v9812_v56, %v11657_v12  ;;  %v3317_v59 = vmul.f32 %v9812_v56, %v3282_v28  ;;  %vm13783_vm0 = vmmov %vm13778_vm9  ;;  %v3422_v56 = vpack.i.b16 %v3417_v5, %v3417_v5 }
 0x62d   : > { %v3313_v51 = vmul.f32 %v3304_v63, %v11659_v27  ;;  %v3218_v4 = vsel %vm13778_vm9, %v3212_v24, %v3213_v25  ;;  %v3221_v31 = vsel %vm13779_vm11, %v3213_v25, %v3214_v48  ;;  %v3318_v17 = vmul.f32 %v3304_v63, %v3283_v38  ;;  %vm13785_vm11 = vmmov %vm13780_vm1  ;;  %v3243_v38 = vld [vmem:[#allocation2 + $0x24] sm:$0x11] }
 0x62e   : > { %v3220_v47 = vsel %vm13780_vm1, %v3201_v2, %v3218_v4  ;;  %v3222_v54 = vsel %vm13781_vm15, %v3203_v7, %v3221_v31  ;;  %vm13782_vm15 = vmmov %vm13778_vm9  ;;  %v3426_v48 = vpack.i.b16 %v3418_v49, %v3418_v49  ;;  %v3281_v25 = vunpack.c.l.bf16 %v3241_v34  ;;  %v3410_v31 = vld [vmem:[%s13557_s4 + $0x28] sm:$0x22] }
 0x62f   : > { %3231 = vst [vmem:[#allocation3 + $0x120] sm:$0xff] %v3220_v47  ;;  %v3322_v10 = vpack.c.bf16 %v3313_v51, %v3312_v15  ;;  %vm13784_vm9 = vmmov %vm13780_vm1  ;;  %v3325_v24 = vpack.c.bf16 %v3318_v17, %v3317_v59  ;;  %v3424_v40 = vperm.slane %v3422_v56, 1  ;;  %vm13786_vm1 = vcmask 72704  }
 0x630   : > { %3232 = vst [vmem:[#allocation3 + $0x128] sm:$0xff] %v3222_v54  ;;  %v3428_v51 = vperm.slane %v3426_v48, 1  ;;  %v3284_v49 = vunpack.c.l.bf16 %v3243_v38  ;;  %v3285_v59 = vunpack.c.h.bf16 %v3243_v38  ;;  %v10230_v38 = vld [vmem:[%s13557_s4 + $0x20] sm:$0x22] }
 0x631   : > { %v3329_v50 = vshrl.u32 %v3322_v10, 16  ;;  %v3332_v46 = vshll.u32 %v3322_v10, 16  ;;  %v3351_v4 = vshll.u32 %v3325_v24, 16 }
 0x632   : > { %v3209_v20 = vpop.permute.xlu1 %3208 }
 0x633   : > { %v3216_v44 = vrot.slane %v3209_v20, 4  ;;  %v3331_v32 = vrot.slane %v3329_v50, 7  ;;  %v3447_v50 = vunpack.c.l.bf16 %v3424_v40 }
 0x635   : > { %v3223_v42 = vsel %vm13782_vm15, %v3215_v18, %v3216_v44  ;;  %v3225_v36 = vsel %vm13783_vm0, %v3216_v44, %v3217_v45  ;;  %v3334_v58 = vor.u32 %v3332_v46, %v3331_v32  ;;  %v3349_v63 = vrot.slane %v3331_v32, 4  ;;  %vm13787_vm15 = vmmov %vm13786_vm1 }
 0x636   : > { %v3224_v2 = vsel %vm13784_vm9, %v3207_v55, %v3223_v42  ;;  %v3226_v11 = vsel %vm13785_vm11, %v3209_v20, %v3225_v36  ;;  %v3448_v45 = vunpack.c.l.bf16 %v3428_v51  ;;  %v3415_v20 = vunpack.c.l.b16 %v3410_v31 }
 0x637   : > { %v3234_v60 = vsel %vm13748_vm12, %v3224_v2, %v3233_v13  ;;  %v3237_v7 = vsel %vm13748_vm12, %v3226_v11, %v3236_v22  ;;  %3364 = vrot.lane.b32.xlu2 %v3334_v58, %s13643_s30  ;;  %v3353_v28 = vsel %vm10878_vm8, %v3349_v63, %v3351_v4  ;;  %v3286_v44 = vunpack.c.l.bf16 %v3244_v6 }
 0x638   : > { %3235 = vst [vmem:[#allocation3 + $0x130] sm:$0x11] %v3234_v60  ;;  %v9819_v13 = vpack.i.bf16 %v3448_v45, %v3447_v50  ;;  %v3419_v22 = vpack.c.b16 %v3415_v20, %v3415_v20  ;;  %v3554_v50 = vunpack.c.h.b16 %v10230_v38  ;;  %vm13788_vm0 = vcmask 449536  }
 0x639   : > { %3238 = vst [vmem:[#allocation3 + $0x138] sm:$0x11] %v3237_v7  ;;  %vm13789_vm9 = vcmask 1043456  }
 0x63a   : > { %v9816_v61 = vpop.permute.xlu1 %9815  ;;  %v3430_v56 = vpack.i.b16 %v3419_v22, %v3419_v22  ;;  %vm13790_vm11 = vmmov %vm13789_vm9 }
 0x63b   : > { %v9818_v55 = vunpack.i.h.bf16 %v9816_v61  ;;  %v9817_v15 = vunpack.i.l.bf16 %v9816_v61 }
 0x63d   : > { %v3316_v47 = vmul.f32 %v9818_v55, %v3281_v25  ;;  %v3305_v54 = vsel %vm13786_vm1, %v9813_v41, %v9817_v15  ;;  %v3306_v1 = vsel %vm13787_vm15, %v9817_v15, %v9818_v55  ;;  %v3416_v41 = vunpack.c.h.b16 %v3410_v31 }
 0x63e   : > { %v3314_v10 = vmul.f32 %v3305_v54, %v11489_v21  ;;  %v3315_v14 = vmul.f32 %v3306_v1, %v11491_v33  ;;  %v3321_v36 = vmul.f32 %v9818_v55, %v3286_v44  ;;  %v3319_v11 = vmul.f32 %v3305_v54, %v3284_v49 }
 0x63f   : > { %3370 = vrot.lane.b32.xlu2 %v3353_v28, %s13643_s30  ;;  %v3324_v18 = vpack.c.bf16 %v3316_v47, %v3316_v47  ;;  %v3420_v58 = vpack.c.b16 %v3416_v41, %v3416_v41  ;;  %v3320_v34 = vmul.f32 %v3306_v1, %v3285_v59  ;;  %v3432_v15 = vperm.slane %v3430_v56, 1  ;;  %v11709_v28 = vld [vmem:[%s13557_s4 + $0x28] sm:$0x22] }
 0x640   : > { %v3323_v5 = vpack.c.bf16 %v3315_v14, %v3314_v10  ;;  %v3327_v7 = vpack.c.bf16 %v3321_v36, %v3321_v36  ;;  %v3406_v10 = vld [vmem:[#allocation2 + $0x1c] sm:$0x11]  ;;  %v3555_v20 = vunpack.c.l.b16 %v11709_v28  ;;  %v3558_v44 = vpack.c.b16 %v3554_v50, %v3554_v50 }
 0x641   : > { %v3343_v32 = vshrl.u32 %v3324_v18, 16  ;;  %v3346_v46 = vshll.u32 %v3324_v18, 16  ;;  %v3434_v48 = vpack.i.b16 %v3420_v58, %v3420_v58  ;;  %v3326_v24 = vpack.c.bf16 %v3320_v34, %v3319_v11 }
 0x642   : > { %v3336_v21 = vshrl.u32 %v3323_v5, 16  ;;  %v3339_v42 = vshll.u32 %v3323_v5, 16  ;;  %v3361_v63 = vshll.u32 %v3327_v7, 16  ;;  %v3449_v31 = vunpack.c.l.bf16 %v3432_v15 }
 0x643   : > { %v3345_v33 = vrot.slane %v3343_v32, 7  ;;  %v3436_v55 = vperm.slane %v3434_v48, 1  ;;  %v3356_v40 = vshll.u32 %v3326_v24, 16  ;;  %v3442_v5 = vunpack.c.l.bf16 %v3406_v10 }
 0x644   : > { %v3338_v17 = vrot.slane %v3336_v21, 7  ;;  %v3443_v41 = vunpack.c.h.bf16 %v3406_v10  ;;  %v3559_v49 = vpack.c.b16 %v3555_v20, %v3555_v20  ;;  %vm13791_vm1 = vcmask 973824  }
 0x645   : > { %v3348_v2 = vor.u32 %v3346_v46, %v3345_v33  ;;  %v3359_v25 = vrot.slane %v3345_v33, 4  ;;  %v3450_v47 = vunpack.c.l.bf16 %v3436_v55  ;;  %vm13792_vm15 = vmmov %vm13791_vm1 }
 0x646   : > { %v3341_v60 = vor.u32 %v3339_v42, %v3338_v17  ;;  %v3354_v61 = vrot.slane %v3338_v17, 4  ;;  %v3572_v33 = vshrl.u32 %v3559_v49, 16 }
 0x647   : > { %9820 = vrot.lane.b32.xlu2 %v9819_v13, %s13648_s23  ;;  %3368 = vrot.lane.b32.xlu1 %v3348_v2, %s13643_s30  ;;  %v3363_v51 = vsel %vm10878_vm8, %v3359_v25, %v3361_v63  ;;  %v9824_v54 = vpack.i.bf16 %v3450_v47, %v3449_v31  ;;  %v3567_v13 = vshrl.u32 %v3558_v44, 16  ;;  %v3395_v31 = vld [vmem:[#allocation3 + $0x130] sm:$0xff]  ;;  %v3398_v47 = vld [vmem:[#allocation3 + $0x138] sm:$0xff] }
 0x648   : > { %3366 = vrot.lane.b32.xlu0 %v3341_v60, %s13643_s30  ;;  %v3358_v4 = vsel %vm10878_vm8, %v3354_v61, %v3356_v40  ;;  %v3573_v58 = vpack.i.b16 %v3572_v33, %v3572_v33  ;;  %v3408_v33 = vld [vmem:[#allocation2 + $0x2c] sm:$0x1] }
 0x649   : > { %v3568_v36 = vpack.i.b16 %v3567_v13, %v3567_v13  ;;  %v3404_v13 = vld [vmem:[#allocation2 + $0xc] sm:$0xff] }
 0x64a   : > { %v3575_v60 = vperm.slane %v3573_v58, 1 }
 0x64b   : > { %v3570_v34 = vperm.slane %v3568_v36, 1  ;;  %v3407_v36 = vld [vmem:[#allocation2 + $0x24] sm:$0x11] }
 0x64c   : > { %v3593_v24 = vunpack.c.l.bf16 %v3575_v60 }
 0x64d   : > { %v3592_v48 = vunpack.c.l.bf16 %v3570_v34  ;;  %v3446_v34 = vunpack.c.l.bf16 %v3408_v33 }
 0x64f   : > { %3374 = vrot.lane.b32.xlu1 %v3363_v51, %s13643_s30  ;;  %v9829_v25 = vpack.i.bf16 %v3593_v24, %v3592_v48 }
 0x650   : > { %3372 = vrot.lane.b32.xlu0 %v3358_v4, %s13643_s30  ;;  %s13993_s30 = smov 8  }
 0x658   : > { %9825 = vrot.lane.b32.xlu0 %v9824_v54, %s13648_s23 }
 0x691   : > { %v3365_v1 = vpop.permute.xlu2 %3364 }
 0x692   : > { %v3376_v55 = vrot.slane %v3365_v1, 4 }
 0x699   : > { %v3371_v6 = vpop.permute.xlu2 %3370 }
 0x69a   : > { %v3379_v44 = vrot.slane %v3371_v6, 4 }
 0x6a1   : > { %v11704_v14 = vpop.permute.xlu2 %9820 }
 0x6a2   : > { %v9823_v45 = vunpack.i.h.bf16 %v11704_v14  ;;  %v9822_v18 = vunpack.i.l.bf16 %v11704_v14 }
 0x6a4   : > { %v3463_v32 = vsel %vm13788_vm0, %v9822_v18, %v9823_v45  ;;  %v3471_v46 = vmul.f32 %v9822_v18, %v11657_v12  ;;  %v3476_v22 = vmul.f32 %v9822_v18, %v3442_v5  ;;  %vm13793_vm0 = vmmov %vm13789_vm9 }
 0x6a5   : > { %v3472_v59 = vmul.f32 %v3463_v32, %v11659_v27  ;;  %v3477_v17 = vmul.f32 %v3463_v32, %v3443_v41 }
 0x6a7   : > { %v3481_v21 = vpack.c.bf16 %v3472_v59, %v3471_v46  ;;  %v3484_v2 = vpack.c.bf16 %v3477_v17, %v3476_v22  ;;  %v3556_v22 = vunpack.c.h.b16 %v11709_v28 }
 0x6a9   : > { %v3493_v42 = vrot.slane %v3481_v21, 7  ;;  %v3497_v7 = vrot.slane %v3484_v2, 7  ;;  %v3405_v21 = vld [vmem:[#allocation2 + $0x14] sm:$0xf]  ;;  %v11743_v2 = vunpack.c.l.bf16 %v3404_v13 }
 0x6ab   : > { %3505 = vrot.lane.b32.xlu1 %v3493_v42, %s13650_s25  ;;  %v3496_v11 = vrot.slane %v3493_v42, 4  ;;  %v3441_v42 = vunpack.c.l.bf16 %v3405_v21 }
 0x6ad   : > { %v3498_v56 = vsel %vm13749_vm2, %v3496_v11, %v3497_v7  ;;  %v11745_v11 = vunpack.c.h.bf16 %v3404_v13  ;;  %v3444_v7 = vunpack.c.l.bf16 %v3407_v36 }
 0x6b3   : > { %3511 = vrot.lane.b32.xlu1 %v3498_v56, %s13650_s25  ;;  %v3560_v56 = vpack.c.b16 %v3556_v22, %v3556_v22 }
 0x6b9   : > { %v3369_v61 = vpop.permute.xlu1 %3368 }
 0x6ba   : > { %v3378_v63 = vrot.slane %v3369_v61, 4  ;;  %v3367_v15 = vpop.permute.xlu0 %3366 }
 0x6bb   : > { %v3377_v40 = vrot.slane %v3367_v15, 4  ;;  %9830 = vrot.lane.b32.xlu1 %v9829_v25, %s13652_s17  ;;  %v3445_v25 = vunpack.c.h.bf16 %v3407_v36  ;;  %v9718_v36 = vunpack.i.h.bf16 %v11198_v29 }
 0x6bd   : > { %v3382_v51 = vsel %vm13789_vm9, %v3376_v55, %v3377_v40  ;;  %v3385_v4 = vsel %vm13790_vm11, %v3377_v40, %v3378_v63  ;;  %vm13794_vm9 = vmmov %vm13793_vm0 }
 0x6be   : > { %v3384_v54 = vsel %vm13791_vm1, %v3365_v1, %v3382_v51  ;;  %v3386_v10 = vsel %vm13792_vm15, %v3367_v15, %v3385_v4  ;;  %v5516_v1 = vld [vmem:[%s13557_s4] sm:$0x11]  ;;  %vm13795_vm11 = vmmov %vm13791_vm1  ;;  %vm13796_vm15 = vcmask 449536   ;;  %v3577_v4 = vshrl.u32 %v3560_v56, 16 }
 0x6bf   : > { %v3396_v38 = vsel %vm11040_vm13, %v3384_v54, %v3395_v31  ;;  %v3399_v50 = vsel %vm11040_vm13, %v3386_v10, %v3398_v47  ;;  %v5520_v17 = vunpack.c.l.b16 %v5516_v1 }
 0x6c0   : > { %3397 = vst [vmem:[#allocation3 + $0x130] sm:$0xff] %v3396_v38  ;;  %v3578_v14 = vpack.i.b16 %v3577_v4, %v3577_v4 }
 0x6c1   : > { %3400 = vst [vmem:[#allocation3 + $0x138] sm:$0xff] %v3399_v50  ;;  %v3375_v18 = vpop.permute.xlu1 %3374  ;;  %v5524_v48 = vpack.c.b16 %v5520_v17, %v5520_v17  ;;  %v3543_v17 = vld [vmem:[#allocation2 + $0x4] sm:$0xff] }
 0x6c2   : > { %v3381_v20 = vrot.slane %v3375_v18, 4  ;;  %v3373_v5 = vpop.permute.xlu0 %3372 }
 0x6c3   : > { %v3380_v41 = vrot.slane %v3373_v5, 4  ;;  %v5529_v31 = vshrl.u32 %v5524_v48, 16  ;;  %v3717_v48 = vld [vmem:[%s13557_s4 + $0x20] sm:$0x44] }
 0x6c5   : > { %v3387_v32 = vsel %vm13793_vm0, %v3379_v44, %v3380_v41  ;;  %v3389_v46 = vsel %vm13794_vm9, %v3380_v41, %v3381_v20  ;;  %vm13797_vm0 = vmmov %vm13796_vm15  ;;  %v3580_v41 = vperm.slane %v3578_v14, 1  ;;  %vm13798_vm9 = vcmask 457728  }
 0x6c6   : > { %v3388_v49 = vsel %vm13795_vm11, %v3371_v6, %v3387_v32  ;;  %v3390_v59 = vsel %vm13791_vm1, %v3373_v5, %v3389_v46  ;;  %vm13799_vm11 = vcmask 1043456   ;;  %vm13800_vm1 = vcmask 596992  }
 0x6c7   : > { %3401 = vst [vmem:[#allocation3 + $0x140] sm:$0x11] %v3388_v49 }
 0x6c8   : > { %3402 = vst [vmem:[#allocation3 + $0x148] sm:$0x11] %v3390_v59  ;;  %v3594_v59 = vunpack.c.l.bf16 %v3580_v41 }
 0x6ca   : > { %v9826_v58 = vpop.permute.xlu0 %9825 }
 0x6cb   : > { %v9828_v60 = vunpack.i.h.bf16 %v9826_v58  ;;  %v9827_v6 = vunpack.i.l.bf16 %v9826_v58  ;;  %v3582_v58 = vunpack.c.h.bf16 %v3543_v17 }
 0x6cd   : > { %v3475_v24 = vmul.f32 %v9828_v60, %v3441_v42  ;;  %v3464_v28 = vsel %vm13796_vm15, %v9823_v45, %v9827_v6  ;;  %v3465_v61 = vsel %vm13797_vm0, %v9827_v6, %v9828_v60  ;;  %v3480_v55 = vmul.f32 %v9828_v60, %v3446_v34  ;;  %vm13801_vm15 = vmmov %vm13799_vm11 }
 0x6ce   : > { %v3473_v63 = vmul.f32 %v3464_v28, %v11743_v2  ;;  %v3474_v15 = vmul.f32 %v3465_v61, %v11745_v11  ;;  %v3478_v54 = vmul.f32 %v3464_v28, %v3444_v7  ;;  %v3479_v10 = vmul.f32 %v3465_v61, %v3445_v25  ;;  %v3546_v7 = vld [vmem:[#allocation2 + $0x1c] sm:$0x11]  ;;  %vm13802_vm0 = vmmov %vm13800_vm1 }
 0x6cf   : > { %v3483_v40 = vpack.c.bf16 %v3475_v24, %v3475_v24  ;;  %v3486_v50 = vpack.c.bf16 %v3480_v55, %v3480_v55  ;;  %v5530_v45 = vpack.i.b16 %v5529_v31, %v5529_v31  ;;  %v3581_v42 = vunpack.c.l.bf16 %v3543_v17 }
 0x6d0   : > { %v3482_v51 = vpack.c.bf16 %v3474_v15, %v3473_v63  ;;  %v3485_v18 = vpack.c.bf16 %v3479_v10, %v3478_v54  ;;  %v3587_v25 = vunpack.c.h.bf16 %v3546_v7  ;;  %v3586_v15 = vunpack.c.l.bf16 %v3546_v7 }
 0x6d1   : > { %v3495_v47 = vrot.slane %v3483_v40, 7  ;;  %v3503_v5 = vrot.slane %v3486_v50, 7  ;;  %v5532_v32 = vperm.slane %v5530_v45, 0  ;;  %v3615_v61 = vmul.f32 %v9718_v36, %v3581_v42  ;;  %v3547_v42 = vld [vmem:[#allocation2 + $0x24] sm:$0x11] }
 0x6d2   : > { %v3494_v38 = vrot.slane %v3482_v51, 7  ;;  %v3500_v46 = vrot.slane %v3485_v18, 7  ;;  %v3721_v55 = vunpack.c.l.b16 %v3717_v48  ;;  %v3722_v40 = vunpack.c.h.b16 %v3717_v48 }
 0x6d3   : > { %3509 = vrot.lane.b32.xlu0 %v3495_v47, %s13650_s25  ;;  %v3502_v20 = vrot.slane %v3495_v47, 4  ;;  %v5553_v21 = vunpack.c.l.bf16 %v5532_v32  ;;  %v3620_v10 = vmul.f32 %v9718_v36, %v3586_v15  ;;  %v3718_v15 = vld [vmem:[%s13557_s4 + $0x28] sm:$0x44] }
 0x6d4   : > { %3507 = vrot.lane.b32.xlu2 %v3494_v38, %s13650_s25  ;;  %v3499_v44 = vrot.slane %v3494_v38, 4  ;;  %v3725_v50 = vpack.c.b16 %v3721_v55, %v3721_v55  ;;  %v3726_v14 = vpack.c.b16 %v3722_v40, %v3722_v40  ;;  %v3589_v55 = vunpack.c.h.bf16 %v3547_v42 }
 0x6d5   : > { %v3504_v1 = vsel %vm13749_vm2, %v3502_v20, %v3503_v5  ;;  %v9834_v13 = vpack.i.bf16 %v5553_v21, %v3594_v59  ;;  %v3545_v59 = vld [vmem:[#allocation2 + $0x14] sm:$0xf] }
 0x6d6   : > { %v3501_v49 = vsel %vm13749_vm2, %v3499_v44, %v3500_v46  ;;  %v3537_v44 = vld [vmem:[#allocation3 + $0x150] sm:$0x33]  ;;  %v3730_v21 = vpack.i.b16 %v3725_v50, %v3725_v50  ;;  %v3724_v50 = vunpack.c.h.b16 %v3718_v15 }
 0x6db   : > { %3515 = vrot.lane.b32.xlu0 %v3504_v1, %s13650_s25 }
 0x6dc   : > { %3513 = vrot.lane.b32.xlu2 %v3501_v49, %s13650_s25 }
 0x6e4   : > { %9835 = vrot.lane.b32.xlu2 %v9834_v13, %s13652_s17  ;;  %v3734_v13 = vpack.i.b16 %v3726_v14, %v3726_v14 }
 0x71d   : > { %v3506_v33 = vpop.permute.xlu1 %3505 }
 0x71e   : > { %v3517_v24 = vrot.slane %v3506_v33, 4 }
 0x725   : > { %v3512_v22 = vpop.permute.xlu1 %3511 }
 0x726   : > { %v3520_v45 = vrot.slane %v3512_v22, 4 }
 0x72d   : > { %v9831_v34 = vpop.permute.xlu1 %9830 }
 0x72e   : > { %v9832_v60 = vunpack.i.l.bf16 %v9831_v34  ;;  %v11763_v6 = vpop.permute.xlu2 %3507  ;;  %v9833_v1 = vunpack.i.h.bf16 %v9831_v34  ;;  %v3732_v34 = vperm.slane %v3730_v21, 2 }
 0x72f   : > { %v3518_v56 = vrot.slane %v11763_v6, 4 }
 0x730   : > { %v3607_v28 = vsel %vm13798_vm9, %v9718_v36, %v9832_v60  ;;  %v3548_v36 = vld [vmem:[#allocation2 + $0x2c] sm:$0x1]  ;;  %v3608_v7 = vsel %vm13798_vm9, %v9832_v60, %v9833_v1 }
 0x731   : > { %v3616_v63 = vmul.f32 %v3607_v28, %v3582_v58  ;;  %v3523_v29 = vsel %vm13799_vm11, %v3517_v24, %v3518_v56  ;;  %v3621_v31 = vmul.f32 %v3607_v28, %v3587_v25  ;;  %v3585_v58 = vunpack.c.l.bf16 %v3545_v59  ;;  %vm13803_vm11 = vmmov %vm13798_vm9 }
 0x732   : > { %v3524_v51 = vsel %vm13800_vm1, %v3506_v33, %v3523_v29  ;;  %v3588_v28 = vunpack.c.l.bf16 %v3547_v42  ;;  %v3617_v29 = vmul.f32 %v3608_v7, %v11743_v2  ;;  %vm13804_vm1 = vmmov %vm13801_vm15 }
 0x733   : > { %v3625_v4 = vpack.c.bf16 %v3616_v63, %v3615_v61  ;;  %3535 = vst [vmem:[#allocation3 + $0x140] sm:$0xee] %v3524_v51  ;;  %v3628_v41 = vpack.c.bf16 %v3621_v31, %v3620_v10  ;;  %v3590_v61 = vunpack.c.l.bf16 %v3548_v36  ;;  %v3755_v31 = vunpack.c.l.bf16 %v3732_v34 }
 0x734   : > { %v3723_v10 = vunpack.c.l.b16 %v3718_v15 }
 0x735   : > { %v3632_v47 = vshrl.u32 %v3625_v4, 16  ;;  %v3635_v54 = vshll.u32 %v3625_v4, 16  ;;  %v3657_v17 = vshll.u32 %v3628_v41, 16 }
 0x736   : > { %v11774_v38 = vpop.permute.xlu2 %3513 }
 0x737   : > { %v3521_v18 = vrot.slane %v11774_v38, 4  ;;  %v3634_v20 = vrot.slane %v3632_v47, 6  ;;  %v3637_v5 = vrot.slane %v3635_v54, 7  ;;  %v3659_v63 = vrot.slane %v3657_v17, 7 }
 0x738   : > { %v3728_v17 = vpack.c.b16 %v3724_v50, %v3724_v50 }
 0x739   : > { %v3527_v32 = vsel %vm13801_vm15, %v3520_v45, %v3521_v18  ;;  %v3638_v46 = vor.u32 %v3637_v5, %v3634_v20  ;;  %v3622_v20 = vmul.f32 %v3608_v7, %v3588_v28  ;;  %vm13805_vm15 = vmmov %vm13802_vm0 }
 0x73a   : > { %v3528_v49 = vsel %vm13802_vm0, %v3512_v22, %v3527_v32  ;;  %v3736_v22 = vperm.slane %v3734_v13, 2  ;;  %vm13807_vm0 = vmmov %vm13804_vm1 }
 0x73b   : > { %v3538_v33 = vsel %vm13751_vm10, %v3528_v49, %v3537_v44  ;;  %3673 = vrot.lane.b32.xlu0 %v3638_v46, %s13645_s13  ;;  %v3655_v48 = vrot.slane %v3638_v46, 4  ;;  %vm13808_vm9 = vmmov %vm13805_vm15 }
 0x73c   : > { %3539 = vst [vmem:[#allocation3 + $0x150] sm:$0x33] %v3538_v33  ;;  %v3756_v47 = vunpack.c.l.bf16 %v3736_v22  ;;  %v3727_v33 = vpack.c.b16 %v3723_v10, %v3723_v10 }
 0x73d   : > { %v3660_v4 = vsel %vm13750_vm3, %v3655_v48, %v3659_v63  ;;  %v3742_v63 = vpack.i.b16 %v3728_v17, %v3728_v17 }
 0x73e   : > { %v11785_v24 = vpop.permute.xlu2 %9835 }
 0x73f   : > { %v9837_v25 = vunpack.i.l.bf16 %v11785_v24 }
 0x741   : > { %v3609_v40 = vsel %vm13803_vm11, %v9833_v1, %v9837_v25  ;;  %v3619_v60 = vmul.f32 %v9837_v25, %v3585_v58  ;;  %v3624_v14 = vmul.f32 %v9837_v25, %v3590_v61  ;;  %v9839_v1 = vpack.i.bf16 %v3756_v47, %v3755_v31  ;;  %vm13810_vm11 = vmmov %vm13807_vm0 }
 0x742   : > { %v3618_v51 = vmul.f32 %v3609_v40, %v11745_v11  ;;  %v3623_v5 = vmul.f32 %v3609_v40, %v3589_v55  ;;  %v3738_v61 = vpack.i.b16 %v3727_v33, %v3727_v33  ;;  %v3744_v31 = vperm.slane %v3742_v63, 2 }
 0x743   : > { %3679 = vrot.lane.b32.xlu0 %v3660_v4, %s13645_s13  ;;  %v3627_v54 = vpack.c.bf16 %v3619_v60, %v3619_v60  ;;  %v3630_v42 = vpack.c.bf16 %v3624_v14, %v3624_v14  ;;  %v3540_v60 = vld [vmem:[#allocation3 + $0x158] sm:$0x33] }
 0x744   : > { %v3626_v45 = vpack.c.bf16 %v3618_v51, %v3617_v29  ;;  %v3629_v22 = vpack.c.bf16 %v3623_v5, %v3622_v20  ;;  %v3740_v4 = vperm.slane %v3738_v61, 2  ;;  %v3703_v61 = vld [vmem:[#allocation3 + $0x150] sm:$0xee] }
 0x745   : > { %v3510_v44 = vpop.permute.xlu0 %3509  ;;  %v3648_v41 = vshrl.u32 %v3627_v54, 16  ;;  %v3651_v32 = vshll.u32 %v3627_v54, 16  ;;  %v3669_v28 = vshll.u32 %v3630_v42, 16 }
 0x746   : > { %v3519_v46 = vrot.slane %v3510_v44, 4  ;;  %v3640_v49 = vshrl.u32 %v3626_v45, 16  ;;  %v3643_v59 = vshll.u32 %v3626_v45, 16  ;;  %v3758_v45 = vunpack.c.l.bf16 %v3744_v31  ;;  %v3857_v44 = vld [vmem:[%s13557_s4 + $0x20] sm:$0x44] }
 0x747   : > { %v3650_v21 = vrot.slane %v3648_v41, 6  ;;  %v3653_v13 = vrot.slane %v3651_v32, 7  ;;  %v3671_v51 = vrot.slane %v3669_v28, 7  ;;  %v3861_v32 = vunpack.c.l.b16 %v3857_v44 }
 0x748   : > { %v3525_v36 = vsel %vm13804_vm1, %v3518_v56, %v3519_v46  ;;  %v3642_v58 = vrot.slane %v3640_v49, 6  ;;  %v3645_v48 = vrot.slane %v3643_v59, 7  ;;  %v3663_v56 = vshll.u32 %v3629_v22, 16  ;;  %vm13811_vm1 = vmmov %vm13807_vm0 }
 0x749   : > { %v3526_v7 = vsel %vm13805_vm15, %v11763_v6, %v3525_v36  ;;  %v3654_v34 = vor.u32 %v3653_v13, %v3650_v21  ;;  %v3862_v46 = vunpack.c.h.b16 %v3857_v44  ;;  %v3865_v13 = vpack.c.b16 %v3861_v32, %v3861_v32 }
 0x74a   : > { %3536 = vst [vmem:[#allocation3 + $0x148] sm:$0xee] %v3526_v7  ;;  %v3646_v25 = vor.u32 %v3645_v48, %v3642_v58  ;;  %v3665_v54 = vrot.slane %v3663_v56, 7  ;;  %vm13812_vm15 = vcmask 588800  }
 0x74b   : > { %9840 = vrot.lane.b32.xlu0 %v9839_v1, %s13806_s24  ;;  %3677 = vrot.lane.b32.xlu2 %v3654_v34, %s13645_s13  ;;  %v3667_v29 = vrot.slane %v3654_v34, 4  ;;  %v3714_v1 = vld [vmem:[#allocation2 + $0x1c] sm:$0x11]  ;;  %v3866_v36 = vpack.c.b16 %v3862_v46, %v3862_v46 }
 0x74c   : > { %3675 = vrot.lane.b32.xlu1 %v3646_v25, %s13645_s13  ;;  %v3661_v40 = vrot.slane %v3646_v25, 4  ;;  %v3750_v58 = vunpack.c.l.bf16 %v3714_v1  ;;  %v3751_v48 = vunpack.c.h.bf16 %v3714_v1  ;;  %v3713_v1 = vld [vmem:[#allocation2 + $0x14] sm:$0xf] }
 0x74d   : > { %v3516_v15 = vpop.permute.xlu0 %3515  ;;  %v3672_v50 = vsel %vm13750_vm3, %v3667_v29, %v3671_v51  ;;  %v3870_v29 = vshrl.u32 %v3865_v13, 16  ;;  %v3875_v51 = vshrl.u32 %v3866_v36, 16 }
 0x74e   : > { %v3522_v55 = vrot.slane %v3516_v15, 4  ;;  %v3666_v14 = vsel %vm13750_vm3, %v3661_v40, %v3665_v54  ;;  %vm13809_vm3 = vcmask 465920  }
 0x750   : > { %v3529_v6 = vsel %vm13807_vm0, %v3521_v18, %v3522_v55  ;;  %v3757_v18 = vunpack.c.l.bf16 %v3740_v4  ;;  %vm13813_vm0 = vmmov %vm13812_vm15 }
 0x751   : > { %v3530_v47 = vsel %vm13808_vm9, %v11774_v38, %v3529_v6  ;;  %vm13815_vm9 = vmmov %vm13811_vm1 }
 0x752   : > { %v3541_v10 = vsel %vm13751_vm10, %v3530_v47, %v3540_v60  ;;  %v9844_v20 = vpack.i.bf16 %v3758_v45, %v3757_v18  ;;  %v3871_v18 = vpack.i.b16 %v3870_v29, %v3870_v29  ;;  %v3876_v45 = vpack.i.b16 %v3875_v51, %v3875_v51 }
 0x753   : > { %3542 = vst [vmem:[#allocation3 + $0x158] sm:$0x33] %v3541_v10  ;;  %3683 = vrot.lane.b32.xlu2 %v3672_v50, %s13645_s13 }
 0x754   : > { %3681 = vrot.lane.b32.xlu1 %v3666_v14, %s13645_s13  ;;  %v3873_v13 = vperm.slane %v3871_v18, 2 }
 0x75a   : > { %v3706_v63 = vld [vmem:[#allocation3 + $0x158] sm:$0xee] }
 0x75c   : > { %9845 = vrot.lane.b32.xlu1 %v9844_v20, %s13806_s24 }
 0x7a5   : > { %v3678_v41 = vpop.permute.xlu2 %3677 }
 0x7a6   : > { %v3687_v33 = vrot.slane %v3678_v41, 4  ;;  %v3858_v41 = vld [vmem:[%s13557_s4 + $0x28] sm:$0x44] }
 0x7a7   : > { %v3864_v36 = vunpack.c.h.b16 %v3858_v41 }
 0x7ad   : > { %v3674_v38 = vpop.permute.xlu0 %3673  ;;  %v3684_v55 = vpop.permute.xlu2 %3683 }
 0x7ae   : > { %v3685_v17 = vrot.slane %v3674_v38, 4  ;;  %v3690_v54 = vrot.slane %v3684_v55, 4 }
 0x7b5   : > { %v3680_v5 = vpop.permute.xlu0 %3679 }
 0x7b6   : > { %v3688_v50 = vrot.slane %v3680_v5, 4 }
 0x7bd   : > { %v11822_v49 = vpop.permute.xlu0 %9840 }
 0x7be   : > { %v9843_v26 = vunpack.i.h.bf16 %v11822_v49  ;;  %v9842_v59 = vunpack.i.l.bf16 %v11822_v49  ;;  %v3676_v21 = vpop.permute.xlu1 %3675 }
 0x7bf   : > { %v3686_v42 = vrot.slane %v3676_v21, 4 }
 0x7c0   : > { %v3771_v7 = vsel %vm13809_vm3, %v9842_v59, %v9843_v26  ;;  %v3779_v34 = vmul.f32 %v9842_v59, %v11657_v12  ;;  %v3784_v4 = vmul.f32 %v9842_v59, %v3750_v58  ;;  %vm13816_vm3 = vmmov %vm13811_vm1  ;;  %v3715_v58 = vld [vmem:[#allocation2 + $0x24] sm:$0x11] }
 0x7c1   : > { %v3780_v22 = vmul.f32 %v3771_v7, %v11659_v27  ;;  %v3691_v25 = vsel %vm13810_vm11, %v3685_v17, %v3686_v42  ;;  %v3693_v28 = vsel %vm13811_vm1, %v3686_v42, %v3687_v33  ;;  %v3785_v31 = vmul.f32 %v3771_v7, %v3751_v48  ;;  %vm13817_vm11 = vmmov %vm13813_vm0 }
 0x7c2   : > { %v3692_v15 = vsel %vm13812_vm15, %v3674_v38, %v3691_v25  ;;  %v3694_v56 = vsel %vm13813_vm0, %v3676_v21, %v3693_v28  ;;  %vm13818_vm1 = vmmov %vm13813_vm0  ;;  %v3716_v21 = vld [vmem:[#allocation2 + $0x2c] sm:$0x1]  ;;  %v3878_v33 = vperm.slane %v3876_v45, 2  ;;  %v3863_v42 = vunpack.c.l.b16 %v3858_v41 }
 0x7c3   : > { %v3704_v40 = vsel %vm11068_vm4, %v3692_v15, %v3703_v61  ;;  %v3707_v60 = vsel %vm11068_vm4, %v3694_v56, %v3706_v63  ;;  %v3789_v6 = vpack.c.bf16 %v3780_v22, %v3779_v34  ;;  %v3792_v20 = vpack.c.bf16 %v3785_v31, %v3784_v4 }
 0x7c4   : > { %3705 = vst [vmem:[#allocation3 + $0x150] sm:$0xee] %v3704_v40  ;;  %v3749_v48 = vunpack.c.l.bf16 %v3713_v1  ;;  %v3754_v7 = vunpack.c.l.bf16 %v3716_v21  ;;  %vm13819_vm15 = vnez %v13687_v16  ;;  %v3899_v28 = vunpack.c.l.bf16 %v3873_v13 }
 0x7c5   : > { %3708 = vst [vmem:[#allocation3 + $0x158] sm:$0xee] %v3707_v60  ;;  %v3801_v47 = vrot.slane %v3789_v6, 6  ;;  %v3805_v17 = vrot.slane %v3792_v20, 6  ;;  %v3900_v61 = vunpack.c.l.bf16 %v3878_v33  ;;  %v3752_v63 = vunpack.c.l.bf16 %v3715_v58 }
 0x7c6   : > { %v3682_v10 = vpop.permute.xlu1 %3681  ;;  %v3867_v15 = vpack.c.b16 %v3863_v42, %v3863_v42  ;;  %v3868_v56 = vpack.c.b16 %v3864_v36, %v3864_v36  ;;  %v3753_v29 = vunpack.c.h.bf16 %v3715_v58  ;;  %vm13820_vm0 = vcmask 465920  }
 0x7c7   : > { %v3689_v14 = vrot.slane %v3682_v10, 4  ;;  %3813 = vrot.lane.b32.xlu2 %v3801_v47, %s13814_s26  ;;  %v3804_v59 = vrot.slane %v3801_v47, 4  ;;  %v9849_v31 = vpack.i.bf16 %v3900_v61, %v3899_v28 }
 0x7c9   : > { %v3695_v38 = vsel %vm13815_vm9, %v3688_v50, %v3689_v14  ;;  %v3697_v44 = vsel %vm13816_vm3, %v3689_v14, %v3690_v54  ;;  %v3806_v22 = vsel %vm13819_vm15, %v3804_v59, %v3805_v17  ;;  %vm13821_vm9 = vmmov %vm13820_vm0  ;;  %v3885_v50 = vshrl.u32 %v3868_v56, 16 }
 0x7ca   : > { %v3696_v32 = vsel %vm13817_vm11, %v3680_v5, %v3695_v38  ;;  %v3698_v46 = vsel %vm13818_vm1, %v3682_v10, %v3697_v44  ;;  %v3880_v10 = vshrl.u32 %v3867_v15, 16  ;;  %vm13823_vm3 = vcmask 515072  }
 0x7cb   : > { %3709 = vst [vmem:[#allocation3 + $0x160] sm:$0x33] %v3696_v32  ;;  %vm13825_vm11 = vcmask 1043456  }
 0x7cc   : > { %3710 = vst [vmem:[#allocation3 + $0x168] sm:$0x33] %v3698_v46  ;;  %v3881_v49 = vpack.i.b16 %v3880_v10, %v3880_v10  ;;  %vm13826_vm1 = vmmov %vm13825_vm11 }
 0x7ce   : > { %v9846_v34 = vpop.permute.xlu1 %9845  ;;  %v3883_v1 = vperm.slane %v3881_v49, 2 }
 0x7cf   : > { %v9848_v5 = vunpack.i.h.bf16 %v9846_v34  ;;  %v9847_v25 = vunpack.i.l.bf16 %v9846_v34  ;;  %3819 = vrot.lane.b32.xlu2 %v3806_v22, %s13814_s26 }
 0x7d0   : > { %v3901_v17 = vunpack.c.l.bf16 %v3883_v1 }
 0x7d1   : > { %v3783_v55 = vmul.f32 %v9848_v5, %v3749_v48  ;;  %v3772_v40 = vsel %vm13820_vm0, %v9843_v26, %v9847_v25  ;;  %v3773_v60 = vsel %vm13821_vm9, %v9847_v25, %v9848_v5  ;;  %v3788_v6 = vmul.f32 %v9848_v5, %v3754_v7  ;;  %v3854_v7 = vld [vmem:[#allocation2 + $0x1c] sm:$0x11]  ;;  %vm13830_vm9 = vmmov %vm13826_vm1 }
 0x7d2   : > { %v3781_v51 = vmul.f32 %v3772_v40, %v11743_v2  ;;  %v3782_v4 = vmul.f32 %v3773_v60, %v11745_v11  ;;  %v3786_v14 = vmul.f32 %v3772_v40, %v3752_v63  ;;  %v3787_v18 = vmul.f32 %v3773_v60, %v3753_v29  ;;  %v4025_v63 = vld [vmem:[%s13557_s4 + $0x20] sm:$0x88] }
 0x7d3   : > { %v3791_v47 = vpack.c.bf16 %v3783_v55, %v3783_v55  ;;  %v3794_v38 = vpack.c.bf16 %v3788_v6, %v3788_v6  ;;  %v3886_v26 = vpack.i.b16 %v3885_v50, %v3885_v50  ;;  %v3894_v25 = vunpack.c.l.bf16 %v3854_v7 }
 0x7d4   : > { %v3790_v54 = vpack.c.bf16 %v3782_v4, %v3781_v51  ;;  %v3793_v44 = vpack.c.bf16 %v3787_v18, %v3786_v14  ;;  %v3895_v28 = vunpack.c.h.bf16 %v3854_v7  ;;  %v4029_v29 = vunpack.c.l.b16 %v4025_v63 }
 0x7d5   : > { %v3803_v45 = vrot.slane %v3791_v47, 6  ;;  %v3811_v32 = vrot.slane %v3794_v38, 6  ;;  %v3888_v59 = vperm.slane %v3886_v26, 2  ;;  %v4030_v55 = vunpack.c.h.b16 %v4025_v63 }
 0x7d6   : > { %v3802_v20 = vrot.slane %v3790_v54, 6  ;;  %v3808_v21 = vrot.slane %v3793_v44, 6  ;;  %v4033_v47 = vpack.c.b16 %v4029_v29, %v4029_v29  ;;  %v3853_v29 = vld [vmem:[#allocation2 + $0x14] sm:$0xf] }
 0x7d7   : > { %9850 = vrot.lane.b32.xlu2 %v9849_v31, %s13822_s19  ;;  %3817 = vrot.lane.b32.xlu1 %v3803_v45, %s13814_s26  ;;  %v3810_v41 = vrot.slane %v3803_v45, 4  ;;  %v3902_v42 = vunpack.c.l.bf16 %v3888_v59  ;;  %v4034_v54 = vpack.c.b16 %v4030_v55, %v4030_v55 }
 0x7d8   : > { %3815 = vrot.lane.b32.xlu0 %v3802_v20, %s13814_s26  ;;  %v3807_v46 = vrot.slane %v3802_v20, 4 }
 0x7d9   : > { %v3812_v13 = vsel %vm13819_vm15, %v3810_v41, %v3811_v32  ;;  %v9854_v36 = vpack.i.bf16 %v3902_v42, %v3901_v17  ;;  %v4042_v14 = vpack.i.b16 %v4034_v54, %v4034_v54 }
 0x7da   : > { %v3809_v33 = vsel %vm13819_vm15, %v3807_v46, %v3808_v21  ;;  %vm13827_vm15 = vcmask 580608  }
 0x7db   : > { %v4044_v20 = vperm.slane %v4042_v14, 3  ;;  %vm13828_vm0 = vmmov %vm13827_vm15 }
 0x7dd   : > { %v4064_v44 = vunpack.c.l.bf16 %v4044_v20 }
 0x7df   : > { %3823 = vrot.lane.b32.xlu1 %v3812_v13, %s13814_s26 }
 0x7e0   : > { %3821 = vrot.lane.b32.xlu0 %v3809_v33, %s13814_s26 }
 0x7e8   : > { %9855 = vrot.lane.b32.xlu0 %v9854_v36, %s13822_s19 }
 0x821   : > { %v3814_v58 = vpop.permute.xlu2 %3813 }
 0x822   : > { %v3825_v1 = vrot.slane %v3814_v58, 4 }
 0x829   : > { %v3820_v48 = vpop.permute.xlu2 %3819 }
 0x831   : > { %v11866_v34 = vpop.permute.xlu2 %9850 }
 0x832   : > { %v9853_v22 = vunpack.i.h.bf16 %v11866_v34  ;;  %v9852_v5 = vunpack.i.l.bf16 %v11866_v34 }
 0x834   : > { %v3915_v16 = vsel %vm13823_vm3, %v9852_v5, %v9853_v22  ;;  %v3923_v61 = vmul.f32 %v9852_v5, %v11657_v12  ;;  %v3928_v40 = vmul.f32 %v9852_v5, %v3894_v25  ;;  %v4038_v12 = vpack.i.b16 %v4033_v47, %v4033_v47  ;;  %vm13831_vm3 = vmmov %vm13826_vm1 }
 0x835   : > { %v3924_v15 = vmul.f32 %v3915_v16, %v11659_v27  ;;  %v3929_v60 = vmul.f32 %v3915_v16, %v3895_v28  ;;  %v3828_v25 = vrot.slane %v3820_v48, 4  ;;  %v3845_v16 = vld [vmem:[#allocation3 + $0x170] sm:$0x77] }
 0x836   : > { %v4040_v27 = vperm.slane %v4038_v12, 3 }
 0x837   : > { %v3933_v56 = vpack.c.bf16 %v3924_v15, %v3923_v61  ;;  %v3936_v10 = vpack.c.bf16 %v3929_v60, %v3928_v40  ;;  %v3848_v61 = vld [vmem:[#allocation3 + $0x178] sm:$0x77] }
 0x838   : > { %v4063_v26 = vunpack.c.l.bf16 %v4040_v27  ;;  %v3855_v60 = vld [vmem:[#allocation2 + $0x24] sm:$0x11] }
 0x839   : > { %v3940_v6 = vshrl.u32 %v3933_v56, 16  ;;  %v3943_v51 = vshll.u32 %v3933_v56, 16  ;;  %v3965_v18 = vshll.u32 %v3936_v10, 16  ;;  %v3896_v54 = vunpack.c.l.bf16 %v3855_v60 }
 0x83a   : > { %v9859_v21 = vpack.i.bf16 %v4064_v44, %v4063_v26 }
 0x83b   : > { %v3942_v4 = vrot.slane %v3940_v6, 5  ;;  %v3945_v31 = vrot.slane %v3943_v51, 6  ;;  %v3967_v38 = vrot.slane %v3965_v18, 6  ;;  %v3856_v6 = vld [vmem:[#allocation2 + $0x2c] sm:$0x1]  ;;  %v3893_v51 = vunpack.c.l.bf16 %v3853_v29 }
 0x83c   : > { %v3898_v10 = vunpack.c.l.bf16 %v3856_v6 }
 0x83d   : > { %v3946_v50 = vor.u32 %v3945_v31, %v3942_v4 }
 0x83f   : > { %3981 = vrot.lane.b32.xlu1 %v3946_v50, %s13824_s20  ;;  %v3963_v45 = vrot.slane %v3946_v50, 4  ;;  %v3897_v50 = vunpack.c.h.bf16 %v3855_v60 }
 0x841   : > { %v3968_v49 = vsel %vm13754_vm6, %v3963_v45, %v3967_v38 }
 0x847   : > { %3987 = vrot.lane.b32.xlu1 %v3968_v49, %s13824_s20 }
 0x849   : > { %v3818_v41 = vpop.permute.xlu1 %3817 }
 0x84a   : > { %v3827_v32 = vrot.slane %v3818_v41, 4  ;;  %v3816_v46 = vpop.permute.xlu0 %3815 }
 0x84b   : > { %v3826_v59 = vrot.slane %v3816_v46, 4 }
 0x84d   : > { %v3831_v13 = vsel %vm13825_vm11, %v3825_v1, %v3826_v59  ;;  %v3833_v33 = vsel %vm13826_vm1, %v3826_v59, %v3827_v32  ;;  %vm13832_vm11 = vmmov %vm13828_vm0 }
 0x84e   : > { %v3832_v17 = vsel %vm13827_vm15, %v3814_v58, %v3831_v13  ;;  %v3834_v42 = vsel %vm13828_vm0, %v3816_v46, %v3833_v33  ;;  %vm13833_vm1 = vmmov %vm13828_vm0  ;;  %vm13834_vm15 = vcmask 515072  }
 0x84f   : > { %3843 = vst [vmem:[#allocation3 + $0x160] sm:$0xcc] %v3832_v17  ;;  %9860 = vrot.lane.b32.xlu1 %v9859_v21, %s13829_s18  ;;  %vm13835_vm0 = vmmov %vm13834_vm15 }
 0x850   : > { %3844 = vst [vmem:[#allocation3 + $0x168] sm:$0xcc] %v3834_v42 }
 0x851   : > { %v3824_v36 = vpop.permute.xlu1 %3823 }
 0x852   : > { %v3830_v7 = vrot.slane %v3824_v36, 4  ;;  %v3822_v5 = vpop.permute.xlu0 %3821 }
 0x853   : > { %v3829_v28 = vrot.slane %v3822_v5, 4 }
 0x855   : > { %v3835_v63 = vsel %vm13830_vm9, %v3828_v25, %v3829_v28  ;;  %v3837_v15 = vsel %vm13831_vm3, %v3829_v28, %v3830_v7  ;;  %vm13837_vm9 = vmmov %vm13831_vm3  ;;  %vm13838_vm3 = vcmask 531456  }
 0x856   : > { %v3836_v56 = vsel %vm13832_vm11, %v3820_v48, %v3835_v63  ;;  %v3838_v58 = vsel %vm13833_vm1, %v3822_v5, %v3837_v15  ;;  %v4026_v48 = vld [vmem:[%s13557_s4 + $0x28] sm:$0x88]  ;;  %vm13839_vm11 = vnez %v13715_v3  ;;  %vm13840_vm1 = vmmov %vm13837_vm9 }
 0x857   : > { %v3846_v55 = vsel %vm13756_vm5, %v3836_v56, %v3845_v16  ;;  %v3849_v40 = vsel %vm13756_vm5, %v3838_v58, %v3848_v61  ;;  %v4031_v38 = vunpack.c.l.b16 %v4026_v48  ;;  %v4032_v44 = vunpack.c.h.b16 %v4026_v48  ;;  %v4165_v48 = vld [vmem:[%s13557_s4 + $0x20] sm:$0x88] }
 0x858   : > { %3847 = vst [vmem:[#allocation3 + $0x170] sm:$0x77] %v3846_v55 }
 0x859   : > { %3850 = vst [vmem:[#allocation3 + $0x178] sm:$0x77] %v3849_v40  ;;  %v4036_v36 = vpack.c.b16 %v4032_v44, %v4032_v44 }
 0x85a   : > { %v9856_v4 = vpop.permute.xlu0 %9855 }
 0x85b   : > { %v9858_v31 = vunpack.i.h.bf16 %v9856_v4  ;;  %v9857_v47 = vunpack.i.l.bf16 %v9856_v4  ;;  %v4050_v61 = vpack.i.b16 %v4036_v36, %v4036_v36 }
 0x85d   : > { %v3927_v12 = vmul.f32 %v9858_v31, %v3893_v51  ;;  %v3916_v14 = vsel %vm13834_vm15, %v9853_v22, %v9857_v47  ;;  %v3917_v18 = vsel %vm13835_vm0, %v9857_v47, %v9858_v31  ;;  %v3932_v49 = vmul.f32 %v9858_v31, %v3898_v10  ;;  %v4019_v10 = vld [vmem:[#allocation2 + $0x4] sm:$0xff]  ;;  %vm13841_vm15 = vmmov %vm13838_vm3 }
 0x85e   : > { %v3925_v45 = vmul.f32 %v3916_v14, %v11743_v2  ;;  %v3926_v27 = vmul.f32 %v3917_v18, %v11745_v11  ;;  %v3930_v41 = vmul.f32 %v3916_v14, %v3896_v54  ;;  %v3931_v32 = vmul.f32 %v3917_v18, %v3897_v50 }
 0x85f   : > { %v3935_v20 = vpack.c.bf16 %v3927_v12, %v3927_v12  ;;  %v4035_v22 = vpack.c.b16 %v4031_v38, %v4031_v38  ;;  %v3938_v33 = vpack.c.bf16 %v3932_v49, %v3932_v49  ;;  %v4052_v55 = vperm.slane %v4050_v61, 3 }
 0x860   : > { %v3934_v26 = vpack.c.bf16 %v3926_v27, %v3925_v45  ;;  %v3937_v5 = vpack.c.bf16 %v3931_v32, %v3930_v41  ;;  %v11916_v50 = vunpack.c.l.bf16 %v4019_v10  ;;  %v4169_v12 = vunpack.c.l.b16 %v4165_v48 }
 0x861   : > { %v3956_v46 = vshrl.u32 %v3935_v20, 16  ;;  %v3959_v1 = vshll.u32 %v3935_v20, 16  ;;  %v3977_v28 = vshll.u32 %v3938_v33, 16  ;;  %v4046_v16 = vpack.i.b16 %v4035_v22, %v4035_v22 }
 0x862   : > { %v3948_v59 = vshrl.u32 %v3934_v26, 16  ;;  %v3951_v21 = vshll.u32 %v3934_v26, 16  ;;  %v3971_v63 = vshll.u32 %v3937_v5, 16  ;;  %v4066_v4 = vunpack.c.l.bf16 %v4052_v55 }
 0x863   : > { %v3958_v34 = vrot.slane %v3956_v46, 5  ;;  %v3961_v13 = vrot.slane %v3959_v1, 6  ;;  %v3979_v58 = vrot.slane %v3977_v28, 6  ;;  %v4048_v29 = vperm.slane %v4046_v16, 3 }
 0x864   : > { %v3950_v17 = vrot.slane %v3948_v59, 5  ;;  %v3953_v42 = vrot.slane %v3951_v21, 6  ;;  %v3973_v40 = vrot.slane %v3971_v63, 6  ;;  %v4170_v14 = vunpack.c.h.b16 %v4165_v48  ;;  %v4023_v48 = vld [vmem:[#allocation2 + $0x24] sm:$0x11] }
 0x865   : > { %v3962_v7 = vor.u32 %v3961_v13, %v3958_v34  ;;  %v4065_v51 = vunpack.c.l.bf16 %v4048_v29  ;;  %v11918_v18 = vunpack.c.h.bf16 %v4019_v10  ;;  %v4173_v44 = vpack.c.b16 %v4169_v12, %v4169_v12  ;;  %v4011_v13 = vld [vmem:[#allocation3 + $0x170] sm:$0xcc] }
 0x866   : > { %v3954_v25 = vor.u32 %v3953_v42, %v3950_v17  ;;  %v4174_v41 = vpack.c.b16 %v4170_v14, %v4170_v14  ;;  %v4058_v32 = vunpack.c.l.bf16 %v4022_v8  ;;  %v4059_v46 = vunpack.c.h.bf16 %v4022_v8  ;;  %v4166_v29 = vld [vmem:[%s13557_s4 + $0x28] sm:$0x88] }
 0x867   : > { %3985 = vrot.lane.b32.xlu0 %v3962_v7, %s13824_s20  ;;  %v3975_v15 = vrot.slane %v3962_v7, 4  ;;  %v9864_v31 = vpack.i.bf16 %v4066_v4, %v4065_v51  ;;  %v4178_v42 = vshrl.u32 %v4173_v44, 16  ;;  %v4172_v10 = vunpack.c.h.b16 %v4166_v29 }
 0x868   : > { %3983 = vrot.lane.b32.xlu2 %v3954_v25, %s13824_s20  ;;  %v3969_v56 = vrot.slane %v3954_v25, 4  ;;  %v4183_v36 = vshrl.u32 %v4174_v41, 16  ;;  %vm13842_vm0 = vnez %v13691_v23  ;;  %v4060_v41 = vunpack.c.l.bf16 %v4023_v48  ;;  %v4162_v23 = vld [vmem:[#allocation2 + $0x1c] sm:$0x11] }
 0x869   : > { %v3980_v60 = vsel %vm13754_vm6, %v3975_v15, %v3979_v58  ;;  %v4179_v63 = vpack.i.b16 %v4178_v42, %v4178_v42 }
 0x86a   : > { %v3974_v6 = vsel %vm13754_vm6, %v3969_v56, %v3973_v40  ;;  %vm13836_vm6 = vcmask 523264   ;;  %v4184_v15 = vpack.i.b16 %v4183_v36, %v4183_v36  ;;  %v4021_v40 = vld [vmem:[#allocation2 + $0x14] sm:$0xf] }
 0x86b   : > { %v4181_v51 = vperm.slane %v4179_v63, 3  ;;  %v4057_v12 = vunpack.c.l.bf16 %v4021_v40 }
 0x86c   : > { %v4186_v4 = vperm.slane %v4184_v15, 3 }
 0x86e   : > { %v4208_v44 = vunpack.c.l.bf16 %v4186_v4 }
 0x86f   : > { %3991 = vrot.lane.b32.xlu0 %v3980_v60, %s13824_s20 }
 0x870   : > { %3989 = vrot.lane.b32.xlu2 %v3974_v6, %s13824_s20  ;;  %v4024_v6 = vld [vmem:[#allocation2 + $0x2c] sm:$0x1] }
 0x871   : > { %v4062_v14 = vunpack.c.l.bf16 %v4024_v6 }
 0x878   : > { %9865 = vrot.lane.b32.xlu2 %v9864_v31, %s13829_s18 }
 0x8b1   : > { %v3982_v47 = vpop.permute.xlu1 %3981 }
 0x8b2   : > { %v3993_v49 = vrot.slane %v3982_v47, 4 }
 0x8b9   : > { %v3988_v54 = vpop.permute.xlu1 %3987 }
 0x8ba   : > { %v3996_v16 = vrot.slane %v3988_v54, 4 }
 0x8c1   : > { %v9861_v45 = vpop.permute.xlu1 %9860 }
 0x8c2   : > { %v9863_v27 = vunpack.i.h.bf16 %v9861_v45  ;;  %v9862_v20 = vunpack.i.l.bf16 %v9861_v45  ;;  %v11920_v38 = vpop.permute.xlu2 %3983 }
 0x8c3   : > { %v3994_v26 = vrot.slane %v11920_v38, 4 }
 0x8c4   : > { %v4079_v1 = vsel %vm13836_vm6, %v9862_v20, %v9863_v27  ;;  %v4087_v59 = vmul.f32 %v9862_v20, %v11916_v50  ;;  %v4092_v7 = vmul.f32 %v9862_v20, %v4058_v32 }
 0x8c5   : > { %v4088_v21 = vmul.f32 %v4079_v1, %v11918_v18  ;;  %v3999_v34 = vsel %vm13837_vm9, %v3993_v49, %v3994_v26  ;;  %v4093_v5 = vmul.f32 %v4079_v1, %v4059_v46  ;;  %v4176_v46 = vpack.c.b16 %v4172_v10, %v4172_v10  ;;  %vm13843_vm9 = vmmov %vm13836_vm6 }
 0x8c6   : > { %v4000_v22 = vsel %vm13838_vm3, %v3982_v47, %v3999_v34  ;;  %v4171_v47 = vunpack.c.l.b16 %v4166_v29  ;;  %v4061_v1 = vunpack.c.h.bf16 %v4023_v48  ;;  %vm13844_vm3 = vmmov %vm13840_vm1 }
 0x8c7   : > { %v4012_v33 = vsel %vm13839_vm11, %v4000_v22, %v4011_v13  ;;  %v4097_v17 = vpack.c.bf16 %v4088_v21, %v4087_v59  ;;  %v4100_v56 = vpack.c.bf16 %v4093_v5, %v4092_v7  ;;  %v4193_v5 = vshrl.u32 %v4176_v46, 16  ;;  %v4333_v46 = vld [vmem:[%s13557_s4 + $0x30] sm:$0x11] }
 0x8c8   : > { %4013 = vst [vmem:[#allocation3 + $0x170] sm:$0xcc] %v4012_v33  ;;  %v4175_v32 = vpack.c.b16 %v4171_v47, %v4171_v47 }
 0x8c9   : > { %v4109_v25 = vrot.slane %v4097_v17, 5  ;;  %v4113_v31 = vrot.slane %v4100_v56, 5 }
 0x8ca   : > { %v11932_v28 = vpop.permute.xlu2 %3989  ;;  %v4188_v7 = vshrl.u32 %v4175_v32, 16 }
 0x8cb   : > { %v3997_v61 = vrot.slane %v11932_v28, 4  ;;  %4121 = vrot.lane.b32.xlu0 %v4109_v25, %s13829_s18  ;;  %v4112_v60 = vrot.slane %v4109_v25, 4 }
 0x8cd   : > { %v4003_v58 = vsel %vm13840_vm1, %v3996_v16, %v3997_v61  ;;  %v4114_v45 = vsel %vm13842_vm0, %v4112_v60, %v4113_v31  ;;  %vm13845_vm1 = vmmov %vm13841_vm15 }
 0x8ce   : > { %v4004_v55 = vsel %vm13841_vm15, %v3988_v54, %v4003_v58  ;;  %v4207_v54 = vunpack.c.l.bf16 %v4181_v51  ;;  %vm13846_vm15 = vmmov %vm13844_vm3 }
 0x8cf   : > { %4017 = vst [vmem:[#allocation3 + $0x180] sm:$0x77] %v4004_v55  ;;  %v4014_v55 = vld [vmem:[#allocation3 + $0x178] sm:$0xcc] }
 0x8d0   : > { %v9869_v17 = vpack.i.bf16 %v4208_v44, %v4207_v54 }
 0x8d2   : > { %v9866_v8 = vpop.permute.xlu2 %9865 }
 0x8d3   : > { %v9868_v20 = vunpack.i.h.bf16 %v9866_v8  ;;  %v9867_v49 = vunpack.i.l.bf16 %v9866_v8  ;;  %4127 = vrot.lane.b32.xlu0 %v4114_v45, %s13829_s18 }
 0x8d5   : > { %v4091_v59 = vmul.f32 %v9868_v20, %v4057_v12  ;;  %v4080_v21 = vsel %vm13836_vm6, %v9863_v27, %v9867_v49  ;;  %v4081_v34 = vsel %vm13843_vm9, %v9867_v49, %v9868_v20  ;;  %v4096_v13 = vmul.f32 %v9868_v20, %v4062_v14  ;;  %vm13847_vm6 = vmmov %vm13845_vm1 }
 0x8d6   : > { %v4089_v22 = vmul.f32 %v4080_v21, %v11743_v2  ;;  %v4090_v33 = vmul.f32 %v4081_v34, %v11745_v11  ;;  %v4094_v25 = vmul.f32 %v4080_v21, %v4060_v41  ;;  %v4095_v16 = vmul.f32 %v4081_v34, %v4061_v1  ;;  %vm13849_vm9 = vmmov %vm13844_vm3 }
 0x8d7   : > { %v4099_v42 = vpack.c.bf16 %v4091_v59, %v4091_v59  ;;  %v4102_v29 = vpack.c.bf16 %v4096_v13, %v4096_v13  ;;  %v4189_v11 = vpack.i.b16 %v4188_v7, %v4188_v7  ;;  %v4194_v27 = vpack.i.b16 %v4193_v5, %v4193_v5 }
 0x8d8   : > { %v4098_v36 = vpack.c.bf16 %v4090_v33, %v4089_v22  ;;  %v4101_v60 = vpack.c.bf16 %v4095_v16, %v4094_v25  ;;  %v4203_v1 = vunpack.c.h.bf16 %v4162_v23  ;;  %v4337_v22 = vunpack.c.l.b16 %v4333_v46 }
 0x8d9   : > { %v3986_v63 = vpop.permute.xlu0 %3985  ;;  %v4111_v15 = vrot.slane %v4099_v42, 5  ;;  %v4119_v4 = vrot.slane %v4102_v29, 5  ;;  %v4191_v47 = vperm.slane %v4189_v11, 3  ;;  %v4196_v10 = vperm.slane %v4194_v27, 3 }
 0x8da   : > { %v3995_v56 = vrot.slane %v3986_v63, 4  ;;  %v4110_v58 = vrot.slane %v4098_v36, 5  ;;  %v4338_v33 = vunpack.c.h.b16 %v4333_v46  ;;  %v4341_v11 = vpack.c.b16 %v4337_v22, %v4337_v22 }
 0x8db   : > { %9870 = vrot.lane.b32.xlu0 %v9869_v17, %s13824_s20  ;;  %4125 = vrot.lane.b32.xlu2 %v4111_v15, %s13829_s18  ;;  %v4118_v51 = vrot.slane %v4111_v15, 4  ;;  %v4209_v45 = vunpack.c.l.bf16 %v4191_v47  ;;  %v4210_v20 = vunpack.c.l.bf16 %v4196_v10 }
 0x8dc   : > { %v4001_v2 = vsel %vm13844_vm3, %v3994_v26, %v3995_v56  ;;  %4123 = vrot.lane.b32.xlu1 %v4110_v58, %s13829_s18  ;;  %v4115_v31 = vrot.slane %v4110_v58, 4  ;;  %v4116_v26 = vrot.slane %v4101_v60, 5  ;;  %v4342_v27 = vpack.c.b16 %v4338_v33, %v4338_v33 }
 0x8dd   : > { %v4002_v40 = vsel %vm13845_vm1, %v11920_v38, %v4001_v2  ;;  %v4120_v14 = vsel %vm13842_vm0, %v4118_v51, %v4119_v4  ;;  %v9874_v54 = vpack.i.bf16 %v4210_v20, %v4209_v45  ;;  %v4153_v45 = vld [vmem:[#allocation3 + $0x190] sm:$0xff]  ;;  %v4156_v20 = vld [vmem:[#allocation3 + $0x198] sm:$0xff] }
 0x8de   : > { %v4015_v6 = vsel %vm13839_vm11, %v4002_v40, %v4014_v55  ;;  %v4117_v38 = vsel %vm13842_vm0, %v4115_v31, %v4116_v26  ;;  %vm13848_vm0 = vmmov %vm13845_vm1  ;;  %vm13850_vm1 = vcmask 523264   ;;  %v4350_v26 = vpack.i.b16 %v4342_v27, %v4342_v27  ;;  %v4334_v27 = vld [vmem:[%s13557_s4 + $0x38] sm:$0x11] }
 0x8df   : > { %4016 = vst [vmem:[#allocation3 + $0x178] sm:$0xcc] %v4015_v6 }
 0x8e1   : > { %v3992_v48 = vpop.permute.xlu0 %3991 }
 0x8e2   : > { %v3998_v12 = vrot.slane %v3992_v48, 4  ;;  %v4346_v48 = vpack.i.b16 %v4341_v11, %v4341_v11 }
 0x8e3   : > { %4131 = vrot.lane.b32.xlu2 %v4120_v14, %s13829_s18 }
 0x8e4   : > { %v4005_v8 = vsel %vm13846_vm15, %v3997_v61, %v3998_v12  ;;  %4129 = vrot.lane.b32.xlu1 %v4117_v38, %s13829_s18  ;;  %v4202_v61 = vunpack.c.l.bf16 %v4162_v23  ;;  %vm13851_vm15 = vmmov %vm13850_vm1 }
 0x8e5   : > { %v4006_v49 = vsel %vm13847_vm6, %v11932_v28, %v4005_v8  ;;  %v5751_v28 = vld [vmem:[%s13557_s4] sm:$0x22]  ;;  %vm13852_vm6 = vmmov %vm13844_vm3 }
 0x8e6   : > { %4018 = vst [vmem:[#allocation3 + $0x188] sm:$0x77] %v4006_v49  ;;  %v5755_v16 = vunpack.c.l.b16 %v5751_v28  ;;  %v4352_v28 = vperm.slane %v4350_v26, 0 }
 0x8e8   : > { %v5759_v6 = vpack.c.b16 %v5755_v16, %v5755_v16 }
 0x8ea   : > { %v5764_v49 = vshrl.u32 %v5759_v6, 16 }
 0x8ec   : > { %9875 = vrot.lane.b32.xlu1 %v9874_v54, %s13824_s20 }
 0x935   : > { %v4126_v32 = vpop.permute.xlu2 %4125 }
 0x936   : > { %v4135_v17 = vrot.slane %v4126_v32, 4 }
 0x93d   : > { %v4122_v44 = vpop.permute.xlu0 %4121  ;;  %v4132_v55 = vpop.permute.xlu2 %4131 }
 0x93e   : > { %v4133_v42 = vrot.slane %v4122_v44, 4  ;;  %v4138_v31 = vrot.slane %v4132_v55, 4 }
 0x945   : > { %v4128_v41 = vpop.permute.xlu0 %4127 }
 0x946   : > { %v4136_v47 = vrot.slane %v4128_v41, 4 }
 0x94d   : > { %v11975_v59 = vpop.permute.xlu0 %9870 }
 0x94e   : > { %v9873_v21 = vunpack.i.h.bf16 %v11975_v59  ;;  %v9872_v34 = vunpack.i.l.bf16 %v11975_v59  ;;  %v4124_v13 = vpop.permute.xlu1 %4123 }
 0x94f   : > { %v4134_v36 = vrot.slane %v4124_v13, 4 }
 0x950   : > { %v4223_v7 = vsel %vm13848_vm0, %v9872_v34, %v9873_v21  ;;  %v4231_v5 = vmul.f32 %v9872_v34, %v11916_v50  ;;  %v4236_v25 = vmul.f32 %v9872_v34, %v4202_v61  ;;  %vm13853_vm0 = vmmov %vm13844_vm3  ;;  %v4161_v61 = vld [vmem:[#allocation2 + $0x14] sm:$0xf] }
 0x951   : > { %v4232_v63 = vmul.f32 %v4223_v7, %v11918_v18  ;;  %v4237_v15 = vmul.f32 %v4223_v7, %v4203_v1  ;;  %v4139_v56 = vsel %vm13849_vm9, %v4133_v42, %v4134_v36  ;;  %v4141_v58 = vsel %vm13844_vm3, %v4134_v36, %v4135_v17  ;;  %vm13854_vm9 = vmmov %vm13850_vm1  ;;  %v4160_v17 = vld [vmem:[#allocation2 + $0xc] sm:$0xff]  ;;  %v4163_v36 = vld [vmem:[#allocation2 + $0x24] sm:$0x11] }
 0x952   : > { %v4140_v29 = vsel %vm13850_vm1, %v4122_v44, %v4139_v56  ;;  %v4142_v2 = vsel %vm13851_vm15, %v4124_v13, %v4141_v58  ;;  %vm13855_vm3 = vmmov %vm13850_vm1  ;;  %v4348_v1 = vperm.slane %v4346_v48, 0  ;;  %v5765_v42 = vpack.i.b16 %v5764_v49, %v5764_v49  ;;  %v4164_v7 = vld [vmem:[#allocation2 + $0x2c] sm:$0x1] }
 0x953   : > { %v4241_v40 = vpack.c.bf16 %v4232_v63, %v4231_v5  ;;  %4151 = vst [vmem:[#allocation3 + $0x180] sm:$0x88] %v4140_v29  ;;  %v4244_v60 = vpack.c.bf16 %v4237_v15, %v4236_v25  ;;  %v4201_v5 = vunpack.c.l.bf16 %v4161_v61  ;;  %v12005_v25 = vunpack.c.l.bf16 %v4160_v17 }
 0x954   : > { %4152 = vst [vmem:[#allocation3 + $0x188] sm:$0x88] %v4142_v2  ;;  %v12007_v16 = vunpack.c.h.bf16 %v4160_v17  ;;  %v4371_v63 = vunpack.c.l.bf16 %v4348_v1  ;;  %v4372_v15 = vunpack.c.l.bf16 %v4352_v28  ;;  %v4204_v29 = vunpack.c.l.bf16 %v4163_v36 }
 0x955   : > { %v4248_v51 = vshll.u32 %v4241_v40, 16  ;;  %v4259_v4 = vshrl.u32 %v4241_v40, 16  ;;  %v4265_v8 = vshll.u32 %v4244_v60, 16  ;;  %v4206_v2 = vunpack.c.l.bf16 %v4164_v7 }
 0x956   : > { %v4130_v10 = vpop.permute.xlu1 %4129  ;;  %v5767_v11 = vperm.slane %v5765_v42, 1  ;;  %v4205_v55 = vunpack.c.h.bf16 %v4163_v36  ;;  %vm13859_vm15 = vcmask 515072  }
 0x957   : > { %v4137_v12 = vrot.slane %v4130_v10, 4  ;;  %v11991_v14 = vrot.slane %v4248_v51, 5  ;;  %v4261_v38 = vrot.slane %v4259_v4, 4  ;;  %v4267_v33 = vrot.slane %v4265_v8, 5 }
 0x959   : > { %v4143_v54 = vsel %vm13852_vm6, %v4136_v47, %v4137_v12  ;;  %v4145_v44 = vsel %vm13853_vm0, %v4137_v12, %v4138_v31  ;;  %v4262_v32 = vor.u32 %v4261_v38, %v11991_v14  ;;  %v9889_v31 = vpack.i.bf16 %v4372_v15, %v4371_v63 }
 0x95a   : > { %v4144_v23 = vsel %vm13854_vm9, %v4128_v41, %v4143_v54  ;;  %v4146_v46 = vsel %vm13855_vm3, %v4130_v10, %v4145_v44  ;;  %v4339_v10 = vunpack.c.l.b16 %v4334_v27  ;;  %v5788_v12 = vunpack.c.l.bf16 %v5767_v11  ;;  %vm13861_vm9 = vmmov %vm13859_vm15 }
 0x95b   : > { %v4154_v34 = vsel %vm11146_vm14, %v4144_v23, %v4153_v45  ;;  %v4157_v13 = vsel %vm11146_vm14, %v4146_v46, %v4156_v20  ;;  %v4263_v22 = vrot.slane %v4262_v32, 4  ;;  %vm13856_vm14 = vcmask 531456  }
 0x95c   : > { %4155 = vst [vmem:[#allocation3 + $0x190] sm:$0xff] %v4154_v34  ;;  %vm13857_vm1 = vmmov %vm13856_vm14  ;;  %v4340_v38 = vunpack.c.h.b16 %v4334_v27  ;;  %v4343_v32 = vpack.c.b16 %v4339_v10, %v4339_v10  ;;  %vm13860_vm6 = vnez %v13737_v43  ;;  %v4461_v10 = vld [vmem:[%s13557_s4 + $0x30] sm:$0x11]  ;;  %vm13862_vm3 = vcmask 580608  }
 0x95d   : > { %4158 = vst [vmem:[#allocation3 + $0x198] sm:$0xff] %v4157_v13  ;;  %v4268_v41 = vsel %vm11126_vm7, %v4263_v22, %v4267_v33 }
 0x95e   : > { %4295 = vrot.lane.b32.xlu1 %v4268_v41, %s13822_s19  ;;  %v9876_v39 = vpop.permute.xlu1 %9875  ;;  %v4344_v1 = vpack.c.b16 %v4340_v38, %v4340_v38  ;;  %v4354_v42 = vpack.i.b16 %v4343_v32, %v4343_v32  ;;  %v4462_v38 = vld [vmem:[%s13557_s4 + $0x38] sm:$0x11] }
 0x95f   : > { %v9878_v56 = vunpack.i.h.bf16 %v9876_v39  ;;  %v9877_v58 = vunpack.i.l.bf16 %v9876_v39 }
 0x960   : > { %v4358_v41 = vpack.i.b16 %v4344_v1, %v4344_v1  ;;  %v4356_v63 = vperm.slane %v4354_v42, 0 }
 0x961   : > { %v4235_v40 = vmul.f32 %v9878_v56, %v4201_v5  ;;  %v4224_v60 = vsel %vm13856_vm14, %v9873_v21, %v9877_v58  ;;  %v4225_v6 = vsel %vm13857_vm1, %v9877_v58, %v9878_v56  ;;  %v4240_v48 = vmul.f32 %v9878_v56, %v4206_v2  ;;  %vm13863_vm14 = vmmov %vm13862_vm3 }
 0x962   : > { %v4233_v51 = vmul.f32 %v4224_v60, %v12005_v25  ;;  %v4234_v4 = vmul.f32 %v4225_v6, %v12007_v16  ;;  %v4238_v45 = vmul.f32 %v4224_v60, %v4204_v29  ;;  %v4239_v20 = vmul.f32 %v4225_v6, %v4205_v55  ;;  %vm13864_vm1 = vmmov %vm13862_vm3 }
 0x963   : > { %v4243_v47 = vpack.c.bf16 %v4235_v40, %v4235_v40  ;;  %v4246_v23 = vpack.c.bf16 %v4240_v48, %v4240_v48  ;;  %v4360_v15 = vperm.slane %v4358_v41, 0  ;;  %v4373_v29 = vunpack.c.l.bf16 %v4356_v63 }
 0x964   : > { %v4242_v26 = vpack.c.bf16 %v4234_v4, %v4233_v51  ;;  %v4245_v34 = vpack.c.bf16 %v4239_v20, %v4238_v45  ;;  %v4319_v51 = vld [vmem:[#allocation3 + $0x190] sm:$0x88]  ;;  %v4465_v45 = vunpack.c.l.b16 %v4461_v10 }
 0x965   : > { %v4279_v8 = vshrl.u32 %v4243_v47, 16  ;;  %v4256_v49 = vshll.u32 %v4243_v47, 16  ;;  %v4285_v17 = vshll.u32 %v4246_v23, 16  ;;  %v4374_v2 = vunpack.c.l.bf16 %v4360_v15 }
 0x966   : > { %9890 = vrot.lane.b32.xlu1 %v9889_v31, %s13814_s26  ;;  %v4252_v59 = vshll.u32 %v4242_v26, 16  ;;  %v4269_v21 = vshrl.u32 %v4242_v26, 16  ;;  %v4275_v36 = vshll.u32 %v4245_v34, 16  ;;  %v4469_v23 = vpack.c.b16 %v4465_v45, %v4465_v45 }
 0x967   : > { %v4258_v54 = vrot.slane %v4256_v49, 5  ;;  %v4281_v44 = vrot.slane %v4279_v8, 4  ;;  %v4287_v39 = vrot.slane %v4285_v17, 5  ;;  %v9894_v11 = vpack.i.bf16 %v4374_v2, %v4373_v29  ;;  %v4329_v8 = vld [vmem:[#allocation2 + $0x14] sm:$0xf] }
 0x968   : > { %v4254_v46 = vrot.slane %v4252_v59, 5  ;;  %v4271_v61 = vrot.slane %v4269_v21, 4  ;;  %v4277_v56 = vrot.slane %v4275_v36, 5  ;;  %v4466_v49 = vunpack.c.h.b16 %v4461_v10 }
 0x969   : > { %v9884_v28 = vpack.i.bf16 %v5788_v12, %v4258_v54  ;;  %v4282_v22 = vor.u32 %v4281_v44, %v4258_v54  ;;  %v4467_v21 = vunpack.c.l.b16 %v4462_v38  ;;  %v4468_v54 = vunpack.c.h.b16 %v4462_v38 }
 0x96a   : > { %v9879_v13 = vpack.i.bf16 %v4254_v46, %v11991_v14  ;;  %v4272_v33 = vor.u32 %v4271_v61, %v4254_v46  ;;  %v4365_v44 = vunpack.c.l.bf16 %v4329_v8  ;;  %v4331_v46 = vld [vmem:[#allocation2 + $0x24] sm:$0x11]  ;;  %v4474_v63 = vshrl.u32 %v4469_v23, 16 }
 0x96b   : > { %9885 = vrot.lane.b32.xlu0 %v9884_v28, %s13822_s19  ;;  %v4283_v7 = vrot.slane %v4282_v22, 4  ;;  %v4470_v28 = vpack.c.b16 %v4466_v49, %v4466_v49  ;;  %v4472_v22 = vpack.c.b16 %v4468_v54, %v4468_v54  ;;  %v4369_v36 = vunpack.c.h.bf16 %v4331_v46 }
 0x96c   : > { %9880 = vrot.lane.b32.xlu2 %v9879_v13, %s13822_s19  ;;  %v4273_v5 = vrot.slane %v4272_v33, 4  ;;  %v4471_v13 = vpack.c.b16 %v4467_v21, %v4467_v21  ;;  %v4475_v8 = vpack.i.b16 %v4474_v63, %v4474_v63 }
 0x96d   : > { %v4288_v58 = vsel %vm11126_vm7, %v4283_v7, %v4287_v39  ;;  %v4332_v39 = vld [vmem:[#allocation2 + $0x2c] sm:$0x1] }
 0x96e   : > { %v4278_v14 = vsel %vm11126_vm7, %v4273_v5, %v4277_v56  ;;  %vm13858_vm7 = vmmov %vm13853_vm0  ;;  %v4330_v5 = vld [vmem:[#allocation2 + $0x1c] sm:$0x11] }
 0x96f   : > { %v4367_v10 = vunpack.c.h.bf16 %v4330_v5 }
 0x973   : > { %4299 = vrot.lane.b32.xlu0 %v4288_v58, %s13822_s19 }
 0x974   : > { %4297 = vrot.lane.b32.xlu2 %v4278_v14, %s13822_s19  ;;  %v4479_v14 = vshrl.u32 %v4470_v28, 16 }
 0x97c   : > { %9895 = vrot.lane.b32.xlu2 %v9894_v11, %s13814_s26  ;;  %v4484_v11 = vshrl.u32 %v4471_v13, 16 }
 0x97e   : > { %v4485_v49 = vpack.i.b16 %v4484_v11, %v4484_v11 }
 0x9c6   : > { %v12029_v27 = vpop.permute.xlu2 %9880 }
 0x9c7   : > { %v9883_v55 = vunpack.i.h.bf16 %v12029_v27  ;;  %v9882_v40 = vunpack.i.l.bf16 %v12029_v27 }
 0x9c9   : > { %v12035_v60 = vrot.slane %v9883_v55, 4  ;;  %v4301_v6 = vrot.slane %v9882_v40, 4 }
 0x9cb   : > { %v4307_v37 = vsel %vm13858_vm7, %v4301_v6, %v12035_v60  ;;  %v4366_v6 = vunpack.c.l.bf16 %v4330_v5  ;;  %vm13865_vm7 = vmmov %vm13853_vm0 }
 0x9cc   : > { %v4308_v4 = vsel %vm13859_vm15, %v9882_v40, %v4307_v37  ;;  %v4489_v40 = vshrl.u32 %v4472_v22, 16  ;;  %v4368_v37 = vunpack.c.l.bf16 %v4331_v46  ;;  %vm13866_vm15 = vmmov %vm13861_vm9 }
 0x9cd   : > { %v4320_v31 = vsel %vm13860_vm6, %v4308_v4, %v4319_v51 }
 0x9ce   : > { %4321 = vst [vmem:[#allocation3 + $0x190] sm:$0x88] %v4320_v31  ;;  %v12042_v47 = vpop.permute.xlu2 %4297  ;;  %v4370_v31 = vunpack.c.l.bf16 %v4332_v39 }
 0x9cf   : > { %v4305_v26 = vrot.slane %v12042_v47, 4 }
 0x9d0   : > { %v4296_v48 = vpop.permute.xlu1 %4295 }
 0x9d1   : > { %v4304_v12 = vrot.slane %v4296_v48, 4 }
 0x9d3   : > { %v4311_v20 = vsel %vm13853_vm0, %v4304_v12, %v4305_v26 }
 0x9d4   : > { %v4312_v59 = vsel %vm13861_vm9, %v4296_v48, %v4311_v20  ;;  %v4480_v20 = vpack.i.b16 %v4479_v14, %v4479_v14 }
 0x9d5   : > { %4325 = vst [vmem:[#allocation3 + $0x1a0] sm:$0xff] %v4312_v59  ;;  %v4490_v59 = vpack.i.b16 %v4489_v40, %v4489_v40 }
 0x9d6   : > { %v9896_v32 = vpop.permute.xlu2 %9895  ;;  %v4482_v22 = vperm.slane %v4480_v20, 0 }
 0x9d7   : > { %v9898_v61 = vunpack.i.h.bf16 %v9896_v32  ;;  %v9897_v1 = vunpack.i.l.bf16 %v9896_v32 }
 0x9d8   : > { %v9891_v34 = vpop.permute.xlu1 %9890 }
 0x9d9   : > { %v4389_v33 = vsel %vm13862_vm3, %v9897_v1, %v9898_v61  ;;  %v9893_v17 = vunpack.i.h.bf16 %v9891_v34  ;;  %v9892_v42 = vunpack.i.l.bf16 %v9891_v34  ;;  %v4399_v41 = vmul.f32 %v9898_v61, %v4365_v44  ;;  %vm13867_vm3 = vmmov %vm13853_vm0 }
 0x9da   : > { %v4398_v7 = vmul.f32 %v4389_v33, %v12007_v16  ;;  %v4403_v21 = vmul.f32 %v4389_v33, %v4369_v36  ;;  %v4404_v54 = vmul.f32 %v9898_v61, %v4370_v31  ;;  %v4477_v34 = vperm.slane %v4475_v8, 0  ;;  %v4449_v8 = vld [vmem:[#allocation3 + $0x1c0] sm:$0x11] }
 0x9db   : > { %v4387_v15 = vsel %vm13863_vm14, %v9892_v42, %v9893_v17  ;;  %v4388_v56 = vsel %vm13864_vm1, %v9893_v17, %v9897_v1  ;;  %v4395_v58 = vmul.f32 %v9892_v42, %v11916_v50  ;;  %v4407_v4 = vpack.c.bf16 %v4399_v41, %v4399_v41  ;;  %v4322_v1 = vld [vmem:[#allocation3 + $0x198] sm:$0x88]  ;;  %vm13868_vm14 = vmmov %vm13853_vm0 }
 0x9dc   : > { %v4396_v29 = vmul.f32 %v4387_v15, %v11918_v18  ;;  %v4397_v2 = vmul.f32 %v4388_v56, %v12005_v25  ;;  %v4400_v44 = vmul.f32 %v9892_v42, %v4366_v6  ;;  %v4401_v32 = vmul.f32 %v4387_v15, %v4367_v10 }
 0x9dd   : > { %v12062_v51 = vpop.permute.xlu0 %9885  ;;  %4421 = vrot.lane.b32.xlu2 %v4407_v4, %s13806_s24  ;;  %v4402_v23 = vmul.f32 %v4388_v56, %v4368_v37  ;;  %v4487_v17 = vperm.slane %v4485_v49, 0  ;;  %v4492_v41 = vperm.slane %v4490_v59, 0  ;;  %v4410_v33 = vpack.c.bf16 %v4404_v54, %v4404_v54  ;;  %v4457_v54 = vld [vmem:[#allocation2 + $0x14] sm:$0xf] }
 0x9de   : > { %v9887_v48 = vunpack.i.l.bf16 %v12062_v51  ;;  %v4405_v12 = vpack.c.bf16 %v4396_v29, %v4395_v58  ;;  %v4406_v38 = vpack.c.bf16 %v4398_v7, %v4397_v2  ;;  %v4408_v36 = vpack.c.bf16 %v4401_v32, %v4400_v44 }
 0x9df   : > { %v4409_v7 = vpack.c.bf16 %v4403_v21, %v4402_v23  ;;  %v4505_v5 = vunpack.c.l.bf16 %v4487_v17  ;;  %v4506_v39 = vunpack.c.l.bf16 %v4492_v41  ;;  %vm13869_vm1 = vcmask 465920   ;;  %v4623_v17 = vld [vmem:[%s13557_s4 + $0x30] sm:$0x22]  ;;  %v4458_v41 = vld [vmem:[#allocation2 + $0x1c] sm:$0x11] }
 0x9e0   : > { %v4303_v45 = vrot.slane %v9887_v48, 4  ;;  %4417 = vrot.lane.b32.xlu0 %v4405_v12, %s13806_s24  ;;  %4419 = vrot.lane.b32.xlu1 %v4406_v38, %s13806_s24  ;;  %v4497_v23 = vunpack.c.l.bf16 %v4457_v54 }
 0x9e1   : > { %v9904_v56 = vpack.i.bf16 %v4506_v39, %v4505_v5  ;;  %v4624_v5 = vld [vmem:[%s13557_s4 + $0x38] sm:$0x22] }
 0x9e2   : > { %v4309_v46 = vsel %vm13865_vm7, %v12035_v60, %v4303_v45  ;;  %v4503_v60 = vunpack.c.l.bf16 %v4477_v34  ;;  %vm13870_vm7 = vmmov %vm13869_vm1  ;;  %v4452_v45 = vld [vmem:[#allocation3 + $0x1c8] sm:$0x11] }
 0x9e3   : > { %v4310_v28 = vsel %vm13866_vm15, %v9883_v55, %v4309_v46  ;;  %v4504_v55 = vunpack.c.l.bf16 %v4482_v22  ;;  %vm13871_vm15 = vmmov %vm13853_vm0 }
 0x9e4   : > { %v4323_v13 = vsel %vm13860_vm6, %v4310_v28, %v4322_v1 }
 0x9e5   : > { %4324 = vst [vmem:[#allocation3 + $0x198] sm:$0x88] %v4323_v13  ;;  %v4300_v61 = vpop.permute.xlu0 %4299  ;;  %4427 = vrot.lane.b32.xlu2 %v4410_v33, %s13806_s24  ;;  %v9899_v15 = vpack.i.bf16 %v4504_v55, %v4503_v60  ;;  %v4459_v60 = vld [vmem:[#allocation2 + $0x24] sm:$0x11]  ;;  %v4627_v55 = vunpack.c.l.b16 %v4623_v17 }
 0x9e6   : > { %v4306_v42 = vrot.slane %v4300_v61, 4 }
 0x9e8   : > { %v4313_v27 = vsel %vm13853_vm0, %v4305_v26, %v4306_v42  ;;  %4423 = vrot.lane.b32.xlu0 %v4408_v36, %s13806_s24  ;;  %4425 = vrot.lane.b32.xlu1 %v4409_v7, %s13806_s24  ;;  %v4460_v42 = vld [vmem:[#allocation2 + $0x2c] sm:$0x1] }
 0x9e9   : > { %v4314_v63 = vsel %vm13861_vm9, %v12042_v47, %v4313_v27  ;;  %vm13872_vm9 = vmmov %vm13869_vm1 }
 0x9ea   : > { %4326 = vst [vmem:[#allocation3 + $0x1a8] sm:$0xff] %v4314_v63 }
 0x9f0   : > { %9900 = vrot.lane.b32.xlu0 %v9899_v15, %s13645_s13  ;;  %9905 = vrot.lane.b32.xlu1 %v9904_v56, %s13645_s13  ;;  %v4628_v56 = vunpack.c.h.b16 %v4623_v17  ;;  %s13905_s13 = smov 72  }
 0xa37   : > { %v4422_v58 = vpop.permute.xlu2 %4421 }
 0xa38   : > { %v4431_v29 = vrot.slane %v4422_v58, 4  ;;  %v4498_v58 = vunpack.c.l.bf16 %v4458_v41 }
 0xa3f   : > { %v4428_v4 = vpop.permute.xlu2 %4427 }
 0xa40   : > { %v4434_v48 = vrot.slane %v4428_v4, 4 }
 0xa52   : > { %v4418_v14 = vpop.permute.xlu0 %4417  ;;  %v4420_v26 = vpop.permute.xlu1 %4419 }
 0xa53   : > { %v4429_v2 = vrot.slane %v4418_v14, 4  ;;  %v4430_v11 = vrot.slane %v4420_v26, 4 }
 0xa55   : > { %v4435_v40 = vsel %vm13867_vm3, %v4429_v2, %v4430_v11  ;;  %v4437_v6 = vsel %vm13868_vm14, %v4430_v11, %v4431_v29  ;;  %vm13873_vm3 = vmmov %vm13869_vm1  ;;  %vm13874_vm14 = vcmask 588800   ;;  %v4499_v2 = vunpack.c.h.bf16 %v4458_v41 }
 0xa56   : > { %v4436_v37 = vsel %vm13869_vm1, %v4418_v14, %v4435_v40  ;;  %v4438_v47 = vsel %vm13870_vm7, %v4420_v26, %v4437_v6  ;;  %vm13875_vm1 = vmmov %vm13874_vm14  ;;  %v4502_v26 = vunpack.c.l.bf16 %v4460_v42  ;;  %v4500_v11 = vunpack.c.l.bf16 %v4459_v60 }
 0xa57   : > { %4447 = vst [vmem:[#allocation3 + $0x1b0] sm:$0xff] %v4436_v37  ;;  %vm13876_vm7 = vmmov %vm13875_vm1  ;;  %v4629_v6 = vunpack.c.l.b16 %v4624_v5  ;;  %v4501_v37 = vunpack.c.h.bf16 %v4459_v60 }
 0xa58   : > { %4448 = vst [vmem:[#allocation3 + $0x1b8] sm:$0xff] %v4438_v47 }
 0xa5a   : > { %v4424_v31 = vpop.permute.xlu0 %4423  ;;  %v4426_v10 = vpop.permute.xlu1 %4425 }
 0xa5b   : > { %v4432_v12 = vrot.slane %v4424_v31, 4  ;;  %v4433_v38 = vrot.slane %v4426_v10, 4 }
 0xa5d   : > { %v4439_v20 = vsel %vm13871_vm15, %v4432_v12, %v4433_v38  ;;  %v4441_v49 = vsel %vm13853_vm0, %v4433_v38, %v4434_v48  ;;  %v4631_v12 = vpack.c.b16 %v4627_v55, %v4627_v55  ;;  %v4632_v38 = vpack.c.b16 %v4628_v56, %v4628_v56 }
 0xa5e   : > { %v4440_v59 = vsel %vm13872_vm9, %v4424_v31, %v4439_v20  ;;  %v4442_v21 = vsel %vm13873_vm3, %v4426_v10, %v4441_v49  ;;  %v4630_v31 = vunpack.c.h.b16 %v4624_v5  ;;  %vm13877_vm15 = vcmask 596992  }
 0xa5f   : > { %v4450_v44 = vsel %vm13748_vm12, %v4440_v59, %v4449_v8  ;;  %v4453_v32 = vsel %vm13748_vm12, %v4442_v21, %v4452_v45  ;;  %vm13879_vm9 = vcmask 457728  }
 0xa60   : > { %4451 = vst [vmem:[#allocation3 + $0x1c0] sm:$0x11] %v4450_v44  ;;  %v4633_v44 = vpack.c.b16 %v4629_v6, %v4629_v6  ;;  %vm13880_vm3 = vmmov %vm13879_vm9 }
 0xa61   : > { %4454 = vst [vmem:[#allocation3 + $0x1c8] sm:$0x11] %v4453_v32 }
 0xa62   : > { %v9901_v46 = vpop.permute.xlu0 %9900  ;;  %v9906_v1 = vpop.permute.xlu1 %9905 }
 0xa63   : > { %v9903_v28 = vunpack.i.h.bf16 %v9901_v46  ;;  %v9902_v34 = vunpack.i.l.bf16 %v9901_v46  ;;  %v9908_v13 = vunpack.i.h.bf16 %v9906_v1  ;;  %v9907_v22 = vunpack.i.l.bf16 %v9906_v1 }
 0xa64   : > { %v4634_v1 = vpack.c.b16 %v4630_v31, %v4630_v31 }
 0xa65   : > { %v4519_v61 = vsel %vm13874_vm14, %v9902_v34, %v9903_v28  ;;  %v4527_v33 = vmul.f32 %v9902_v34, %v11916_v50  ;;  %v4531_v36 = vmul.f32 %v9908_v13, %v4497_v23  ;;  %v4520_v27 = vsel %vm13875_vm1, %v9903_v28, %v9907_v22  ;;  %vm13881_vm14 = vmmov %vm13853_vm0 }
 0xa66   : > { %v4528_v7 = vmul.f32 %v4519_v61, %v11918_v18  ;;  %v4521_v63 = vsel %vm13876_vm7, %v9907_v22, %v9908_v13  ;;  %v4529_v15 = vmul.f32 %v4520_v27, %v12005_v25  ;;  %v4536_v8 = vmul.f32 %v9908_v13, %v4502_v26  ;;  %vm13882_vm1 = vmmov %vm13853_vm0 }
 0xa67   : > { %v4539_v39 = vpack.c.bf16 %v4531_v36, %v4531_v36  ;;  %v4530_v29 = vmul.f32 %v4521_v63, %v12007_v16  ;;  %v4532_v59 = vmul.f32 %v9902_v34, %v4498_v58  ;;  %v4533_v21 = vmul.f32 %v4519_v61, %v4499_v2  ;;  %vm13883_vm7 = vmmov %vm13880_vm3 }
 0xa68   : > { %v4537_v14 = vpack.c.bf16 %v4528_v7, %v4527_v33  ;;  %v4534_v28 = vmul.f32 %v4520_v27, %v4500_v11  ;;  %v4535_v22 = vmul.f32 %v4521_v63, %v4501_v37  ;;  %v4542_v41 = vpack.c.bf16 %v4536_v8, %v4536_v8 }
 0xa69   : > { %v4558_v40 = vshrl.u32 %v4539_v39, 16  ;;  %v4538_v47 = vpack.c.bf16 %v4530_v29, %v4529_v15  ;;  %v4561_v48 = vshll.u32 %v4539_v39, 16  ;;  %v4636_v13 = vpack.i.b16 %v4631_v12, %v4631_v12 }
 0xa6a   : > { %v4544_v4 = vshrl.u32 %v4537_v14, 16  ;;  %v4547_v20 = vshll.u32 %v4537_v14, 16  ;;  %v4640_v33 = vpack.i.b16 %v4632_v38, %v4632_v38  ;;  %v4540_v42 = vpack.c.bf16 %v4533_v21, %v4532_v59 }
 0xa6b   : > { %v4560_v10 = vrot.slane %v4558_v40, 7  ;;  %v4551_v49 = vshrl.u32 %v4538_v47, 16  ;;  %v4554_v46 = vshll.u32 %v4538_v47, 16  ;;  %v4644_v61 = vpack.i.b16 %v4633_v44, %v4633_v44 }
 0xa6c   : > { %v4546_v45 = vrot.slane %v4544_v4, 7  ;;  %v4648_v36 = vpack.i.b16 %v4634_v1, %v4634_v1  ;;  %v4541_v60 = vpack.c.bf16 %v4535_v22, %v4534_v28  ;;  %v4576_v55 = vshll.u32 %v4542_v41, 16 }
 0xa6d   : > { %v4563_v54 = vor.u32 %v4561_v48, %v4560_v10  ;;  %v4553_v23 = vrot.slane %v4551_v49, 7  ;;  %v4574_v34 = vrot.slane %v4560_v10, 4  ;;  %v4638_v5 = vperm.slane %v4636_v13, 1  ;;  %v4620_v10 = vld [vmem:[#allocation2 + $0x1c] sm:$0x11] }
 0xa6e   : > { %v4549_v32 = vor.u32 %v4547_v20, %v4546_v45  ;;  %v4564_v7 = vrot.slane %v4546_v45, 4  ;;  %v4642_v27 = vperm.slane %v4640_v33, 1  ;;  %v4566_v39 = vshll.u32 %v4540_v42, 16  ;;  %v4612_v33 = vld [vmem:[#allocation3 + $0x1c8] sm:$0xff] }
 0xa6f   : > { %4583 = vrot.lane.b32.xlu1 %v4563_v54, %s13652_s17  ;;  %v4556_v17 = vor.u32 %v4554_v46, %v4553_v23  ;;  %v4569_v63 = vrot.slane %v4553_v23, 4  ;;  %v4578_v15 = vsel %vm10878_vm8, %v4574_v34, %v4576_v55  ;;  %v4646_v56 = vperm.slane %v4644_v61, 1 }
 0xa70   : > { %4579 = vrot.lane.b32.xlu2 %v4549_v32, %s13652_s17  ;;  %v4650_v58 = vperm.slane %v4648_v36, 1  ;;  %v4568_v14 = vsel %vm10878_vm8, %v4564_v7, %v4566_v39  ;;  %v4571_v26 = vshll.u32 %v4541_v60, 16  ;;  %v4661_v29 = vunpack.c.l.bf16 %v4638_v5 }
 0xa71   : > { %4581 = vrot.lane.b32.xlu0 %v4556_v17, %s13652_s17  ;;  %v4662_v2 = vunpack.c.l.bf16 %v4642_v27  ;;  %v4663_v40 = vunpack.c.l.bf16 %v4646_v56  ;;  %v4656_v8 = vunpack.c.l.bf16 %v4620_v10  ;;  %v4657_v45 = vunpack.c.h.bf16 %v4620_v10 }
 0xa72   : > { %v4573_v11 = vsel %vm10878_vm8, %v4569_v63, %v4571_v26  ;;  %v4664_v6 = vunpack.c.l.bf16 %v4650_v58  ;;  %vm13878_vm8 = vmmov %vm13853_vm0  ;;  %v4619_v58 = vld [vmem:[#allocation2 + $0x14] sm:$0xf]  ;;  %v4622_v26 = vld [vmem:[#allocation2 + $0x2c] sm:$0x1] }
 0xa73   : > { %v9909_v37 = vpack.i.bf16 %v4662_v2, %v4661_v29  ;;  %v4655_v29 = vunpack.c.l.bf16 %v4619_v58 }
 0xa74   : > { %v9914_v47 = vpack.i.bf16 %v4664_v6, %v4663_v40 }
 0xa77   : > { %4589 = vrot.lane.b32.xlu1 %v4578_v15, %s13652_s17 }
 0xa78   : > { %4585 = vrot.lane.b32.xlu2 %v4568_v14, %s13652_s17  ;;  %v4621_v14 = vld [vmem:[#allocation2 + $0x24] sm:$0x11] }
 0xa79   : > { %4587 = vrot.lane.b32.xlu0 %v4573_v11, %s13652_s17  ;;  %v4658_v6 = vunpack.c.l.bf16 %v4621_v14 }
 0xa80   : > { %9910 = vrot.lane.b32.xlu2 %v9909_v37, %s13650_s25  ;;  %v4660_v37 = vunpack.c.l.bf16 %v4622_v26 }
 0xa81   : > { %9915 = vrot.lane.b32.xlu0 %v9914_v47, %s13650_s25  ;;  %v4659_v47 = vunpack.c.h.bf16 %v4621_v14 }
 0xaca   : > { %v4580_v4 = vpop.permute.xlu2 %4579 }
 0xacb   : > { %v4591_v1 = vrot.slane %v4580_v4, 4 }
 0xad2   : > { %v4586_v31 = vpop.permute.xlu2 %4585 }
 0xad3   : > { %v4594_v27 = vrot.slane %v4586_v31, 4 }
 0xada   : > { %v9911_v48 = vpop.permute.xlu2 %9910 }
 0xadb   : > { %v9913_v12 = vunpack.i.h.bf16 %v9911_v48  ;;  %v9912_v38 = vunpack.i.l.bf16 %v9911_v48 }
 0xadd   : > { %v4677_v53 = vsel %vm13877_vm15, %v9912_v38, %v9913_v12  ;;  %v4685_v20 = vmul.f32 %v9912_v38, %v11916_v50  ;;  %v4690_v21 = vmul.f32 %v9912_v38, %v4656_v8  ;;  %v4609_v50 = vld [vmem:[#allocation3 + $0x1c0] sm:$0xff] }
 0xade   : > { %v4686_v49 = vmul.f32 %v4677_v53, %v11918_v18  ;;  %v4691_v54 = vmul.f32 %v4677_v53, %v4657_v45 }
 0xae0   : > { %v4695_v59 = vpack.c.bf16 %v4686_v49, %v4685_v20  ;;  %v4698_v22 = vpack.c.bf16 %v4691_v54, %v4690_v21 }
 0xae1   : > { %v4584_v44 = vpop.permute.xlu1 %4583 }
 0xae2   : > { %v4707_v32 = vrot.slane %v4695_v59, 7  ;;  %v4593_v23 = vrot.slane %v4584_v44, 4  ;;  %v4711_v7 = vrot.slane %v4698_v22, 7 }
 0xae3   : > { %v4582_v46 = vpop.permute.xlu0 %4581 }
 0xae4   : > { %4719 = vrot.lane.b32.xlu1 %v4707_v32, %s13648_s23  ;;  %v4592_v28 = vrot.slane %v4582_v46, 4  ;;  %v4710_v13 = vrot.slane %v4707_v32, 4 }
 0xae6   : > { %v4597_v17 = vsel %vm13878_vm8, %v4591_v1, %v4592_v28  ;;  %v4599_v41 = vsel %vm13853_vm0, %v4592_v28, %v4593_v23  ;;  %v4712_v55 = vsel %vm13749_vm2, %v4710_v13, %v4711_v7  ;;  %vm13885_vm8 = vmmov %vm13877_vm15  ;;  %v12164_v7 = vld [vmem:[%s13889_s5] sm:$0xff]  ;;  %s14023_s5 = smov 55  }
 0xae7   : > { %v4598_v18 = vsel %vm13879_vm9, %v4580_v4, %v4597_v17  ;;  %v4600_v42 = vsel %vm13880_vm3, %v4582_v46, %v4599_v41  ;;  %vm13886_vm9 = vcmask 449536  }
 0xae8   : > { %v4610_v34 = vsel %vm11040_vm13, %v4598_v18, %v4609_v50  ;;  %v4613_v61 = vsel %vm11040_vm13, %v4600_v42, %v4612_v33  ;;  %vm13884_vm13 = vmmov %vm13880_vm3 }
 0xae9   : > { %v4590_v36 = vpop.permute.xlu1 %4589  ;;  %4611 = vst [vmem:[#allocation3 + $0x1c0] sm:$0xff] %v4610_v34  ;;  %v4751_v34 = vld [vmem:[#allocation3 + $0x1e0] sm:$0x33]  ;;  %vm13887_vm3 = vmmov %vm13853_vm0 }
 0xaea   : > { %4614 = vst [vmem:[#allocation3 + $0x1c8] sm:$0xff] %v4613_v61  ;;  %v4596_v60 = vrot.slane %v4590_v36, 4 }
 0xaeb   : > { %v4588_v5 = vpop.permute.xlu0 %4587 }
 0xaec   : > { %4725 = vrot.lane.b32.xlu1 %v4712_v55, %s13648_s23  ;;  %v4595_v39 = vrot.slane %v4588_v5, 4 }
 0xaee   : > { %v4601_v63 = vsel %vm13881_vm14, %v4594_v27, %v4595_v39  ;;  %v4603_v15 = vsel %vm13882_vm1, %v4595_v39, %v4596_v60  ;;  %vm13888_vm14 = vmmov %vm13886_vm9  ;;  %v4821_v60 = vunpack.c.l.b16 %v12164_v7  ;;  %vm13891_vm1 = vcmask 1041408  }
 0xaef   : > { %v4602_v62 = vsel %vm13883_vm7, %v4586_v31, %v4601_v63  ;;  %v4604_v56 = vsel %vm13884_vm13, %v4588_v5, %v4603_v15  ;;  %v13655_v5 = vmov 65535   ;;  %vm13892_vm7 = vmmov %vm13853_vm0 }
 0xaf0   : > { %4615 = vst [vmem:[#allocation3 + $0x1d0] sm:$0x11] %v4602_v62  ;;  %v4823_v55 = vpack.c.b16 %v4821_v60, %v4821_v60  ;;  %vm13893_vm13 = vmmov %vm13886_vm9  ;;  %v9546_v60 = vld [vmem:[#allocation3 + $0x12c] sm:$0xf0] }
 0xaf1   : > { %4616 = vst [vmem:[#allocation3 + $0x1d8] sm:$0x11] %v4604_v56 }
 0xaf2   : > { %5190 = vmatmul.bf16.vlgmr.msra.gmra.mxu2 %v4823_v55  ;;  %5164 = vmatmul.bf16.vlgmr.msra.gmra.mxu0 %v4823_v55 }
 0xaf3   : > { %v9916_v2 = vpop.permute.xlu0 %9915 }
 0xaf4   : > { %v9918_v11 = vunpack.i.h.bf16 %v9916_v2  ;;  %v9917_v40 = vunpack.i.l.bf16 %v9916_v2 }
 0xaf6   : > { %v4689_v4 = vmul.f32 %v9918_v11, %v4655_v29  ;;  %v4678_v10 = vsel %vm13877_vm15, %v9913_v12, %v9917_v40  ;;  %v4679_v48 = vsel %vm13885_vm8, %v9917_v40, %v9918_v11  ;;  %v4694_v45 = vmul.f32 %v9918_v11, %v4660_v37  ;;  %vm13894_vm15 = vmmov %vm13853_vm0 }
 0xaf7   : > { %v4687_v31 = vmul.f32 %v4678_v10, %v12005_v25  ;;  %v4688_v38 = vmul.f32 %v4679_v48, %v12007_v16  ;;  %v4692_v20 = vmul.f32 %v4678_v10, %v4658_v6  ;;  %v4693_v49 = vmul.f32 %v4679_v48, %v4659_v47  ;;  %v9335_v47 = vld [vmem:[#allocation3 + $0x1c0] sm:$0xf]  ;;  %vm13895_vm8 = vmmov %vm13886_vm9 }
 0xaf8   : > { %v4697_v8 = vpack.c.bf16 %v4689_v4, %v4689_v4  ;;  %v4700_v54 = vpack.c.bf16 %v4694_v45, %v4694_v45  ;;  %v9564_v4 = vld [vmem:[#allocation3 + $0x1c4] sm:$0xf] }
 0xaf9   : > { %v4696_v53 = vpack.c.bf16 %v4688_v38, %v4687_v31  ;;  %v4699_v44 = vpack.c.bf16 %v4693_v49, %v4692_v20  ;;  %v9562_v38 = vld [vmem:[#allocation3 + $0x1ac] sm:$0xf0]  ;;  %v9319_v20 = vld [vmem:[#allocation3 + $0x1a0] sm:$0xf]  ;;  %v9560_v49 = vld [vmem:[#allocation3 + $0x1a4] sm:$0xf] }
 0xafa   : > { %v4709_v59 = vrot.slane %v4697_v8, 7  ;;  %v4717_v23 = vrot.slane %v4700_v54, 7  ;;  %v9321_v8 = vld [vmem:[#allocation3 + $0x1b0] sm:$0xf0] }
 0xafb   : > { %v4708_v21 = vrot.slane %v4696_v53, 7  ;;  %v4714_v46 = vrot.slane %v4699_v44, 7  ;;  %v4754_v53 = vld [vmem:[#allocation3 + $0x1e8] sm:$0x33]  ;;  %v9324_v54 = vor.u32 %v9560_v49, %v9321_v8 }
 0xafc   : > { %4723 = vrot.lane.b32.xlu0 %v4709_v59, %s13648_s23  ;;  %v4716_v12 = vrot.slane %v4709_v59, 4  ;;  %v5302_v8 = vld [vmem:[%s13561_s8] sm:$0xf] }
 0xafd   : > { %4721 = vrot.lane.b32.xlu2 %v4708_v21, %s13648_s23  ;;  %v4713_v32 = vrot.slane %v4708_v21, 4  ;;  %v9320_v21 = vor.u32 %v9562_v38, %v9319_v20  ;;  %v5424_v49 = vld [vmem:[%s13557_s4] sm:$0x11] }
 0xafe   : > { %v4718_v25 = vsel %vm13749_vm2, %v4716_v12, %v4717_v23  ;;  %v9558_v12 = vld [vmem:[#allocation3 + $0x18c] sm:$0xf0] }
 0xaff   : > { %v4715_v16 = vsel %vm13749_vm2, %v4713_v32, %v4714_v46  ;;  %vm13890_vm2 = vcmask 1040384   ;;  %v9305_v32 = vld [vmem:[#allocation3 + $0x190] sm:$0xf0]  ;;  %v9303_v46 = vld [vmem:[#allocation3 + $0x180] sm:$0xf] }
 0xb00   : > { %v5142_v27 = vsel %vm13890_vm2, 4294967295, %v13655_v5 }
 0xb01   : > { %v12170_v56 = vsel %vm13891_vm1, %v5142_v27, 0  ;;  %vm13899_vm1 = vsmask.f32 6400 }
 0xb02   : > { %5216 = vmatmul.bf16.vlgmr.msrb.gmra.mxu0 %v4823_v55  ;;  %5242 = vmatmul.bf16.vlgmr.msrb.gmra.mxu2 %v4823_v55  ;;  %v9257_v55 = vld [vmem:[#allocation3 + $0x130] sm:$0xf0] }
 0xb04   : > { %4729 = vrot.lane.b32.xlu0 %v4718_v25, %s13648_s23  ;;  %v9556_v25 = vld [vmem:[#allocation3 + $0x184] sm:$0xf] }
 0xb05   : > { %4727 = vrot.lane.b32.xlu2 %v4715_v16, %s13648_s23  ;;  %v9304_v16 = vor.u32 %v9558_v12, %v9303_v46  ;;  %v9563_v46 = vld [vmem:[#allocation3 + $0x1b4] sm:$0xf0] }
 0xb0d   : > { %5305 = vperm.xlu2 %9920, %v5302_v8  }
 0xb56   : > { %v4720_v1 = vpop.permute.xlu1 %4719 }
 0xb57   : > { %v4731_v28 = vrot.slane %v4720_v1, 4  ;;  %v4722_v22 = vpop.permute.xlu2 %4721 }
 0xb58   : > { %v4732_v17 = vrot.slane %v4722_v22, 4 }
 0xb5a   : > { %v4737_v41 = vsel %vm13853_vm0, %v4731_v28, %v4732_v17  ;;  %v9554_v28 = vld [vmem:[#allocation3 + $0x16c] sm:$0xf0]  ;;  %vm5136_vm0 = vcmask 941056  }
 0xb5b   : > { %v4738_v13 = vsel %vm13886_vm9, %v4720_v1, %v4737_v41  ;;  %v9308_v1 = vor.u32 %v9556_v25, %v9305_v32  ;;  %v9552_v41 = vld [vmem:[#allocation3 + $0x164] sm:$0xf]  ;;  %v9329_v25 = vld [vmem:[#allocation3 + $0x1b8] sm:$0xf0]  ;;  %vm13647_vm9 = vcmask 1042434  }
 0xb5c   : > { %4749 = vst [vmem:[#allocation3 + $0x1d0] sm:$0xee] %v4738_v13 }
 0xb5e   : > { %v4726_v50 = vpop.permute.xlu1 %4725 }
 0xb5f   : > { %v4734_v33 = vrot.slane %v4726_v50, 4  ;;  %v4728_v18 = vpop.permute.xlu2 %4727 }
 0xb60   : > { %v4735_v42 = vrot.slane %v4728_v18, 4 }
 0xb62   : > { %v4741_v61 = vsel %vm13887_vm3, %v4734_v33, %v4735_v42  ;;  %v9550_v33 = vld [vmem:[#allocation3 + $0x14c] sm:$0xf0]  ;;  %vm5412_vm3 = vcmask 1046534  }
 0xb63   : > { %v4742_v52 = vsel %vm13888_vm14, %v4726_v50, %v4741_v61  ;;  %v9566_v6 = vld [vmem:[#allocation3 + $0x1cc] sm:$0xf0]  ;;  %v9337_v37 = vld [vmem:[#allocation3 + $0x1d0] sm:$0xf0]  ;;  %v9548_v61 = vld [vmem:[#allocation3 + $0x144] sm:$0xf] }
 0xb64   : > { %v4752_v36 = vsel %vm13751_vm10, %v4742_v52, %v4751_v34  ;;  %v9336_v10 = vor.u32 %v9566_v6, %v9335_v47  ;;  %v9340_v48 = vor.u32 %v9564_v4, %v9337_v37  ;;  %v9271_v34 = vld [vmem:[#allocation3 + $0x140] sm:$0xf]  ;;  %v9540_v6 = vld [vmem:[#allocation3 + $0x104] sm:$0xf]  ;;  %vm13896_vm14 = vsmask.f32 2304 }
 0xb65   : > { %4753 = vst [vmem:[#allocation3 + $0x1e0] sm:$0x33] %v4752_v36  ;;  %v9272_v52 = vor.u32 %v9550_v33, %v9271_v34  ;;  %vm12213_vm2 = vmand %vm13647_vm9, %vm13896_vm14 }
 0xb6c   : > { %v4818_v39 = vld [vmem:[#allocation3 + $0x1e0] sm:$0x33] }
 0xb6d   : > { %v5008_v63 = vunpack.c.l.b16 %v4818_v39  ;;  %v5009_v15 = vunpack.c.h.b16 %v4818_v39 }
 0xb6e   : > { %v4724_v62 = vpop.permute.xlu0 %4723 }
 0xb6f   : > { %v4733_v58 = vrot.slane %v4724_v62, 4  ;;  %v5072_v14 = vpack.c.b16 %v5008_v63, %v5008_v63  ;;  %v5073_v26 = vpack.c.b16 %v5009_v15, %v5009_v15  ;;  %v9255_v63 = vld [vmem:[#allocation3 + $0x120] sm:$0xf]  ;;  %v9544_v15 = vld [vmem:[#allocation3 + $0x124] sm:$0xf] }
 0xb70   : > { %v9256_v62 = vor.u32 %v9546_v60, %v9255_v63  ;;  %v9557_v63 = vld [vmem:[#allocation3 + $0x18c] sm:$0xf] }
 0xb71   : > { %v4739_v29 = vsel %vm13892_vm7, %v4732_v17, %v4733_v58  ;;  %v5145_v2 = vand.u32 %v12170_v56, %v5072_v14  ;;  %v5148_v11 = vand.u32 %v12170_v56, %v5073_v26  ;;  %v9287_v17 = vld [vmem:[#allocation3 + $0x160] sm:$0xf]  ;;  %v9260_v58 = vor.u32 %v9544_v15, %v9257_v55  ;;  %v9542_v14 = vld [vmem:[#allocation3 + $0x10c] sm:$0xf0]  ;;  %v9241_v26 = vld [vmem:[#allocation3 + $0x110] sm:$0xf0] }
 0xb72   : > { %v4740_v40 = vsel %vm13893_vm13, %v4722_v22, %v4739_v29  ;;  %v9289_v22 = vld [vmem:[#allocation3 + $0x170] sm:$0xf0]  ;;  %v9288_v13 = vor.u32 %v9554_v28, %v9287_v17  ;;  %v9244_v47 = vor.u32 %v9540_v6, %v9241_v26  ;;  %v9327_v17 = vld [vmem:[#allocation3 + $0x1a8] sm:$0xf]  ;;  %v9553_v6 = vld [vmem:[#allocation3 + $0x16c] sm:$0xf] }
 0xb73   : > { %4750 = vst [vmem:[#allocation3 + $0x1d8] sm:$0xee] %v4740_v40  ;;  %5169 = vmatpush.bf16.msra.mxu1 %v5145_v2  ;;  %5195 = vmatpush.bf16.msra.mxu3 %v5148_v11  ;;  %v9292_v50 = vor.u32 %v9552_v41, %v9289_v22  ;;  %v4822_v11 = vunpack.c.h.b16 %v12164_v7  ;;  %v9239_v40 = vld [vmem:[#allocation3 + $0x100] sm:$0xf]  ;;  %v5292_v7 = vld [vmem:[%s13560_s7] sm:$0xf]  ;;  %v9328_v33 = vor.u32 %v9563_v46, %v9327_v17  ;;  %v5165_v46 = vpop.f32.mrf.mxu0  ;;  %vm12221_vm7 = vmand %vm5412_vm3, %vm13899_vm1 }
 0xb74   : > { %v9240_v37 = vor.u32 %v9542_v14, %v9239_v40  ;;  %5295 = vperm.xlu1 %9919, %v5292_v7   ;;  %v9561_v41 = vld [vmem:[#allocation3 + $0x1ac] sm:$0xf]  ;;  %v9295_v40 = vld [vmem:[#allocation3 + $0x168] sm:$0xf]  ;;  %vm5414_vm13 = vmor %vm12221_vm7, %vm12213_vm2  ;;  %vm13902_vm2 = vcmask 449536  }
 0xb76   : > { %v4730_v31 = vpop.permute.xlu0 %4729 }
 0xb77   : > { %v4736_v45 = vrot.slane %v4730_v31, 4  ;;  %5170 = vmatpush.bf16.msra.mxu1 %v9336_v10  ;;  %5196 = vmatpush.bf16.msra.mxu3 %v9340_v48  ;;  %v12183_v48 = vpack.c.b16 %v4822_v11, %v4822_v11 }
 0xb79   : > { %v4743_v59 = vsel %vm13894_vm15, %v4735_v42, %v4736_v45  ;;  %v5425_v45 = vld [vmem:[%s13557_s4 + $0x8] sm:$0x11] }
 0xb7a   : > { %v4744_v44 = vsel %vm13895_vm8, %v4728_v18, %v4743_v59  ;;  %v9273_v18 = vld [vmem:[#allocation3 + $0x150] sm:$0xf0]  ;;  %v9567_v31 = vld [vmem:[#allocation3 + $0x1d4] sm:$0xf0]  ;;  %v9345_v38 = vld [vmem:[#allocation3 + $0x1d8] sm:$0xf0]  ;;  %v5431_v20 = vunpack.c.h.b16 %v5425_v45 }
 0xb7b   : > { %v4755_v23 = vsel %vm13751_vm10, %v4744_v44, %v4754_v53  ;;  %5171 = vmatpush.bf16.msra.mxu1 %v9320_v21  ;;  %5197 = vmatpush.bf16.msra.mxu3 %v9324_v54  ;;  %v9276_v36 = vor.u32 %v9548_v61, %v9273_v18  ;;  %v5430_v53 = vunpack.c.l.b16 %v5425_v45  ;;  %v9565_v21 = vld [vmem:[#allocation3 + $0x1cc] sm:$0xf]  ;;  %v5428_v54 = vunpack.c.l.b16 %v5424_v49  ;;  %v9559_v61 = vld [vmem:[#allocation3 + $0x194] sm:$0xf0] }
 0xb7c   : > { %4756 = vst [vmem:[#allocation3 + $0x1e8] sm:$0x33] %v4755_v23  ;;  %v5429_v44 = vunpack.c.h.b16 %v5424_v49  ;;  %v9348_v12 = vor.u32 %v9565_v21, %v9345_v38  ;;  %v5435_v23 = vpack.c.b16 %v5431_v20, %v5431_v20  ;;  %v9332_v18 = vor.u32 %v9561_v41, %v9329_v25  ;;  %v9549_v38 = vld [vmem:[#allocation3 + $0x14c] sm:$0xf]  ;;  %v9547_v45 = vld [vmem:[#allocation3 + $0x134] sm:$0xf0]  ;;  %v5191_v25 = vpop.f32.mrf.mxu2 }
 0xb7d   : > { %v5434_v32 = vpack.c.b16 %v5430_v53, %v5430_v53  ;;  %v9263_v53 = vld [vmem:[#allocation3 + $0x128] sm:$0xf]  ;;  %v9545_v20 = vld [vmem:[#allocation3 + $0x12c] sm:$0xf]  ;;  %v9543_v21 = vld [vmem:[#allocation3 + $0x114] sm:$0xf0] }
 0xb7e   : > { %v5449_v22 = vpack.i.b16 %v5435_v23, %v5435_v23  ;;  %v9264_v49 = vor.u32 %v9547_v45, %v9263_v53 }
 0xb7f   : > { %5172 = vmatpush.bf16.msra.mxu1 %v9304_v16  ;;  %5198 = vmatpush.bf16.msra.mxu3 %v9308_v1  ;;  %v5432_v16 = vpack.c.b16 %v5428_v54, %v5428_v54  ;;  %v5433_v1 = vpack.c.b16 %v5429_v44, %v5429_v44  ;;  %v5445_v28 = vpack.i.b16 %v5434_v32, %v5434_v32  ;;  %v9249_v54 = vld [vmem:[#allocation3 + $0x118] sm:$0xf0]  ;;  %v9247_v44 = vld [vmem:[#allocation3 + $0x108] sm:$0xf] }
 0xb80   : > { %v5451_v34 = vperm.slane %v5449_v22, 0  ;;  %v9248_v32 = vor.u32 %v9543_v21, %v9247_v44 }
 0xb83   : > { %5173 = vmatpush.bf16.msra.mxu1 %v9288_v13  ;;  %5199 = vmatpush.bf16.msra.mxu3 %v9292_v50  ;;  %v4819_v42 = vld [vmem:[#allocation3 + $0x1e8] sm:$0x33]  ;;  %v5437_v13 = vpack.i.b16 %v5432_v16, %v5432_v16  ;;  %v5441_v50 = vpack.i.b16 %v5433_v1, %v5433_v1  ;;  %v5167_v16 = vpop.f32.mrf.mxu0 }
 0xb84   : > { %v5010_v27 = vunpack.c.l.b16 %v4819_v42  ;;  %v5011_v39 = vunpack.c.h.b16 %v4819_v42  ;;  %v5447_v42 = vperm.slane %v5445_v28, 0  ;;  %v5193_v1 = vpop.f32.mrf.mxu2  ;;  %v515_v28 = vld [vmem:[#allocation4 + $0x8] sm:$0x77] }
 0xb85   : > { %v5443_v60 = vperm.slane %v5441_v50, 0  ;;  %v516_v22 = vsel %vm13756_vm5, 0, %v515_v28 }
 0xb86   : > { %v5074_v29 = vpack.c.b16 %v5010_v27, %v5010_v27  ;;  %v5075_v2 = vpack.c.b16 %v5011_v39, %v5011_v39  ;;  %v5459_v55 = vunpack.c.l.bf16 %v5447_v42  ;;  %v5460_v27 = vunpack.c.l.bf16 %v5451_v34  ;;  %v9311_v39 = vld [vmem:[#allocation3 + $0x188] sm:$0xf]  ;;  %517 = vst [vmem:[#allocation4 + $0x8] sm:$0x77] %v516_v22 }
 0xb87   : > { %5174 = vmatpush.bf16.msra.mxu1 %v9272_v52  ;;  %5200 = vmatpush.bf16.msra.mxu3 %v9276_v36  ;;  %v9313_v52 = vld [vmem:[#allocation3 + $0x198] sm:$0xf0]  ;;  %v5439_v36 = vperm.slane %v5437_v13, 0 }
 0xb88   : > { %v5151_v4 = vand.u32 %v12170_v56, %v5074_v29  ;;  %v5154_v10 = vand.u32 %v12170_v56, %v5075_v2  ;;  %v9343_v56 = vld [vmem:[#allocation3 + $0x1c8] sm:$0xf]  ;;  %v9316_v14 = vor.u32 %v9557_v63, %v9313_v52  ;;  %v9926_v26 = vpack.i.bf16 %v5460_v27, %v5459_v55  ;;  %v9555_v29 = vld [vmem:[#allocation3 + $0x174] sm:$0xf0]  ;;  %v9297_v2 = vld [vmem:[#allocation3 + $0x178] sm:$0xf0] }
 0xb89   : > { %v9344_v59 = vor.u32 %v9567_v31, %v9343_v56  ;;  %v5457_v15 = vunpack.c.l.bf16 %v5439_v36  ;;  %v9279_v31 = vld [vmem:[#allocation3 + $0x148] sm:$0xf]  ;;  %v9265_v56 = vld [vmem:[#allocation3 + $0x138] sm:$0xf0] }
 0xb8a   : > { %9927 = vrot.lane.b32.xlu1 %v9926_v26, %s13648_s23 }
 0xb8b   : > { %5175 = vmatpush.bf16.msra.mxu1 %v9256_v62  ;;  %5201 = vmatpush.bf16.msra.mxu3 %v9260_v58  ;;  %v5458_v62 = vunpack.c.l.bf16 %v5443_v60  ;;  %v9312_v58 = vor.u32 %v9559_v61, %v9311_v39  ;;  %v5217_v21 = vpop.f32.mrf.mxu0 }
 0xb8c   : > { %v5243_v16 = vpop.f32.mrf.mxu2 }
 0xb8d   : > { %v9921_v11 = vpack.i.bf16 %v5458_v62, %v5457_v15  ;;  %v5415_v62 = vld [vmem:[#allocation4 + $0x4] sm:$0x44] }
 0xb8f   : > { %5176 = vmatpush.bf16.msra.mxu1 %v9240_v37  ;;  %5202 = vmatpush.bf16.msra.mxu3 %v9244_v47  ;;  %v9296_v37 = vor.u32 %v9555_v29, %v9295_v40  ;;  %v9300_v47 = vor.u32 %v9553_v6, %v9297_v2 }
 0xb90   : > { %9922 = vrot.lane.b32.xlu0 %v9921_v11, %s13648_s23 }
 0xb92   : > { %9349 = vmatmul.msk.bf16.vlgmr.msra.gmra.mxu1 %vm5136_vm0, %v12183_v48  ;;  %9350 = vmatmul.msk.bf16.vlgmr.msra.gmra.mxu3 %vm5136_vm0, %v12183_v48 }
 0xb93   : > { %5221 = vmatpush.bf16.msrb.mxu1 %v5151_v4  ;;  %5247 = vmatpush.bf16.msrb.mxu3 %v5154_v10  ;;  %v9551_v4 = vld [vmem:[#allocation3 + $0x154] sm:$0xf0]  ;;  %v9281_v10 = vld [vmem:[#allocation3 + $0x158] sm:$0xf0] }
 0xb94   : > { %v9280_v7 = vor.u32 %v9551_v4, %v9279_v31  ;;  %v9284_v8 = vor.u32 %v9549_v38, %v9281_v10 }
 0xb97   : > { %5222 = vmatpush.bf16.msrb.mxu1 %v9344_v59  ;;  %5248 = vmatpush.bf16.msrb.mxu3 %v9348_v12  ;;  %v9268_v59 = vor.u32 %v9545_v20, %v9265_v56  ;;  %v9541_v12 = vld [vmem:[#allocation3 + $0x10c] sm:$0xf] }
 0xb98   : > { %v9252_v23 = vor.u32 %v9541_v12, %v9249_v54 }
 0xb9b   : > { %5223 = vmatpush.bf16.msrb.mxu1 %v9328_v33  ;;  %5249 = vmatpush.bf16.msrb.mxu3 %v9332_v18 }
 0xb9f   : > { %5224 = vmatpush.bf16.msrb.mxu1 %v9312_v58  ;;  %5250 = vmatpush.bf16.msrb.mxu3 %v9316_v14 }
 0xba3   : > { %5225 = vmatpush.bf16.msrb.mxu1 %v9296_v37  ;;  %5251 = vmatpush.bf16.msrb.mxu3 %v9300_v47  ;;  %v12238_v37 = vpop.permute.xlu2 %5305 }
 0xba7   : > { %5226 = vmatpush.bf16.msrb.mxu1 %v9280_v7  ;;  %5252 = vmatpush.bf16.msrb.mxu3 %v9284_v8 }
 0xbab   : > { %5227 = vmatpush.bf16.msrb.mxu1 %v9264_v49  ;;  %5253 = vmatpush.bf16.msrb.mxu3 %v9268_v59 }
 0xbaf   : > { %5228 = vmatpush.bf16.msrb.mxu1 %v9248_v32  ;;  %5254 = vmatpush.bf16.msrb.mxu3 %v9252_v23 }
 0xbb2   : > { %9351 = vmatmul.msk.bf16.vlgmr.msrb.gmra.mxu1 %vm5136_vm0, %v12183_v48  ;;  %9352 = vmatmul.msk.bf16.vlgmr.msrb.gmra.mxu3 %vm5136_vm0, %v12183_v48 }
 0xbe6   : > { %v12236_v11 = vpop.permute.xlu1 %5295 }
 0xc0f   : > { %v5178_v17 = vpop.f32.mrf.mxu1 }
 0xc10   : > { %v5179_v41 = vadd.f32 %v5178_v17, %v5165_v46 }
 0xc12   : > { %v5260_v13 = vmax.f32 %v5179_v41, 0.0  ;;  %v5268_v50 = vadd.f32 1e-08, %v5179_v41 }
 0xc14   : > { %10182 = vrcp.f32 %v5268_v50  ;;  %v12209_v18 = vmin.f32 %v5260_v13, 1.0  ;;  %v5219_v13 = vpop.f32.mrf.mxu0 }
 0xc15   : > { %v5204_v33 = vpop.f32.mrf.mxu3 }
 0xc16   : > { %v5205_v42 = vadd.f32 %v5204_v33, %v5191_v25  ;;  %v5404_v60 = vmul.f32 4.0, %v12209_v18 }
 0xc17   : > { %v5180_v48 = vpop.f32.mrf.mxu1 }
 0xc18   : > { %v5261_v34 = vmax.f32 %v5205_v42, 0.0  ;;  %v5269_v61 = vadd.f32 1e-08, %v5205_v42 }
 0xc1a   : > { %v10183_v36 = vpop.eup %10182  ;;  %v12218_v55 = vmin.f32 %v5261_v34, 1.0  ;;  %10184 = vrcp.f32 %v5269_v61 }
 0xc1b   : > { %v5276_v39 = vmul.f32 216.0, %v10183_v36 }
 0xc1c   : > { %v5405_v63 = vmul.f32 4.0, %v12218_v55 }
 0xc1d   : > { %v5280_v15 = vmul.f32 %v5276_v39, %v12209_v18  ;;  %v5206_v58 = vpop.f32.mrf.mxu3 }
 0xc1e   : > { %v5408_v14 = vpack.c.bf16 %v5405_v63, %v5404_v60 }
 0xc1f   : > { %v5284_v26 = vperm.slane %v5280_v15, 4 }
 0xc20   : > { %v10185_v29 = vpop.eup %10184  ;;  %v5416_v2 = vsel %vm5414_vm13, %v5408_v14, %v5415_v62 }
 0xc21   : > { %v5288_v40 = vmul.f32 %v5284_v26, %v5179_v41  ;;  %v5277_v6 = vmul.f32 216.0, %v10185_v29  ;;  %5417 = vst [vmem:[#allocation4 + $0x4] sm:$0x44] %v5416_v2  ;;  %v5245_v2 = vpop.f32.mrf.mxu2 }
 0xc23   : > { %v5281_v47 = vmul.f32 %v5277_v6, %v12218_v55  ;;  %v5298_v4 = vmul.f32 %v12236_v11, %v5288_v40 }
 0xc25   : > { %v5285_v10 = vperm.slane %v5281_v47, 4  ;;  %v12243_v31 = vadd.f32 %v12238_v37, %v5298_v4 }
 0xc27   : > { %v5289_v38 = vmul.f32 %v5285_v10, %v5205_v42  ;;  %v9353_v7 = vmul.f32 -1.442695, %v12243_v31 }
 0xc29   : > { %v5299_v8 = vmul.f32 %v12236_v11, %v5289_v38  ;;  %10186 = vpow2.f32 %v9353_v7 }
 0xc2b   : > { %v12248_v45 = vadd.f32 %v12238_v37, %v5299_v8 }
 0xc2d   : > { %v9354_v56 = vmul.f32 -1.442695, %v12248_v45 }
 0xc2f   : > { %v10187_v53 = vpop.eup %10186  ;;  %10188 = vpow2.f32 %v9354_v56  ;;  %v5230_v54 = vpop.f32.mrf.mxu1 }
 0xc30   : > { %v5324_v20 = vadd.f32 1.0, %v10187_v53  ;;  %v5231_v44 = vadd.f32 %v5230_v54, %v5217_v21  ;;  %v5392_v21 = vperm.slane %v12209_v18, 4  ;;  %v5393_v54 = vperm.slane %v12218_v55, 4 }
 0xc32   : > { %10190 = vrcp.f32 %v5324_v20  ;;  %v5270_v23 = vadd.f32 1e-08, %v5231_v44  ;;  %v5262_v25 = vmax.f32 %v5231_v44, 0.0  ;;  %vm5333_vm8 = vweird.f32 %v5324_v20 }
 0xc33   : > { %v5339_v41 = vand.u32 2147483648, %v5324_v20  ;;  %v5337_v42 = vand.u32 2147483647, %v5324_v20 }
 0xc34   : > { %v12251_v61 = vmin.f32 %v5262_v25, 1.0 }
 0xc35   : > { %v10189_v49 = vpop.eup %10188  ;;  %v5256_v1 = vpop.f32.mrf.mxu3  ;;  %v5340_v63 = vor.u32 1.1754944e-38, %v5339_v41  ;;  %vm5338_vm3 = vcmp.eq.f32.partialorder %v5337_v42, 8.507059e+37 }
 0xc36   : > { %v5325_v59 = vadd.f32 1.0, %v10189_v49  ;;  %v5257_v22 = vadd.f32 %v5256_v1, %v5243_v16 }
 0xc37   : > { %v5232_v50 = vpop.f32.mrf.mxu1 }
 0xc38   : > { %v10191_v12 = vpop.eup %10190  ;;  %10192 = vrcp.f32 %v5325_v59  ;;  %v5271_v34 = vadd.f32 1e-08, %v5257_v22  ;;  %v5354_v15 = vand.u32 2147483648, %v5325_v59  ;;  %v5352_v14 = vand.u32 2147483647, %v5325_v59 }
 0xc39   : > { %v5329_v32 = vmul.f32 %v10191_v12, %v5324_v20  ;;  %10194 = vrcp.f32 %v5270_v23  ;;  %vm5334_vm15 = vweird.f32 %v10191_v12  ;;  %vm5348_vm1 = vweird.f32 %v5325_v59 }
 0xc3a   : > { %vm5335_vm0 = vmor %vm5333_vm8, %vm5334_vm15  ;;  %10196 = vrcp.f32 %v5271_v34  ;;  %v5355_v47 = vor.u32 1.1754944e-38, %v5354_v15  ;;  %v5263_v10 = vmax.f32 %v5257_v22, 0.0  ;;  %vm5353_vm8 = vcmp.eq.f32.partialorder %v5352_v14, 8.507059e+37 }
 0xc3b   : > { %v5330_v46 = vsub.f32 1.0, %v5329_v32 }
 0xc3c   : > { %v12255_v20 = vmin.f32 %v5263_v10, 1.0 }
 0xc3d   : > { %v5331_v28 = vmul.f32 %v10191_v12, %v5330_v46  ;;  %v5258_v40 = vpop.f32.mrf.mxu3 }
 0xc3e   : > { %v10193_v17 = vpop.eup %10192  ;;  %v5407_v41 = vmul.f32 4.0, %v12255_v20 }
 0xc3f   : > { %v5332_v33 = vadd.f32 %v10191_v12, %v5331_v28  ;;  %v5344_v48 = vmul.f32 %v10193_v17, %v5325_v59  ;;  %v10195_v36 = vpop.eup %10194  ;;  %vm5349_vm14 = vweird.f32 %v10193_v17 }
 0xc40   : > { %v5278_v62 = vmul.f32 216.0, %v10195_v36  ;;  %vm5350_vm15 = vmor %vm5348_vm1, %vm5349_vm14  ;;  %v10197_v38 = vpop.eup %10196 }
 0xc41   : > { %v5336_v60 = vsel %vm5335_vm0, %v10191_v12, %v5332_v33  ;;  %v5345_v39 = vsub.f32 1.0, %v5344_v48  ;;  %v5279_v49 = vmul.f32 216.0, %v10197_v38 }
 0xc42   : > { %v5341_v26 = vsel %vm5338_vm3, %v5340_v63, %v5336_v60  ;;  %v5282_v29 = vmul.f32 %v5278_v62, %v12251_v61  ;;  %v5517_v62 = vld [vmem:[%s13557_s4 + $0x8] sm:$0x11] }
 0xc43   : > { %v5346_v58 = vmul.f32 %v10193_v17, %v5345_v39  ;;  %v5388_v8 = vmul.f32 %v5341_v26, %v12243_v31  ;;  %v5283_v32 = vmul.f32 %v5279_v49, %v12255_v20  ;;  %v518_v31 = vld [vmem:[#allocation4 + $0x10] sm:$0x77]  ;;  %v12283_v39 = vpop.permute.xlu0 %9922  ;;  %v5522_v40 = vunpack.c.l.b16 %v5517_v62 }
 0xc44   : > { %v5286_v4 = vperm.slane %v5282_v29, 4  ;;  %v519_v1 = vsel %vm13756_vm5, 0, %v518_v31  ;;  %v9925_v27 = vunpack.i.h.bf16 %v12283_v39  ;;  %v9924_v52 = vunpack.i.l.bf16 %v12283_v39 }
 0xc45   : > { %v5347_v6 = vadd.f32 %v10193_v17, %v5346_v58  ;;  %v5396_v23 = vmul.f32 %v5392_v21, %v5388_v8  ;;  %520 = vst [vmem:[#allocation4 + $0x10] sm:$0x77] %v519_v1  ;;  %v5526_v8 = vpack.c.b16 %v5522_v40, %v5522_v40 }
 0xc46   : > { %v5290_v53 = vmul.f32 %v5286_v4, %v5231_v44  ;;  %v5287_v44 = vperm.slane %v5283_v32, 4  ;;  %v5473_v29 = vsel %vm13902_vm2, %v9924_v52, %v9925_v27 }
 0xc47   : > { %v5351_v7 = vsel %vm5350_vm15, %v10193_v17, %v5347_v6 }
 0xc48   : > { %v5356_v56 = vsel %vm5353_vm8, %v5355_v47, %v5351_v7  ;;  %v5300_v12 = vmul.f32 %v12236_v11, %v5290_v53  ;;  %v5291_v55 = vmul.f32 %v5287_v44, %v5257_v22 }
 0xc49   : > { %v5389_v59 = vmul.f32 %v5356_v56, %v12248_v45  ;;  %v5406_v45 = vmul.f32 4.0, %v12251_v61 }
 0xc4a   : > { %v12263_v25 = vadd.f32 %v12238_v37, %v5300_v12  ;;  %v5301_v28 = vmul.f32 %v12236_v11, %v5291_v55  ;;  %v10231_v11 = vld [vmem:[%s13557_s4] sm:$0x11]  ;;  %v5539_v12 = vshrl.u32 %v5526_v8, 16 }
 0xc4b   : > { %v5397_v46 = vmul.f32 %v5393_v54, %v5389_v59  ;;  %v5409_v50 = vpack.c.bf16 %v5407_v41, %v5406_v45 }
 0xc4c   : > { %v9355_v18 = vmul.f32 -1.442695, %v12263_v25  ;;  %v12271_v17 = vadd.f32 %v12238_v37, %v5301_v28  ;;  %v5418_v33 = vld [vmem:[#allocation4 + $0xc] sm:$0x44]  ;;  %v5521_v37 = vunpack.c.h.b16 %v10231_v11  ;;  %v5540_v44 = vpack.i.b16 %v5539_v12, %v5539_v12 }
 0xc4d   : > { %v5400_v16 = vpack.c.bf16 %v5397_v46, %v5396_v23  ;;  %v5419_v22 = vsel %vm5414_vm13, %v5409_v50, %v5418_v33  ;;  %v7554_v50 = vld [vmem:[%s13557_s4 + $0x20] sm:$0x22]  ;;  %v5523_v11 = vunpack.c.h.b16 %v5517_v62 }
 0xc4e   : > { %10198 = vpow2.f32 %v9355_v18  ;;  %v9356_v13 = vmul.f32 -1.442695, %v12271_v17  ;;  %5420 = vst [vmem:[#allocation4 + $0xc] sm:$0x44] %v5419_v22  ;;  %v5525_v60 = vpack.c.b16 %v5521_v37, %v5521_v37  ;;  %v5542_v55 = vperm.slane %v5540_v44, 0 }
 0xc4f   : > { %5402 = vst [vmem:[#allocation4 + $0x4] sm:$0x33] %v5400_v16  ;;  %v5394_v37 = vperm.slane %v12251_v61, 4 }
 0xc50   : > { %10200 = vpow2.f32 %v9356_v13  ;;  %v5534_v6 = vshrl.u32 %v5525_v60, 16  ;;  %v5555_v13 = vunpack.c.l.bf16 %v5542_v55  ;;  %v7558_v60 = vunpack.c.l.b16 %v7554_v50 }
 0xc52   : > { %v5535_v56 = vpack.i.b16 %v5534_v6, %v5534_v6 }
 0xc54   : > { %v10199_v42 = vpop.eup %10198  ;;  %v5537_v59 = vperm.slane %v5535_v56, 0 }
 0xc55   : > { %v5326_v48 = vadd.f32 1.0, %v10199_v42 }
 0xc56   : > { %v10201_v34 = vpop.eup %10200  ;;  %v5421_v15 = vld [vmem:[#allocation4] sm:$0x77]  ;;  %v5554_v45 = vunpack.c.l.bf16 %v5537_v59 }
 0xc57   : > { %10202 = vrcp.f32 %v5326_v48  ;;  %v5327_v36 = vadd.f32 1.0, %v10201_v34  ;;  %v5452_v14 = vunpack.c.l.bf16 %v5421_v15  ;;  %v5453_v26 = vunpack.c.h.bf16 %v5421_v15  ;;  %v5513_v39 = vld [vmem:[#allocation4] sm:$0x77] }
 0xc58   : > { %v5369_v47 = vand.u32 2147483648, %v5326_v48  ;;  %v5367_v53 = vand.u32 2147483647, %v5326_v48  ;;  %vm5363_vm13 = vweird.f32 %v5326_v48  ;;  %v5527_v15 = vpack.c.b16 %v5523_v11, %v5523_v11 }
 0xc59   : > { %10204 = vrcp.f32 %v5327_v36  ;;  %v5481_v4 = vmul.f32 %v9924_v52, %v5452_v14  ;;  %v5482_v10 = vmul.f32 %v5473_v29, %v5453_v26  ;;  %v5384_v31 = vand.u32 2147483648, %v5327_v36  ;;  %v9928_v26 = vpop.permute.xlu1 %9927 }
 0xc5a   : > { %v5370_v46 = vor.u32 1.1754944e-38, %v5369_v47  ;;  %vm5368_vm3 = vcmp.eq.f32.partialorder %v5367_v53, 8.507059e+37  ;;  %v5382_v1 = vand.u32 2147483647, %v5327_v36  ;;  %vm5378_vm1 = vweird.f32 %v5327_v36 }
 0xc5b   : > { %v5486_v21 = vpack.c.bf16 %v5482_v10, %v5481_v4  ;;  %v5385_v41 = vor.u32 1.1754944e-38, %v5384_v31  ;;  %v7562_v14 = vpack.c.b16 %v7558_v60, %v7558_v60  ;;  %v9929_v62 = vunpack.i.l.bf16 %v9928_v26 }
 0xc5c   : > { %vm5383_vm8 = vcmp.eq.f32.partialorder %v5382_v1, 8.507059e+37  ;;  %v9838_v31 = vunpack.i.h.bf16 %v11785_v24 }
 0xc5d   : > { %v10203_v63 = vpop.eup %10202  ;;  %5492 = vrot.lane.b32.xlu2 %v5486_v21, %s13650_s25  ;;  %v7567_v29 = vshrl.u32 %v7562_v14, 16 }
 0xc5e   : > { %v5359_v58 = vmul.f32 %v10203_v63, %v5326_v48  ;;  %vm5364_vm7 = vweird.f32 %v10203_v63  ;;  %v9931_v48 = vpack.i.bf16 %v5555_v13, %v5554_v45 }
 0xc5f   : > { %v10205_v38 = vpop.eup %10204  ;;  %vm5365_vm0 = vmor %vm5363_vm13, %vm5364_vm7  ;;  %v7568_v61 = vpack.i.b16 %v7567_v29, %v7567_v29  ;;  %vm13904_vm13 = vcmask 457728  }
 0xc60   : > { %v5360_v2 = vsub.f32 1.0, %v5359_v58  ;;  %v5374_v49 = vmul.f32 %v10205_v38, %v5327_v36  ;;  %vm5379_vm14 = vweird.f32 %v10205_v38  ;;  %v5395_v36 = vperm.slane %v12255_v20, 4  ;;  %vm13903_vm7 = vmmov %vm13902_vm2 }
 0xc61   : > { %vm5380_vm15 = vmor %vm5378_vm1, %vm5379_vm14  ;;  %vm13908_vm14 = vcmask 596992  }
 0xc62   : > { %v5361_v7 = vmul.f32 %v10203_v63, %v5360_v2  ;;  %v5375_v32 = vsub.f32 1.0, %v5374_v49  ;;  %v9930_v2 = vunpack.i.h.bf16 %v9928_v26  ;;  %v7570_v49 = vperm.slane %v7568_v61, 1  ;;  %vm13909_vm1 = vmmov %vm13908_vm14 }
 0xc64   : > { %v5362_v54 = vadd.f32 %v10203_v63, %v5361_v7  ;;  %v5376_v16 = vmul.f32 %v10205_v38, %v5375_v32  ;;  %v5475_v20 = vsel %vm13902_vm2, %v9929_v62, %v9930_v2  ;;  %v7591_v12 = vunpack.c.l.bf16 %v7570_v49 }
 0xc65   : > { %9932 = vrot.lane.b32.xlu2 %v9931_v48, %s13652_s17  ;;  %vm13912_vm2 = vcmask 465920  }
 0xc66   : > { %v5366_v23 = vsel %vm5365_vm0, %v10203_v63, %v5362_v54  ;;  %v5377_v28 = vadd.f32 %v10205_v38, %v5376_v16  ;;  %v5549_v16 = vunpack.c.h.bf16 %v5513_v39  ;;  %vm13906_vm0 = vcmask 1043456  }
 0xc67   : > { %v5371_v18 = vsel %vm5368_vm3, %v5370_v46, %v5366_v23  ;;  %v5548_v46 = vunpack.c.l.bf16 %v5513_v39  ;;  %vm13907_vm3 = vmmov %vm13906_vm0 }
 0xc68   : > { %v5390_v33 = vmul.f32 %v5371_v18, %v12263_v25  ;;  %v5381_v42 = vsel %vm5380_vm15, %v10205_v38, %v5377_v28  ;;  %v5544_v25 = vshrl.u32 %v5527_v15, 16  ;;  %v5474_v38 = vsel %vm13903_vm7, %v9925_v27, %v9929_v62  ;;  %v5653_v18 = vld [vmem:[%s13557_s4] sm:$0x22]  ;;  %vm13910_vm15 = vmmov %vm13904_vm13 }
 0xc69   : > { %v5386_v22 = vsel %vm5383_vm8, %v5385_v41, %v5381_v42  ;;  %v5577_v55 = vmul.f32 %v9838_v31, %v5548_v46  ;;  %v5657_v41 = vunpack.c.l.b16 %v5653_v18  ;;  %v5658_v13 = vunpack.c.h.b16 %v5653_v18  ;;  %v5507_v62 = vld [vmem:[#allocation5] sm:$0x77]  ;;  %vm13911_vm8 = vmmov %vm13904_vm13 }
 0xc6a   : > { %v5391_v34 = vmul.f32 %v5386_v22, %v12271_v17  ;;  %v5398_v63 = vmul.f32 %v5394_v37, %v5390_v33  ;;  %v5545_v40 = vpack.i.b16 %v5544_v25, %v5544_v25  ;;  %vm13913_vm7 = vmmov %vm13906_vm0 }
 0xc6b   : > { %v5661_v48 = vpack.c.b16 %v5657_v41, %v5657_v41  ;;  %v5662_v11 = vpack.c.b16 %v5658_v13, %v5658_v13 }
 0xc6c   : > { %v5399_v52 = vmul.f32 %v5395_v36, %v5391_v34  ;;  %v5547_v7 = vperm.slane %v5545_v40, 0  ;;  %v5510_v40 = vld [vmem:[#allocation5 + $0x8] sm:$0x77] }
 0xc6d   : > { %v5666_v37 = vpack.i.b16 %v5661_v48, %v5661_v48  ;;  %v5670_v34 = vpack.i.b16 %v5662_v11, %v5662_v11 }
 0xc6e   : > { %v5401_v58 = vpack.c.bf16 %v5399_v52, %v5398_v63  ;;  %v5556_v59 = vunpack.c.l.bf16 %v5547_v7 }
 0xc6f   : > { %v5668_v36 = vperm.slane %v5666_v37, 1  ;;  %v5672_v60 = vperm.slane %v5670_v34, 1 }
 0xc70   : > { %5403 = vst [vmem:[#allocation4 + $0xc] sm:$0x33] %v5401_v58  ;;  %v9936_v32 = vpack.i.bf16 %v7591_v12, %v5556_v59 }
 0xc71   : > { %v5686_v52 = vunpack.c.l.bf16 %v5668_v36  ;;  %v5687_v15 = vunpack.c.l.bf16 %v5672_v60 }
 0xc73   : > { %v9941_v58 = vpack.i.bf16 %v5687_v15, %v5686_v52 }
 0xc77   : > { %v5422_v6 = vld [vmem:[#allocation4 + $0x8] sm:$0x77]  ;;  %v5423_v17 = vld [vmem:[#allocation4 + $0x10] sm:$0x7] }
 0xc78   : > { %v5455_v47 = vunpack.c.h.bf16 %v5422_v6  ;;  %v5456_v4 = vunpack.c.l.bf16 %v5423_v17  ;;  %v5454_v10 = vunpack.c.l.bf16 %v5422_v6  ;;  %v5514_v7 = vld [vmem:[#allocation4 + $0x8] sm:$0x77] }
 0xc7a   : > { %v5484_v8 = vmul.f32 %v5475_v20, %v5455_v47  ;;  %v5485_v56 = vmul.f32 %v9930_v2, %v5456_v4  ;;  %v5483_v53 = vmul.f32 %v5474_v38, %v5454_v10  ;;  %v5515_v38 = vld [vmem:[#allocation4 + $0x10] sm:$0x7] }
 0xc7c   : > { %v5488_v21 = vpack.c.bf16 %v5485_v56, %v5485_v56  ;;  %v5487_v54 = vpack.c.bf16 %v5484_v8, %v5483_v53  ;;  %v5552_v53 = vunpack.c.l.bf16 %v5515_v38 }
 0xc7e   : > { %5496 = vrot.lane.b32.xlu1 %v5488_v21, %s13650_s25  ;;  %5494 = vrot.lane.b32.xlu0 %v5487_v54, %s13650_s25  ;;  %v5550_v21 = vunpack.c.l.bf16 %v5514_v7  ;;  %v5551_v54 = vunpack.c.h.bf16 %v5514_v7 }
 0xc86   : > { %9937 = vrot.lane.b32.xlu0 %v9936_v32, %s13652_s17  ;;  %v5654_v32 = vld [vmem:[%s13557_s4 + $0x8] sm:$0x22] }
 0xcb7   : > { %v5493_v23 = vpop.permute.xlu2 %5492 }
 0xcb8   : > { %v5498_v26 = vrot.slane %v5493_v23, 4 }
 0xcbf   : > { %v9933_v27 = vpop.permute.xlu2 %9932 }
 0xcc0   : > { %v9934_v44 = vunpack.i.l.bf16 %v9933_v27  ;;  %v9935_v47 = vunpack.i.h.bf16 %v9933_v27 }
 0xcc2   : > { %v5569_v1 = vsel %vm13904_vm13, %v9838_v31, %v9934_v44  ;;  %v5570_v56 = vsel %vm13910_vm15, %v9934_v44, %v9935_v47  ;;  %v5659_v31 = vunpack.c.l.b16 %v5654_v32  ;;  %vm13914_vm13 = vcmask 588800   ;;  %vm13918_vm15 = vmmov %vm13906_vm0 }
 0xcc3   : > { %v5578_v45 = vmul.f32 %v5569_v1, %v5549_v16  ;;  %v5660_v16 = vunpack.c.h.b16 %v5654_v32 }
 0xcc5   : > { %v5582_v28 = vpack.c.bf16 %v5578_v45, %v5577_v55 }
 0xcc7   : > { %v5586_v50 = vshrl.u32 %v5582_v28, 16  ;;  %v5589_v33 = vshll.u32 %v5582_v28, 16 }
 0xcc9   : > { %v5588_v42 = vrot.slane %v5586_v50, 5  ;;  %v5591_v22 = vrot.slane %v5589_v33, 6  ;;  %v5663_v50 = vpack.c.b16 %v5659_v31, %v5659_v31  ;;  %v5664_v33 = vpack.c.b16 %v5660_v16, %v5660_v16 }
 0xccb   : > { %v5592_v24 = vor.u32 %v5591_v22, %v5588_v42  ;;  %v5674_v48 = vpack.i.b16 %v5663_v50, %v5663_v50  ;;  %v5678_v11 = vpack.i.b16 %v5664_v33, %v5664_v33 }
 0xccd   : > { %5612 = vrot.lane.b32.xlu1 %v5592_v24, %s13905_s13  ;;  %v5609_v63 = vrot.slane %v5592_v24, 4  ;;  %v5676_v24 = vperm.slane %v5674_v48, 1  ;;  %v5680_v37 = vperm.slane %v5678_v11, 1  ;;  %v5652_v11 = vld [vmem:[#allocation4 + $0x10] sm:$0x7] }
 0xccf   : > { %v5688_v60 = vunpack.c.l.bf16 %v5676_v24 }
 0xcd5   : > { %5618 = vrot.lane.b32.xlu1 %v5609_v63, %s13905_s13  ;;  %v5689_v63 = vunpack.c.l.bf16 %v5680_v37 }
 0xcd7   : > { %v9946_v52 = vpack.i.bf16 %v5689_v63, %v5688_v60  ;;  %v5685_v60 = vunpack.c.l.bf16 %v5652_v11 }
 0xcdd   : > { %9942 = vrot.lane.b32.xlu1 %v9941_v58, %s13806_s24  ;;  %v5752_v58 = vld [vmem:[%s13557_s4 + $0x8] sm:$0x22] }
 0xcf0   : > { %v5497_v14 = vpop.permute.xlu1 %5496  ;;  %v5495_v25 = vpop.permute.xlu0 %5494 }
 0xcf1   : > { %v5500_v29 = vrot.slane %v5497_v14, 4  ;;  %v5499_v2 = vrot.slane %v5495_v25, 4  ;;  %v10232_v14 = vld [vmem:[%s13557_s4] sm:$0x22] }
 0xcf3   : > { %v5501_v61 = vsel %vm13906_vm0, %v5498_v26, %v5499_v2  ;;  %v5503_v6 = vsel %vm13907_vm3, %v5499_v2, %v5500_v29  ;;  %v5757_v26 = vunpack.c.l.b16 %v5752_v58  ;;  %vm13915_vm3 = vmmov %vm13914_vm13 }
 0xcf4   : > { %v5502_v17 = vsel %vm13908_vm14, %v5493_v23, %v5501_v61  ;;  %v5504_v20 = vsel %vm13909_vm1, %v5495_v25, %v5503_v6  ;;  %v5579_v23 = vmul.f32 %v5570_v56, %v5550_v21  ;;  %v5756_v25 = vunpack.c.h.b16 %v10232_v14  ;;  %vm13916_vm14 = vmmov %vm13912_vm2 }
 0xcf5   : > { %v5508_v4 = vsel %vm13756_vm5, %v5502_v17, %v5507_v62  ;;  %v5511_v10 = vsel %vm13756_vm5, %v5504_v20, %v5510_v40  ;;  %v5761_v62 = vpack.c.b16 %v5757_v26, %v5757_v26  ;;  %v5650_v40 = vld [vmem:[#allocation4] sm:$0x77]  ;;  %vm13917_vm1 = vmmov %vm13912_vm2 }
 0xcf6   : > { %5509 = vst [vmem:[#allocation5] sm:$0x77] %v5508_v4  ;;  %v5760_v2 = vpack.c.b16 %v5756_v25, %v5756_v25  ;;  %v5681_v20 = vunpack.c.l.bf16 %v5650_v40 }
 0xcf7   : > { %5512 = vst [vmem:[#allocation5 + $0x8] sm:$0x77] %v5511_v10  ;;  %v5774_v6 = vshrl.u32 %v5761_v62, 16  ;;  %v5682_v10 = vunpack.c.h.bf16 %v5650_v40 }
 0xcf8   : > { %v12325_v8 = vpop.permute.xlu0 %9937  ;;  %v5769_v61 = vshrl.u32 %v5760_v2, 16 }
 0xcf9   : > { %v9939_v49 = vunpack.i.l.bf16 %v12325_v8  ;;  %v5775_v7 = vpack.i.b16 %v5774_v6, %v5774_v6 }
 0xcfa   : > { %v5770_v38 = vpack.i.b16 %v5769_v61, %v5769_v61 }
 0xcfb   : > { %v5571_v59 = vsel %vm13911_vm8, %v9935_v47, %v9939_v49  ;;  %v5581_v12 = vmul.f32 %v9939_v49, %v5552_v53  ;;  %vm13919_vm8 = vmmov %vm13915_vm3 }
 0xcfc   : > { %v5580_v39 = vmul.f32 %v5571_v59, %v5551_v54  ;;  %v5772_v54 = vperm.slane %v5770_v38, 1  ;;  %v5777_v59 = vperm.slane %v5775_v7, 1 }
 0xcfd   : > { %v5584_v46 = vpack.c.bf16 %v5581_v12, %v5581_v12 }
 0xcfe   : > { %v5583_v27 = vpack.c.bf16 %v5580_v39, %v5579_v23  ;;  %v5789_v32 = vunpack.c.l.bf16 %v5772_v54  ;;  %v5790_v23 = vunpack.c.l.bf16 %v5777_v59 }
 0xcff   : > { %v5602_v1 = vshrl.u32 %v5584_v46, 16  ;;  %v5605_v44 = vshll.u32 %v5584_v46, 16 }
 0xd00   : > { %v5594_v18 = vshrl.u32 %v5583_v27, 16  ;;  %v5597_v55 = vshll.u32 %v5583_v27, 16  ;;  %v9951_v16 = vpack.i.bf16 %v5790_v23, %v5789_v32 }
 0xd01   : > { %v5604_v45 = vrot.slane %v5602_v1, 5  ;;  %v5607_v28 = vrot.slane %v5605_v44, 6  ;;  %v5642_v1 = vld [vmem:[#allocation5] sm:$0xcc] }
 0xd02   : > { %v5596_v41 = vrot.slane %v5594_v18, 5  ;;  %v5599_v13 = vrot.slane %v5597_v55, 6  ;;  %v7806_v18 = vld [vmem:[%s13557_s4 + $0x20] sm:$0x44] }
 0xd03   : > { %v5608_v42 = vor.u32 %v5607_v28, %v5604_v45  ;;  %v5758_v45 = vunpack.c.h.b16 %v5752_v58  ;;  %v7810_v28 = vunpack.c.l.b16 %v7806_v18 }
 0xd04   : > { %v5600_v22 = vor.u32 %v5599_v13, %v5596_v41 }
 0xd05   : > { %5616 = vrot.lane.b32.xlu0 %v5608_v42, %s13905_s13  ;;  %v5611_v34 = vrot.slane %v5608_v42, 4  ;;  %v5762_v33 = vpack.c.b16 %v5758_v45, %v5758_v45  ;;  %v7814_v42 = vpack.c.b16 %v7810_v28, %v7810_v28 }
 0xd06   : > { %5614 = vrot.lane.b32.xlu2 %v5600_v22, %s13905_s13  ;;  %v5610_v36 = vrot.slane %v5600_v22, 4 }
 0xd07   : > { %v5779_v24 = vshrl.u32 %v5762_v33, 16  ;;  %v7819_v37 = vshrl.u32 %v7814_v42, 16 }
 0xd09   : > { %v5780_v14 = vpack.i.b16 %v5779_v24, %v5779_v24  ;;  %v7820_v25 = vpack.i.b16 %v7819_v37, %v7819_v37 }
 0xd0d   : > { %5622 = vrot.lane.b32.xlu0 %v5611_v34, %s13905_s13  ;;  %v5651_v34 = vld [vmem:[#allocation4 + $0x8] sm:$0x77] }
 0xd0e   : > { %5620 = vrot.lane.b32.xlu2 %v5610_v36, %s13905_s13  ;;  %v5684_v58 = vunpack.c.h.bf16 %v5651_v34 }
 0xd16   : > { %9947 = vrot.lane.b32.xlu2 %v9946_v52, %s13806_s24 }
 0xd3f   : > { %v5613_v15 = vpop.permute.xlu1 %5612 }
 0xd40   : > { %v5624_v46 = vrot.slane %v5613_v15, 4 }
 0xd47   : > { %v5619_v29 = vpop.permute.xlu1 %5618 }
 0xd48   : > { %v5627_v13 = vrot.slane %v5619_v29, 4 }
 0xd4f   : > { %v9943_v17 = vpop.permute.xlu1 %9942 }
 0xd50   : > { %v9945_v47 = vunpack.i.h.bf16 %v9943_v17  ;;  %v9944_v4 = vunpack.i.l.bf16 %v9943_v17  ;;  %v5782_v17 = vperm.slane %v5780_v14, 1 }
 0xd52   : > { %v5702_v56 = vsel %vm13912_vm2, %v9944_v4, %v9945_v47  ;;  %v5710_v53 = vmul.f32 %v9944_v4, %v5681_v20  ;;  %v7822_v20 = vperm.slane %v7820_v25, 2  ;;  %vm13920_vm2 = vmmov %vm13906_vm0 }
 0xd53   : > { %v5711_v49 = vmul.f32 %v5702_v56, %v5682_v10 }
 0xd55   : > { %v5715_v21 = vpack.c.bf16 %v5711_v49, %v5710_v53  ;;  %v5791_v53 = vunpack.c.l.bf16 %v5782_v17  ;;  %v5645_v49 = vld [vmem:[#allocation5 + $0x8] sm:$0xcc]  ;;  %v5742_v17 = vld [vmem:[#allocation5 + $0x10] sm:$0xee] }
 0xd57   : > { %v5721_v12 = vrot.slane %v5715_v21, 7 }
 0xd59   : > { %5724 = vrot.lane.b32.xlu0 %v5721_v12, %s13814_s26 }
 0xd60   : > { %v5615_v39 = vpop.permute.xlu2 %5614 }
 0xd61   : > { %v5625_v27 = vrot.slane %v5615_v39, 4  ;;  %9952 = vrot.lane.b32.xlu0 %v9951_v16, %s13822_s19 }
 0xd63   : > { %v5630_v31 = vsel %vm13913_vm7, %v5624_v46, %v5625_v27  ;;  %vm13921_vm7 = vmmov %vm13915_vm3 }
 0xd64   : > { %v5631_v44 = vsel %vm13914_vm13, %v5613_v15, %v5630_v31  ;;  %v5683_v15 = vunpack.c.l.bf16 %v5651_v34  ;;  %v5748_v31 = vld [vmem:[#allocation4] sm:$0x77]  ;;  %vm13922_vm13 = vcmask 515072  }
 0xd65   : > { %v5643_v55 = vsel %vm13839_vm11, %v5631_v44, %v5642_v1  ;;  %v5783_v16 = vunpack.c.l.bf16 %v5748_v31  ;;  %v5784_v28 = vunpack.c.h.bf16 %v5748_v31 }
 0xd66   : > { %5644 = vst [vmem:[#allocation5] sm:$0xcc] %v5643_v55  ;;  %v9888_v55 = vunpack.i.h.bf16 %v12062_v51  ;;  %v12377_v51 = vld [vmem:[%s13557_s4] sm:$0x44] }
 0xd68   : > { %v5621_v41 = vpop.permute.xlu2 %5620 }
 0xd69   : > { %v5628_v50 = vrot.slane %v5621_v41, 4 }
 0xd6b   : > { %v5634_v22 = vsel %vm13906_vm0, %v5627_v13, %v5628_v50 }
 0xd6c   : > { %v5635_v48 = vsel %vm13915_vm3, %v5619_v29, %v5634_v22  ;;  %vm13923_vm3 = vmmov %vm13906_vm0 }
 0xd6d   : > { %5648 = vst [vmem:[#allocation5 + $0x10] sm:$0x11] %v5635_v48 }
 0xd70   : > { %v9948_v36 = vpop.permute.xlu2 %9947 }
 0xd71   : > { %v9950_v63 = vunpack.i.h.bf16 %v9948_v36  ;;  %v9949_v52 = vunpack.i.l.bf16 %v9948_v36 }
 0xd73   : > { %v5714_v26 = vmul.f32 %v9950_v63, %v5685_v60  ;;  %v5703_v2 = vsel %vm13916_vm14, %v9945_v47, %v9949_v52  ;;  %v5704_v62 = vsel %vm13917_vm1, %v9949_v52, %v9950_v63  ;;  %v7843_v47 = vunpack.c.l.bf16 %v7822_v20  ;;  %v5745_v20 = vld [vmem:[#allocation5 + $0x18] sm:$0xee] }
 0xd74   : > { %v5712_v40 = vmul.f32 %v5703_v2, %v5683_v15  ;;  %v5713_v29 = vmul.f32 %v5704_v62, %v5684_v58  ;;  %v6007_v58 = vunpack.c.l.b16 %v12377_v51  ;;  %vm13924_vm14 = vcmask 580608  }
 0xd75   : > { %v5717_v61 = vpack.c.bf16 %v5714_v26, %v5714_v26  ;;  %v9956_v59 = vpack.i.bf16 %v7843_v47, %v5791_v53  ;;  %vm13925_vm1 = vmmov %vm13924_vm14 }
 0xd76   : > { %v5716_v6 = vpack.c.bf16 %v5713_v29, %v5712_v40  ;;  %v6011_v2 = vpack.c.b16 %v6007_v58, %v6007_v58 }
 0xd77   : > { %v5723_v4 = vrot.slane %v5717_v61, 7  ;;  %v5617_v10 = vpop.permute.xlu0 %5616 }
 0xd78   : > { %v5626_v38 = vrot.slane %v5617_v10, 4  ;;  %v5722_v7 = vrot.slane %v5716_v6, 7 }
 0xd79   : > { %5728 = vrot.lane.b32.xlu2 %v5723_v4, %s13814_s26 }
 0xd7a   : > { %v5632_v56 = vsel %vm13918_vm15, %v5625_v27, %v5626_v38  ;;  %5726 = vrot.lane.b32.xlu1 %v5722_v7, %s13814_s26  ;;  %v6016_v38 = vshrl.u32 %v6011_v2, 16  ;;  %vm13926_vm15 = vnez %v13722_v35 }
 0xd7b   : > { %v5633_v21 = vsel %vm13919_vm8, %v5615_v39, %v5632_v56  ;;  %v5888_v39 = vld [vmem:[%s13557_s4] sm:$0x44]  ;;  %vm13927_vm8 = vmmov %vm13922_vm13 }
 0xd7c   : > { %v5646_v54 = vsel %vm13839_vm11, %v5633_v21, %v5645_v49  ;;  %v5892_v44 = vunpack.c.l.b16 %v5888_v39  ;;  %v5893_v18 = vunpack.c.h.b16 %v5888_v39  ;;  %v5750_v21 = vld [vmem:[#allocation4 + $0x10] sm:$0x7] }
 0xd7d   : > { %5647 = vst [vmem:[#allocation5 + $0x8] sm:$0xcc] %v5646_v54  ;;  %v5749_v54 = vld [vmem:[#allocation4 + $0x8] sm:$0x77] }
 0xd7e   : > { %v5897_v42 = vpack.c.b16 %v5893_v18, %v5893_v18  ;;  %v5786_v31 = vunpack.c.h.bf16 %v5749_v54 }
 0xd7f   : > { %v5623_v12 = vpop.permute.xlu0 %5622 }
 0xd80   : > { %v5629_v32 = vrot.slane %v5623_v12, 4  ;;  %v5905_v37 = vpack.i.b16 %v5897_v42, %v5897_v42 }
 0xd82   : > { %v5636_v23 = vsel %vm13920_vm2, %v5628_v50, %v5629_v32  ;;  %9957 = vrot.lane.b32.xlu1 %v9956_v59, %s13822_s19  ;;  %v5812_v50 = vmul.f32 %v9888_v55, %v5783_v16  ;;  %v5907_v52 = vperm.slane %v5905_v37, 2  ;;  %v6017_v59 = vpack.i.b16 %v6016_v38, %v6016_v38  ;;  %vm13928_vm2 = vmmov %vm13927_vm8  ;;  %v6004_v38 = vld [vmem:[%s13557_s4 + $0x8] sm:$0x44] }
 0xd83   : > { %v5637_v46 = vsel %vm13921_vm7, %v5621_v41, %v5636_v23  ;;  %v5896_v41 = vpack.c.b16 %v5892_v44, %v5892_v44  ;;  %v5787_v23 = vunpack.c.l.bf16 %v5750_v21  ;;  %v5889_v44 = vld [vmem:[%s13557_s4 + $0x8] sm:$0x44]  ;;  %vm13929_vm7 = vmmov %vm13906_vm0  ;;  %v6009_v21 = vunpack.c.l.b16 %v6004_v38 }
 0xd84   : > { %5649 = vst [vmem:[#allocation5 + $0x18] sm:$0x11] %v5637_v46  ;;  %v5922_v25 = vunpack.c.l.bf16 %v5907_v52 }
 0xd85   : > { %v5901_v24 = vpack.i.b16 %v5896_v41, %v5896_v41 }
 0xd87   : > { %v5903_v63 = vperm.slane %v5901_v24, 2 }
 0xd89   : > { %v5921_v14 = vunpack.c.l.bf16 %v5903_v63 }
 0xd8b   : > { %v9971_v6 = vpack.i.bf16 %v5922_v25, %v5921_v14 }
 0xdcb   : > { %v5725_v27 = vpop.permute.xlu0 %5724 }
 0xdcc   : > { %v5730_v40 = vrot.slane %v5725_v27, 4 }
 0xdd3   : > { %v9953_v1 = vpop.permute.xlu0 %9952  ;;  %v5729_v26 = vpop.permute.xlu2 %5728 }
 0xdd4   : > { %v9954_v45 = vunpack.i.l.bf16 %v9953_v1  ;;  %v5732_v29 = vrot.slane %v5729_v26, 4  ;;  %v9955_v53 = vunpack.i.h.bf16 %v9953_v1  ;;  %v6019_v1 = vperm.slane %v6017_v59, 2 }
 0xdd6   : > { %v5804_v13 = vsel %vm13922_vm13, %v9888_v55, %v9954_v45  ;;  %v5805_v32 = vsel %vm13927_vm8, %v9954_v45, %v9955_v53  ;;  %v6040_v42 = vunpack.c.l.bf16 %v6019_v1  ;;  %vm13930_vm13 = vcmask 531456  }
 0xdd7   : > { %v5813_v33 = vmul.f32 %v5804_v13, %v5784_v28 }
 0xdd9   : > { %v5817_v22 = vpack.c.bf16 %v5813_v33, %v5812_v50  ;;  %v5894_v50 = vunpack.c.l.b16 %v5889_v44  ;;  %v5895_v33 = vunpack.c.h.b16 %v5889_v44 }
 0xddb   : > { %v5821_v48 = vshll.u32 %v5817_v22, 16  ;;  %v5832_v11 = vshrl.u32 %v5817_v22, 16  ;;  %v5898_v37 = vpack.c.b16 %v5894_v50, %v5894_v50 }
 0xddd   : > { %v12372_v34 = vrot.slane %v5821_v48, 5  ;;  %v5834_v36 = vrot.slane %v5832_v11, 4  ;;  %v5909_v58 = vpack.i.b16 %v5898_v37, %v5898_v37 }
 0xddf   : > { %v5835_v60 = vor.u32 %v5834_v36, %v12372_v34  ;;  %v5899_v36 = vpack.c.b16 %v5895_v33, %v5895_v33  ;;  %v5911_v2 = vperm.slane %v5909_v58, 2  ;;  %v8035_v33 = vld [vmem:[%s13557_s4 + $0x20] sm:$0x88] }
 0xde1   : > { %v5836_v15 = vrot.slane %v5835_v60, 4  ;;  %v5913_v14 = vpack.i.b16 %v5899_v36, %v5899_v36  ;;  %v5886_v36 = vld [vmem:[#allocation4 + $0x8] sm:$0x77] }
 0xde3   : > { %5853 = vrot.lane.b32.xlu1 %v5836_v15, %s13824_s20 }
 0xdeb   : > { %9972 = vrot.lane.b32.xlu1 %v9971_v6, %s13829_s18 }
 0xdec   : > { %v5727_v62 = vpop.permute.xlu1 %5726 }
 0xded   : > { %v5731_v61 = vrot.slane %v5727_v62, 4 }
 0xdef   : > { %v5733_v4 = vsel %vm13906_vm0, %v5730_v40, %v5731_v61  ;;  %v5735_v10 = vsel %vm13923_vm3, %v5731_v61, %v5732_v29  ;;  %v5923_v61 = vunpack.c.l.bf16 %v5911_v2  ;;  %vm13931_vm0 = vcmask 523264  }
 0xdf0   : > { %v5734_v7 = vsel %vm13924_vm14, %v5725_v27, %v5733_v4  ;;  %v5736_v56 = vsel %vm13925_vm1, %v5727_v62, %v5735_v10  ;;  %v5785_v27 = vunpack.c.l.bf16 %v5749_v54  ;;  %v5915_v62 = vperm.slane %v5913_v14, 2  ;;  %vm13932_vm14 = vmmov %vm13930_vm13 }
 0xdf1   : > { %v5743_v47 = vsel %vm13926_vm15, %v5734_v7, %v5742_v17  ;;  %v5746_v49 = vsel %vm13926_vm15, %v5736_v56, %v5745_v20  ;;  %vm13933_vm1 = vmmov %vm13931_vm0 }
 0xdf2   : > { %5744 = vst [vmem:[#allocation5 + $0x10] sm:$0xee] %v5743_v47  ;;  %v5814_v18 = vmul.f32 %v5805_v32, %v5785_v27  ;;  %v5924_v6 = vunpack.c.l.bf16 %v5915_v62  ;;  %v5885_v47 = vld [vmem:[#allocation4] sm:$0x77]  ;;  %vm13934_vm8 = vmmov %vm13931_vm0 }
 0xdf3   : > { %5747 = vst [vmem:[#allocation5 + $0x18] sm:$0xee] %v5746_v49  ;;  %v6008_v49 = vunpack.c.h.b16 %v12377_v51  ;;  %v5917_v27 = vunpack.c.h.bf16 %v5885_v47  ;;  %v6013_v51 = vpack.c.b16 %v6009_v21, %v6009_v21 }
 0xdf4   : > { %v12391_v12 = vpop.permute.xlu1 %9957 }
 0xdf5   : > { %v9959_v46 = vunpack.i.l.bf16 %v12391_v12 }
 0xdf7   : > { %v5806_v39 = vsel %vm13928_vm2, %v9955_v53, %v9959_v46  ;;  %v5816_v16 = vmul.f32 %v9959_v46, %v5787_v23  ;;  %v5916_v46 = vunpack.c.l.bf16 %v5885_v47  ;;  %vm13935_vm2 = vmmov %vm13923_vm3 }
 0xdf8   : > { %v5815_v55 = vmul.f32 %v5806_v39, %v5786_v31 }
 0xdf9   : > { %v5819_v28 = vpack.c.bf16 %v5816_v16, %v5816_v16  ;;  %v5877_v54 = vld [vmem:[#allocation5 + $0x10] sm:$0x88] }
 0xdfa   : > { %v5818_v13 = vpack.c.bf16 %v5815_v55, %v5814_v18  ;;  %v6012_v18 = vpack.c.b16 %v6008_v49, %v6008_v49 }
 0xdfb   : > { %v5829_v45 = vshll.u32 %v5819_v28, 16  ;;  %v5842_v41 = vshrl.u32 %v5819_v28, 16 }
 0xdfc   : > { %v5825_v22 = vshll.u32 %v5818_v13, 16  ;;  %v5837_v48 = vshrl.u32 %v5818_v13, 16 }
 0xdfd   : > { %v5831_v11 = vrot.slane %v5829_v45, 5  ;;  %v5844_v60 = vrot.slane %v5842_v41, 4 }
 0xdfe   : > { %v5827_v24 = vrot.slane %v5825_v22, 5  ;;  %v5839_v15 = vrot.slane %v5837_v48, 4  ;;  %v6021_v22 = vshrl.u32 %v6012_v18, 16  ;;  %v6026_v48 = vshrl.u32 %v6013_v51, 16  ;;  %v5880_v18 = vld [vmem:[#allocation5 + $0x18] sm:$0x88] }
 0xdff   : > { %v9966_v63 = vpack.i.bf16 %v6040_v42, %v5831_v11  ;;  %v5845_v25 = vor.u32 %v5844_v60, %v5831_v11  ;;  %v5887_v42 = vld [vmem:[#allocation4 + $0x10] sm:$0x7]  ;;  %v6010_v11 = vunpack.c.h.b16 %v6004_v38 }
 0xe00   : > { %v9961_v52 = vpack.i.bf16 %v5827_v24, %v12372_v34  ;;  %v5840_v26 = vor.u32 %v5839_v15, %v5827_v24  ;;  %v9976_v34 = vpack.i.bf16 %v5924_v6, %v5923_v61  ;;  %v8039_v24 = vunpack.c.l.b16 %v8035_v33 }
 0xe01   : > { %9967 = vrot.lane.b32.xlu0 %v9966_v63, %s13824_s20  ;;  %v5846_v40 = vrot.slane %v5845_v25, 4  ;;  %v5920_v60 = vunpack.c.l.bf16 %v5887_v42  ;;  %v6022_v58 = vpack.i.b16 %v6021_v22, %v6021_v22  ;;  %v6027_v14 = vpack.i.b16 %v6026_v48, %v6026_v48 }
 0xe02   : > { %9962 = vrot.lane.b32.xlu2 %v9961_v52, %s13824_s20  ;;  %v5841_v29 = vrot.slane %v5840_v26, 4  ;;  %v5918_v25 = vunpack.c.l.bf16 %v5886_v36  ;;  %v5919_v26 = vunpack.c.h.bf16 %v5886_v36  ;;  %v6014_v2 = vpack.c.b16 %v6010_v11, %v6010_v11 }
 0xe03   : > { %v8043_v62 = vpack.c.b16 %v8039_v24, %v8039_v24  ;;  %v6029_v38 = vperm.slane %v6027_v14, 2 }
 0xe05   : > { %v8048_v47 = vshrl.u32 %v8043_v62, 16 }
 0xe09   : > { %5857 = vrot.lane.b32.xlu0 %v5846_v40, %s13824_s20 }
 0xe0a   : > { %5855 = vrot.lane.b32.xlu2 %v5841_v29, %s13824_s20 }
 0xe12   : > { %9977 = vrot.lane.b32.xlu2 %v9976_v34, %s13829_s18 }
 0xe55   : > { %v5854_v17 = vpop.permute.xlu1 %5853 }
 0xe56   : > { %v5862_v1 = vrot.slane %v5854_v17, 4 }
 0xe5c   : > { %v12405_v20 = vpop.permute.xlu2 %9962 }
 0xe5d   : > { %v9965_v4 = vunpack.i.h.bf16 %v12405_v20  ;;  %v9964_v10 = vunpack.i.l.bf16 %v12405_v20  ;;  %v9973_v23 = vpop.permute.xlu1 %9972 }
 0xe5e   : > { %v9975_v31 = vunpack.i.h.bf16 %v9973_v23  ;;  %v9974_v39 = vunpack.i.l.bf16 %v9973_v23 }
 0xe5f   : > { %v12414_v7 = vrot.slane %v9965_v4, 4  ;;  %v5859_v56 = vrot.slane %v9964_v10, 4 }
 0xe60   : > { %v5937_v55 = vsel %vm13931_vm0, %v9974_v39, %v9975_v31  ;;  %v5945_v28 = vmul.f32 %v9974_v39, %v5916_v46  ;;  %v6042_v46 = vunpack.c.l.bf16 %v6029_v38  ;;  %v8049_v39 = vpack.i.b16 %v8048_v47, %v8048_v47 }
 0xe61   : > { %v5865_v53 = vsel %vm13929_vm7, %v5859_v56, %v12414_v7  ;;  %v5946_v13 = vmul.f32 %v5937_v55, %v5917_v27  ;;  %vm13936_vm7 = vmmov %vm13930_vm13 }
 0xe62   : > { %v5866_v59 = vsel %vm13930_vm13, %v9964_v10, %v5865_v53  ;;  %v6024_v10 = vperm.slane %v6022_v58, 2  ;;  %v6031_v53 = vshrl.u32 %v6014_v2, 16  ;;  %vm13937_vm13 = vmmov %vm13935_vm2  ;;  %v6000_v2 = vld [vmem:[#allocation4] sm:$0x77] }
 0xe63   : > { %v5878_v32 = vsel %vm13860_vm6, %v5866_v59, %v5877_v54  ;;  %v5950_v41 = vpack.c.bf16 %v5946_v13, %v5945_v28  ;;  %vm13938_vm0 = vmmov %vm13936_vm7  ;;  %v6036_v38 = vunpack.c.h.bf16 %v6000_v2 }
 0xe64   : > { %5879 = vst [vmem:[#allocation5 + $0x10] sm:$0x88] %v5878_v32  ;;  %v12422_v16 = vpop.permute.xlu2 %5855  ;;  %v6041_v23 = vunpack.c.l.bf16 %v6024_v10 }
 0xe65   : > { %v5863_v44 = vrot.slane %v12422_v16, 4  ;;  %v5956_v37 = vrot.slane %v5950_v41, 6 }
 0xe66   : > { %v9981_v55 = vpack.i.bf16 %v6042_v46, %v6041_v23 }
 0xe67   : > { %v5869_v50 = vsel %vm13923_vm3, %v5862_v1, %v5863_v44  ;;  %5962 = vrot.lane.b32.xlu0 %v5956_v37, %s13829_s18  ;;  %v5959_v54 = vrot.slane %v5956_v37, 4  ;;  %vm13939_vm3 = vmmov %vm13935_vm2 }
 0xe68   : > { %v5870_v45 = vsel %vm13932_vm14, %v5854_v17, %v5869_v50  ;;  %v8051_v50 = vperm.slane %v8049_v39, 3  ;;  %vm13940_vm14 = vmmov %vm13935_vm2 }
 0xe69   : > { %5883 = vst [vmem:[#allocation5 + $0x20] sm:$0x33] %v5870_v45 }
 0xe6c   : > { %v9978_v63 = vpop.permute.xlu2 %9977 }
 0xe6d   : > { %v9980_v52 = vunpack.i.h.bf16 %v9978_v63  ;;  %v9979_v15 = vunpack.i.l.bf16 %v9978_v63 }
 0xe6f   : > { %v5949_v40 = vmul.f32 %v9980_v52, %v5920_v60  ;;  %v5938_v29 = vsel %vm13933_vm1, %v9975_v31, %v9979_v15  ;;  %v5939_v61 = vsel %vm13934_vm8, %v9979_v15, %v9980_v52  ;;  %5968 = vrot.lane.b32.xlu0 %v5959_v54, %s13829_s18  ;;  %v6032_v31 = vpack.i.b16 %v6031_v53, %v6031_v53  ;;  %vm13941_vm8 = vmmov %vm13933_vm1  ;;  %v5994_v54 = vld [vmem:[#allocation5 + $0x30] sm:$0x11] }
 0xe70   : > { %v5947_v6 = vmul.f32 %v5938_v29, %v5918_v25  ;;  %v5948_v34 = vmul.f32 %v5939_v61, %v5919_v26  ;;  %v6035_v61 = vunpack.c.l.bf16 %v6000_v2 }
 0xe71   : > { %v5952_v17 = vpack.c.bf16 %v5949_v40, %v5949_v40  ;;  %v6034_v13 = vperm.slane %v6032_v31, 2 }
 0xe72   : > { %v5951_v56 = vpack.c.bf16 %v5948_v34, %v5947_v6 }
 0xe73   : > { %v5958_v49 = vrot.slane %v5952_v17, 6  ;;  %v12436_v21 = vpop.permute.xlu0 %9967 }
 0xe74   : > { %v9969_v59 = vunpack.i.l.bf16 %v12436_v21  ;;  %v5957_v32 = vrot.slane %v5951_v56, 6  ;;  %v9970_v40 = vunpack.i.h.bf16 %v12436_v21 }
 0xe75   : > { %5966 = vrot.lane.b32.xlu2 %v5958_v49, %s13829_s18  ;;  %v5961_v33 = vrot.slane %v5958_v49, 4 }
 0xe76   : > { %v5861_v27 = vrot.slane %v9969_v59, 4  ;;  %5964 = vrot.lane.b32.xlu1 %v5957_v32, %s13829_s18  ;;  %v5960_v42 = vrot.slane %v5957_v32, 4  ;;  %v5997_v59 = vld [vmem:[#allocation5 + $0x38] sm:$0x11]  ;;  %v6064_v32 = vmul.f32 %v9970_v40, %v6035_v61 }
 0xe77   : > { %9982 = vrot.lane.b32.xlu0 %v9981_v55, %s13824_s20 }
 0xe78   : > { %v5867_v1 = vsel %vm13935_vm2, %v12414_v7, %v5861_v27  ;;  %v8072_v7 = vunpack.c.l.bf16 %v8051_v50  ;;  %vm13942_vm2 = vmmov %vm13938_vm0  ;;  %v6121_v27 = vld [vmem:[%s13557_s4 + $0x8] sm:$0x88]  ;;  %v6002_v50 = vld [vmem:[#allocation4 + $0x10] sm:$0x7] }
 0xe79   : > { %v5868_v51 = vsel %vm13936_vm7, %v9965_v4, %v5867_v1  ;;  %v6043_v4 = vunpack.c.l.bf16 %v6034_v13  ;;  %vm13943_vm7 = vmmov %vm13939_vm3 }
 0xe7a   : > { %v5881_v28 = vsel %vm13860_vm6, %v5868_v51, %v5880_v18 }
 0xe7b   : > { %5882 = vst [vmem:[#allocation5 + $0x18] sm:$0x88] %v5881_v28  ;;  %v5858_v45 = vpop.permute.xlu0 %5857  ;;  %v9986_v48 = vpack.i.bf16 %v8072_v7, %v6043_v4 }
 0xe7c   : > { %v5864_v41 = vrot.slane %v5858_v45, 4  ;;  %v6127_v45 = vunpack.c.h.b16 %v6121_v27 }
 0xe7d   : > { %5972 = vrot.lane.b32.xlu2 %v5961_v33, %s13829_s18  ;;  %v6126_v33 = vunpack.c.l.b16 %v6121_v27  ;;  %v6117_v27 = vld [vmem:[#allocation4] sm:$0x77] }
 0xe7e   : > { %v5871_v20 = vsel %vm13937_vm13, %v5863_v44, %v5864_v41  ;;  %5970 = vrot.lane.b32.xlu1 %v5960_v42, %s13829_s18  ;;  %v6120_v44 = vld [vmem:[%s13557_s4] sm:$0x88]  ;;  %vm13944_vm13 = vmmov %vm13939_vm3  ;;  %v6001_v41 = vld [vmem:[#allocation4 + $0x8] sm:$0x77] }
 0xe7f   : > { %v5872_v22 = vsel %vm13938_vm0, %v12422_v16, %v5871_v20  ;;  %v6124_v25 = vunpack.c.l.b16 %v6120_v44  ;;  %v6125_v26 = vunpack.c.h.b16 %v6120_v44  ;;  %vm13945_vm0 = vmmov %vm13933_vm1  ;;  %v6039_v20 = vunpack.c.l.bf16 %v6002_v50 }
 0xe80   : > { %5884 = vst [vmem:[#allocation5 + $0x28] sm:$0x33] %v5872_v22 }
 0xe81   : > { %v6128_v17 = vpack.c.b16 %v6124_v25, %v6124_v25  ;;  %v6129_v10 = vpack.c.b16 %v6125_v26, %v6125_v26 }
 0xe83   : > { %v6133_v1 = vpack.i.b16 %v6128_v17, %v6128_v17  ;;  %v6137_v18 = vpack.i.b16 %v6129_v10, %v6129_v10 }
 0xe85   : > { %v6135_v7 = vperm.slane %v6133_v1, 3  ;;  %v6139_v22 = vperm.slane %v6137_v18, 3  ;;  %v6148_v18 = vunpack.c.l.bf16 %v6117_v27 }
 0xe86   : > { %9987 = vrot.lane.b32.xlu1 %v9986_v48, %s13824_s20 }
 0xe87   : > { %v6153_v26 = vunpack.c.l.bf16 %v6135_v7  ;;  %v6154_v2 = vunpack.c.l.bf16 %v6139_v22 }
 0xe89   : > { %v9991_v10 = vpack.i.bf16 %v6154_v2, %v6153_v26 }
 0xecf   : > { %v5967_v24 = vpop.permute.xlu2 %5966 }
 0xed0   : > { %v5976_v60 = vrot.slane %v5967_v24, 4 }
 0xed7   : > { %v5973_v62 = vpop.permute.xlu2 %5972 }
 0xed8   : > { %v5979_v56 = vrot.slane %v5973_v62, 4 }
 0xed9   : > { %v5963_v11 = vpop.permute.xlu0 %5962 }
 0xeda   : > { %v5974_v63 = vrot.slane %v5963_v11, 4 }
 0xee1   : > { %v5969_v37 = vpop.permute.xlu0 %5968 }
 0xee2   : > { %v5977_v53 = vrot.slane %v5969_v37, 4 }
 0xee8   : > { %v5965_v36 = vpop.permute.xlu1 %5964 }
 0xee9   : > { %v5975_v52 = vrot.slane %v5965_v36, 4  ;;  %v9983_v29 = vpop.permute.xlu0 %9982 }
 0xeea   : > { %v9984_v6 = vunpack.i.l.bf16 %v9983_v29  ;;  %v9985_v51 = vunpack.i.h.bf16 %v9983_v29 }
 0xeeb   : > { %v5980_v15 = vsel %vm13939_vm3, %v5974_v63, %v5975_v52  ;;  %v5982_v58 = vsel %vm13940_vm14, %v5975_v52, %v5976_v60  ;;  %vm13946_vm3 = vmmov %vm13945_vm0  ;;  %v6038_v60 = vunpack.c.h.bf16 %v6001_v41  ;;  %v6130_v63 = vpack.c.b16 %v6126_v33, %v6126_v33 }
 0xeec   : > { %v5981_v16 = vsel %vm13933_vm1, %v5963_v11, %v5980_v15  ;;  %v5983_v14 = vsel %vm13941_vm8, %v5965_v36, %v5982_v58  ;;  %v6056_v49 = vsel %vm13942_vm2, %v9970_v40, %v9984_v6  ;;  %vm13947_vm14 = vmmov %vm13942_vm2  ;;  %v6037_v36 = vunpack.c.l.bf16 %v6001_v41 }
 0xeed   : > { %5992 = vst [vmem:[#allocation5 + $0x20] sm:$0xcc] %v5981_v16  ;;  %v6065_v23 = vmul.f32 %v6056_v49, %v6036_v38  ;;  %v6057_v48 = vsel %vm13947_vm14, %v9984_v6, %v9985_v51  ;;  %v6131_v52 = vpack.c.b16 %v6127_v45, %v6127_v45  ;;  %vm13948_vm1 = vmmov %vm13942_vm2  ;;  %v6141_v40 = vpack.i.b16 %v6130_v63, %v6130_v63 }
 0xeee   : > { %5993 = vst [vmem:[#allocation5 + $0x28] sm:$0xcc] %v5983_v14  ;;  %v6066_v16 = vmul.f32 %v6057_v48, %v6037_v36  ;;  %vm13949_vm8 = vcmask 580608   ;;  %vm13950_vm2 = vsmask.f32 7938 }
 0xeef   : > { %v6069_v55 = vpack.c.bf16 %v6065_v23, %v6064_v32  ;;  %v6145_v29 = vpack.i.b16 %v6131_v52, %v6131_v52 }
 0xef0   : > { %v5971_v34 = vpop.permute.xlu1 %5970 }
 0xef1   : > { %v5978_v47 = vrot.slane %v5971_v34, 4  ;;  %v6073_v42 = vshrl.u32 %v6069_v55, 16 }
 0xef3   : > { %v5984_v46 = vsel %vm13943_vm7, %v5977_v53, %v5978_v47  ;;  %v5986_v21 = vsel %vm13944_vm13, %v5978_v47, %v5979_v56  ;;  %v6075_v24 = vrot.slane %v6073_v42, 7  ;;  %v6143_v53 = vperm.slane %v6141_v40, 3 }
 0xef4   : > { %v5985_v31 = vsel %vm13945_vm0, %v5969_v37, %v5984_v46  ;;  %v5987_v39 = vsel %vm13946_vm3, %v5971_v34, %v5986_v21  ;;  %v6076_v37 = vshll.u32 %v6069_v55, 16  ;;  %v6147_v47 = vperm.slane %v6145_v29, 3  ;;  %v6235_v21 = vld [vmem:[%s13557_s4] sm:$0x88] }
 0xef5   : > { %v5995_v28 = vsel %vm13748_vm12, %v5985_v31, %v5994_v54  ;;  %v5998_v13 = vsel %vm13748_vm12, %v5987_v39, %v5997_v59  ;;  %v6155_v59 = vunpack.c.l.bf16 %v6143_v53  ;;  %v6239_v31 = vunpack.c.l.b16 %v6235_v21  ;;  %v6118_v53 = vld [vmem:[#allocation4 + $0x8] sm:$0x77] }
 0xef6   : > { %5996 = vst [vmem:[#allocation5 + $0x30] sm:$0x11] %v5995_v28  ;;  %v6078_v58 = vor.u32 %v6076_v37, %v6075_v24  ;;  %v6156_v32 = vunpack.c.l.bf16 %v6147_v47  ;;  %v6240_v39 = vunpack.c.h.b16 %v6235_v21  ;;  %v6149_v28 = vunpack.c.h.bf16 %v6117_v27 }
 0xef7   : > { %5999 = vst [vmem:[#allocation5 + $0x38] sm:$0x11] %v5998_v13  ;;  %v6243_v13 = vpack.c.b16 %v6239_v31, %v6239_v31  ;;  %vm13951_vm7 = vcmask 1042432   ;;  %vm13952_vm0 = vsmask.f32 7954  ;;  %vm13953_vm3 = vcmask 1046532  }
 0xef8   : > { %v12478_v4 = vpop.permute.xlu1 %9987  ;;  %6093 = vrot.lane.b32.xlu2 %v6078_v58, %s13822_s19  ;;  %v9996_v23 = vpack.i.bf16 %v6156_v32, %v6155_v59  ;;  %v6244_v50 = vpack.c.b16 %v6240_v39, %v6240_v39  ;;  %vm6108_vm13 = vmand %vm13951_vm7, %vm13950_vm2  ;;  %vm13958_vm2 = vcmask 515072   ;;  %v6150_v32 = vunpack.c.l.bf16 %v6118_v53 }
 0xef9   : > { %v9989_v11 = vunpack.i.l.bf16 %v12478_v4  ;;  %vm6109_vm14 = vmand %vm13953_vm3, %vm13952_vm0  ;;  %vm13963_vm3 = vcmask 465920  }
 0xefa   : > { %v6253_v7 = vshrl.u32 %v6244_v50, 16  ;;  %vm13959_vm7 = vmmov %vm13958_vm2 }
 0xefb   : > { %v6058_v44 = vsel %vm13948_vm1, %v9985_v51, %v9989_v11  ;;  %v6068_v15 = vmul.f32 %v9989_v11, %v6039_v20  ;;  %v6248_v20 = vshrl.u32 %v6243_v13, 16  ;;  %vm12499_vm1 = vmor %vm6109_vm14, %vm6108_vm13  ;;  %vm13964_vm14 = vcmask 588800  }
 0xefc   : > { %v6067_v14 = vmul.f32 %v6058_v44, %v6038_v60  ;;  %v6254_v11 = vpack.i.b16 %v6253_v7, %v6253_v7 }
 0xefd   : > { %v6071_v25 = vpack.c.bf16 %v6068_v15, %v6068_v15  ;;  %v6249_v48 = vpack.i.b16 %v6248_v20, %v6248_v20  ;;  %v6111_v40 = vld [vmem:[#allocation5 + $0x30] sm:$0x77] }
 0xefe   : > { %v6070_v62 = vpack.c.bf16 %v6067_v14, %v6066_v16  ;;  %v6256_v37 = vperm.slane %v6254_v11, 3  ;;  %v6114_v29 = vld [vmem:[#allocation5 + $0x38] sm:$0x77] }
 0xeff   : > { %v6087_v61 = vshrl.u32 %v6071_v25, 16  ;;  %v6090_v17 = vshll.u32 %v6071_v25, 16  ;;  %v6251_v24 = vperm.slane %v6249_v48, 3 }
 0xf00   : > { %v6080_v6 = vshrl.u32 %v6070_v62, 16  ;;  %v6083_v56 = vshll.u32 %v6070_v62, 16  ;;  %9992 = vrot.lane.b32.xlu2 %v9991_v10, %s13814_s26  ;;  %v6273_v63 = vunpack.c.l.bf16 %v6256_v37  ;;  %v6236_v62 = vld [vmem:[%s13557_s4 + $0x8] sm:$0x88]  ;;  %v6119_v10 = vld [vmem:[#allocation4 + $0x10] sm:$0x7] }
 0xf01   : > { %v6089_v34 = vrot.slane %v6087_v61, 7  ;;  %v6272_v60 = vunpack.c.l.bf16 %v6251_v24 }
 0xf02   : > { %v6082_v38 = vrot.slane %v6080_v6, 7 }
 0xf03   : > { %v6092_v49 = vor.u32 %v6090_v17, %v6089_v34  ;;  %v10001_v52 = vpack.i.bf16 %v6273_v63, %v6272_v60 }
 0xf04   : > { %v6085_v54 = vor.u32 %v6083_v56, %v6082_v38  ;;  %v6241_v38 = vunpack.c.l.b16 %v6236_v62  ;;  %v6242_v56 = vunpack.c.h.b16 %v6236_v62 }
 0xf05   : > { %6097 = vrot.lane.b32.xlu1 %v6092_v49, %s13822_s19  ;;  %v6152_v49 = vunpack.c.l.bf16 %v6119_v10 }
 0xf06   : > { %6095 = vrot.lane.b32.xlu0 %v6085_v54, %s13822_s19  ;;  %v6246_v21 = vpack.c.b16 %v6242_v56, %v6242_v56  ;;  %v6353_v56 = vld [vmem:[%s13557_s4 + $0x18] sm:$0x11] }
 0xf08   : > { %v6263_v50 = vshrl.u32 %v6246_v21, 16  ;;  %v6358_v21 = vunpack.c.l.b16 %v6353_v56 }
 0xf0e   : > { %9997 = vrot.lane.b32.xlu0 %v9996_v23, %s13814_s26  ;;  %v6151_v23 = vunpack.c.h.bf16 %v6118_v53 }
 0xf52   : > { %v6094_v46 = vpop.permute.xlu2 %6093 }
 0xf53   : > { %v6099_v16 = vrot.slane %v6094_v46, 4 }
 0xf5a   : > { %v9993_v1 = vpop.permute.xlu2 %9992 }
 0xf5b   : > { %v9995_v51 = vunpack.i.h.bf16 %v9993_v1  ;;  %v9994_v55 = vunpack.i.l.bf16 %v9993_v1 }
 0xf5d   : > { %v6169_v33 = vsel %vm13949_vm8, %v9994_v55, %v9995_v51  ;;  %v6177_v45 = vmul.f32 %v9994_v55, %v6148_v18  ;;  %vm13956_vm8 = vcmask 1043456  }
 0xf5e   : > { %v6178_v41 = vmul.f32 %v6169_v33, %v6149_v28  ;;  %vm13957_vm9 = vmmov %vm13956_vm8 }
 0xf5f   : > { %vm13962_vm0 = vmmov %vm13956_vm8 }
 0xf60   : > { %v6182_v42 = vpack.c.bf16 %v6178_v41, %v6177_v45 }
 0xf62   : > { %v6188_v22 = vrot.slane %v6182_v42, 5  ;;  %v6264_v42 = vpack.i.b16 %v6263_v50, %v6263_v50 }
 0xf64   : > { %6194 = vrot.lane.b32.xlu1 %v6188_v22, %s13806_s24  ;;  %v6191_v36 = vrot.slane %v6188_v22, 4  ;;  %v6266_v7 = vperm.slane %v6264_v42, 3 }
 0xf66   : > { %v6275_v11 = vunpack.c.l.bf16 %v6266_v7 }
 0xf6c   : > { %6200 = vrot.lane.b32.xlu1 %v6191_v36, %s13806_s24 }
 0xf74   : > { %10002 = vrot.lane.b32.xlu1 %v10001_v52, %s13905_s13 }
 0xf77   : > { %v6098_v44 = vpop.permute.xlu1 %6097 }
 0xf78   : > { %v6101_v15 = vrot.slane %v6098_v44, 4  ;;  %v6096_v58 = vpop.permute.xlu0 %6095  ;;  %v6352_v44 = vld [vmem:[%s13557_s4 + $0x10] sm:$0x11] }
 0xf79   : > { %v6100_v14 = vrot.slane %v6096_v58, 4 }
 0xf7b   : > { %v6102_v26 = vsel %vm13956_vm8, %v6099_v16, %v6100_v14  ;;  %v6104_v2 = vsel %vm13957_vm9, %v6100_v14, %v6101_v15  ;;  %vm13960_vm9 = vcmask 580608   ;;  %v6232_v16 = vld [vmem:[#allocation4] sm:$0x77]  ;;  %v6356_v14 = vunpack.c.l.b16 %v6352_v44  ;;  %vm13965_vm8 = vmmov %vm13962_vm0 }
 0xf7c   : > { %v6103_v61 = vsel %vm13958_vm2, %v6094_v46, %v6102_v26  ;;  %v6105_v6 = vsel %vm13959_vm7, %v6096_v58, %v6104_v2  ;;  %v6245_v46 = vpack.c.b16 %v6241_v38, %v6241_v38  ;;  %vm13961_vm13 = vmmov %vm13960_vm9  ;;  %v6357_v26 = vunpack.c.h.b16 %v6352_v44 }
 0xf7d   : > { %v6112_v34 = vsel %vm12499_vm1, %v6103_v61, %v6111_v40  ;;  %v6115_v17 = vsel %vm12499_vm1, %v6105_v6, %v6114_v29  ;;  %v6267_v2 = vunpack.c.l.bf16 %v6232_v16  ;;  %v6360_v6 = vpack.c.b16 %v6356_v14, %v6356_v14  ;;  %vm13966_vm2 = vmmov %vm13963_vm3 }
 0xf7e   : > { %6113 = vst [vmem:[#allocation5 + $0x30] sm:$0x77] %v6112_v34  ;;  %v6258_v13 = vshrl.u32 %v6245_v46, 16  ;;  %v6361_v34 = vpack.c.b16 %v6357_v26, %v6357_v26  ;;  %v6268_v10 = vunpack.c.h.bf16 %v6232_v16  ;;  %vm13967_vm7 = vmmov %vm13964_vm14 }
 0xf7f   : > { %6116 = vst [vmem:[#allocation5 + $0x38] sm:$0x77] %v6115_v17 }
 0xf80   : > { %v9998_v47 = vpop.permute.xlu0 %9997  ;;  %v6259_v41 = vpack.i.b16 %v6258_v13, %v6258_v13  ;;  %v6369_v46 = vpack.i.b16 %v6361_v34, %v6361_v34 }
 0xf81   : > { %v10000_v54 = vunpack.i.h.bf16 %v9998_v47  ;;  %v9999_v59 = vunpack.i.l.bf16 %v9998_v47 }
 0xf82   : > { %v6261_v20 = vperm.slane %v6259_v41, 3  ;;  %v6362_v41 = vpack.c.b16 %v6358_v21, %v6358_v21 }
 0xf83   : > { %v6181_v27 = vmul.f32 %v10000_v54, %v6152_v49  ;;  %v6170_v31 = vsel %vm13960_vm9, %v9995_v51, %v9999_v59  ;;  %v6171_v39 = vsel %vm13961_vm13, %v9999_v59, %v10000_v54  ;;  %v6226_v49 = vld [vmem:[#allocation5 + $0x40] sm:$0x33]  ;;  %vm13968_vm9 = vmmov %vm13967_vm7 }
 0xf84   : > { %v6179_v1 = vmul.f32 %v6170_v31, %v6150_v32  ;;  %v6180_v18 = vmul.f32 %v6171_v39, %v6151_v23  ;;  %v6274_v48 = vunpack.c.l.bf16 %v6261_v20  ;;  %v6365_v23 = vpack.i.b16 %v6360_v6, %v6360_v6  ;;  %v6234_v39 = vld [vmem:[#allocation4 + $0x10] sm:$0x7]  ;;  %vm13969_vm13 = vmmov %vm13962_vm0 }
 0xf85   : > { %v6184_v55 = vpack.c.bf16 %v6181_v27, %v6181_v27  ;;  %v6271_v13 = vunpack.c.l.bf16 %v6234_v39  ;;  %v6373_v26 = vpack.i.b16 %v6362_v41, %v6362_v41 }
 0xf86   : > { %v6183_v28 = vpack.c.bf16 %v6180_v18, %v6179_v1  ;;  %v10006_v24 = vpack.i.bf16 %v6275_v11, %v6274_v48  ;;  %v6359_v1 = vunpack.c.h.b16 %v6353_v56 }
 0xf87   : > { %v6190_v33 = vrot.slane %v6184_v55, 5 }
 0xf88   : > { %v6189_v45 = vrot.slane %v6183_v28, 5  ;;  %v6233_v28 = vld [vmem:[#allocation4 + $0x8] sm:$0x77]  ;;  %v6363_v11 = vpack.c.b16 %v6359_v1, %v6359_v1 }
 0xf89   : > { %6198 = vrot.lane.b32.xlu0 %v6190_v33, %s13806_s24  ;;  %v6193_v22 = vrot.slane %v6190_v33, 4  ;;  %v6367_v33 = vperm.slane %v6365_v23, 0  ;;  %v6270_v48 = vunpack.c.h.bf16 %v6233_v28 }
 0xf8a   : > { %6196 = vrot.lane.b32.xlu2 %v6189_v45, %s13806_s24  ;;  %v6192_v51 = vrot.slane %v6189_v45, 4  ;;  %v6371_v45 = vperm.slane %v6369_v46, 0 }
 0xf8b   : > { %v6385_v16 = vunpack.c.l.bf16 %v6367_v33 }
 0xf8c   : > { %v6386_v14 = vunpack.c.l.bf16 %v6371_v45 }
 0xf91   : > { %6204 = vrot.lane.b32.xlu0 %v6193_v22, %s13806_s24 }
 0xf92   : > { %6202 = vrot.lane.b32.xlu2 %v6192_v51, %s13806_s24  ;;  %v6269_v51 = vunpack.c.l.bf16 %v6233_v28 }
 0xf9a   : > { %10007 = vrot.lane.b32.xlu2 %v10006_v24, %s13905_s13 }
 0xfd6   : > { %v6195_v37 = vpop.permute.xlu1 %6194 }
 0xfd7   : > { %v6206_v63 = vrot.slane %v6195_v37, 4 }
 0xfde   : > { %v6201_v36 = vpop.permute.xlu1 %6200 }
 0xfdf   : > { %v6209_v17 = vrot.slane %v6201_v36, 4 }
 0xfe4   : > { %v12521_v60 = vpop.permute.xlu2 %6196 }
 0xfe5   : > { %v6207_v52 = vrot.slane %v12521_v60, 4 }
 0xfe6   : > { %v10003_v62 = vpop.permute.xlu1 %10002 }
 0xfe7   : > { %v6212_v15 = vsel %vm13962_vm0, %v6206_v63, %v6207_v52  ;;  %v10005_v40 = vunpack.i.h.bf16 %v10003_v62  ;;  %v10004_v29 = vunpack.i.l.bf16 %v10003_v62  ;;  %v6377_v62 = vpack.i.b16 %v6363_v11, %v6363_v11  ;;  %vm13970_vm0 = vmmov %vm13966_vm2 }
 0xfe8   : > { %v6213_v58 = vsel %vm13963_vm3, %v6195_v37, %v6212_v15  ;;  %vm13971_vm3 = vmmov %vm13965_vm8 }
 0xfe9   : > { %6224 = vst [vmem:[#allocation5 + $0x30] sm:$0x88] %v6213_v58  ;;  %v6288_v53 = vsel %vm13964_vm14, %v10004_v29, %v10005_v40  ;;  %v6296_v47 = vmul.f32 %v10004_v29, %v6267_v2  ;;  %v6379_v23 = vperm.slane %v6377_v62, 0  ;;  %vm13972_vm14 = vmmov %vm13970_vm0 }
 0xfea   : > { %v6297_v54 = vmul.f32 %v6288_v53, %v6268_v10 }
 0xfeb   : > { %v6388_v39 = vunpack.c.l.bf16 %v6379_v23 }
 0xfec   : > { %v12531_v61 = vpop.permute.xlu2 %6202  ;;  %v6301_v27 = vpack.c.bf16 %v6297_v54, %v6296_v47  ;;  %v10011_v47 = vpack.i.bf16 %v6386_v14, %v6385_v16 }
 0xfed   : > { %v6210_v38 = vrot.slane %v12531_v61, 4 }
 0xfee   : > { %v6305_v18 = vshrl.u32 %v6301_v27, 16  ;;  %v6308_v55 = vshll.u32 %v6301_v27, 16 }
 0xfef   : > { %v6216_v59 = vsel %vm13965_vm8, %v6209_v17, %v6210_v38  ;;  %vm13973_vm8 = vcmask 596992  }
 0xff0   : > { %v6217_v32 = vsel %vm13966_vm2, %v6201_v36, %v6216_v59  ;;  %v6307_v42 = vrot.slane %v6305_v18, 6  ;;  %v6310_v20 = vrot.slane %v6308_v55, 7  ;;  %vm13974_vm2 = vmmov %vm13971_vm3 }
 0xff1   : > { %v6227_v31 = vsel %vm13751_vm10, %v6217_v32, %v6226_v49  ;;  %v6375_v49 = vperm.slane %v6373_v26, 0 }
 0xff2   : > { %6228 = vst [vmem:[#allocation5 + $0x40] sm:$0x33] %v6227_v31  ;;  %v6311_v63 = vor.u32 %v6310_v20, %v6307_v42 }
 0xff3   : > { %v6387_v31 = vunpack.c.l.bf16 %v6375_v49 }
 0xff4   : > { %v10008_v50 = vpop.permute.xlu2 %10007  ;;  %6328 = vrot.lane.b32.xlu0 %v6311_v63, %s13652_s17 }
 0xff5   : > { %v10010_v7 = vunpack.i.h.bf16 %v10008_v50  ;;  %v10009_v22 = vunpack.i.l.bf16 %v10008_v50  ;;  %v10016_v28 = vpack.i.bf16 %v6388_v39, %v6387_v31  ;;  %v6444_v50 = vld [vmem:[%s13557_s4 + $0x10] sm:$0x11]  ;;  %v6351_v31 = vld [vmem:[#allocation4 + $0x10] sm:$0x7] }
 0xff6   : > { %v6448_v33 = vunpack.c.l.b16 %v6444_v50  ;;  %v6449_v45 = vunpack.c.h.b16 %v6444_v50  ;;  %v6350_v39 = vld [vmem:[#allocation4 + $0x8] sm:$0x77] }
 0xff7   : > { %v6300_v24 = vmul.f32 %v10010_v7, %v6271_v13  ;;  %v6289_v37 = vsel %vm13967_vm7, %v10005_v40, %v10009_v22  ;;  %v6290_v36 = vsel %vm13968_vm9, %v10009_v22, %v10010_v7  ;;  %v6349_v22 = vld [vmem:[#allocation4] sm:$0x77]  ;;  %vm13975_vm7 = vmmov %vm13974_vm2  ;;  %vm13976_vm9 = vcmask 457728  }
 0xff8   : > { %v6298_v44 = vmul.f32 %v6289_v37, %v6269_v51  ;;  %v6299_v15 = vmul.f32 %v6290_v36, %v6270_v48  ;;  %v6452_v41 = vpack.c.b16 %v6448_v33, %v6448_v33  ;;  %v6453_v20 = vpack.c.b16 %v6449_v45, %v6449_v45 }
 0xff9   : > { %v6303_v58 = vpack.c.bf16 %v6300_v24, %v6300_v24  ;;  %v6380_v37 = vunpack.c.l.bf16 %v6349_v22  ;;  %v6381_v62 = vunpack.c.h.bf16 %v6349_v22  ;;  %v6382_v33 = vunpack.c.l.bf16 %v6350_v39 }
 0xffa   : > { %v6302_v2 = vpack.c.bf16 %v6299_v15, %v6298_v44  ;;  %v6462_v7 = vshrl.u32 %v6453_v20, 16  ;;  %v6383_v45 = vunpack.c.h.bf16 %v6350_v39 }
 0xffb   : > { %v6321_v29 = vshrl.u32 %v6303_v58, 16  ;;  %v6324_v6 = vshll.u32 %v6303_v58, 16  ;;  %v6199_v34 = vpop.permute.xlu0 %6198 }
 0xffc   : > { %v6208_v17 = vrot.slane %v6199_v34, 4  ;;  %v6313_v10 = vshrl.u32 %v6302_v2, 16  ;;  %v6316_v56 = vshll.u32 %v6302_v2, 16  ;;  %10012 = vrot.lane.b32.xlu0 %v10011_v47, %s13650_s25  ;;  %v6463_v63 = vpack.i.b16 %v6462_v7, %v6462_v7  ;;  %v6343_v47 = vld [vmem:[#allocation5 + $0x40] sm:$0xee] }
 0xffd   : > { %v6323_v40 = vrot.slane %v6321_v29, 6  ;;  %v6326_v53 = vrot.slane %v6324_v6, 7 }
 0xffe   : > { %v6214_v54 = vsel %vm13969_vm13, %v6207_v52, %v6208_v17  ;;  %v6315_v59 = vrot.slane %v6313_v10, 6  ;;  %v6318_v32 = vrot.slane %v6316_v56, 7  ;;  %v6229_v52 = vld [vmem:[#allocation5 + $0x48] sm:$0x33]  ;;  %vm13977_vm13 = vmmov %vm13976_vm9 }
 0xfff   : > { %v6215_v46 = vsel %vm13970_vm0, %v12521_v60, %v6214_v54  ;;  %v6327_v21 = vor.u32 %v6326_v53, %v6323_v40  ;;  %v6465_v53 = vperm.slane %v6463_v63, 0  ;;  %vm13978_vm0 = vmmov %vm13973_vm8 }
0x1000   : > { %6225 = vst [vmem:[#allocation5 + $0x38] sm:$0x88] %v6215_v46  ;;  %v6319_v27 = vor.u32 %v6318_v32, %v6315_v59 }
0x1001   : > { %6332 = vrot.lane.b32.xlu2 %v6327_v21, %s13652_s17 }
0x1002   : > { %6330 = vrot.lane.b32.xlu1 %v6319_v27, %s13652_s17  ;;  %s14022_s17 = smov 1  }
0x1003   : > { %v6205_v1 = vpop.permute.xlu0 %6204 }
0x1004   : > { %v6211_v18 = vrot.slane %v6205_v1, 4 }
0x1006   : > { %v6218_v55 = vsel %vm13971_vm3, %v6210_v38, %v6211_v18  ;;  %v6445_v38 = vld [vmem:[%s13557_s4 + $0x18] sm:$0x11]  ;;  %v6482_v18 = vunpack.c.l.bf16 %v6465_v53  ;;  %vm13979_vm3 = vmmov %vm13978_vm0 }
0x1007   : > { %v6219_v60 = vsel %vm13972_vm14, %v12531_v61, %v6218_v55  ;;  %v6457_v61 = vshrl.u32 %v6452_v41, 16  ;;  %v6450_v51 = vunpack.c.l.b16 %v6445_v38  ;;  %v6451_v48 = vunpack.c.h.b16 %v6445_v38 }
0x1008   : > { %v6230_v13 = vsel %vm13751_vm10, %v6219_v60, %v6229_v52  ;;  %v6384_v60 = vunpack.c.l.bf16 %v6351_v31  ;;  %vm13981_vm14 = vcmask 973824  }
0x1009   : > { %6231 = vst [vmem:[#allocation5 + $0x48] sm:$0x33] %v6230_v13  ;;  %v6458_v24 = vpack.i.b16 %v6457_v61, %v6457_v61  ;;  %v6454_v16 = vpack.c.b16 %v6450_v51, %v6450_v51  ;;  %v6455_v14 = vpack.c.b16 %v6451_v48, %v6451_v48 }
0x100a   : > { %10017 = vrot.lane.b32.xlu1 %v10016_v28, %s13650_s25  ;;  %s14009_s25 = smov 127  }
0x100b   : > { %v6460_v17 = vperm.slane %v6458_v24, 0  ;;  %v6467_v32 = vshrl.u32 %v6454_v16, 16  ;;  %v6472_v23 = vshrl.u32 %v6455_v14, 16 }
0x100d   : > { %v6481_v1 = vunpack.c.l.bf16 %v6460_v17  ;;  %v6468_v55 = vpack.i.b16 %v6467_v32, %v6467_v32  ;;  %v6473_v28 = vpack.i.b16 %v6472_v23, %v6472_v23 }
0x100f   : > { %v10021_v38 = vpack.i.bf16 %v6482_v18, %v6481_v1  ;;  %v6470_v22 = vperm.slane %v6468_v55, 0  ;;  %v6475_v51 = vperm.slane %v6473_v28, 0 }
0x1010   : > { %v6346_v49 = vld [vmem:[#allocation5 + $0x48] sm:$0xee] }
0x1011   : > { %v6483_v24 = vunpack.c.l.bf16 %v6470_v22 }
0x105b   : > { %v6333_v11 = vpop.permute.xlu2 %6332 }
0x105c   : > { %v6336_v26 = vrot.slane %v6333_v11, 4 }
0x1066   : > { %v6329_v42 = vpop.permute.xlu0 %6328 }
0x1067   : > { %v6334_v2 = vrot.slane %v6329_v42, 4 }
0x106e   : > { %v10013_v36 = vpop.permute.xlu0 %10012 }
0x106f   : > { %v10015_v44 = vunpack.i.h.bf16 %v10013_v36  ;;  %v10014_v15 = vunpack.i.l.bf16 %v10013_v36 }
0x1071   : > { %v6401_v6 = vsel %vm13973_vm8, %v10014_v15, %v10015_v44  ;;  %v6409_v34 = vmul.f32 %v10014_v15, %v6380_v37  ;;  %v6484_v37 = vunpack.c.l.bf16 %v6475_v51  ;;  %vm13983_vm8 = vmmov %vm13974_vm2 }
0x1072   : > { %v6410_v10 = vmul.f32 %v6401_v6, %v6381_v62 }
0x1073   : > { %v10026_v36 = vpack.i.bf16 %v6484_v37, %v6483_v24 }
0x1074   : > { %v6331_v58 = vpop.permute.xlu1 %6330  ;;  %v6414_v46 = vpack.c.bf16 %v6410_v10, %v6409_v34 }
0x1075   : > { %v6335_v29 = vrot.slane %v6331_v58, 4 }
0x1076   : > { %6420 = vrot.lane.b32.xlu2 %v6414_v46, %s13648_s23 }
0x1077   : > { %v6337_v56 = vsel %vm13974_vm2, %v6334_v2, %v6335_v29  ;;  %v6339_v40 = vsel %vm13975_vm7, %v6335_v29, %v6336_v26  ;;  %v6581_v29 = vld [vmem:[%s13557_s4 + $0x10] sm:$0x22]  ;;  %vm13984_vm7 = vcmask 449536  }
0x1078   : > { %v6338_v54 = vsel %vm13976_vm9, %v6329_v42, %v6337_v56  ;;  %v6340_v59 = vsel %vm13977_vm13, %v6331_v58, %v6339_v40  ;;  %v6585_v17 = vunpack.c.l.b16 %v6581_v29  ;;  %v6586_v10 = vunpack.c.h.b16 %v6581_v29  ;;  %vm13985_vm9 = vmmov %vm13984_vm7 }
0x1079   : > { %v6344_v21 = vsel %vm11068_vm4, %v6338_v54, %v6343_v47  ;;  %v6347_v27 = vsel %vm11068_vm4, %v6340_v59, %v6346_v49  ;;  %vm13987_vm13 = vmmov %vm13981_vm14 }
0x107a   : > { %6345 = vst [vmem:[#allocation5 + $0x40] sm:$0xee] %v6344_v21  ;;  %v6589_v49 = vpack.c.b16 %v6585_v17, %v6585_v17  ;;  %v6590_v54 = vpack.c.b16 %v6586_v10, %v6586_v10 }
0x107b   : > { %6348 = vst [vmem:[#allocation5 + $0x48] sm:$0xee] %v6347_v27 }
0x107c   : > { %v10018_v52 = vpop.permute.xlu1 %10017  ;;  %v6594_v32 = vpack.i.b16 %v6589_v49, %v6589_v49  ;;  %v6598_v23 = vpack.i.b16 %v6590_v54, %v6590_v54 }
0x107d   : > { %v10020_v13 = vunpack.i.h.bf16 %v10018_v52  ;;  %v10019_v50 = vunpack.i.l.bf16 %v10018_v52 }
0x107e   : > { %10022 = vrot.lane.b32.xlu2 %v10021_v38, %s13980_s27  ;;  %v6596_v46 = vperm.slane %v6594_v32, 1  ;;  %v6600_v21 = vperm.slane %v6598_v23, 1 }
0x107f   : > { %v6413_v41 = vmul.f32 %v10020_v13, %v6384_v60  ;;  %v6402_v42 = vsel %vm13978_vm0, %v10015_v44, %v10019_v50  ;;  %v6403_v20 = vsel %vm13979_vm3, %v10019_v50, %v10020_v13  ;;  %v6441_v44 = vld [vmem:[#allocation4] sm:$0x77]  ;;  %v6435_v13 = vld [vmem:[#allocation5 + $0x50] sm:$0x77]  ;;  %v6438_v50 = vld [vmem:[#allocation5 + $0x58] sm:$0x77] }
0x1080   : > { %v6411_v61 = vmul.f32 %v6402_v42, %v6382_v33  ;;  %v6412_v7 = vmul.f32 %v6403_v20, %v6383_v45  ;;  %v6476_v58 = vunpack.c.l.bf16 %v6441_v44  ;;  %v6477_v26 = vunpack.c.h.bf16 %v6441_v44  ;;  %vm13988_vm0 = vmmov %vm13987_vm13 }
0x1081   : > { %v6416_v48 = vpack.c.bf16 %v6413_v41, %v6413_v41  ;;  %v6614_v31 = vunpack.c.l.bf16 %v6596_v46  ;;  %v6615_v39 = vunpack.c.l.bf16 %v6600_v21  ;;  %vm13989_vm3 = vmmov %vm13974_vm2 }
0x1082   : > { %v6415_v11 = vpack.c.bf16 %v6412_v7, %v6411_v61  ;;  %v6443_v61 = vld [vmem:[#allocation4 + $0x10] sm:$0x7]  ;;  %v6442_v7 = vld [vmem:[#allocation4 + $0x8] sm:$0x77] }
0x1083   : > { %6424 = vrot.lane.b32.xlu1 %v6416_v48, %s13648_s23  ;;  %v10031_v60 = vpack.i.bf16 %v6615_v39, %v6614_v31  ;;  %v6480_v51 = vunpack.c.l.bf16 %v6443_v61  ;;  %v6478_v24 = vunpack.c.l.bf16 %v6442_v7  ;;  %v6479_v37 = vunpack.c.h.bf16 %v6442_v7 }
0x1084   : > { %6422 = vrot.lane.b32.xlu0 %v6415_v11, %s13648_s23  ;;  %s14011_s23 = smov 73  }
0x108c   : > { %10027 = vrot.lane.b32.xlu0 %v10026_v36, %s13980_s27 }
0x10d0   : > { %v6421_v63 = vpop.permute.xlu2 %6420 }
0x10d1   : > { %v6426_v55 = vrot.slane %v6421_v63, 4 }
0x10d8   : > { %v10023_v15 = vpop.permute.xlu2 %10022 }
0x10d9   : > { %v10025_v16 = vunpack.i.h.bf16 %v10023_v15  ;;  %v10024_v14 = vunpack.i.l.bf16 %v10023_v15  ;;  %v6582_v15 = vld [vmem:[%s13557_s4 + $0x18] sm:$0x22] }
0x10da   : > { %v6588_v29 = vunpack.c.h.b16 %v6582_v15 }
0x10db   : > { %v6497_v2 = vsel %vm13981_vm14, %v10024_v14, %v10025_v16  ;;  %v6505_v62 = vmul.f32 %v10024_v14, %v6476_v58  ;;  %vm13990_vm14 = vcmask 72704  }
0x10dc   : > { %v6506_v6 = vmul.f32 %v6497_v2, %v6477_v26  ;;  %v6592_v49 = vpack.c.b16 %v6588_v29, %v6588_v29 }
0x10de   : > { %v6510_v34 = vpack.c.bf16 %v6506_v6, %v6505_v62  ;;  %v6587_v62 = vunpack.c.l.b16 %v6582_v15  ;;  %v6606_v23 = vpack.i.b16 %v6592_v49, %v6592_v49 }
0x10e0   : > { %v6514_v56 = vshrl.u32 %v6510_v34, 16  ;;  %v6517_v40 = vshll.u32 %v6510_v34, 16  ;;  %v6608_v21 = vperm.slane %v6606_v23, 1 }
0x10e2   : > { %v6516_v53 = vrot.slane %v6514_v56, 5  ;;  %v6519_v47 = vrot.slane %v6517_v40, 6 }
0x10e4   : > { %v6520_v59 = vor.u32 %v6519_v47, %v6516_v53  ;;  %v6591_v47 = vpack.c.b16 %v6587_v62, %v6587_v62 }
0x10e6   : > { %6540 = vrot.lane.b32.xlu1 %v6520_v59, %s13982_s29  ;;  %v6537_v27 = vrot.slane %v6520_v59, 4  ;;  %v6602_v32 = vpack.i.b16 %v6591_v47, %v6591_v47 }
0x10e8   : > { %v6604_v46 = vperm.slane %v6602_v32, 1 }
0x10ea   : > { %v6616_v39 = vunpack.c.l.bf16 %v6604_v46 }
0x10ee   : > { %6546 = vrot.lane.b32.xlu1 %v6537_v27, %s13982_s29 }
0x10f5   : > { %v6425_v1 = vpop.permute.xlu1 %6424 }
0x10f6   : > { %v6428_v18 = vrot.slane %v6425_v1, 4  ;;  %v6423_v52 = vpop.permute.xlu0 %6422  ;;  %10032 = vrot.lane.b32.xlu1 %v10031_v60, %s13986_s14  ;;  %v6617_v1 = vunpack.c.l.bf16 %v6608_v21  ;;  %v6677_v60 = vld [vmem:[%s13557_s4 + $0x18] sm:$0x22] }
0x10f7   : > { %v6427_v28 = vrot.slane %v6423_v52, 4 }
0x10f9   : > { %v6429_v33 = vsel %vm13983_vm8, %v6426_v55, %v6427_v28  ;;  %v6431_v45 = vsel %vm13974_vm2, %v6427_v28, %v6428_v18  ;;  %v10036_v18 = vpack.i.bf16 %v6617_v1, %v6616_v39  ;;  %v10233_v55 = vld [vmem:[%s13557_s4 + $0x10] sm:$0x22]  ;;  %vm13991_vm8 = vcmask 982016  }
0x10fa   : > { %v6430_v41 = vsel %vm13984_vm7, %v6421_v63, %v6429_v33  ;;  %v6432_v42 = vsel %vm13985_vm9, %v6423_v52, %v6431_v45  ;;  %v6681_v28 = vunpack.c.h.b16 %v10233_v55  ;;  %vm13992_vm7 = vmmov %vm13990_vm14 }
0x10fb   : > { %v6436_v20 = vsel %vm13756_vm5, %v6430_v41, %v6435_v13  ;;  %v6439_v38 = vsel %vm13756_vm5, %v6432_v42, %v6438_v50  ;;  %v6682_v13 = vunpack.c.l.b16 %v6677_v60  ;;  %vm13994_vm9 = vmmov %vm13991_vm8 }
0x10fc   : > { %6437 = vst [vmem:[#allocation5 + $0x50] sm:$0x77] %v6436_v20  ;;  %v6685_v45 = vpack.c.b16 %v6681_v28, %v6681_v28 }
0x10fd   : > { %6440 = vst [vmem:[#allocation5 + $0x58] sm:$0x77] %v6439_v38  ;;  %v6686_v20 = vpack.c.b16 %v6682_v13, %v6682_v13 }
0x10fe   : > { %v10028_v22 = vpop.permute.xlu0 %10027 }
0x10ff   : > { %v10030_v48 = vunpack.i.h.bf16 %v10028_v22  ;;  %v10029_v11 = vunpack.i.l.bf16 %v10028_v22 }
0x1101   : > { %v6509_v36 = vmul.f32 %v10030_v48, %v6480_v51  ;;  %v6498_v63 = vsel %vm13987_vm13, %v10025_v16, %v10029_v11  ;;  %v6499_v44 = vsel %vm13988_vm0, %v10029_v11, %v10030_v48  ;;  %v6578_v51 = vld [vmem:[#allocation4] sm:$0x77]  ;;  %v6694_v48 = vshrl.u32 %v6685_v45, 16  ;;  %vm13995_vm13 = vmmov %vm13991_vm8 }
0x1102   : > { %v6507_v58 = vmul.f32 %v6498_v63, %v6478_v24  ;;  %v6508_v14 = vmul.f32 %v6499_v44, %v6479_v37  ;;  %v6699_v11 = vshrl.u32 %v6686_v20, 16  ;;  %v6609_v37 = vunpack.c.l.bf16 %v6578_v51  ;;  %vm13997_vm0 = vmmov %vm13974_vm2 }
0x1103   : > { %v6512_v26 = vpack.c.bf16 %v6509_v36, %v6509_v36  ;;  %v6570_v61 = vld [vmem:[#allocation5 + $0x50] sm:$0xcc]  ;;  %v6610_v36 = vunpack.c.h.bf16 %v6578_v51 }
0x1104   : > { %v6511_v2 = vpack.c.bf16 %v6508_v14, %v6507_v58 }
0x1105   : > { %v6530_v6 = vshrl.u32 %v6512_v26, 16  ;;  %v6533_v34 = vshll.u32 %v6512_v26, 16  ;;  %v6695_v26 = vpack.i.b16 %v6694_v48, %v6694_v48  ;;  %v6573_v48 = vld [vmem:[#allocation5 + $0x58] sm:$0xcc] }
0x1106   : > { %v6522_v17 = vshrl.u32 %v6511_v2, 16  ;;  %v6525_v10 = vshll.u32 %v6511_v2, 16  ;;  %v6700_v2 = vpack.i.b16 %v6699_v11, %v6699_v11 }
0x1107   : > { %v6532_v56 = vrot.slane %v6530_v6, 5  ;;  %v6535_v40 = vrot.slane %v6533_v34, 6  ;;  %v6683_v6 = vunpack.c.h.b16 %v6677_v60 }
0x1108   : > { %v6524_v53 = vrot.slane %v6522_v17, 5  ;;  %v6527_v16 = vrot.slane %v6525_v10, 6 }
0x1109   : > { %v6536_v54 = vor.u32 %v6535_v40, %v6532_v56  ;;  %v6580_v40 = vld [vmem:[#allocation4 + $0x10] sm:$0x7]  ;;  %v6687_v47 = vpack.c.b16 %v6683_v6, %v6683_v6 }
0x110a   : > { %v6528_v59 = vor.u32 %v6527_v16, %v6524_v53  ;;  %v6697_v53 = vperm.slane %v6695_v26, 1  ;;  %v6702_v16 = vperm.slane %v6700_v2, 1  ;;  %v6673_v2 = vld [vmem:[#allocation4] sm:$0x77] }
0x110b   : > { %6544 = vrot.lane.b32.xlu0 %v6536_v54, %s13982_s29  ;;  %v6539_v27 = vrot.slane %v6536_v54, 4  ;;  %v6579_v54 = vld [vmem:[#allocation4 + $0x8] sm:$0x77]  ;;  %v6704_v1 = vshrl.u32 %v6687_v47, 16 }
0x110c   : > { %6542 = vrot.lane.b32.xlu2 %v6528_v59, %s13982_s29  ;;  %v6538_v31 = vrot.slane %v6528_v59, 4  ;;  %v6613_v59 = vunpack.c.l.bf16 %v6580_v40  ;;  %v6714_v21 = vunpack.c.l.bf16 %v6697_v53  ;;  %v6612_v39 = vunpack.c.h.bf16 %v6579_v54 }
0x1113   : > { %6550 = vrot.lane.b32.xlu0 %v6539_v27, %s13982_s29  ;;  %v6715_v27 = vunpack.c.l.bf16 %v6702_v16 }
0x1114   : > { %6548 = vrot.lane.b32.xlu2 %v6538_v31, %s13982_s29  ;;  %v6611_v31 = vunpack.c.l.bf16 %v6579_v54 }
0x111c   : > { %10037 = vrot.lane.b32.xlu2 %v10036_v18, %s13986_s14 }
0x1158   : > { %v6541_v52 = vpop.permute.xlu1 %6540 }
0x1159   : > { %v6552_v41 = vrot.slane %v6541_v52, 4 }
0x1160   : > { %v6547_v50 = vpop.permute.xlu1 %6546 }
0x1161   : > { %v6555_v58 = vrot.slane %v6547_v50, 4 }
0x1166   : > { %v12616_v33 = vpop.permute.xlu2 %6542 }
0x1167   : > { %v6553_v42 = vrot.slane %v12616_v33, 4 }
0x1168   : > { %v10033_v24 = vpop.permute.xlu1 %10032 }
0x1169   : > { %v6558_v38 = vsel %vm13989_vm3, %v6552_v41, %v6553_v42  ;;  %v10035_v63 = vunpack.i.h.bf16 %v10033_v24  ;;  %v10034_v44 = vunpack.i.l.bf16 %v10033_v24  ;;  %v6705_v41 = vpack.i.b16 %v6704_v1, %v6704_v1  ;;  %vm13998_vm3 = vmmov %vm13992_vm7 }
0x116a   : > { %v6559_v7 = vsel %vm13990_vm14, %v6541_v52, %v6558_v38  ;;  %vm13999_vm14 = vmmov %vm13997_vm0 }
0x116b   : > { %v6571_v22 = vsel %vm13839_vm11, %v6559_v7, %v6570_v61  ;;  %v6630_v62 = vsel %vm13991_vm8, %v10034_v44, %v10035_v63  ;;  %v6638_v29 = vmul.f32 %v10034_v44, %v6609_v37  ;;  %v6707_v51 = vperm.slane %v6705_v41, 1  ;;  %vm14000_vm8 = vmmov %vm13998_vm3 }
0x116c   : > { %6572 = vst [vmem:[#allocation5 + $0x50] sm:$0xcc] %v6571_v22  ;;  %v6639_v34 = vmul.f32 %v6630_v62, %v6610_v36  ;;  %v6813_v62 = vld [vmem:[%s13557_s4 + $0x10] sm:$0x44] }
0x116d   : > { %v6716_v37 = vunpack.c.l.bf16 %v6707_v51 }
0x116e   : > { %v6549_v15 = vpop.permute.xlu2 %6548  ;;  %v6643_v56 = vpack.c.bf16 %v6639_v34, %v6638_v29  ;;  %v6817_v34 = vunpack.c.l.b16 %v6813_v62 }
0x116f   : > { %v6556_v14 = vrot.slane %v6549_v15, 4 }
0x1170   : > { %v6649_v49 = vrot.slane %v6643_v56, 7 }
0x1171   : > { %v6562_v17 = vsel %vm13974_vm2, %v6555_v58, %v6556_v14  ;;  %v12643_v58 = vld [vmem:[%s13557_s4 + $0x10] sm:$0x88]  ;;  %vm14001_vm2 = vcmask 990208  }
0x1172   : > { %v6563_v10 = vsel %vm13992_vm7, %v6547_v50, %v6562_v17  ;;  %6652 = vrot.lane.b32.xlu0 %v6649_v49, %s13993_s30  ;;  %v10041_v50 = vpack.i.bf16 %v6715_v27, %v6714_v21  ;;  %v7117_v26 = vunpack.c.l.b16 %v12643_v58  ;;  %v6818_v17 = vunpack.c.h.b16 %v6813_v62  ;;  %vm14002_vm7 = vmmov %vm13997_vm0 }
0x1173   : > { %6576 = vst [vmem:[#allocation5 + $0x60] sm:$0x11] %v6563_v10  ;;  %v9798_v10 = vunpack.i.h.bf16 %v11636_v57  ;;  %v6709_v49 = vunpack.c.h.bf16 %v6673_v2  ;;  %v6821_v21 = vpack.c.b16 %v6817_v34, %v6817_v34 }
0x1174   : > { %v7121_v29 = vpack.c.b16 %v7117_v26, %v7117_v26  ;;  %v6822_v27 = vpack.c.b16 %v6818_v17, %v6818_v17 }
0x1176   : > { %v10038_v32 = vpop.permute.xlu2 %10037  ;;  %v7126_v53 = vshrl.u32 %v7121_v29, 16 }
0x1177   : > { %v10040_v23 = vunpack.i.h.bf16 %v10038_v32  ;;  %v10039_v46 = vunpack.i.l.bf16 %v10038_v32 }
0x1179   : > { %v6642_v18 = vmul.f32 %v10040_v23, %v6613_v59  ;;  %v6631_v52 = vsel %vm13994_vm9, %v10035_v63, %v10039_v46  ;;  %v6632_v55 = vsel %vm13995_vm13, %v10039_v46, %v10040_v23  ;;  %v6667_v23 = vld [vmem:[#allocation5 + $0x60] sm:$0xee]  ;;  %v6670_v46 = vld [vmem:[#allocation5 + $0x68] sm:$0xee]  ;;  %vm14003_vm9 = vmmov %vm13997_vm0  ;;  %vm14004_vm13 = vcmask 64512  }
0x117a   : > { %v6640_v28 = vmul.f32 %v6631_v52, %v6611_v31  ;;  %v6641_v60 = vmul.f32 %v6632_v55, %v6612_v39  ;;  %10042 = vrot.lane.b32.xlu0 %v10041_v50, %s13996_s28 }
0x117b   : > { %v6645_v13 = vpack.c.bf16 %v6642_v18, %v6642_v18  ;;  %v6675_v18 = vld [vmem:[#allocation4 + $0x10] sm:$0x7] }
0x117c   : > { %v6644_v45 = vpack.c.bf16 %v6641_v60, %v6640_v28  ;;  %v7127_v28 = vpack.i.b16 %v7126_v53, %v7126_v53  ;;  %v6712_v41 = vunpack.c.l.bf16 %v6675_v18 }
0x117d   : > { %v6651_v20 = vrot.slane %v6645_v13, 7  ;;  %v6545_v38 = vpop.permute.xlu0 %6544 }
0x117e   : > { %v6554_v61 = vrot.slane %v6545_v38, 4  ;;  %v6650_v7 = vrot.slane %v6644_v45, 7  ;;  %v6674_v45 = vld [vmem:[#allocation4 + $0x8] sm:$0x77] }
0x117f   : > { %6656 = vrot.lane.b32.xlu2 %v6651_v20, %s13993_s30  ;;  %v6826_v20 = vpack.i.b16 %v6821_v21, %v6821_v21  ;;  %v6710_v51 = vunpack.c.l.bf16 %v6674_v45 }
0x1180   : > { %v6560_v22 = vsel %vm13997_vm0, %v6553_v42, %v6554_v61  ;;  %6654 = vrot.lane.b32.xlu1 %v6650_v7, %s13993_s30  ;;  %vm14005_vm0 = vmmov %vm14004_vm13 }
0x1181   : > { %v6561_v11 = vsel %vm13998_vm3, %v12616_v33, %v6560_v22  ;;  %vm14006_vm3 = vmmov %vm14001_vm2  ;;  %v6830_v22 = vpack.i.b16 %v6822_v27, %v6822_v27  ;;  %v6828_v29 = vperm.slane %v6826_v20, 2  ;;  %v7920_v27 = vld [vmem:[%s13557_s4 + $0x20] sm:$0x88]  ;;  %v7692_v20 = vld [vmem:[%s13557_s4 + $0x28] sm:$0x44] }
0x1182   : > { %v6574_v24 = vsel %vm13839_vm11, %v6561_v11, %v6573_v48  ;;  %v6711_v48 = vunpack.c.h.bf16 %v6674_v45  ;;  %v7129_v11 = vperm.slane %v7127_v28, 3 }
0x1183   : > { %6575 = vst [vmem:[#allocation5 + $0x58] sm:$0xcc] %v6574_v24 }
0x1185   : > { %v6551_v36 = vpop.permute.xlu0 %6550 }
0x1186   : > { %v6557_v63 = vrot.slane %v6551_v36, 4 }
0x1188   : > { %v6564_v44 = vsel %vm13999_vm14, %v6556_v14, %v6557_v63  ;;  %6727 = vrot.lane.b32.xlu1 %v6716_v37, %s13996_s28  ;;  %v6708_v14 = vunpack.c.l.bf16 %v6673_v2  ;;  %vm14007_vm14 = vmmov %vm14001_vm2 }
0x1189   : > { %v6565_v42 = vsel %vm14000_vm8, %v6549_v15, %v6564_v44  ;;  %vm14012_vm8 = vmmov %vm14002_vm7 }
0x118a   : > { %6577 = vst [vmem:[#allocation5 + $0x68] sm:$0x11] %v6565_v42  ;;  %v6737_v59 = vmul.f32 %v9798_v10, %v6708_v14  ;;  %v6814_v42 = vld [vmem:[%s13557_s4 + $0x18] sm:$0x44]  ;;  %v6832_v14 = vperm.slane %v6830_v22, 2  ;;  %v7698_v22 = vunpack.c.h.b16 %v7692_v20 }
0x118b   : > { %v6819_v34 = vunpack.c.l.b16 %v6814_v42  ;;  %v6820_v17 = vunpack.c.h.b16 %v6814_v42 }
0x11d9   : > { %v6657_v6 = vpop.permute.xlu2 %6656 }
0x11da   : > { %v6660_v16 = vrot.slane %v6657_v6, 4 }
0x11e4   : > { %v6653_v33 = vpop.permute.xlu0 %6652 }
0x11e5   : > { %v6658_v47 = vrot.slane %v6653_v33, 4 }
0x11ec   : > { %v10043_v15 = vpop.permute.xlu0 %10042 }
0x11ed   : > { %v10044_v56 = vunpack.i.l.bf16 %v10043_v15  ;;  %v10045_v31 = vunpack.i.h.bf16 %v10043_v15  ;;  %v7150_v15 = vunpack.c.l.bf16 %v7129_v11 }
0x11ef   : > { %v6729_v32 = vsel %vm14001_vm2, %v9798_v10, %v10044_v56  ;;  %v6730_v38 = vsel %vm14006_vm3, %v10044_v56, %v10045_v31  ;;  %vm14013_vm2 = vcmask 56320  }
0x11f0   : > { %v6738_v39 = vmul.f32 %v6729_v32, %v6709_v49  ;;  %v6846_v49 = vunpack.c.l.bf16 %v6828_v29  ;;  %v6823_v32 = vpack.c.b16 %v6819_v34, %v6819_v34  ;;  %vm14017_vm3 = vmmov %vm14013_vm2 }
0x11f2   : > { %v6655_v40 = vpop.permute.xlu1 %6654  ;;  %v6742_v60 = vpack.c.bf16 %v6738_v39, %v6737_v59 }
0x11f3   : > { %v6659_v54 = vrot.slane %v6655_v40, 4 }
0x11f4   : > { %v6746_v61 = vshll.u32 %v6742_v60, 16  ;;  %v6757_v7 = vshrl.u32 %v6742_v60, 16 }
0x11f5   : > { %v6661_v1 = vsel %vm14002_vm7, %v6658_v47, %v6659_v54  ;;  %v6663_v57 = vsel %vm14003_vm9, %v6659_v54, %v6660_v16  ;;  %v6847_v54 = vunpack.c.l.bf16 %v6832_v14  ;;  %vm14014_vm9 = vmmov %vm14013_vm2 }
0x11f6   : > { %v6662_v52 = vsel %vm14004_vm13, %v6653_v33, %v6661_v1  ;;  %v6664_v55 = vsel %vm14005_vm0, %v6655_v40, %v6663_v57  ;;  %v6748_v63 = vrot.slane %v6746_v61, 5  ;;  %v6759_v44 = vrot.slane %v6757_v7, 4  ;;  %vm14016_vm0 = vmmov %vm14002_vm7 }
0x11f7   : > { %v6668_v13 = vsel %vm13926_vm15, %v6662_v52, %v6667_v23  ;;  %v6671_v50 = vsel %vm13926_vm15, %v6664_v55, %v6670_v46  ;;  %v6739_v33 = vmul.f32 %v6730_v38, %v6710_v51  ;;  %v6824_v23 = vpack.c.b16 %v6820_v17, %v6820_v17 }
0x11f8   : > { %6669 = vst [vmem:[#allocation5 + $0x60] sm:$0xee] %v6668_v13  ;;  %v6760_v62 = vor.u32 %v6759_v44, %v6748_v63  ;;  %v10056_v1 = vpack.i.bf16 %v6847_v54, %v6846_v49  ;;  %v6834_v57 = vpack.i.b16 %v6823_v32, %v6823_v32  ;;  %v7924_v52 = vunpack.c.l.b16 %v7920_v27  ;;  %v10234_v44 = vld [vmem:[%s13557_s4 + $0x20] sm:$0x88] }
0x11f9   : > { %6672 = vst [vmem:[#allocation5 + $0x68] sm:$0xee] %v6671_v50  ;;  %v6838_v18 = vpack.i.b16 %v6824_v23, %v6824_v23  ;;  %v7925_v55 = vunpack.c.h.b16 %v7920_v27  ;;  %v7697_v7 = vunpack.c.l.b16 %v7692_v20  ;;  %v8040_v42 = vunpack.c.h.b16 %v10234_v44 }
0x11fa   : > { %v6728_v24 = vpop.permute.xlu1 %6727  ;;  %v6761_v40 = vrot.slane %v6760_v62, 4  ;;  %v6836_v13 = vperm.slane %v6834_v57, 2  ;;  %v7928_v45 = vpack.c.b16 %v7924_v52, %v7924_v52  ;;  %vm14015_vm13 = vcmask 1039360  }
0x11fb   : > { %v6741_v37 = vmul.f32 %v6728_v24, %v6712_v41  ;;  %v6731_v36 = vsel %vm14007_vm14, %v10045_v31, %v6728_v24  ;;  %v6840_v50 = vperm.slane %v6838_v18, 2  ;;  %v7929_v41 = vpack.c.b16 %v7925_v55, %v7925_v55  ;;  %v10235_v55 = vld [vmem:[%s13557_s4 + $0x20] sm:$0x22]  ;;  %vm14018_vm14 = vmmov %vm14015_vm13 }
0x11fc   : > { %v6740_v26 = vmul.f32 %v6731_v36, %v6711_v48  ;;  %6778 = vrot.lane.b32.xlu1 %v6761_v40, %s14008_s16  ;;  %v6848_v51 = vunpack.c.l.bf16 %v6836_v13  ;;  %v7933_v11 = vpack.i.b16 %v7928_v45, %v7928_v45  ;;  %v7701_v36 = vpack.c.b16 %v7697_v7, %v7697_v7 }
0x11fd   : > { %v6744_v2 = vpack.c.bf16 %v6741_v37, %v6741_v37  ;;  %v6849_v48 = vunpack.c.l.bf16 %v6840_v50  ;;  %v7937_v24 = vpack.i.b16 %v7929_v41, %v7929_v41  ;;  %v12679_v37 = vld [vmem:[%s13557_s4 + $0x28] sm:$0x88] }
0x11fe   : > { %v6743_v6 = vpack.c.bf16 %v6740_v26, %v6739_v33  ;;  %v7935_v26 = vperm.slane %v7933_v11, 3  ;;  %v8041_v62 = vunpack.c.l.b16 %v12679_v37  ;;  %v7712_v29 = vpack.i.b16 %v7701_v36, %v7701_v36  ;;  %v12703_v11 = vld [vmem:[%s13557_s4 + $0x28] sm:$0x44] }
0x11ff   : > { %v6754_v10 = vshll.u32 %v6744_v2, 16  ;;  %v6767_v56 = vshrl.u32 %v6744_v2, 16  ;;  %v10061_v33 = vpack.i.bf16 %v6849_v48, %v6848_v51  ;;  %v7939_v2 = vperm.slane %v7937_v24, 3 }
0x1200   : > { %v6750_v53 = vshll.u32 %v6743_v6, 16  ;;  %v6762_v16 = vshrl.u32 %v6743_v6, 16  ;;  %v8044_v6 = vpack.c.b16 %v8040_v42, %v8040_v42  ;;  %v7953_v34 = vunpack.c.l.bf16 %v7935_v26 }
0x1201   : > { %v6756_v47 = vrot.slane %v6754_v10, 5  ;;  %v6769_v46 = vrot.slane %v6767_v56, 4  ;;  %v7954_v17 = vunpack.c.l.bf16 %v7939_v2  ;;  %v8245_v10 = vld [vmem:[%s13557_s4 + $0x38] sm:$0x11]  ;;  %v7714_v56 = vperm.slane %v7712_v29, 2 }
0x1202   : > { %v6752_v59 = vrot.slane %v6750_v53, 5  ;;  %v6764_v31 = vrot.slane %v6762_v16, 4  ;;  %v8053_v53 = vshrl.u32 %v8044_v6, 16  ;;  %v8250_v16 = vunpack.c.l.b16 %v8245_v10  ;;  %v7230_v29 = vld [vmem:[%s13557_s4 + $0x20] sm:$0x11] }
0x1203   : > { %v10051_v21 = vpack.i.bf16 %v7150_v15, %v6756_v47  ;;  %v6770_v28 = vor.u32 %v6769_v46, %v6756_v47  ;;  %v8045_v15 = vpack.c.b16 %v8041_v62, %v8041_v62  ;;  %v10066_v47 = vpack.i.bf16 %v7954_v17, %v7953_v34 }
0x1204   : > { %v10046_v39 = vpack.i.bf16 %v6752_v59, %v6748_v63  ;;  %v6765_v60 = vor.u32 %v6764_v31, %v6752_v59  ;;  %10057 = vrot.lane.b32.xlu1 %v10056_v1, %s14009_s25  ;;  %v7702_v63 = vpack.c.b16 %v7698_v22, %v7698_v22  ;;  %v8251_v54 = vunpack.c.h.b16 %v8245_v10  ;;  %v12693_v31 = vld [vmem:[%s13557_s4 + $0x28] sm:$0x22]  ;;  %v7323_v10 = vld [vmem:[%s13557_s4 + $0x28] sm:$0x11] }
0x1205   : > { %10052 = vrot.lane.b32.xlu0 %v10051_v21, %s14008_s16  ;;  %v6771_v38 = vrot.slane %v6770_v28, 4  ;;  %v8058_v49 = vshrl.u32 %v8045_v15, 16  ;;  %v7726_v59 = vunpack.c.l.bf16 %v7714_v56  ;;  %v8054_v23 = vpack.i.b16 %v8053_v53, %v8053_v53 }
0x1206   : > { %10047 = vrot.lane.b32.xlu2 %v10046_v39, %s14008_s16  ;;  %v6766_v61 = vrot.slane %v6765_v60, 4  ;;  %v7716_v14 = vpack.i.b16 %v7702_v63, %v7702_v63  ;;  %v8254_v46 = vpack.c.b16 %v8250_v16, %v8250_v16  ;;  %v8255_v27 = vpack.c.b16 %v8251_v54, %v8251_v54 }
0x1207   : > { %v8059_v21 = vpack.i.b16 %v8058_v49, %v8058_v49  ;;  %v8056_v1 = vperm.slane %v8054_v23, 3  ;;  %v7559_v28 = vunpack.c.h.b16 %v10235_v55  ;;  %v7560_v60 = vunpack.c.l.b16 %v12693_v31 }
0x1208   : > { %v7718_v40 = vperm.slane %v7716_v14, 2  ;;  %v8267_v57 = vshrl.u32 %v8254_v46, 16  ;;  %v8272_v52 = vshrl.u32 %v8255_v27, 16  ;;  %v7813_v42 = vunpack.c.h.b16 %v12703_v11 }
0x1209   : > { %v8061_v18 = vperm.slane %v8059_v21, 3  ;;  %v8073_v13 = vunpack.c.l.bf16 %v8056_v1  ;;  %v7563_v20 = vpack.c.b16 %v7559_v28, %v7559_v28  ;;  %v7234_v14 = vunpack.c.l.b16 %v7230_v29 }
0x120a   : > { %v7727_v32 = vunpack.c.l.bf16 %v7718_v40  ;;  %v8268_v50 = vpack.i.b16 %v8267_v57, %v8267_v57  ;;  %v8273_v41 = vpack.i.b16 %v8272_v52, %v8272_v52  ;;  %v7817_v62 = vpack.c.b16 %v7813_v42, %v7813_v42 }
0x120b   : > { %v8074_v45 = vunpack.c.l.bf16 %v8061_v18  ;;  %v7572_v51 = vshrl.u32 %v7563_v20, 16  ;;  %v7235_v6 = vunpack.c.h.b16 %v7230_v29  ;;  %v7238_v56 = vpack.c.b16 %v7234_v14, %v7234_v14  ;;  %v8381_v18 = vld [vmem:[%s13557_s4 + $0x30] sm:$0x22] }
0x120c   : > { %v10081_v39 = vpack.i.bf16 %v7727_v32, %v7726_v59  ;;  %v8275_v22 = vperm.slane %v8273_v41, 0  ;;  %v7834_v15 = vshrl.u32 %v7817_v62, 16  ;;  %v7329_v49 = vunpack.c.h.b16 %v7323_v10 }
0x120d   : > { %6782 = vrot.lane.b32.xlu0 %v6771_v38, %s14008_s16  ;;  %v7564_v38 = vpack.c.b16 %v7560_v60, %v7560_v60  ;;  %v10096_v7 = vpack.i.bf16 %v8074_v45, %v8073_v13  ;;  %v7573_v63 = vpack.i.b16 %v7572_v51, %v7572_v51  ;;  %v7239_v40 = vpack.c.b16 %v7235_v6, %v7235_v6 }
0x120e   : > { %6780 = vrot.lane.b32.xlu2 %v6766_v61, %s14008_s16  ;;  %v8270_v61 = vperm.slane %v8268_v50, 0  ;;  %v8284_v36 = vunpack.c.l.bf16 %v8275_v22  ;;  %v7835_v16 = vpack.i.b16 %v7834_v15, %v7834_v15  ;;  %v7243_v54 = vpack.i.b16 %v7238_v56, %v7238_v56  ;;  %v7691_v56 = vld [vmem:[%s13557_s4 + $0x20] sm:$0x44] }
0x120f   : > { %v7577_v48 = vshrl.u32 %v7564_v38, 16  ;;  %v7575_v26 = vperm.slane %v7573_v63, 1  ;;  %v7247_v59 = vpack.i.b16 %v7239_v40, %v7239_v40  ;;  %v7333_v46 = vpack.c.b16 %v7329_v49, %v7329_v49  ;;  %v7921_v40 = vld [vmem:[%s13557_s4 + $0x28] sm:$0x88] }
0x1210   : > { %v8283_v24 = vunpack.c.l.bf16 %v8270_v61  ;;  %v7837_v32 = vperm.slane %v7835_v16, 2  ;;  %v7245_v21 = vperm.slane %v7243_v54, 0  ;;  %v8385_v13 = vunpack.c.l.b16 %v8381_v18 }
0x1211   : > { %v7578_v44 = vpack.i.b16 %v7577_v48, %v7577_v48  ;;  %v7592_v34 = vunpack.c.l.bf16 %v7575_v26  ;;  %v7249_v27 = vperm.slane %v7247_v59, 0  ;;  %v7350_v57 = vshrl.u32 %v7333_v46, 16 }
0x1212   : > { %v7263_v52 = vunpack.c.l.bf16 %v7245_v21  ;;  %v8386_v50 = vunpack.c.h.b16 %v8381_v18  ;;  %v8389_v38 = vpack.c.b16 %v8385_v13, %v8385_v13  ;;  %v7696_v49 = vunpack.c.h.b16 %v7691_v56 }
0x1213   : > { %v7580_v2 = vperm.slane %v7578_v44, 1  ;;  %v7264_v55 = vunpack.c.l.bf16 %v7249_v27  ;;  %v7351_v60 = vpack.i.b16 %v7350_v57, %v7350_v57  ;;  %v7926_v54 = vunpack.c.l.b16 %v7921_v40 }
0x1214   : > { %v8390_v61 = vpack.c.b16 %v8386_v50, %v8386_v50  ;;  %v8394_v51 = vpack.i.b16 %v8389_v38, %v8389_v38 }
0x1215   : > { %v7593_v17 = vunpack.c.l.bf16 %v7580_v2  ;;  %v10141_v45 = vpack.i.bf16 %v7264_v55, %v7263_v52  ;;  %v7353_v20 = vperm.slane %v7351_v60, 0  ;;  %v7700_v55 = vpack.c.b16 %v7696_v49, %v7696_v49 }
0x1216   : > { %10062 = vrot.lane.b32.xlu2 %v10061_v33, %s14009_s25  ;;  %v10106_v33 = vpack.i.bf16 %v8284_v36, %v8283_v24  ;;  %v8398_v48 = vpack.i.b16 %v8390_v61, %v8390_v61  ;;  %v8396_v36 = vperm.slane %v8394_v51, 1 }
0x1217   : > { %v10121_v53 = vpack.i.bf16 %v7593_v17, %v7592_v34  ;;  %v7362_v22 = vunpack.c.l.bf16 %v7353_v20  ;;  %v6802_v34 = vld [vmem:[#allocation5 + $0x60] sm:$0x88] }
0x1218   : > { %v8400_v63 = vperm.slane %v8398_v48, 1  ;;  %v8414_v44 = vunpack.c.l.bf16 %v8396_v36 }
0x121a   : > { %v8415_v42 = vunpack.c.l.bf16 %v8400_v63 }
0x121e   : > { %10067 = vrot.lane.b32.xlu2 %v10066_v47, %s13829_s18  ;;  %v7328_v47 = vunpack.c.l.b16 %v7323_v10 }
0x1220   : > { %v7332_v23 = vpack.c.b16 %v7328_v47, %v7328_v47  ;;  %v7695_v47 = vunpack.c.l.b16 %v7691_v56 }
0x1222   : > { %v7345_v1 = vshrl.u32 %v7332_v23, 16  ;;  %v7927_v23 = vunpack.c.h.b16 %v7921_v40  ;;  %v7699_v52 = vpack.c.b16 %v7695_v47, %v7695_v47 }
0x1224   : > { %v7346_v28 = vpack.i.b16 %v7345_v1, %v7345_v1  ;;  %v6811_v1 = vld [vmem:[#allocation4 + $0x8] sm:$0x77]  ;;  %v7931_v50 = vpack.c.b16 %v7927_v23, %v7927_v23  ;;  %v7704_v48 = vpack.i.b16 %v7699_v52, %v7699_v52 }
0x1225   : > { %v6843_v61 = vunpack.c.l.bf16 %v6811_v1 }
0x1226   : > { %10082 = vrot.lane.b32.xlu2 %v10081_v39, %s13806_s24  ;;  %v7846_v39 = vunpack.c.l.bf16 %v7837_v32  ;;  %v7348_v41 = vperm.slane %v7346_v28, 0  ;;  %v7930_v28 = vpack.c.b16 %v7926_v54, %v7926_v54  ;;  %v7706_v23 = vperm.slane %v7704_v48, 2 }
0x1228   : > { %v7941_v36 = vpack.i.b16 %v7930_v28, %v7930_v28 }
0x122e   : > { %10097 = vrot.lane.b32.xlu2 %v10096_v7, %s13824_s20  ;;  %v7361_v7 = vunpack.c.l.bf16 %v7348_v41  ;;  %v6844_v41 = vunpack.c.h.bf16 %v6811_v1 }
0x1230   : > { %v10156_v24 = vpack.i.bf16 %v7362_v22, %v7361_v7  ;;  %v8152_v7 = vld [vmem:[%s13557_s4 + $0x30] sm:$0x11] }
0x1231   : > { %v8157_v40 = vunpack.c.h.b16 %v8152_v7 }
0x1236   : > { %10107 = vrot.lane.b32.xlu2 %v10106_v33, %s13905_s13  ;;  %v10166_v33 = vpack.i.bf16 %v8415_v42, %v8414_v44 }
0x123e   : > { %10122 = vrot.lane.b32.xlu2 %v10121_v53, %s14010_s0 }
0x1246   : > { %7857 = vrot.lane.b32.xlu2 %v7846_v39, %s13822_s19  ;;  %v6810_v39 = vld [vmem:[#allocation4] sm:$0x77] }
0x1247   : > { %v6841_v13 = vunpack.c.l.bf16 %v6810_v39  ;;  %v6842_v38 = vunpack.c.h.bf16 %v6810_v39 }
0x124e   : > { %10142 = vrot.lane.b32.xlu2 %v10141_v45, %s13993_s30  ;;  %v8153_v45 = vld [vmem:[%s13557_s4 + $0x38] sm:$0x11] }
0x1256   : > { %10157 = vrot.lane.b32.xlu2 %v10156_v24, %s13982_s29  ;;  %v7708_v24 = vpack.i.b16 %v7700_v55, %v7700_v55 }
0x125e   : > { %10167 = vrot.lane.b32.xlu2 %v10166_v33, %s14011_s23  ;;  %v8158_v33 = vunpack.c.l.b16 %v8153_v45 }
0x1260   : > { %v10048_v26 = vpop.permute.xlu2 %10047 }
0x1261   : > { %v10050_v2 = vunpack.i.h.bf16 %v10048_v26  ;;  %v10049_v62 = vunpack.i.l.bf16 %v10048_v26  ;;  %v6805_v26 = vld [vmem:[#allocation5 + $0x68] sm:$0x88] }
0x1263   : > { %v6785_v29 = vrot.slane %v10050_v2, 4  ;;  %v6784_v14 = vrot.slane %v10049_v62, 4 }
0x1265   : > { %v6790_v6 = vsel %vm14012_vm8, %v6784_v14, %v6785_v29  ;;  %v7945_v14 = vpack.i.b16 %v7931_v50, %v7931_v50  ;;  %vm14019_vm8 = vmmov %vm14015_vm13  ;;  %v8244_v50 = vld [vmem:[%s13557_s4 + $0x30] sm:$0x11] }
0x1266   : > { %v6791_v17 = vsel %vm14013_vm2, %v10049_v62, %v6790_v6  ;;  %v8159_v6 = vunpack.c.h.b16 %v8153_v45  ;;  %vm14020_vm2 = vmmov %vm14016_vm0 }
0x1267   : > { %v6803_v15 = vsel %vm13860_vm6, %v6791_v17, %v6802_v34  ;;  %v8156_v34 = vunpack.c.l.b16 %v8152_v7 }
0x1268   : > { %6804 = vst [vmem:[#allocation5 + $0x60] sm:$0x88] %v6803_v15  ;;  %v12726_v10 = vpop.permute.xlu2 %6780  ;;  %v8163_v28 = vpack.c.b16 %v8159_v6, %v8159_v6  ;;  %v7460_v6 = vld [vmem:[%s13557_s4 + $0x28] sm:$0x22] }
0x1269   : > { %v6788_v59 = vrot.slane %v12726_v10, 4  ;;  %v8160_v52 = vpack.c.b16 %v8156_v34, %v8156_v34 }
0x126b   : > { %v8165_v7 = vpack.i.b16 %v8160_v52, %v8160_v52 }
0x126e   : > { %v6779_v16 = vpop.permute.xlu1 %6778 }
0x126f   : > { %v6787_v32 = vrot.slane %v6779_v16, 4 }
0x1270   : > { %v12734_v53 = vpop.permute.xlu2 %10062 }
0x1271   : > { %v13657_v46 = vunpack.i.h.bf16 %v12734_v53  ;;  %v10064_v21 = vunpack.i.l.bf16 %v12734_v53  ;;  %v6794_v27 = vsel %vm14002_vm7, %v6787_v32, %v6788_v59  ;;  %vm14021_vm7 = vmmov %vm14017_vm3 }
0x1272   : > { %v6795_v57 = vsel %vm14014_vm9, %v6779_v16, %v6794_v27  ;;  %v8162_v27 = vpack.c.b16 %v8158_v33, %v8158_v33  ;;  %vm14024_vm9 = vcmask 523264  }
0x1273   : > { %6808 = vst [vmem:[#allocation5 + $0x70] sm:$0x33] %v6795_v57  ;;  %v6864_v22 = vsel %vm14015_vm13, %v10064_v21, %v13657_v46  ;;  %v7947_v57 = vperm.slane %v7945_v14, 3  ;;  %vm14025_vm13 = vmmov %vm14016_vm0  ;;  %v7551_v46 = vld [vmem:[#allocation4 + $0x4] sm:$0x77] }
0x1274   : > { %v6873_v16 = vmul.f32 %v6864_v22, %v6844_v41 }
0x1276   : > { %v10058_v51 = vpop.permute.xlu1 %10057 }
0x1277   : > { %v12741_v18 = vpop.permute.xlu0 %10052  ;;  %v10060_v44 = vunpack.i.h.bf16 %v10058_v51  ;;  %v10059_v42 = vunpack.i.l.bf16 %v10058_v51  ;;  %v8248_v51 = vunpack.c.l.b16 %v8244_v50 }
0x1278   : > { %v10054_v60 = vunpack.i.l.bf16 %v12741_v18 }
0x1279   : > { %v6863_v15 = vsel %vm14018_vm14, %v10060_v44, %v10064_v21  ;;  %v6862_v56 = vsel %vm14019_vm8, %v10059_v42, %v10060_v44  ;;  %v6870_v47 = vmul.f32 %v10059_v42, %v6841_v13  ;;  %v7710_v21 = vperm.slane %v7708_v24, 2 }
0x127a   : > { %v6786_v20 = vrot.slane %v10054_v60, 4  ;;  %v6871_v49 = vmul.f32 %v6862_v56, %v6842_v38  ;;  %v8161_v60 = vpack.c.b16 %v8157_v40, %v8157_v40  ;;  %v8177_v24 = vpack.i.b16 %v8163_v28, %v8163_v28  ;;  %v7459_v40 = vld [vmem:[%s13557_s4 + $0x20] sm:$0x22] }
0x127b   : > { %v7725_v48 = vunpack.c.l.bf16 %v7710_v21  ;;  %vm14029_vm8 = vcmask 465920  }
0x127c   : > { %v6792_v63 = vsel %vm14016_vm0, %v6785_v29, %v6786_v20  ;;  %v6872_v29 = vmul.f32 %v6863_v15, %v6843_v61  ;;  %v6875_v39 = vpack.c.bf16 %v6871_v49, %v6870_v47  ;;  %v7724_v20 = vunpack.c.l.bf16 %v7706_v23 }
0x127d   : > { %v6793_v62 = vsel %vm14017_vm3, %v10050_v2, %v6792_v63  ;;  %v7943_v2 = vperm.slane %v7941_v36, 3  ;;  %v8173_v61 = vpack.i.b16 %v8162_v27, %v8162_v27  ;;  %v8169_v22 = vpack.i.b16 %v8161_v60, %v8161_v60  ;;  %vm14027_vm3 = vmmov %vm14024_vm9 }
0x127e   : > { %v6806_v17 = vsel %vm13860_vm6, %v6793_v62, %v6805_v26  ;;  %v6876_v1 = vpack.c.bf16 %v6873_v16, %v6872_v29  ;;  %v12763_v13 = vrot.slane %v6875_v39, 6  ;;  %v8249_v36 = vunpack.c.h.b16 %v8244_v50  ;;  %vm14028_vm14 = vmmov %vm14027_vm3 }
0x127f   : > { %6807 = vst [vmem:[#allocation5 + $0x68] sm:$0x88] %v6806_v17  ;;  %v6783_v54 = vpop.permute.xlu0 %6782  ;;  %v7955_v38 = vunpack.c.l.bf16 %v7943_v2  ;;  %v8252_v63 = vpack.c.b16 %v8248_v51, %v8248_v51  ;;  %v8175_v44 = vperm.slane %v8173_v61, 0  ;;  %v8167_v26 = vperm.slane %v8165_v7, 0 }
0x1280   : > { %v6789_v32 = vrot.slane %v6783_v54, 4  ;;  %v12767_v41 = vrot.slane %v6876_v1, 6  ;;  %6887 = vrot.lane.b32.xlu0 %v12763_v13, %s14022_s17  ;;  %v8253_v42 = vpack.c.b16 %v8249_v36, %v8249_v36  ;;  %v8171_v62 = vperm.slane %v8169_v22, 0 }
0x1281   : > { %v10076_v34 = vpack.i.bf16 %v7725_v48, %v7724_v20  ;;  %v8179_v17 = vperm.slane %v8177_v24, 0  ;;  %v8257_v15 = vshrl.u32 %v8252_v63, 16  ;;  %v8187_v16 = vunpack.c.l.bf16 %v8175_v44  ;;  %v10236_v20 = vld [vmem:[%s13557_s4 + $0x20] sm:$0x44] }
0x1282   : > { %v6796_v55 = vsel %vm14020_vm2, %v6788_v59, %v6789_v32  ;;  %v7956_v59 = vunpack.c.l.bf16 %v7947_v57  ;;  %6889 = vrot.lane.b32.xlu1 %v12767_v41, %s14022_s17  ;;  %v8262_v56 = vshrl.u32 %v8253_v42, 16  ;;  %v7466_v29 = vunpack.c.h.b16 %v7460_v6  ;;  %vm14030_vm2 = vmmov %vm14029_vm8 }
0x1283   : > { %v6797_v45 = vsel %vm14021_vm7, %v12726_v10, %v6796_v55  ;;  %v8042_v10 = vunpack.c.h.b16 %v12679_v37  ;;  %v7465_v37 = vunpack.c.l.b16 %v7460_v6  ;;  %v8185_v47 = vunpack.c.l.bf16 %v8167_v26  ;;  %vm14031_vm7 = vmmov %vm14030_vm2 }
0x1284   : > { %6809 = vst [vmem:[#allocation5 + $0x78] sm:$0x33] %v6797_v45  ;;  %v10071_v33 = vpack.i.bf16 %v7956_v59, %v7955_v38  ;;  %v8186_v49 = vunpack.c.l.bf16 %v8171_v62  ;;  %v7463_v32 = vunpack.c.l.b16 %v7459_v40  ;;  %v8188_v23 = vunpack.c.l.bf16 %v8179_v17 }
0x1285   : > { %v8046_v14 = vpack.c.b16 %v8042_v10, %v8042_v10  ;;  %v8258_v2 = vpack.i.b16 %v8257_v15, %v8257_v15  ;;  %v8263_v27 = vpack.i.b16 %v8262_v56, %v8262_v56  ;;  %v7464_v39 = vunpack.c.h.b16 %v7459_v40  ;;  %v6998_v56 = vld [vmem:[%s13557_s4 + $0x10] sm:$0x88] }
0x1286   : > { %v7469_v1 = vpack.c.b16 %v7465_v37, %v7465_v37  ;;  %v7470_v57 = vpack.c.b16 %v7466_v29, %v7466_v29  ;;  %v7467_v52 = vpack.c.b16 %v7463_v32, %v7463_v32  ;;  %v10086_v21 = vpack.i.bf16 %v8186_v49, %v8185_v47  ;;  %v9423_v35 = vld [vmem:[#allocation5 + $0x68] sm:$0xf] }
0x1287   : > { %v8063_v54 = vshrl.u32 %v8046_v14, 16  ;;  %v7468_v55 = vpack.c.b16 %v7464_v39, %v7464_v39  ;;  %v10091_v60 = vpack.i.bf16 %v8188_v23, %v8187_v16  ;;  %v8260_v50 = vperm.slane %v8258_v2, 0 }
0x1288   : > { %10072 = vrot.lane.b32.xlu0 %v10071_v33, %s13829_s18  ;;  %v8265_v45 = vperm.slane %v8263_v27, 0  ;;  %v7811_v38 = vunpack.c.h.b16 %v10236_v20  ;;  %v7480_v61 = vpack.i.b16 %v7469_v1, %v7469_v1  ;;  %v7812_v59 = vunpack.c.l.b16 %v12703_v11 }
0x1289   : > { %v8064_v28 = vpack.i.b16 %v8063_v54, %v8063_v54  ;;  %v7484_v7 = vpack.i.b16 %v7470_v57, %v7470_v57  ;;  %v7472_v22 = vpack.i.b16 %v7467_v52, %v7467_v52  ;;  %v7476_v51 = vpack.i.b16 %v7468_v55, %v7468_v55  ;;  %v7322_v57 = vld [vmem:[%s13557_s4 + $0x20] sm:$0x11] }
0x128a   : > { %10077 = vrot.lane.b32.xlu1 %v10076_v34, %s13806_s24  ;;  %v7561_v24 = vunpack.c.h.b16 %v12693_v31  ;;  %v8281_v36 = vunpack.c.l.bf16 %v8260_v50  ;;  %v8282_v10 = vunpack.c.l.bf16 %v8265_v45  ;;  %v7815_v63 = vpack.c.b16 %v7811_v38, %v7811_v38  ;;  %v6999_v31 = vld [vmem:[%s13557_s4 + $0x18] sm:$0x88] }
0x128b   : > { %v8066_v48 = vperm.slane %v8064_v28, 3  ;;  %v7816_v44 = vpack.c.b16 %v7812_v59, %v7812_v59  ;;  %v7482_v42 = vperm.slane %v7480_v61, 1  ;;  %v7486_v33 = vperm.slane %v7484_v7, 1 }
0x128c   : > { %v7474_v26 = vperm.slane %v7472_v22, 1  ;;  %v7478_v62 = vperm.slane %v7476_v51, 1  ;;  %v7565_v14 = vpack.c.b16 %v7561_v24, %v7561_v24  ;;  %v10101_v6 = vpack.i.bf16 %v8282_v10, %v8281_v36 }
0x128d   : > { %v8075_v11 = vunpack.c.l.bf16 %v8066_v48  ;;  %v7824_v34 = vshrl.u32 %v7815_v63, 16  ;;  %v7829_v17 = vshrl.u32 %v7816_v44, 16  ;;  %v7494_v15 = vunpack.c.l.bf16 %v7482_v42 }
0x128e   : > { %v7495_v40 = vunpack.c.l.bf16 %v7486_v33  ;;  %v7492_v37 = vunpack.c.l.bf16 %v7474_v26  ;;  %v7493_v16 = vunpack.c.l.bf16 %v7478_v62  ;;  %v7582_v29 = vshrl.u32 %v7565_v14, 16 }
0x128f   : > { %v7004_v47 = vunpack.c.l.b16 %v6999_v31  ;;  %v7005_v49 = vunpack.c.h.b16 %v6999_v31  ;;  %v7002_v54 = vunpack.c.l.b16 %v6998_v56  ;;  %v7003_v32 = vunpack.c.h.b16 %v6998_v56  ;;  %v7114_v31 = vld [vmem:[%s13557_s4 + $0x18] sm:$0x88] }
0x1290   : > { %10087 = vrot.lane.b32.xlu0 %v10086_v21, %s13814_s26  ;;  %v7825_v23 = vpack.i.b16 %v7824_v34, %v7824_v34  ;;  %v7830_v2 = vpack.i.b16 %v7829_v17, %v7829_v17  ;;  %v10116_v27 = vpack.i.bf16 %v7495_v40, %v7494_v15  ;;  %v10111_v52 = vpack.i.bf16 %v7493_v16, %v7492_v37 }
0x1291   : > { %v7008_v39 = vpack.c.b16 %v7004_v47, %v7004_v47  ;;  %v7009_v1 = vpack.c.b16 %v7005_v49, %v7005_v49  ;;  %v7583_v55 = vpack.i.b16 %v7582_v29, %v7582_v29  ;;  %v7006_v21 = vpack.c.b16 %v7002_v54, %v7002_v54 }
0x1292   : > { %10092 = vrot.lane.b32.xlu1 %v10091_v60, %s13814_s26  ;;  %v7007_v28 = vpack.c.b16 %v7003_v32, %v7003_v32  ;;  %v7231_v60 = vld [vmem:[%s13557_s4 + $0x28] sm:$0x11]  ;;  %v7827_v50 = vperm.slane %v7825_v23, 2  ;;  %v7832_v45 = vperm.slane %v7830_v2, 2  ;;  %v7326_v20 = vunpack.c.l.b16 %v7322_v57 }
0x1293   : > { %v7327_v38 = vunpack.c.h.b16 %v7322_v57  ;;  %v7019_v61 = vpack.i.b16 %v7008_v39, %v7008_v39  ;;  %v7023_v59 = vpack.i.b16 %v7009_v1, %v7009_v1  ;;  %v7236_v7 = vunpack.c.l.b16 %v7231_v60 }
0x1294   : > { %v7237_v22 = vunpack.c.h.b16 %v7231_v60  ;;  %v7585_v51 = vperm.slane %v7583_v55, 1  ;;  %v7011_v48 = vpack.i.b16 %v7006_v21, %v7006_v21  ;;  %v7015_v24 = vpack.i.b16 %v7007_v28, %v7007_v28 }
0x1295   : > { %v7844_v36 = vunpack.c.l.bf16 %v7827_v50  ;;  %v7845_v10 = vunpack.c.l.bf16 %v7832_v45  ;;  %v7330_v63 = vpack.c.b16 %v7326_v20, %v7326_v20  ;;  %v7331_v44 = vpack.c.b16 %v7327_v38, %v7327_v38  ;;  %v8382_v45 = vld [vmem:[%s13557_s4 + $0x38] sm:$0x22] }
0x1296   : > { %v7021_v42 = vperm.slane %v7019_v61, 3  ;;  %v7025_v33 = vperm.slane %v7023_v59, 3  ;;  %v7240_v26 = vpack.c.b16 %v7236_v7, %v7236_v7  ;;  %v7241_v62 = vpack.c.b16 %v7237_v22, %v7237_v22  ;;  %v12814_v61 = vpop.permute.xlu2 %10067 }
0x1297   : > { %v7594_v14 = vunpack.c.l.bf16 %v7585_v51  ;;  %v10126_v34 = vpack.i.bf16 %v7845_v10, %v7844_v36  ;;  %v7335_v17 = vshrl.u32 %v7330_v63, 16  ;;  %v7340_v15 = vshrl.u32 %v7331_v44, 16 }
0x1298   : > { %8086 = vrot.lane.b32.xlu0 %v8075_v11, %s13824_s20  ;;  %v7013_v11 = vperm.slane %v7011_v48, 3  ;;  %v7118_v56 = vunpack.c.h.b16 %v12643_v58  ;;  %v7033_v40 = vunpack.c.l.bf16 %v7021_v42  ;;  %v7034_v37 = vunpack.c.l.bf16 %v7025_v33 }
0x1299   : > { %v7251_v16 = vpack.i.b16 %v7240_v26, %v7240_v26  ;;  %v7255_v29 = vpack.i.b16 %v7241_v62, %v7241_v62  ;;  %v7119_v54 = vunpack.c.l.b16 %v7114_v31  ;;  %v7336_v23 = vpack.i.b16 %v7335_v17, %v7335_v17 }
0x129a   : > { %10102 = vrot.lane.b32.xlu1 %v10101_v6, %s13905_s13  ;;  %v7017_v6 = vperm.slane %v7015_v24, 3  ;;  %v7031_v47 = vunpack.c.l.bf16 %v7013_v11  ;;  %v7122_v32 = vpack.c.b16 %v7118_v56, %v7118_v56  ;;  %v7341_v2 = vpack.i.b16 %v7340_v15, %v7340_v15 }
0x129b   : > { %v7123_v39 = vpack.c.b16 %v7119_v54, %v7119_v54  ;;  %v7253_v1 = vperm.slane %v7251_v16, 0  ;;  %v7257_v57 = vperm.slane %v7255_v29, 0  ;;  %v7338_v21 = vperm.slane %v7336_v23, 0 }
0x129c   : > { %v7032_v49 = vunpack.c.l.bf16 %v7017_v6  ;;  %v7131_v55 = vshrl.u32 %v7122_v32, 16  ;;  %v7343_v28 = vperm.slane %v7341_v2, 0  ;;  %v8387_v22 = vunpack.c.l.b16 %v8382_v45  ;;  %v7917_v6 = vld [vmem:[#allocation4 + $0x4] sm:$0x77] }
0x129d   : > { %v7136_v50 = vshrl.u32 %v7123_v39, 16  ;;  %v7265_v20 = vunpack.c.l.bf16 %v7253_v1  ;;  %v7266_v38 = vunpack.c.l.bf16 %v7257_v57  ;;  %v8388_v51 = vunpack.c.h.b16 %v8382_v45 }
0x129e   : > { %v10131_v58 = vpack.i.bf16 %v7032_v49, %v7031_v47  ;;  %v7132_v59 = vpack.i.b16 %v7131_v55, %v7131_v55  ;;  %v7359_v48 = vunpack.c.l.bf16 %v7338_v21  ;;  %v7360_v24 = vunpack.c.l.bf16 %v7343_v28 }
0x129f   : > { %v7137_v7 = vpack.i.b16 %v7136_v50, %v7136_v50  ;;  %v10070_v10 = vunpack.i.h.bf16 %v12814_v61  ;;  %v10069_v63 = vunpack.i.l.bf16 %v12814_v61  ;;  %v10146_v44 = vpack.i.bf16 %v7266_v38, %v7265_v20 }
0x12a0   : > { %10112 = vrot.lane.b32.xlu0 %v10111_v52, %s14023_s5  ;;  %v10136_v52 = vpack.i.bf16 %v7034_v37, %v7033_v40  ;;  %v7134_v42 = vperm.slane %v7132_v59, 3  ;;  %v8391_v26 = vpack.c.b16 %v8387_v22, %v8387_v22  ;;  %v8392_v62 = vpack.c.b16 %v8388_v51, %v8388_v51 }
0x12a1   : > { %v7139_v33 = vperm.slane %v7137_v7, 3  ;;  %v7948_v40 = vunpack.c.l.bf16 %v7917_v6  ;;  %v7949_v37 = vunpack.c.h.bf16 %v7917_v6  ;;  %vm14026_vm0 = vcmask 7168   ;;  %v7918_v7 = vld [vmem:[#allocation4 + $0xc] sm:$0x77] }
0x12a2   : > { %10117 = vrot.lane.b32.xlu1 %v10116_v27, %s14023_s5  ;;  %v7120_v27 = vunpack.c.h.b16 %v7114_v31  ;;  %v7151_v17 = vunpack.c.l.bf16 %v7134_v42  ;;  %v8402_v31 = vpack.i.b16 %v8391_v26, %v8391_v26  ;;  %v8406_v56 = vpack.i.b16 %v8392_v62, %v8392_v62  ;;  %v7688_v42 = vld [vmem:[#allocation4 + $0x4] sm:$0x77] }
0x12a3   : > { %v7152_v15 = vunpack.c.l.bf16 %v7139_v33  ;;  %v7977_v29 = vmul.f32 %v10069_v63, %v7948_v40  ;;  %v7951_v33 = vunpack.c.h.bf16 %v7918_v7  ;;  %v7720_v40 = vunpack.c.h.bf16 %v7688_v42 }
0x12a4   : > { %v7124_v60 = vpack.c.b16 %v7120_v27, %v7120_v27  ;;  %v8404_v54 = vperm.slane %v8402_v31, 1  ;;  %v8408_v32 = vperm.slane %v8406_v56, 1  ;;  %v8150_v31 = vld [vmem:[#allocation4 + $0xc] sm:$0x77]  ;;  %v7719_v56 = vunpack.c.l.bf16 %v7688_v42 }
0x12a5   : > { %v10161_v49 = vpack.i.bf16 %v7152_v15, %v7151_v17 }
0x12a6   : > { %v7141_v36 = vshrl.u32 %v7124_v60, 16  ;;  %v8416_v27 = vunpack.c.l.bf16 %v8404_v54  ;;  %v8417_v39 = vunpack.c.l.bf16 %v8408_v32 }
0x12a8   : > { %7605 = vrot.lane.b32.xlu0 %v7594_v14, %s14010_s0  ;;  %v10151_v14 = vpack.i.bf16 %v7360_v24, %v7359_v48  ;;  %v7142_v11 = vpack.i.b16 %v7141_v36, %v7141_v36  ;;  %v10171_v57 = vpack.i.bf16 %v8417_v39, %v8416_v27  ;;  %v8182_v27 = vunpack.c.l.bf16 %v8150_v31 }
0x12aa   : > { %10127 = vrot.lane.b32.xlu1 %v10126_v34, %s13822_s19  ;;  %v7969_v34 = vsel %vm14024_vm9, %v10069_v63, %v10070_v10  ;;  %v7144_v16 = vperm.slane %v7142_v11, 3  ;;  %v7689_v11 = vld [vmem:[#allocation4 + $0xc] sm:$0x77]  ;;  %vm14032_vm9 = vcmask 580608  }
0x12ab   : > { %v7978_v47 = vmul.f32 %v7969_v34, %v7949_v37 }
0x12ac   : > { %v7153_v23 = vunpack.c.l.bf16 %v7144_v16 }
0x12ad   : > { %v7982_v2 = vpack.c.bf16 %v7978_v47, %v7977_v29  ;;  %v7722_v29 = vunpack.c.h.bf16 %v7689_v11 }
0x12af   : > { %v12825_v1 = vrot.slane %v7982_v2, 5  ;;  %v8183_v2 = vunpack.c.h.bf16 %v8150_v31  ;;  %v7227_v31 = vld [vmem:[#allocation4 + $0x4] sm:$0x77] }
0x12b0   : > { %10132 = vrot.lane.b32.xlu0 %v10131_v58, %s14022_s17  ;;  %v12830_v58 = vpop.permute.xlu2 %10082 }
0x12b1   : > { %v13656_v6 = vunpack.i.h.bf16 %v12830_v58  ;;  %v10084_v34 = vunpack.i.l.bf16 %v12830_v58 }
0x12b2   : > { %10137 = vrot.lane.b32.xlu1 %v10136_v52, %s14022_s17  ;;  %v7991_v52 = vrot.slane %v12825_v1, 4 }
0x12b3   : > { %v7742_v54 = vsel %vm14031_vm7, %v10084_v34, %v13656_v6  ;;  %vm14039_vm7 = vcmask 449536  }
0x12b8   : > { %10147 = vrot.lane.b32.xlu0 %v10146_v44, %s13993_s30  ;;  %v12832_v55 = vpop.permute.xlu2 %10097  ;;  %v7950_v44 = vunpack.c.l.bf16 %v7918_v7 }
0x12ba   : > { %10152 = vrot.lane.b32.xlu1 %v10151_v14, %s13982_s29  ;;  %v8149_v14 = vld [vmem:[#allocation4 + $0x4] sm:$0x77] }
0x12bb   : > { %v8180_v16 = vunpack.c.l.bf16 %v8149_v14 }
0x12c0   : > { %10162 = vrot.lane.b32.xlu0 %v10161_v49, %s14008_s16  ;;  %v12834_v21 = vpop.permute.xlu2 %10107  ;;  %v8181_v49 = vunpack.c.h.bf16 %v8149_v14 }
0x12c2   : > { %7164 = vrot.lane.b32.xlu1 %v7153_v23, %s14008_s16  ;;  %v7721_v23 = vunpack.c.l.bf16 %v7689_v11 }
0x12c8   : > { %10172 = vrot.lane.b32.xlu0 %v10171_v57, %s14011_s23  ;;  %v12836_v28 = vpop.permute.xlu2 %10122 }
0x12ca   : > { %8000 = vrot.lane.b32.xlu1 %v7991_v52, %s13829_s18 }
0x12d0   : > { %v12845_v59 = vpop.permute.xlu2 %7857 }
0x12d8   : > { %v12862_v32 = vpop.permute.xlu2 %10142 }
0x12f2   : > { %v6888_v60 = vpop.permute.xlu0 %6887 }
0x12f3   : > { %v6899_v45 = vrot.slane %v6888_v60, 4 }
0x12f4   : > { %v12838_v50 = vpop.permute.xlu1 %6889 }
0x12f5   : > { %v13654_v20 = vrot.slane %v12838_v50, 4 }
0x12f7   : > { %v6905_v38 = vsel %vm14025_vm13, %v6899_v45, %v13654_v20  ;;  %vm14033_vm13 = vmmov %vm14032_vm9 }
0x12f8   : > { %v6906_v61 = vsel %vm14026_vm0, %v6888_v60, %v6905_v38  ;;  %vm14034_vm0 = vmmov %vm14032_vm9 }
0x12f9   : > { %6917 = vst [vmem:[#allocation5 + $0x70] sm:$0xcc] %v6906_v61 }
0x12fa   : > { %v12847_v22 = vpop.permute.xlu0 %10072 }
0x12fb   : > { %v13660_v48 = vunpack.i.h.bf16 %v12847_v22  ;;  %v10074_v24 = vunpack.i.l.bf16 %v12847_v22 }
0x12fc   : > { %v10078_v51 = vpop.permute.xlu1 %10077 }
0x12fd   : > { %v10080_v36 = vunpack.i.h.bf16 %v10078_v51  ;;  %v10079_v63 = vunpack.i.l.bf16 %v10078_v51  ;;  %v7970_v26 = vsel %vm14027_vm3, %v10070_v10, %v10074_v24  ;;  %v7971_v62 = vsel %vm14028_vm14, %v10074_v24, %v13660_v48 }
0x12fe   : > { %v7979_v17 = vmul.f32 %v7970_v26, %v7950_v44  ;;  %v7980_v15 = vmul.f32 %v7971_v62, %v7951_v33  ;;  %v13664_v44 = vunpack.i.h.bf16 %v12862_v32  ;;  %vm14035_vm3 = vcmask 64512  }
0x12ff   : > { %v7740_v37 = vsel %vm14029_vm8, %v10079_v63, %v10080_v36  ;;  %v7741_v10 = vsel %vm14030_vm2, %v10080_v36, %v10084_v34  ;;  %v7748_v57 = vmul.f32 %v10079_v63, %v7719_v56  ;;  %v7751_v36 = vmul.f32 %v7742_v54, %v7722_v29 }
0x1300   : > { %v7983_v47 = vpack.c.bf16 %v7980_v15, %v7979_v17  ;;  %v7749_v52 = vmul.f32 %v7740_v37, %v7720_v40  ;;  %v7750_v61 = vmul.f32 %v7741_v10, %v7721_v23  ;;  %v10144_v63 = vunpack.i.l.bf16 %v12862_v32 }
0x1301   : > { %v10100_v10 = vunpack.i.h.bf16 %v12832_v55  ;;  %vm14036_vm14 = vcmask 531456   ;;  %vm14037_vm8 = vcmask 588800  }
0x1302   : > { %v10088_v39 = vpop.permute.xlu0 %10087  ;;  %v12868_v24 = vrot.slane %v7983_v47, 5  ;;  %v7753_v11 = vpack.c.bf16 %v7749_v52, %v7748_v57  ;;  %v7754_v56 = vpack.c.bf16 %v7751_v36, %v7750_v61  ;;  %v7258_v47 = vunpack.c.l.bf16 %v7227_v31  ;;  %v8033_v57 = vld [vmem:[#allocation4 + $0xc] sm:$0x77]  ;;  %v8241_v61 = vld [vmem:[#allocation4 + $0x4] sm:$0x77]  ;;  %vm14038_vm2 = vmmov %vm14036_vm14 }
0x1303   : > { %v10090_v45 = vunpack.i.h.bf16 %v10088_v39  ;;  %v10089_v38 = vunpack.i.l.bf16 %v10088_v39 }
0x1304   : > { %v12864_v60 = vpop.permute.xlu1 %10092  ;;  %v7992_v15 = vrot.slane %v12868_v24, 4  ;;  %v12886_v54 = vrot.slane %v7753_v11, 6  ;;  %v12894_v52 = vrot.slane %v7754_v56, 6 }
0x1305   : > { %v13659_v7 = vunpack.i.h.bf16 %v12864_v60  ;;  %v10094_v51 = vunpack.i.l.bf16 %v12864_v60  ;;  %v8201_v42 = vsel %vm14032_vm9, %v10089_v38, %v10090_v45  ;;  %v8209_v33 = vmul.f32 %v10089_v38, %v8180_v16  ;;  %vm14040_vm9 = vmmov %vm14039_vm7 }
0x1306   : > { %v8210_v14 = vmul.f32 %v8201_v42, %v8181_v49  ;;  %8002 = vrot.lane.b32.xlu2 %v7992_v15, %s13829_s18  ;;  %v7279_v16 = vsel %vm14035_vm3, %v10144_v63, %v13664_v44  ;;  %v7259_v49 = vunpack.c.h.bf16 %v7227_v31  ;;  %v8070_v42 = vunpack.c.h.bf16 %v8033_v57  ;;  %v7456_v15 = vld [vmem:[#allocation4 + $0x4] sm:$0x77] }
0x1307   : > { %v8203_v26 = vsel %vm14033_vm13, %v10094_v51, %v13659_v7  ;;  %v8202_v62 = vsel %vm14034_vm0, %v10090_v45, %v10094_v51  ;;  %v7287_v45 = vmul.f32 %v10144_v63, %v7258_v47  ;;  %v7763_v63 = vrot.slane %v12894_v52, 4  ;;  %vm14041_vm13 = vmmov %vm14039_vm7 }
0x1308   : > { %v8212_v34 = vmul.f32 %v8203_v26, %v8183_v2  ;;  %v8211_v17 = vmul.f32 %v8202_v62, %v8182_v27  ;;  %v8214_v40 = vpack.c.bf16 %v8210_v14, %v8209_v33  ;;  %v10099_v2 = vunpack.i.l.bf16 %v12832_v55 }
0x1309   : > { %v7288_v38 = vmul.f32 %v7279_v16, %v7259_v49  ;;  %v7762_v33 = vrot.slane %v12886_v54, 4  ;;  %v8276_v62 = vunpack.c.l.bf16 %v8241_v61  ;;  %v8277_v14 = vunpack.c.h.bf16 %v8241_v61 }
0x130a   : > { %v8215_v37 = vpack.c.bf16 %v8212_v34, %v8211_v17  ;;  %v12882_v29 = vpop.permute.xlu0 %8086  ;;  %8220 = vrot.lane.b32.xlu0 %v8214_v40, %s13806_s24  ;;  %v8089_v26 = vsel %vm14038_vm2, %v10099_v2, %v10100_v10  ;;  %v8069_v34 = vunpack.c.l.bf16 %v8033_v57  ;;  %v7457_v40 = vld [vmem:[#allocation4 + $0xc] sm:$0x77]  ;;  %vm14042_vm0 = vcmask 515072  }
0x130b   : > { %v8090_v51 = vsel %vm14036_vm14, %v10100_v10, %v12882_v29  ;;  %v7292_v11 = vpack.c.bf16 %v7288_v38, %v7287_v45  ;;  %v7487_v45 = vunpack.c.l.bf16 %v7456_v15  ;;  %vm14043_vm3 = vcmask 457728  }
0x130c   : > { %v12888_v23 = vpop.permute.xlu1 %10102  ;;  %8222 = vrot.lane.b32.xlu1 %v8215_v37, %s13806_s24  ;;  %v8099_v17 = vmul.f32 %v8090_v51, %v8070_v42  ;;  %v8098_v16 = vmul.f32 %v8089_v26, %v8069_v34  ;;  %v7490_v51 = vunpack.c.h.bf16 %v7457_v40  ;;  %vm14044_vm14 = vmmov %vm14043_vm3 }
0x130d   : > { %v13662_v27 = vunpack.i.h.bf16 %v12888_v23  ;;  %v10104_v39 = vunpack.i.l.bf16 %v12888_v23 }
0x130e   : > { %7771 = vrot.lane.b32.xlu2 %v7762_v33, %s13814_s26  ;;  %v8102_v61 = vpack.c.bf16 %v8099_v17, %v8098_v16 }
0x130f   : > { %v8297_v36 = vsel %vm14037_vm8, %v10104_v39, %v13662_v27  ;;  %v8305_v31 = vmul.f32 %v10104_v39, %v8276_v62  ;;  %v7488_v39 = vunpack.c.h.bf16 %v7456_v15  ;;  %vm14045_vm8 = vmmov %vm14038_vm2 }
0x1310   : > { %v8306_v56 = vmul.f32 %v8297_v36, %v8277_v14  ;;  %v7489_v36 = vunpack.c.l.bf16 %v7457_v40  ;;  %v8116_v17 = vshll.u32 %v8102_v61, 16  ;;  %vm14046_vm2 = vmmov %vm14043_vm3 }
0x1312   : > { %v10113_v37 = vpop.permute.xlu0 %10112  ;;  %7773 = vrot.lane.b32.xlu0 %v7763_v63, %s13814_s26  ;;  %v8310_v42 = vpack.c.bf16 %v8306_v56, %v8305_v31 }
0x1313   : > { %v10115_v10 = vunpack.i.h.bf16 %v10113_v37  ;;  %v10114_v38 = vunpack.i.l.bf16 %v10113_v37  ;;  %v8113_v37 = vshrl.u32 %v8102_v61, 16  ;;  %v10124_v61 = vunpack.i.l.bf16 %v12836_v28 }
0x1314   : > { %v12908_v47 = vpop.permute.xlu1 %10117  ;;  %7298 = vrot.lane.b32.xlu1 %v7292_v11, %s13986_s14  ;;  %v8314_v15 = vshrl.u32 %v8310_v42, 16  ;;  %v8317_v31 = vshll.u32 %v8310_v42, 16  ;;  %v7552_v42 = vld [vmem:[#allocation4 + $0xc] sm:$0x77] }
0x1315   : > { %v13658_v49 = vunpack.i.h.bf16 %v12908_v47  ;;  %v10119_v57 = vunpack.i.l.bf16 %v12908_v47  ;;  %v7508_v62 = vsel %vm14041_vm13, %v10114_v38, %v10115_v10  ;;  %v7516_v11 = vmul.f32 %v10114_v38, %v7487_v45  ;;  %v8032_v38 = vld [vmem:[#allocation4 + $0x4] sm:$0x77] }
0x1316   : > { %v7517_v34 = vmul.f32 %v7508_v62, %v7488_v39  ;;  %v9960_v45 = vunpack.i.h.bf16 %v12391_v12  ;;  %v8118_v39 = vrot.slane %v8116_v17, 7  ;;  %v8068_v62 = vunpack.c.h.bf16 %v8032_v38 }
0x1317   : > { %v7510_v33 = vsel %vm14039_vm7, %v10119_v57, %v13658_v49  ;;  %v7509_v26 = vsel %vm14040_vm9, %v10115_v10, %v10119_v57  ;;  %v7803_v10 = vld [vmem:[#allocation4 + $0x4] sm:$0x77]  ;;  %v10125_v12 = vunpack.i.h.bf16 %v12836_v28  ;;  %v7589_v17 = vunpack.c.h.bf16 %v7552_v42 }
0x1318   : > { %v7519_v14 = vmul.f32 %v7510_v33, %v7490_v51  ;;  %v7518_v63 = vmul.f32 %v7509_v26, %v7489_v36  ;;  %v7521_v20 = vpack.c.bf16 %v7517_v34, %v7516_v11  ;;  %v8115_v51 = vrot.slane %v8113_v37, 6  ;;  %v6996_v11 = vld [vmem:[#allocation4 + $0xc] sm:$0x77] }
0x1319   : > { %v8316_v36 = vrot.slane %v8314_v15, 5  ;;  %v7586_v33 = vunpack.c.l.bf16 %v7551_v46  ;;  %v7838_v26 = vunpack.c.l.bf16 %v7803_v10  ;;  %v9990_v34 = vunpack.i.h.bf16 %v12478_v4 }
0x131a   : > { %v7522_v5 = vpack.c.bf16 %v7519_v14, %v7518_v63  ;;  %v12918_v16 = vpop.permute.xlu0 %7605  ;;  %v7527_v56 = vrot.slane %v7521_v20, 7  ;;  %v8319_v20 = vrot.slane %v8317_v31, 6  ;;  %v7587_v14 = vunpack.c.h.bf16 %v7551_v46 }
0x131b   : > { %v7839_v63 = vunpack.c.h.bf16 %v7803_v10  ;;  %v8119_v31 = vor.u32 %v8118_v39, %v8115_v51  ;;  %v7867_v28 = vmul.f32 %v9960_v45, %v7838_v26  ;;  %v7029_v10 = vunpack.c.h.bf16 %v6996_v11 }
0x131c   : > { %v12920_v40 = vpop.permute.xlu1 %10127  ;;  %v7528_v6 = vrot.slane %v7522_v5, 7  ;;  %7530 = vrot.lane.b32.xlu0 %v7527_v56, %s14011_s23  ;;  %v9940_v5 = vunpack.i.h.bf16 %v12325_v8  ;;  %v7609_v56 = vsel %vm14044_vm14, %v10125_v12, %v12918_v16  ;;  %v12941_v7 = vor.u32 %v8319_v20, %v8316_v36 }
0x131d   : > { %v13661_v57 = vunpack.i.l.bf16 %v12920_v40  ;;  %v8088_v51 = vsel %vm14045_vm8, %v9990_v34, %v10099_v2  ;;  %v7608_v39 = vsel %vm14046_vm2, %v10124_v61, %v10125_v12  ;;  %v7588_v36 = vunpack.c.l.bf16 %v7552_v42 }
0x131e   : > { %7532 = vrot.lane.b32.xlu1 %v7528_v6, %s14011_s23  ;;  %v7607_v37 = vsel %vm14043_vm3, %v9940_v5, %v10124_v61  ;;  %vm14047_vm7 = vcmask 7168   ;;  %v7615_v2 = vmul.f32 %v9940_v5, %v7586_v33  ;;  %v8067_v12 = vunpack.c.l.bf16 %v8032_v38 }
0x131f   : > { %v7859_v6 = vsel %vm14042_vm0, %v9960_v45, %v13661_v57  ;;  %v7618_v45 = vmul.f32 %v7609_v56, %v7589_v17  ;;  %vm14048_vm9 = vmmov %vm14047_vm7  ;;  %v8242_v57 = vld [vmem:[#allocation4 + $0xc] sm:$0x77]  ;;  %v10109_v42 = vunpack.i.l.bf16 %v12834_v21  ;;  %v6884_v33 = vrot.slane %v12763_v13, 4 }
0x1320   : > { %v7868_v8 = vmul.f32 %v7859_v6, %v7839_v63  ;;  %v7616_v6 = vmul.f32 %v7607_v37, %v7587_v14  ;;  %v7028_v63 = vunpack.c.l.bf16 %v6996_v11  ;;  %v8097_v11 = vmul.f32 %v8088_v51, %v8068_v62  ;;  %v7228_v56 = vld [vmem:[#allocation4 + $0xc] sm:$0x77] }
0x1321   : > { %v7617_v37 = vmul.f32 %v7608_v39, %v7588_v36  ;;  %v8096_v27 = vmul.f32 %v9990_v34, %v8067_v12  ;;  %v7260_v51 = vunpack.c.l.bf16 %v7228_v56  ;;  %v7261_v39 = vunpack.c.h.bf16 %v7228_v56 }
0x1322   : > { %v12934_v15 = vpop.permute.xlu0 %10132  ;;  %v7872_v26 = vpack.c.bf16 %v7868_v8, %v7867_v28  ;;  %v7620_v17 = vpack.c.bf16 %v7616_v6, %v7615_v2  ;;  %vm14049_vm13 = vcmask 588800   ;;  %v14050_v6 = vunpack.i.h.bf16 %v12862_v32 }
0x1323   : > { %v10135_v46 = vunpack.i.h.bf16 %v12934_v15  ;;  %v8101_v28 = vpack.c.bf16 %v8097_v11, %v8096_v27  ;;  %vm14051_vm0 = vcmask 64512   ;;  %vm14054_vm14 = vmmov %vm14049_vm13  ;;  %v8279_v12 = vunpack.c.h.bf16 %v8242_v57 }
0x1324   : > { %v12938_v49 = vpop.permute.xlu1 %10137  ;;  %8130 = vrot.lane.b32.xlu0 %v8119_v31, %s13822_s19  ;;  %v13666_v31 = vunpack.i.h.bf16 %v12834_v21  ;;  %v7876_v8 = vshrl.u32 %v7872_v26, 16  ;;  %vm14052_vm3 = vmmov %vm14051_vm0  ;;  %v7624_v27 = vshll.u32 %v7620_v17, 16  ;;  %vm14055_vm8 = vcmask 72704  }
0x1325   : > { %v13663_v4 = vunpack.i.h.bf16 %v12938_v49  ;;  %v10139_v48 = vunpack.i.l.bf16 %v12938_v49  ;;  %v8105_v11 = vshrl.u32 %v8101_v28, 16  ;;  %vm14056_vm2 = vmmov %vm14055_vm8 }
0x1326   : > { %8340 = vrot.lane.b32.xlu1 %v12941_v7, %s14010_s0  ;;  %v8299_v34 = vsel %vm14049_vm13, %v10109_v42, %v13666_v31  ;;  %v7804_v31 = vld [vmem:[#allocation4 + $0xc] sm:$0x77]  ;;  %vm14058_vm13 = vcmask 515072  }
0x1327   : > { %v7049_v20 = vsel %vm14047_vm7, %v10139_v48, %v13663_v4  ;;  %v7048_v55 = vsel %vm14048_vm9, %v10135_v46, %v10139_v48  ;;  %v7621_v4 = vpack.c.bf16 %v7618_v45, %v7617_v37  ;;  %v6885_v48 = vrot.slane %v12767_v41, 4  ;;  %vm14057_vm7 = vmmov %vm14056_vm2 }
0x1328   : > { %v7058_v61 = vmul.f32 %v7049_v20, %v7029_v10  ;;  %v7057_v14 = vmul.f32 %v7048_v55, %v7028_v63  ;;  %v8278_v10 = vunpack.c.l.bf16 %v8242_v57  ;;  %v14053_v63 = vunpack.i.h.bf16 %v12888_v23 }
0x1329   : > { %v7628_v45 = vshll.u32 %v7621_v4, 16  ;;  %v7635_v55 = vshrl.u32 %v7620_v17, 16  ;;  %v7640_v2 = vshrl.u32 %v7621_v4, 16  ;;  %v12984_v23 = vrot.slane %v7624_v27, 5 }
0x132a   : > { %v12960_v44 = vpop.permute.xlu0 %10147  ;;  %v7061_v5 = vpack.c.bf16 %v7058_v61, %v7057_v14  ;;  %v8298_v36 = vsel %vm14054_vm14, %v14053_v63, %v10109_v42  ;;  %v7878_v61 = vrot.slane %v7876_v8, 7  ;;  %v7319_v8 = vld [vmem:[#allocation4 + $0x4] sm:$0x77]  ;;  %v10134_v63 = vunpack.i.l.bf16 %v12934_v15 }
0x132b   : > { %v13665_v38 = vunpack.i.h.bf16 %v12960_v44  ;;  %v10149_v62 = vunpack.i.l.bf16 %v12960_v44  ;;  %v8307_v37 = vmul.f32 %v8298_v36, %v8278_v10  ;;  %v7637_v42 = vrot.slane %v7635_v55, 4 }
0x132c   : > { %6893 = vrot.lane.b32.xlu0 %v6884_v33, %s14022_s17  ;;  %v12980_v14 = vrot.slane %v7061_v5, 5  ;;  %v10153_v56 = vpop.permute.xlu1 %10152  ;;  %v8108_v33 = vshll.u32 %v8101_v28, 16  ;;  %v7642_v4 = vrot.slane %v7640_v2, 4  ;;  %v6995_v5 = vld [vmem:[#allocation4 + $0x4] sm:$0x77]  ;;  %v7354_v55 = vunpack.c.l.bf16 %v7319_v8 }
0x132d   : > { %v7280_v41 = vsel %vm14051_vm0, %v14050_v6, %v10149_v62  ;;  %v7281_v13 = vsel %vm14052_vm3, %v10149_v62, %v13665_v38  ;;  %v7879_v62 = vshll.u32 %v7872_v26, 16  ;;  %v8308_v6 = vmul.f32 %v8299_v34, %v8279_v12  ;;  %v12982_v38 = vpop.permute.xlu2 %10157  ;;  %v7320_v28 = vld [vmem:[#allocation4 + $0xc] sm:$0x77]  ;;  %vm14060_vm0 = vmmov %vm14058_vm13 }
0x132e   : > { %6895 = vrot.lane.b32.xlu1 %v6885_v48, %s14022_s17  ;;  %v7289_v20 = vmul.f32 %v7280_v41, %v7260_v51  ;;  %v7290_v32 = vmul.f32 %v7281_v13, %v7261_v39  ;;  %v12986_v51 = vrot.slane %v7628_v45, 5  ;;  %v7070_v57 = vrot.slane %v12980_v14, 4 }
0x132f   : > { %v7881_v17 = vor.u32 %v7879_v62, %v7878_v61  ;;  %v10155_v10 = vunpack.i.h.bf16 %v10153_v56  ;;  %v10154_v39 = vunpack.i.l.bf16 %v10153_v56  ;;  %v8107_v26 = vrot.slane %v8105_v11, 6 }
0x1330   : > { %v7293_v48 = vpack.c.bf16 %v7290_v32, %v7289_v20  ;;  %v10160_v34 = vunpack.i.h.bf16 %v12982_v38  ;;  %v10159_v41 = vunpack.i.l.bf16 %v12982_v38  ;;  %v8311_v13 = vpack.c.bf16 %v8308_v6, %v8307_v37 }
0x1331   : > { %v8110_v27 = vrot.slane %v8108_v33, 7  ;;  %v7638_v36 = vor.u32 %v7637_v42, %v12984_v23  ;;  %v7026_v45 = vunpack.c.l.bf16 %v6995_v5  ;;  %v7027_v20 = vunpack.c.h.bf16 %v6995_v5 }
0x1332   : > { %7300 = vrot.lane.b32.xlu2 %v7293_v48, %s13986_s14  ;;  %v7643_v2 = vor.u32 %v7642_v4, %v12986_v51  ;;  %v7355_v32 = vunpack.c.h.bf16 %v7319_v8  ;;  %v7356_v61 = vunpack.c.l.bf16 %v7320_v28  ;;  %v7376_v12 = vsel %vm14055_vm8, %v10155_v10, %v10159_v41 }
0x1333   : > { %v7375_v11 = vsel %vm14056_vm2, %v10154_v39, %v10155_v10  ;;  %v7377_v37 = vsel %vm14057_vm7, %v10159_v41, %v10160_v34  ;;  %v8111_v56 = vor.u32 %v8110_v27, %v8107_v26  ;;  %v8322_v48 = vshrl.u32 %v8311_v13, 16 }
0x1334   : > { %7080 = vrot.lane.b32.xlu0 %v7070_v57, %s14009_s25  ;;  %v8325_v62 = vshll.u32 %v8311_v13, 16  ;;  %v7357_v33 = vunpack.c.h.bf16 %v7320_v28  ;;  %v10130_v6 = vunpack.i.h.bf16 %v12920_v40  ;;  %v7047_v42 = vsel %vm14048_vm9, %v10134_v63, %v10135_v46 }
0x1335   : > { %v7639_v4 = vrot.slane %v7638_v36, 4  ;;  %v7383_v57 = vmul.f32 %v10154_v39, %v7354_v55  ;;  %v7384_v5 = vmul.f32 %v7375_v11, %v7355_v32  ;;  %v7644_v8 = vrot.slane %v7643_v2, 4 }
0x1336   : > { %7896 = vrot.lane.b32.xlu1 %v7881_v17, %s13824_s20  ;;  %v7385_v17 = vmul.f32 %v7376_v12, %v7356_v61  ;;  %v7386_v10 = vmul.f32 %v7377_v37, %v7357_v33  ;;  %v7055_v41 = vmul.f32 %v10134_v63, %v7026_v45  ;;  %v7056_v26 = vmul.f32 %v7047_v42, %v7027_v20  ;;  %v13014_v20 = vpop.permute.xlu0 %10162  ;;  %v7111_v33 = vld [vmem:[#allocation4 + $0xc] sm:$0x77] }
0x1337   : > { %v8324_v28 = vrot.slane %v8322_v48, 5  ;;  %v8327_v13 = vrot.slane %v8325_v62, 6  ;;  %v7861_v15 = vsel %vm14058_vm13, %v10130_v6, %v12845_v59  ;;  %v14059_v46 = vunpack.i.l.bf16 %v12920_v40 }
0x1338   : > { %v7840_v27 = vunpack.c.l.bf16 %v7804_v31  ;;  %v7841_v36 = vunpack.c.h.bf16 %v7804_v31  ;;  %v7389_v55 = vpack.c.bf16 %v7386_v10, %v7385_v17  ;;  %v7388_v2 = vpack.c.bf16 %v7384_v5, %v7383_v57 }
0x1339   : > { %v7860_v39 = vsel %vm14060_vm0, %v14059_v46, %v10130_v6  ;;  %v7060_v45 = vpack.c.bf16 %v7056_v26, %v7055_v41  ;;  %v13016_v61 = vor.u32 %v8327_v13, %v8324_v28  ;;  %v10164_v31 = vunpack.i.l.bf16 %v13014_v20 }
0x133a   : > { %8128 = vrot.lane.b32.xlu2 %v8111_v56, %s13822_s19  ;;  %v7870_v32 = vmul.f32 %v7861_v15, %v7841_v36  ;;  %v7869_v63 = vmul.f32 %v7860_v39, %v7840_v27  ;;  %v7392_v12 = vshrl.u32 %v7388_v2, 16  ;;  %v7395_v11 = vshll.u32 %v7388_v2, 16  ;;  %v7919_v39 = vld [vmem:[#allocation4 + $0x14] sm:$0x7] }
0x133b   : > { %v7400_v37 = vshrl.u32 %v7389_v55, 16  ;;  %v7403_v40 = vshll.u32 %v7389_v55, 16  ;;  %v10165_v56 = vunpack.i.h.bf16 %v13014_v20  ;;  %v7066_v62 = vrot.slane %v7060_v45, 5 }
0x133c   : > { %7656 = vrot.lane.b32.xlu0 %v7639_v4, %s13905_s13  ;;  %v7873_v48 = vpack.c.bf16 %v7870_v32, %v7869_v63  ;;  %v7394_v6 = vrot.slane %v7392_v12, 5  ;;  %v7397_v42 = vrot.slane %v7395_v11, 6  ;;  %v13026_v4 = vpop.permute.xlu1 %7164  ;;  %vm14061_vm3 = vcmask 56320  }
0x133d   : > { %v7402_v17 = vrot.slane %v7400_v37, 5  ;;  %v7405_v57 = vrot.slane %v7403_v40, 6  ;;  %v7168_v5 = vsel %vm14061_vm3, %v10165_v56, %v13026_v4  ;;  %vm14062_vm14 = vmmov %vm14061_vm3  ;;  %v7147_v10 = vunpack.c.l.bf16 %v7111_v33 }
0x133e   : > { %7658 = vrot.lane.b32.xlu1 %v7644_v8, %s13905_s13  ;;  %v7167_v8 = vsel %vm14062_vm14, %v10164_v31, %v10165_v56  ;;  %v7148_v41 = vunpack.c.h.bf16 %v7111_v33  ;;  %v7069_v26 = vrot.slane %v7066_v62, 4  ;;  %v7883_v28 = vshrl.u32 %v7873_v48, 16  ;;  %v8151_v56 = vld [vmem:[#allocation4 + $0x14] sm:$0x7]  ;;  %vm14064_vm8 = vmmov %vm14061_vm3 }
0x133f   : > { %v7176_v13 = vmul.f32 %v7167_v8, %v7147_v10  ;;  %v7398_v15 = vor.u32 %v7397_v42, %v7394_v6  ;;  %v7886_v36 = vshll.u32 %v7873_v48, 16  ;;  %v7952_v2 = vunpack.c.l.bf16 %v7919_v39  ;;  %v8243_v33 = vld [vmem:[#allocation4 + $0x14] sm:$0x7]  ;;  %v13039_v48 = vpop.permute.xlu2 %10167 }
0x1340   : > { %v7885_v46 = vrot.slane %v7883_v28, 7  ;;  %v14063_v12 = vunpack.i.h.bf16 %v12847_v22  ;;  %v8184_v42 = vunpack.c.l.bf16 %v8151_v56  ;;  %v7458_v8 = vld [vmem:[#allocation4 + $0x14] sm:$0x7]  ;;  %v8280_v22 = vunpack.c.l.bf16 %v8243_v33 }
0x1341   : > { %v7415_v63 = vrot.slane %v7398_v15, 4  ;;  %v14065_v28 = vunpack.i.h.bf16 %v12864_v60  ;;  %v14066_v39 = vunpack.i.h.bf16 %v12834_v21  ;;  %v10170_v60 = vunpack.i.h.bf16 %v13039_v48 }
0x1342   : > { %8342 = vrot.lane.b32.xlu2 %v13016_v61, %s14010_s0  ;;  %v7888_v55 = vor.u32 %v7886_v36, %v7885_v46  ;;  %v7981_v11 = vmul.f32 %v14063_v12, %v7952_v2  ;;  %vm14068_vm2 = vcmask 1043456   ;;  %vm14070_vm7 = vcmask 523264  }
0x1343   : > { %vm14071_vm9 = vcmask 596992   ;;  %vm14075_vm13 = vmmov %vm14068_vm2  ;;  %vm14076_vm0 = vcmask 465920  }
0x1344   : > { %7767 = vrot.lane.b32.xlu0 %v12894_v52, %s13814_s26  ;;  %v7406_v52 = vor.u32 %v7405_v57, %v7402_v17  ;;  %v7984_v6 = vpack.c.bf16 %v7981_v11, %v7981_v11  ;;  %v7110_v57 = vld [vmem:[#allocation4 + $0x4] sm:$0x77]  ;;  %v8001_v46 = vpop.permute.xlu1 %8000  ;;  %v8026_v11 = vld [vmem:[#allocation5 + $0xe0] sm:$0x33]  ;;  %vm14077_vm3 = vmmov %vm14071_vm9 }
0x1345   : > { %vm14078_vm14 = vmmov %vm14077_vm3 }
0x1346   : > { %7994 = vrot.lane.b32.xlu1 %v12825_v1, %s13829_s18  ;;  %v7177_v1 = vmul.f32 %v7168_v5, %v7148_v41  ;;  %v7416_v32 = vrot.slane %v7406_v52, 4  ;;  %v10055_v5 = vunpack.i.h.bf16 %v12741_v18  ;;  %v7146_v41 = vunpack.c.h.bf16 %v7110_v57 }
0x1348   : > { %v7180_v27 = vpack.c.bf16 %v7177_v1, %v7176_v13  ;;  %v7166_v10 = vsel %vm14064_vm8, %v10055_v5, %v10164_v31  ;;  %v8213_v1 = vmul.f32 %v14065_v28, %v8184_v42  ;;  %v7491_v13 = vunpack.c.l.bf16 %v7458_v8  ;;  %vm14079_vm8 = vmmov %vm14068_vm2 }
0x1349   : > { %v14067_v31 = vunpack.i.h.bf16 %v12908_v47 }
0x134a   : > { %7078 = vrot.lane.b32.xlu2 %v7069_v26, %s14009_s25  ;;  %v7191_v45 = vshrl.u32 %v7180_v27, 16  ;;  %v7194_v20 = vshll.u32 %v7180_v27, 16  ;;  %v13047_v26 = vrot.slane %v7984_v6, 5  ;;  %v8216_v36 = vpack.c.bf16 %v8213_v1, %v8213_v1 }
0x134c   : > { %7418 = vrot.lane.b32.xlu0 %v7398_v15, %s13980_s27  ;;  %v7193_v37 = vrot.slane %v7191_v45, 6  ;;  %v7196_v40 = vrot.slane %v7194_v20, 7  ;;  %v7175_v15 = vmul.f32 %v7166_v10, %v7146_v41  ;;  %v7993_v27 = vrot.slane %v13047_v26, 4  ;;  %v8378_v20 = vld [vmem:[#allocation4 + $0x4] sm:$0x77] }
0x134d   : > { %v8009_v45 = vrot.slane %v8001_v46, 4  ;;  %v8409_v6 = vunpack.c.l.bf16 %v8378_v20  ;;  %v8410_v8 = vunpack.c.h.bf16 %v8378_v20 }
0x134e   : > { %7420 = vrot.lane.b32.xlu1 %v7406_v52, %s13980_s27  ;;  %v7197_v17 = vor.u32 %v7196_v40, %v7193_v37  ;;  %v7229_v52 = vld [vmem:[#allocation4 + $0x14] sm:$0x7]  ;;  %v14069_v40 = vunpack.i.h.bf16 %v12960_v44 }
0x134f   : > { %v7262_v2 = vunpack.c.l.bf16 %v7229_v52 }
0x1351   : > { %v7291_v56 = vmul.f32 %v14069_v40, %v7262_v2 }
0x1352   : > { %7898 = vrot.lane.b32.xlu2 %v7888_v55, %s13824_s20  ;;  %v7520_v55 = vmul.f32 %v14067_v31, %v7491_v13  ;;  %v7805_v13 = vld [vmem:[#allocation4 + $0x14] sm:$0x7] }
0x1354   : > { %7424 = vrot.lane.b32.xlu0 %v7415_v63, %s13980_s27  ;;  %v10169_v63 = vunpack.i.l.bf16 %v13039_v48 }
0x1356   : > { %7426 = vrot.lane.b32.xlu1 %v7416_v32, %s13980_s27  ;;  %v8430_v42 = vsel %vm14071_vm9, %v10169_v63, %v10170_v60  ;;  %v8438_v1 = vmul.f32 %v10169_v63, %v8409_v6  ;;  %v14073_v63 = vunpack.i.h.bf16 %v12938_v49  ;;  %vm14082_vm9 = vcmask 982016  }
0x135a   : > { %7765 = vrot.lane.b32.xlu2 %v12886_v54, %s13814_s26  ;;  %v7145_v54 = vunpack.c.l.bf16 %v7110_v57 }
0x135c   : > { %7208 = vrot.lane.b32.xlu0 %v7197_v17, %s13996_s28  ;;  %v7174_v18 = vmul.f32 %v10055_v5, %v7145_v54  ;;  %v6997_v17 = vld [vmem:[#allocation4 + $0x14] sm:$0x7]  ;;  %v6812_v5 = vld [vmem:[#allocation4 + $0x10] sm:$0x7]  ;;  %v8439_v54 = vmul.f32 %v8430_v42, %v8410_v8 }
0x135e   : > { %7072 = vrot.lane.b32.xlu1 %v7066_v62, %s14009_s25  ;;  %v8309_v62 = vmul.f32 %v14066_v39, %v8280_v22  ;;  %v7179_v12 = vpack.c.bf16 %v7175_v15, %v7174_v18  ;;  %v10176_v22 = vpack.i.bf16 %v12986_v51, %v12984_v23  ;;  %v7030_v15 = vunpack.c.l.bf16 %v6997_v17 }
0x135f   : > { %v6845_v18 = vunpack.c.l.bf16 %v6812_v5  ;;  %v14072_v23 = vunpack.i.h.bf16 %v12734_v53  ;;  %v8443_v2 = vpack.c.bf16 %v8439_v54, %v8438_v1 }
0x1360   : > { %v13056_v32 = vpop.permute.xlu2 %8002  ;;  %v8312_v47 = vpack.c.bf16 %v8309_v62, %v8309_v62  ;;  %v7183_v10 = vshrl.u32 %v7179_v12, 16  ;;  %v7186_v44 = vshll.u32 %v7179_v12, 16 }
0x1361   : > { %v8010_v21 = vrot.slane %v13056_v32, 4  ;;  %v6874_v51 = vmul.f32 %v14072_v23, %v6845_v18  ;;  %v8235_v18 = vld [vmem:[#allocation5 + $0xf0] sm:$0x77] }
0x1362   : > { %7996 = vrot.lane.b32.xlu2 %v12868_v24, %s13829_s18  ;;  %v7523_v24 = vpack.c.bf16 %v7520_v55, %v7520_v55  ;;  %v8330_v41 = vshrl.u32 %v8312_v47, 16  ;;  %v8333_v28 = vshll.u32 %v8312_v47, 16  ;;  %v7185_v39 = vrot.slane %v7183_v10, 6  ;;  %v8034_v47 = vld [vmem:[#allocation4 + $0x14] sm:$0x7] }
0x1363   : > { %v8016_v37 = vsel %vm14068_vm2, %v8009_v45, %v8010_v21  ;;  %v7188_v62 = vrot.slane %v7186_v44, 7  ;;  %v7059_v45 = vmul.f32 %v14073_v63, %v7030_v15  ;;  %v8071_v42 = vunpack.c.l.bf16 %v8034_v47 }
0x1364   : > { %8004 = vrot.lane.b32.xlu0 %v7993_v27, %s13829_s18  ;;  %v8017_v33 = vsel %vm14070_vm7, %v8001_v46, %v8016_v37  ;;  %v7529_v52 = vrot.slane %v7523_v24, 7  ;;  %v7294_v46 = vpack.c.bf16 %v7291_v56, %v7291_v56  ;;  %v7690_v27 = vld [vmem:[#allocation4 + $0x14] sm:$0x7]  ;;  %v8332_v31 = vrot.slane %v8330_v41, 5  ;;  %v13089_v56 = vpop.permute.xlu0 %10172  ;;  %vm14081_vm7 = vmmov %vm14079_vm8 }
0x1365   : > { %v8027_v57 = vsel %vm13751_vm10, %v8017_v33, %v8026_v11  ;;  %v8335_v55 = vrot.slane %v8333_v28, 6  ;;  %v7723_v20 = vunpack.c.l.bf16 %v7690_v27  ;;  %v7189_v12 = vor.u32 %v7188_v62, %v7185_v39  ;;  %v7553_v39 = vld [vmem:[#allocation4 + $0x14] sm:$0x7] }
0x1366   : > { %8224 = vrot.lane.b32.xlu1 %v8216_v36, %s13806_s24  ;;  %8028 = vst [vmem:[#allocation5 + $0xe0] sm:$0x33] %v8027_v57  ;;  %v7842_v36 = vunpack.c.l.bf16 %v7805_v13  ;;  %v6877_v11 = vpack.c.bf16 %v6874_v51, %v6874_v51  ;;  %v8449_v24 = vrot.slane %v8443_v2, 7  ;;  %v7062_v40 = vpack.c.bf16 %v7059_v45, %v7059_v45  ;;  %v7321_v57 = vld [vmem:[#allocation4 + $0x14] sm:$0x7] }
0x1367   : > { %v13087_v53 = vor.u32 %v8335_v55, %v8332_v31  ;;  %v14074_v33 = vunpack.i.h.bf16 %v12830_v58  ;;  %v8100_v8 = vmul.f32 %v12882_v29, %v8071_v42  ;;  %v7358_v58 = vunpack.c.l.bf16 %v7321_v57  ;;  %v6927_v29 = vld [vmem:[%s13557_s4 + $0x10] sm:$0x44] }
0x1368   : > { %v7871_v37 = vmul.f32 %v12845_v59, %v7842_v36  ;;  %v13096_v49 = vrot.slane %v6877_v11, 6  ;;  %v13098_v17 = vrot.slane %v7062_v40, 5  ;;  %v6931_v23 = vunpack.c.l.b16 %v6927_v29  ;;  %v7772_v38 = vpop.permute.xlu2 %7771  ;;  %v8379_v11 = vld [vmem:[#allocation4 + $0xc] sm:$0x77] }
0x1369   : > { %v7752_v6 = vmul.f32 %v14074_v33, %v7723_v20  ;;  %v8103_v1 = vpack.c.bf16 %v8100_v8, %v8100_v8  ;;  %v6932_v51 = vunpack.c.h.b16 %v6927_v29  ;;  %v10175_v2 = vunpack.i.h.bf16 %v13089_v56 }
0x136a   : > { %10177 = vrot.lane.b32.xlu2 %v10176_v22, %s13905_s13  ;;  %v7874_v59 = vpack.c.bf16 %v7871_v37, %v7871_v37  ;;  %v6886_v22 = vrot.slane %v13096_v49, 4  ;;  %v7071_v44 = vrot.slane %v13098_v17, 4  ;;  %v10174_v63 = vunpack.i.l.bf16 %v13089_v56 }
0x136b   : > { %v7755_v5 = vpack.c.bf16 %v7752_v6, %v7752_v6  ;;  %v8121_v36 = vshrl.u32 %v8103_v1, 16  ;;  %v8124_v31 = vshll.u32 %v8103_v1, 16  ;;  %v8338_v47 = vrot.slane %v13016_v61, 4 }
0x136c   : > { %7302 = vrot.lane.b32.xlu0 %v7294_v46, %s13986_s14  ;;  %v7890_v10 = vshrl.u32 %v7874_v59, 16  ;;  %v7893_v46 = vshll.u32 %v7874_v59, 16  ;;  %v6936_v40 = vpack.c.b16 %v6932_v51, %v6932_v51  ;;  %v7780_v42 = vrot.slane %v7772_v38, 4 }
0x136d   : > { %v13105_v28 = vrot.slane %v7755_v5, 6  ;;  %v8123_v33 = vrot.slane %v8121_v36, 6  ;;  %v8126_v6 = vrot.slane %v8124_v31, 7  ;;  %v8411_v57 = vunpack.c.l.bf16 %v8379_v11 }
0x136e   : > { %7534 = vrot.lane.b32.xlu1 %v7529_v52, %s14011_s23  ;;  %v7892_v15 = vrot.slane %v7890_v10, 7  ;;  %v8412_v5 = vunpack.c.h.bf16 %v8379_v11  ;;  %v8431_v8 = vsel %vm14077_vm3, %v10170_v60, %v10174_v63  ;;  %v8432_v61 = vsel %vm14078_vm14, %v10174_v63, %v10175_v2  ;;  %v7313_v63 = vld [vmem:[#allocation5 + $0xa0] sm:$0x77]  ;;  %v7545_v11 = vld [vmem:[#allocation5 + $0xb0] sm:$0xee] }
0x136f   : > { %v7764_v27 = vrot.slane %v13105_v28, 4  ;;  %vm14080_vm2 = vcmask 580608   ;;  %v8127_v29 = vor.u32 %v8126_v6, %v8123_v33  ;;  %v8440_v48 = vmul.f32 %v8431_v8, %v8411_v57 }
0x1370   : > { %v7895_v45 = vor.u32 %v7893_v46, %v7892_v15  ;;  %v8441_v15 = vmul.f32 %v8432_v61, %v8412_v5  ;;  %v6925_v61 = vld [vmem:[#allocation4 + $0x4] sm:$0x77]  ;;  %vm14086_vm14 = vcmask 515072  }
0x1372   : > { %7206 = vrot.lane.b32.xlu2 %v7189_v12, %s13996_s28  ;;  %v7590_v12 = vunpack.c.l.bf16 %v7553_v39 }
0x1374   : > { %8344 = vrot.lane.b32.xlu0 %v13087_v53, %s14010_s0 }
0x1376   : > { %8452 = vrot.lane.b32.xlu1 %v8449_v24, %s14023_s5  ;;  %v6935_v24 = vpack.c.b16 %v6931_v23, %v6931_v23  ;;  %v8444_v23 = vpack.c.bf16 %v8441_v15, %v8440_v48 }
0x1378   : > { %v6940_v46 = vshrl.u32 %v6935_v24, 16 }
0x137a   : > { %7074 = vrot.lane.b32.xlu2 %v12980_v14, %s14009_s25  ;;  %v7387_v14 = vmul.f32 %v10160_v34, %v7358_v58  ;;  %v6941_v36 = vpack.i.b16 %v6940_v46, %v6940_v46  ;;  %v8337_v46 = vrot.slane %v12941_v7, 4 }
0x137c   : > { %v8221_v41 = vpop.permute.xlu0 %8220  ;;  %6897 = vrot.lane.b32.xlu0 %v6886_v22, %s14022_s17  ;;  %v7390_v20 = vpack.c.bf16 %v7387_v14, %v7387_v14  ;;  %v7797_v22 = vld [vmem:[#allocation5 + $0xd0] sm:$0x11]  ;;  %v6943_v33 = vperm.slane %v6941_v36, 2 }
0x137d   : > { %v8226_v54 = vrot.slane %v8221_v41, 4 }
0x137e   : > { %7082 = vrot.lane.b32.xlu1 %v7071_v44, %s14009_s25  ;;  %v13108_v13 = vpop.permute.xlu1 %8222  ;;  %v7408_v10 = vshrl.u32 %v7390_v20, 16  ;;  %v7411_v58 = vshll.u32 %v7390_v20, 16  ;;  %v7619_v44 = vmul.f32 %v12918_v16, %v7590_v12  ;;  %v6945_v16 = vshrl.u32 %v6936_v40, 16 }
0x137f   : > { %v8227_v52 = vrot.slane %v13108_v13, 4 }
0x1380   : > { %v7410_v14 = vrot.slane %v7408_v10, 5  ;;  %v7622_v39 = vpack.c.bf16 %v7619_v44, %v7619_v44 }
0x1381   : > { %v8229_v62 = vsel %vm14075_vm13, %v8226_v54, %v8227_v52  ;;  %vm14083_vm13 = vmmov %vm14081_vm7 }
0x1382   : > { %v8230_v55 = vsel %vm14076_vm0, %v8221_v41, %v8229_v62  ;;  %7775 = vrot.lane.b32.xlu2 %v7764_v27, %s13814_s26  ;;  %vm14084_vm0 = vmmov %vm14077_vm3 }
0x1383   : > { %v8236_v34 = vsel %vm13756_vm5, %v8230_v55, %v8235_v18  ;;  %v7413_v18 = vrot.slane %v7411_v58, 6  ;;  %v7632_v55 = vshll.u32 %v7622_v39, 16  ;;  %vm14085_vm3 = vmmov %vm14081_vm7 }
0x1384   : > { %8237 = vst [vmem:[#allocation5 + $0xf0] sm:$0x77] %v8236_v34  ;;  %v13128_v37 = vpop.permute.xlu0 %7773  ;;  %8348 = vrot.lane.b32.xlu0 %v8338_v47, %s14010_s0  ;;  %v8450_v47 = vrot.slane %v8444_v23, 7 }
0x1385   : > { %v7781_v59 = vrot.slane %v13128_v37, 4  ;;  %v13154_v31 = vor.u32 %v7413_v18, %v7410_v14  ;;  %v7634_v6 = vrot.slane %v7632_v55, 5  ;;  %v7112_v14 = vld [vmem:[#allocation4 + $0x14] sm:$0x7] }
0x1386   : > { %7900 = vrot.lane.b32.xlu1 %v7895_v45, %s13824_s20  ;;  %v7299_v41 = vpop.permute.xlu1 %7298  ;;  %v6946_v45 = vpack.i.b16 %v6945_v16, %v6945_v16  ;;  %v8143_v16 = vld [vmem:[#allocation5 + $0xe0] sm:$0xee]  ;;  %s484_s20 = scalar_lea.vmem %s13565_s12, %s9108_s1 }
0x1387   : > { %v7787_v1 = vsel %vm14079_vm8, %v7780_v42, %v7781_v59  ;;  %v7304_v51 = vrot.slane %v7299_v41, 4  ;;  %v7417_v57 = vrot.slane %v13154_v31, 4  ;;  %vm14087_vm8 = vmmov %vm14085_vm3 }
0x1388   : > { %v7788_v54 = vsel %vm14080_vm2, %v7772_v38, %v7787_v1  ;;  %v6948_v5 = vperm.slane %v6946_v45, 2  ;;  %v6960_v1 = vunpack.c.h.bf16 %v6925_v61  ;;  %vm14088_vm2 = vcmask 457728  }
0x1389   : > { %v7798_v60 = vsel %vm13748_vm12, %v7788_v54, %v7797_v22  ;;  %v7645_v22 = vshrl.u32 %v7622_v39, 16  ;;  %v6963_v54 = vunpack.c.l.bf16 %v6943_v33 }
0x138a   : > { %7799 = vst [vmem:[#allocation5 + $0xd0] sm:$0x11] %v7798_v60  ;;  %8132 = vrot.lane.b32.xlu2 %v8127_v29, %s13822_s19  ;;  %v6964_v29 = vunpack.c.l.bf16 %v6948_v5  ;;  %v8850_v5 = vld [vmem:[%s13562_s9] sm:$0xff] }
0x138b   : > { %v7647_v60 = vrot.slane %v7645_v22, 4  ;;  %v8370_v33 = vld [vmem:[#allocation5 + $0xf0] sm:$0xcc] }
0x138c   : > { %v13149_v62 = vpop.permute.xlu2 %7300  ;;  %7769 = vrot.lane.b32.xlu0 %v13105_v28, %s13814_s26 }
0x138d   : > { %v7305_v27 = vrot.slane %v13149_v62, 4  ;;  %v7648_v55 = vor.u32 %v7647_v60, %v7634_v6 }
0x138e   : > { %7998 = vrot.lane.b32.xlu1 %v13047_v26, %s13829_s18  ;;  %v7531_v34 = vpop.permute.xlu0 %7530 }
0x138f   : > { %v7307_v26 = vsel %vm14081_vm7, %v7304_v51, %v7305_v27  ;;  %v7536_v28 = vrot.slane %v7531_v34, 4  ;;  %v6968_v51 = vmul.f32 %v6964_v29, %v6960_v1  ;;  %vm14089_vm7 = vmmov %vm14085_vm3  ;;  %v8380_v29 = vld [vmem:[#allocation4 + $0x14] sm:$0x7] }
0x1390   : > { %v13156_v38 = vpop.permute.xlu1 %7532  ;;  %v7308_v12 = vsel %vm14082_vm9, %v7299_v41, %v7307_v26  ;;  %v6959_v41 = vunpack.c.l.bf16 %v6925_v61  ;;  %vm14090_vm9 = vcmask 7168  }
0x1391   : > { %v7537_v20 = vrot.slane %v13156_v38, 4  ;;  %v7314_v24 = vsel %vm13756_vm5, %v7308_v12, %v7313_v63  ;;  %v7149_v63 = vunpack.c.l.bf16 %v7112_v14 }
0x1392   : > { %7315 = vst [vmem:[#allocation5 + $0xa0] sm:$0x77] %v7314_v24  ;;  %8454 = vrot.lane.b32.xlu2 %v8450_v47, %s14023_s5  ;;  %v6967_v23 = vmul.f32 %v6963_v54, %v6959_v41 }
0x1393   : > { %v7539_v40 = vsel %vm14083_vm13, %v7536_v28, %v7537_v20  ;;  %vm14091_vm13 = vmmov %vm14085_vm3 }
0x1394   : > { %v7540_v42 = vsel %vm14084_vm0, %v7531_v34, %v7539_v40  ;;  %v8129_v10 = vpop.permute.xlu2 %8128  ;;  %7654 = vrot.lane.b32.xlu0 %v7634_v6, %s13905_s13  ;;  %v6971_v28 = vpack.c.bf16 %v6968_v51, %v6967_v23  ;;  %v7178_v40 = vmul.f32 %v13026_v4, %v7149_v63  ;;  %v6919_v6 = vld [vmem:[#allocation5 + $0x80] sm:$0x11]  ;;  %v8339_v4 = vrot.slane %v13087_v53, 4 }
0x1395   : > { %v7546_v8 = vsel %vm13926_vm15, %v7540_v42, %v7545_v11  ;;  %v8134_v48 = vrot.slane %v8129_v10, 4  ;;  %vm14092_vm0 = vcmask 1039360  }
0x1396   : > { %7547 = vst [vmem:[#allocation5 + $0xb0] sm:$0xee] %v7546_v8  ;;  %7428 = vrot.lane.b32.xlu1 %v7417_v57, %s13980_s27  ;;  %v13175_v44 = vpop.permute.xlu0 %8130  ;;  %v6974_v8 = vshrl.u32 %v6971_v28, 16 }
0x1397   : > { %v8135_v15 = vrot.slane %v13175_v44, 4 }
0x1398   : > { %v8341_v58 = vpop.permute.xlu1 %8340  ;;  %v6976_v41 = vrot.slane %v6974_v8, 7 }
0x1399   : > { %v8137_v18 = vsel %vm14085_vm3, %v8134_v48, %v8135_v15  ;;  %v8352_v34 = vrot.slane %v8341_v58, 4  ;;  %v6977_v48 = vshll.u32 %v6971_v28, 16 }
0x139a   : > { %v8138_v39 = vsel %vm14086_vm14, %v8129_v10, %v8137_v18  ;;  %8346 = vrot.lane.b32.xlu2 %v8337_v46, %s14010_s0  ;;  %v7181_v10 = vpack.c.bf16 %v7178_v40, %v7178_v40  ;;  %v7104_v18 = vld [vmem:[#allocation5 + $0x90] sm:$0x33]  ;;  %v8413_v40 = vunpack.c.l.bf16 %v8380_v29  ;;  %vm14093_vm14 = vcmask 531456  }
0x139b   : > { %v8144_v36 = vsel %vm11068_vm4, %v8138_v39, %v8143_v16 }
0x139c   : > { %8145 = vst [vmem:[#allocation5 + $0xe0] sm:$0xee] %v8144_v36  ;;  %v13188_v7 = vpop.permute.xlu2 %8342  ;;  %7076 = vrot.lane.b32.xlu0 %v13098_v17, %s14009_s25  ;;  %v7199_v14 = vshrl.u32 %v7181_v10, 16  ;;  %v7202_v53 = vshll.u32 %v7181_v10, 16  ;;  %v7911_v10 = vld [vmem:[#allocation5 + $0xd0] sm:$0x77] }
0x139d   : > { %v8353_v45 = vrot.slane %v13188_v7, 4 }
0x139e   : > { %6891 = vrot.lane.b32.xlu1 %v13096_v49, %s14022_s17  ;;  %v6894_v12 = vpop.permute.xlu0 %6893  ;;  %v7649_v49 = vrot.slane %v7648_v55, 4  ;;  %v6979_v55 = vor.u32 %v6977_v48, %v6976_v41  ;;  %s9507_s17 = sshll.u32 %s14166_s22, 5 }
0x139f   : > { %v8358_v11 = vsel %vm14087_vm8, %v8352_v34, %v8353_v45  ;;  %v6902_v24 = vrot.slane %v6894_v12, 4  ;;  %vm14094_vm8 = vmmov %vm14085_vm3  ;;  %s13528_s15 = scalar_lea.vmem %s13564_s11, %s9507_s17 }
0x13a0   : > { %v13193_v26 = vpop.permute.xlu1 %6895  ;;  %v8359_v17 = vsel %vm14088_vm2, %v8341_v58, %v8358_v11  ;;  %vm14095_vm2 = vcmask 588800  }
0x13a1   : > { %v6903_v47 = vrot.slane %v13193_v26, 4  ;;  %v8371_v42 = vsel %vm13839_vm11, %v8359_v17, %v8370_v33 }
0x13a2   : > { %8372 = vst [vmem:[#allocation5 + $0xf0] sm:$0xcc] %v8371_v42  ;;  %7660 = vrot.lane.b32.xlu2 %v7649_v49, %s13905_s13  ;;  %v7204_v49 = vrot.slane %v7202_v53, 7 }
0x13a3   : > { %v6909_v57 = vsel %vm14089_vm7, %v6902_v24, %v6903_v47  ;;  %v9479_v39 = vld [vmem:[#allocation5 + $0xe0] sm:$0xf]  ;;  %v9598_v51 = vld [vmem:[#allocation5 + $0xe4] sm:$0xf]  ;;  %v7201_v24 = vrot.slane %v7199_v14, 6  ;;  %vm14096_vm7 = vmmov %vm14085_vm3 }
0x13a4   : > { %v6910_v61 = vsel %vm14090_vm9, %v6894_v12, %v6909_v57  ;;  %v7079_v58 = vpop.permute.xlu2 %7078  ;;  %8350 = vrot.lane.b32.xlu0 %v8339_v4, %s14010_s0  ;;  %vm14097_vm9 = vcmask 580608  }
0x13a5   : > { %v6920_v22 = vsel %vm13748_vm12, %v6910_v61, %v6919_v6  ;;  %v7087_v60 = vrot.slane %v7079_v58, 4  ;;  %v7205_v4 = vor.u32 %v7204_v49, %v7201_v24 }
0x13a6   : > { %6921 = vst [vmem:[#allocation5 + $0x80] sm:$0x11] %v6920_v22  ;;  %8853 = vperm.xlu1 %9919, %v8850_v5   ;;  %v13215_v54 = vpop.permute.xlu0 %7080  ;;  %v8442_v22 = vmul.f32 %v10175_v2, %v8413_v40  ;;  %v7448_v40 = vld [vmem:[#allocation5 + $0xa0] sm:$0xcc] }
0x13a7   : > { %v7088_v46 = vrot.slane %v13215_v54, 4 }
0x13a8   : > { %v7897_v1 = vpop.permute.xlu1 %7896 }
0x13a9   : > { %v7094_v16 = vsel %vm14091_vm13, %v7087_v60, %v7088_v46  ;;  %v9600_v23 = vld [vmem:[#allocation5 + $0xec] sm:$0xf0]  ;;  %v9481_v36 = vld [vmem:[#allocation5 + $0xf0] sm:$0xf0]  ;;  %v7902_v6 = vrot.slane %v7897_v1, 4  ;;  %v8445_v60 = vpack.c.bf16 %v8442_v22, %v8442_v22  ;;  %vm14098_vm13 = vmmov %vm14085_vm3 }
0x13aa   : > { %v7095_v63 = vsel %vm14092_vm0, %v7079_v58, %v7094_v16  ;;  %7422 = vrot.lane.b32.xlu2 %v13154_v31, %s13980_s27  ;;  %v9480_v34 = vor.u32 %v9600_v23, %v9479_v39  ;;  %v9484_v28 = vor.u32 %v9598_v51, %v9481_v36  ;;  %vm14099_vm0 = vcmask 523264  }
0x13ab   : > { %v7105_v11 = vsel %vm13751_vm10, %v7095_v63, %v7104_v18  ;;  %v8451_v18 = vrot.slane %v8445_v60, 7 }
0x13ac   : > { %7106 = vst [vmem:[#allocation5 + $0x90] sm:$0x33] %v7105_v11  ;;  %8706 = vmatpush.bf16.msra.mxu0 %v9480_v34  ;;  %8734 = vmatpush.bf16.msra.mxu2 %v9484_v28  ;;  %v13228_v17 = vpop.permute.xlu2 %7898  ;;  %v8860_v11 = vld [vmem:[%s13563_s10] sm:$0xff] }
0x13ad   : > { %v6989_v12 = vld [vmem:[#allocation5 + $0x80] sm:$0x77]  ;;  %v7903_v31 = vrot.slane %v13228_v17, 4 }
0x13ae   : > { %v6990_v33 = vsel %vm12499_vm1, %v6979_v55, %v6989_v12  ;;  %v7657_v57 = vpop.permute.xlu0 %7656 }
0x13af   : > { %6991 = vst [vmem:[#allocation5 + $0x80] sm:$0x77] %v6990_v33  ;;  %v7905_v5 = vsel %vm14085_vm3, %v7902_v6, %v7903_v31  ;;  %v7665_v61 = vrot.slane %v7657_v57, 4 }
0x13b0   : > { %v13231_v42 = vpop.permute.xlu1 %7658  ;;  %v7906_v58 = vsel %vm14093_vm14, %v7897_v1, %v7905_v5  ;;  %vm14100_vm14 = vcmask 973824  }
0x13b1   : > { %v7666_v8 = vrot.slane %v13231_v42, 4  ;;  %v7912_v41 = vsel %vm12499_vm1, %v7906_v58, %v7911_v10 }
0x13b2   : > { %7913 = vst [vmem:[#allocation5 + $0xd0] sm:$0x77] %v7912_v41  ;;  %7210 = vrot.lane.b32.xlu2 %v7205_v4, %s13996_s28 }
0x13b3   : > { %v7672_v29 = vsel %vm14094_vm8, %v7665_v61, %v7666_v8  ;;  %vm14101_vm8 = vmmov %vm14085_vm3 }
0x13b4   : > { %v7673_v48 = vsel %vm14095_vm2, %v7657_v57, %v7672_v29  ;;  %v7766_v14 = vpop.permute.xlu2 %7765  ;;  %vm14102_vm2 = vmmov %vm14085_vm3 }
0x13b5   : > { %7686 = vst [vmem:[#allocation5 + $0xc0] sm:$0x33] %v7673_v48  ;;  %v7777_v53 = vrot.slane %v7766_v14, 4 }
0x13b6   : > { %v13247_v2 = vpop.permute.xlu0 %7767 }
0x13b7   : > { %v7778_v1 = vrot.slane %v13247_v2, 4 }
0x13b8   : > { %v7995_v56 = vpop.permute.xlu1 %7994 }
0x13b9   : > { %v7783_v39 = vsel %vm14096_vm7, %v7777_v53, %v7778_v1  ;;  %v8006_v51 = vrot.slane %v7995_v56, 4  ;;  %vm14103_vm7 = vcmask 588800  }
0x13ba   : > { %v7784_v16 = vsel %vm14097_vm9, %v7766_v14, %v7783_v39  ;;  %8456 = vrot.lane.b32.xlu2 %v8451_v18, %s14023_s5  ;;  %vm14104_vm9 = vmmov %vm14100_vm14 }
0x13bb   : > { %7795 = vst [vmem:[#allocation5 + $0xc0] sm:$0xcc] %v7784_v16 }
0x13bc   : > { %v13255_v23 = vpop.permute.xlu2 %7996 }
0x13bd   : > { %v8007_v36 = vrot.slane %v13255_v23, 4 }
0x13be   : > { %v7419_v63 = vpop.permute.xlu0 %7418 }
0x13bf   : > { %v8012_v34 = vsel %vm14098_vm13, %v8006_v51, %v8007_v36  ;;  %v7430_v12 = vrot.slane %v7419_v63, 4  ;;  %v7680_v51 = vld [vmem:[#allocation5 + $0xb0] sm:$0x88]  ;;  %vm14105_vm13 = vmmov %vm14102_vm2 }
0x13c0   : > { %v13258_v55 = vpop.permute.xlu1 %7420  ;;  %v8013_v24 = vsel %vm14099_vm0, %v7995_v56, %v8012_v34  ;;  %vm14106_vm0 = vcmask 990208  }
0x13c1   : > { %v7431_v28 = vrot.slane %v13258_v55, 4  ;;  %8024 = vst [vmem:[#allocation5 + $0xd0] sm:$0x88] %v8013_v24 }
0x13c2   : > { %8863 = vperm.xlu2 %9920, %v8860_v11   ;;  %v9463_v48 = vld [vmem:[#allocation5 + $0xc0] sm:$0xf]  ;;  %v9594_v14 = vld [vmem:[#allocation5 + $0xc4] sm:$0xf] }
0x13c3   : > { %v7436_v49 = vsel %vm14085_vm3, %v7430_v12, %v7431_v28  ;;  %vm14107_vm3 = vmmov %vm14102_vm2 }
0x13c4   : > { %v7437_v33 = vsel %vm14100_vm14, %v7419_v63, %v7436_v49  ;;  %v13274_v57 = vpop.permute.xlu2 %10177  ;;  %vm14108_vm14 = vcmask 1039360  }
0x13c5   : > { %v7449_v6 = vsel %vm13839_vm11, %v7437_v33, %v7448_v40  ;;  %v10180_v5 = vunpack.i.h.bf16 %v13274_v57  ;;  %v10179_v61 = vunpack.i.l.bf16 %v13274_v57 }
0x13c6   : > { %7450 = vst [vmem:[#allocation5 + $0xa0] sm:$0xcc] %v7449_v6  ;;  %v7425_v22 = vpop.permute.xlu0 %7424  ;;  %v6928_v6 = vld [vmem:[%s13557_s4 + $0x18] sm:$0x44] }
0x13c7   : > { %v13282_v10 = vrot.slane %v10180_v5, 4  ;;  %v7662_v58 = vrot.slane %v10179_v61, 4  ;;  %v7433_v29 = vrot.slane %v7425_v22, 4 }
0x13c8   : > { %v13278_v4 = vpop.permute.xlu1 %7426  ;;  %v9596_v60 = vld [vmem:[#allocation5 + $0xcc] sm:$0xf0]  ;;  %v9465_v56 = vld [vmem:[#allocation5 + $0xd0] sm:$0xf0] }
0x13c9   : > { %v7434_v41 = vrot.slane %v13278_v4, 4  ;;  %v7668_v53 = vsel %vm14101_vm8, %v7662_v58, %v13282_v10  ;;  %v9464_v39 = vor.u32 %v9596_v60, %v9463_v48  ;;  %v9468_v16 = vor.u32 %v9594_v14, %v9465_v56  ;;  %vm14109_vm8 = vmmov %vm14102_vm2 }
0x13ca   : > { %v7669_v63 = vsel %vm14103_vm7, %v10179_v61, %v7668_v53  ;;  %v6933_v48 = vunpack.c.l.b16 %v6928_v6  ;;  %vm14110_vm7 = vcmask 465920  }
0x13cb   : > { %v7440_v18 = vsel %vm14102_vm2, %v7433_v29, %v7434_v41  ;;  %v7681_v12 = vsel %vm13860_vm6, %v7669_v63, %v7680_v51  ;;  %8707 = vmatpush.bf16.msra.mxu0 %v9464_v39  ;;  %8735 = vmatpush.bf16.msra.mxu2 %v9468_v16 }
0x13cc   : > { %v7441_v34 = vsel %vm14104_vm9, %v7425_v22, %v7440_v18  ;;  %7682 = vst [vmem:[#allocation5 + $0xb0] sm:$0x88] %v7681_v12  ;;  %v7207_v11 = vpop.permute.xlu2 %7206  ;;  %v7221_v22 = vld [vmem:[#allocation5 + $0x90] sm:$0xee]  ;;  %v6934_v18 = vunpack.c.h.b16 %v6928_v6  ;;  %vm14111_vm9 = vcmask 523264  }
0x13cd   : > { %7454 = vst [vmem:[#allocation5 + $0xb0] sm:$0x11] %v7441_v34  ;;  %v7212_v40 = vrot.slane %v7207_v11, 4  ;;  %v9447_v29 = vld [vmem:[#allocation5 + $0xa0] sm:$0xf] }
0x13ce   : > { %v13294_v49 = vpop.permute.xlu0 %7208  ;;  %v9590_v56 = vld [vmem:[#allocation5 + $0xa4] sm:$0xf]  ;;  %v6938_v6 = vpack.c.b16 %v6934_v18, %v6934_v18 }
0x13cf   : > { %v13667_v33 = vrot.slane %v13294_v49, 4  ;;  %v14148_v43 = vrot.slane %v13294_v49, 4 }
0x13d0   : > { %v7073_v24 = vpop.permute.xlu1 %7072 }
0x13d1   : > { %v7215_v61 = vsel %vm14105_vm13, %v7212_v40, %v13667_v33  ;;  %v7084_v63 = vrot.slane %v7073_v24, 4  ;;  %v6937_v40 = vpack.c.b16 %v6933_v48, %v6933_v48  ;;  %v8238_v33 = vld [vmem:[#allocation5 + $0xf8] sm:$0x77]  ;;  %vm14112_vm13 = vmmov %vm14102_vm2 }
0x13d2   : > { %v7216_v58 = vsel %vm14106_vm0, %v7207_v11, %v7215_v61  ;;  %vm14113_vm0 = vcmask 580608  }
0x13d3   : > { %v7222_v60 = vsel %vm11068_vm4, %v7216_v58, %v7221_v22  ;;  %v6950_v18 = vshrl.u32 %v6937_v40, 16 }
0x13d4   : > { %v9592_v14 = vld [vmem:[#allocation5 + $0xac] sm:$0xf0]  ;;  %v9449_v53 = vld [vmem:[#allocation5 + $0xb0] sm:$0xf0]  ;;  %7223 = vst [vmem:[#allocation5 + $0x90] sm:$0xee] %v7222_v60  ;;  %v13306_v39 = vpop.permute.xlu2 %7074 }
0x13d5   : > { %v9448_v16 = vor.u32 %v9592_v14, %v9447_v29  ;;  %v9452_v51 = vor.u32 %v9590_v56, %v9449_v53  ;;  %v7085_v34 = vrot.slane %v13306_v39, 4  ;;  %v8029_v29 = vld [vmem:[#allocation5 + $0xe8] sm:$0x33] }
0x13d6   : > { %v8005_v11 = vpop.permute.xlu0 %8004 }
0x13d7   : > { %8708 = vmatpush.bf16.msra.mxu0 %v9448_v16  ;;  %8736 = vmatpush.bf16.msra.mxu2 %v9452_v51  ;;  %v7090_v61 = vsel %vm14107_vm3, %v7084_v63, %v7085_v34  ;;  %v8011_v58 = vrot.slane %v8005_v11, 4  ;;  %v6955_v51 = vshrl.u32 %v6938_v6, 16  ;;  %vm14114_vm3 = vmmov %vm14102_vm2 }
0x13d8   : > { %v8225_v12 = vpop.permute.xlu1 %8224  ;;  %v7091_v60 = vsel %vm14108_vm14, %v7073_v24, %v7090_v61  ;;  %v6951_v61 = vpack.i.b16 %v6950_v18, %v6950_v18  ;;  %vm14115_vm14 = vmmov %vm14102_vm2 }
0x13d9   : > { %v8228_v22 = vrot.slane %v8225_v12, 4  ;;  %7102 = vst [vmem:[#allocation5 + $0x80] sm:$0x88] %v7091_v60  ;;  %v8018_v48 = vsel %vm14102_vm2, %v8010_v21, %v8011_v58  ;;  %v7800_v12 = vld [vmem:[#allocation5 + $0xd8] sm:$0x11]  ;;  %v6956_v58 = vpack.i.b16 %v6955_v51, %v6955_v51  ;;  %vm14117_vm2 = vcmask 982016  }
0x13da   : > { %v8019_v53 = vsel %vm14111_vm9, %v13056_v32, %v8018_v48  ;;  %v9584_v51 = vld [vmem:[#allocation5 + $0x6c] sm:$0xf0]  ;;  %vm14120_vm9 = vmmov %vm14114_vm3 }
0x13db   : > { %v8231_v14 = vsel %vm14109_vm8, %v8227_v52, %v8228_v22  ;;  %v8030_v16 = vsel %vm13751_vm10, %v8019_v53, %v8029_v29  ;;  %v7316_v22 = vld [vmem:[#allocation5 + $0xa8] sm:$0x77]  ;;  %v9588_v29 = vld [vmem:[#allocation5 + $0x8c] sm:$0xf0]  ;;  %v9433_v18 = vld [vmem:[#allocation5 + $0x90] sm:$0xf0] }
0x13dc   : > { %v8232_v56 = vsel %vm14110_vm7, %v13108_v13, %v8231_v14  ;;  %v7776_v52 = vpop.permute.xlu2 %7775  ;;  %8031 = vst [vmem:[#allocation5 + $0xe8] sm:$0x33] %v8030_v16  ;;  %v7548_v13 = vld [vmem:[#allocation5 + $0xb8] sm:$0xee]  ;;  %vm14116_vm8 = vcmask 596992   ;;  %vm14119_vm7 = vcmask 515072  }
0x13dd   : > { %v8239_v24 = vsel %vm13756_vm5, %v8232_v56, %v8238_v33  ;;  %v7782_v63 = vrot.slane %v7776_v52, 4 }
0x13de   : > { %8240 = vst [vmem:[#allocation5 + $0xf8] sm:$0x77] %v8239_v24  ;;  %v7303_v11 = vpop.permute.xlu0 %7302 }
0x13df   : > { %v7789_v32 = vsel %vm14112_vm13, %v7781_v59, %v7782_v63  ;;  %v7306_v33 = vrot.slane %v7303_v11, 4  ;;  %v9417_v63 = vld [vmem:[#allocation5 + $0x70] sm:$0xf0]  ;;  %vm14121_vm13 = vcmask 457728  }
0x13e0   : > { %v7535_v21 = vpop.permute.xlu1 %7534  ;;  %v7790_v6 = vsel %vm14113_vm0, %v13128_v37, %v7789_v32  ;;  %v9431_v60 = vld [vmem:[#allocation5 + $0x80] sm:$0xf]  ;;  %v9586_v14 = vld [vmem:[#allocation5 + $0x84] sm:$0xf]  ;;  %vm14122_vm0 = vmmov %vm14114_vm3 }
0x13e1   : > { %v7538_v40 = vrot.slane %v7535_v21, 4  ;;  %v7801_v48 = vsel %vm13748_vm12, %v7790_v6, %v7800_v12  ;;  %v7309_v59 = vsel %vm14115_vm14, %v7305_v27, %v7306_v33  ;;  %v9432_v53 = vor.u32 %v9588_v29, %v9431_v60  ;;  %v6926_v27 = vld [vmem:[#allocation4 + $0xc] sm:$0x77]  ;;  %vm14124_vm14 = vmmov %vm14122_vm0 }
0x13e2   : > { %7802 = vst [vmem:[#allocation5 + $0xd8] sm:$0x11] %v7801_v48  ;;  %v7310_v24 = vsel %vm14117_vm2, %v13149_v62, %v7309_v59  ;;  %v9436_v16 = vor.u32 %v9586_v14, %v9433_v18  ;;  %v6953_v12 = vperm.slane %v6951_v61, 2  ;;  %v6958_v21 = vperm.slane %v6956_v58, 2  ;;  %v9401_v58 = vld [vmem:[#allocation5 + $0x50] sm:$0xf0] }
0x13e3   : > { %v7541_v56 = vsel %vm14114_vm3, %v7537_v20, %v7538_v40  ;;  %v7317_v20 = vsel %vm13756_vm5, %v7310_v24, %v7316_v22  ;;  %8709 = vmatpush.bf16.msra.mxu0 %v9432_v53  ;;  %v9582_v40 = vld [vmem:[#allocation5 + $0x64] sm:$0xf]  ;;  %v6961_v29 = vunpack.c.l.bf16 %v6926_v27  ;;  %v6962_v9 = vunpack.c.h.bf16 %v6926_v27  ;;  %vm14118_vm5 = vmmov %vm14114_vm3  ;;  %v8146_v59 = vld [vmem:[#allocation5 + $0xe8] sm:$0xee] }
0x13e4   : > { %v7542_v37 = vsel %vm14116_vm8, %v13156_v38, %v7541_v56  ;;  %8737 = vmatpush.bf16.msra.mxu2 %v9436_v16  ;;  %v8133_v11 = vpop.permute.xlu2 %8132  ;;  %v9415_v38 = vld [vmem:[#allocation5 + $0x60] sm:$0xf]  ;;  %7318 = vst [vmem:[#allocation5 + $0xa8] sm:$0x77] %v7317_v20  ;;  %v9420_v60 = vor.u32 %v9582_v40, %v9417_v63  ;;  %v6965_v14 = vunpack.c.l.bf16 %v6953_v12  ;;  %v6966_v48 = vunpack.c.l.bf16 %v6958_v21  ;;  %v9576_v20 = vld [vmem:[#allocation5 + $0x2c] sm:$0xf0]  ;;  %vm14125_vm8 = vmmov %vm14122_vm0 }
0x13e5   : > { %v7549_v52 = vsel %vm13926_vm15, %v7542_v37, %v7548_v13  ;;  %v8136_v32 = vrot.slane %v8133_v11, 4  ;;  %v9416_v62 = vor.u32 %v9584_v51, %v9415_v38  ;;  %v9580_v13 = vld [vmem:[#allocation5 + $0x4c] sm:$0xf0]  ;;  %v9399_v53 = vld [vmem:[#allocation5 + $0x40] sm:$0xf]  ;;  %vm14123_vm3 = vcmask 449536  }
0x13e6   : > { %7550 = vst [vmem:[#allocation5 + $0xb8] sm:$0xee] %v7549_v52  ;;  %v8345_v6 = vpop.permute.xlu0 %8344  ;;  %v9400_v24 = vor.u32 %v9580_v13, %v9399_v53  ;;  %v8373_v16 = vld [vmem:[#allocation5 + $0xf8] sm:$0xcc]  ;;  %v6969_v63 = vmul.f32 %v6965_v14, %v6961_v29  ;;  %v6970_v27 = vmul.f32 %v6966_v48, %v6962_v9  ;;  %v9385_v12 = vld [vmem:[#allocation5 + $0x30] sm:$0xf0] }
0x13e7   : > { %v8139_v22 = vsel %vm14118_vm5, %v8135_v15, %v8136_v32  ;;  %v8354_v61 = vrot.slane %v8345_v6, 4  ;;  %8710 = vmatpush.bf16.msra.mxu0 %v9416_v62  ;;  %v9578_v15 = vld [vmem:[#allocation5 + $0x44] sm:$0xf]  ;;  %v9572_v13 = vld [vmem:[#allocation5 + $0xc] sm:$0xf0]  ;;  %vm14126_vm2 = vcmask 1039360  }
0x13e8   : > { %v8453_v33 = vpop.permute.xlu1 %8452  ;;  %v8140_v56 = vsel %vm14119_vm7, %v13175_v44, %v8139_v22  ;;  %8738 = vmatpush.bf16.msra.mxu2 %v9420_v60  ;;  %v9404_v52 = vor.u32 %v9578_v15, %v9401_v58  ;;  %v9574_v62 = vld [vmem:[#allocation5 + $0x24] sm:$0xf]  ;;  %v6972_v22 = vpack.c.bf16 %v6970_v27, %v6969_v63  ;;  %v9369_v58 = vld [vmem:[#allocation5 + $0x10] sm:$0xf0]  ;;  %v7107_v48 = vld [vmem:[#allocation5 + $0x98] sm:$0x33] }
0x13e9   : > { %v8147_v18 = vsel %vm11068_vm4, %v8140_v56, %v8146_v59  ;;  %v8360_v37 = vsel %vm14120_vm9, %v8353_v45, %v8354_v61  ;;  %v9383_v45 = vld [vmem:[#allocation5 + $0x20] sm:$0xf]  ;;  %v8458_v11 = vrot.slane %v8453_v33, 4  ;;  %v9388_v60 = vor.u32 %v9574_v62, %v9385_v12  ;;  %v6922_v56 = vld [vmem:[#allocation5 + $0x88] sm:$0x11]  ;;  %vm14131_vm9 = vmmov %vm14121_vm13 }
0x13ea   : > { %8148 = vst [vmem:[#allocation5 + $0xe8] sm:$0xee] %v8147_v18  ;;  %v8361_v51 = vsel %vm14121_vm13, %v13188_v7, %v8360_v37  ;;  %v9384_v32 = vor.u32 %v9576_v20, %v9383_v45  ;;  %v8467_v7 = vld [vmem:[#allocation5 + $0x100] sm:$0xee]  ;;  %vm14127_vm5 = vcmask 7168   ;;  %v6981_v20 = vshrl.u32 %v6972_v22, 16  ;;  %vm14132_vm13 = vmmov %vm14122_vm0 }
0x13eb   : > { %v8374_v44 = vsel %vm13839_vm11, %v8361_v51, %v8373_v16  ;;  %8711 = vmatpush.bf16.msra.mxu0 %v9400_v24  ;;  %v9367_v59 = vld [vmem:[#allocation5] sm:$0xf]  ;;  %v9570_v15 = vld [vmem:[#allocation5 + $0x4] sm:$0xf]  ;;  %vm14130_vm7 = vcmask 531456  }
0x13ec   : > { %8375 = vst [vmem:[#allocation5 + $0xf8] sm:$0xcc] %v8374_v44  ;;  %8739 = vmatpush.bf16.msra.mxu2 %v9404_v52  ;;  %v13362_v21 = vpop.permute.xlu2 %8454  ;;  %v9368_v24 = vor.u32 %v9572_v13, %v9367_v59  ;;  %v9372_v51 = vor.u32 %v9570_v15, %v9369_v58  ;;  %v9359_v52 = vld [vmem:[%s13559_s6] sm:$0xf]  ;;  %v6983_v19 = vrot.slane %v6981_v20, 7 }
0x13ed   : > { %v8459_v38 = vrot.slane %v13362_v21, 4  ;;  %v7914_v13 = vld [vmem:[#allocation5 + $0xd8] sm:$0x77] }
0x13ee   : > { %v6898_v6 = vpop.permute.xlu0 %6897 }
0x13ef   : > { %v8461_v29 = vsel %vm14122_vm0, %v8458_v11, %v8459_v38  ;;  %v6904_v61 = vrot.slane %v6898_v6, 4  ;;  %8712 = vmatpush.bf16.msra.mxu0 %v9384_v32 }
0x13f0   : > { %v7083_v40 = vpop.permute.xlu1 %7082  ;;  %v8462_v14 = vsel %vm14123_vm3, %v8453_v33, %v8461_v29  ;;  %8740 = vmatpush.bf16.msra.mxu2 %v9388_v60  ;;  %vm14135_vm3 = vcmask 1042432  }
0x13f1   : > { %v7089_v9 = vrot.slane %v7083_v40, 4  ;;  %v8468_v53 = vsel %vm13926_vm15, %v8462_v14, %v8467_v7  ;;  %v6911_v37 = vsel %vm14125_vm8, %v6903_v47, %v6904_v61  ;;  %v6984_v7 = vshll.u32 %v6972_v22, 16 }
0x13f2   : > { %8469 = vst [vmem:[#allocation5 + $0x100] sm:$0xee] %v8468_v53  ;;  %v6912_v16 = vsel %vm14127_vm5, %v13193_v26, %v6911_v37  ;;  %v14134_v37 = vmov 65535  }
0x13f3   : > { %v7096_v18 = vsel %vm14124_vm14, %v7088_v46, %v7089_v9  ;;  %v9569_v46 = vld [vmem:[%s13559_s6 + $0x4] sm:$0xf0]  ;;  %v6923_v44 = vsel %vm13748_vm12, %v6912_v16, %v6922_v56  ;;  %8713 = vmatpush.bf16.msra.mxu0 %v9368_v24  ;;  %v9489_v63 = vld [vmem:[#allocation5 + $0xf8] sm:$0xf0]  ;;  %vm14128_vm12 = vmmov %vm14122_vm0  ;;  %v6986_v9 = vor.u32 %v6984_v7, %v6983_v19  ;;  %v8692_v24 = vsel %vm14135_vm3, 4294967295, %v14134_v37 }
0x13f4   : > { %v7097_v33 = vsel %vm14126_vm2, %v13215_v54, %v7096_v18  ;;  %v9599_v54 = vld [vmem:[#allocation5 + $0xec] sm:$0xf]  ;;  %v13391_v26 = vor.u32 %v9569_v46, %v9359_v52  ;;  %8741 = vmatpush.bf16.msra.mxu2 %v9372_v51  ;;  %v8347_v27 = vpop.permute.xlu2 %8346  ;;  %6924 = vst [vmem:[#allocation5 + $0x88] sm:$0x11] %v6923_v44  ;;  %vm14139_vm2 = vcmask 580608   ;;  %v14151_v37 = vrot.slane %v12838_v50, 4 }
0x13f5   : > { %v7108_v47 = vsel %vm13751_vm10, %v7097_v33, %v7107_v48  ;;  %v9492_v12 = vor.u32 %v9599_v54, %v9489_v63  ;;  %v8355_v32 = vrot.slane %v8347_v27, 4  ;;  %vm14129_vm10 = vmmov %vm14122_vm0  ;;  %vm14133_vm0 = vcmask 588800   ;;  %v9487_v19 = vld [vmem:[#allocation5 + $0xe8] sm:$0xf] }
0x13f6   : > { %7109 = vst [vmem:[#allocation5 + $0x98] sm:$0x33] %v7108_v47  ;;  %v13393_v11 = vpop.permute.xlu0 %8348  ;;  %8714 = vmatmul.bf16.vlgmr.msra.gmra.mxu0 %v13391_v26 }
0x13f7   : > { %8790 = vmatpush.bf16.msrb.mxu0 %v9492_v12  ;;  %v8356_v30 = vrot.slane %v13393_v11, 4  ;;  %8742 = vmatmul.bf16.vlgmr.msra.gmra.mxu2 %v13391_v26 }
0x13f8   : > { %v7901_v45 = vpop.permute.xlu1 %7900 }
0x13f9   : > { %v7904_v62 = vrot.slane %v7901_v45, 4  ;;  %v8362_v6 = vsel %vm14129_vm10, %v8355_v32, %v8356_v30  ;;  %vm14142_vm10 = vcmask 973824  }
0x13fa   : > { %v8363_v29 = vsel %vm14131_vm9, %v8347_v27, %v8362_v6 }
0x13fb   : > { %v7907_v40 = vsel %vm14128_vm12, %v7903_v31, %v7904_v62  ;;  %8376 = vst [vmem:[#allocation5 + $0x100] sm:$0x11] %v8363_v29  ;;  %v6992_v22 = vld [vmem:[#allocation5 + $0x88] sm:$0x77] }
0x13fc   : > { %v7908_v60 = vsel %vm14130_vm7, %v13228_v17, %v7907_v40  ;;  %v7661_v58 = vpop.permute.xlu2 %7660  ;;  %v6993_v31 = vsel %vm12499_vm1, %v6986_v9, %v6992_v22  ;;  %v7451_v62 = vld [vmem:[#allocation5 + $0xa8] sm:$0xcc] }
0x13fd   : > { %v7915_v61 = vsel %vm12499_vm1, %v7908_v60, %v7914_v13  ;;  %v7667_v14 = vrot.slane %v7661_v58, 4  ;;  %6994 = vst [vmem:[#allocation5 + $0x88] sm:$0x77] %v6993_v31  ;;  %vm14136_vm1 = vmmov %vm14125_vm8  ;;  %vm14138_vm8 = vcmask 523264   ;;  %v7683_v13 = vld [vmem:[#allocation5 + $0xb8] sm:$0x88] }
0x13fe   : > { %7916 = vst [vmem:[#allocation5 + $0xd8] sm:$0x77] %v7915_v61  ;;  %v7770_v56 = vpop.permute.xlu0 %7769  ;;  %vm14137_vm14 = vmmov %vm14136_vm1 }
0x13ff   : > { %v7674_v17 = vsel %vm14132_vm13, %v7666_v8, %v7667_v14  ;;  %v7779_v53 = vrot.slane %v7770_v56, 4  ;;  %vm14140_vm5 = vmmov %vm14136_vm1 }
0x1400   : > { %v7999_v48 = vpop.permute.xlu1 %7998  ;;  %v7675_v18 = vsel %vm14133_vm0, %v13231_v42, %v7674_v17  ;;  %v13429_v52 = vsel %vm14140_vm5, %v8692_v24, 0  ;;  %vm14141_vm12 = vmmov %vm14136_vm1 }
0x1401   : > { %v8008_v59 = vrot.slane %v7999_v48, 4  ;;  %7687 = vst [vmem:[#allocation5 + $0xc8] sm:$0x33] %v7675_v18  ;;  %v7785_v15 = vsel %vm14137_vm14, %v7778_v1, %v7779_v53  ;;  %v9568_v1 = vld [vmem:[%s13559_s6 + $0x4] sm:$0xf]  ;;  %vm14143_vm7 = vmmov %vm14136_vm1 }
0x1402   : > { %v7786_v33 = vsel %vm14139_vm2, %v13247_v2, %v7785_v15  ;;  %v8507_v16 = vld [vmem:[#allocation5 + $0x100] sm:$0xff]  ;;  %v9361_v2 = vld [vmem:[%s13559_s6 + $0x8] sm:$0xf0]  ;;  %vm14144_vm9 = vmmov %vm14136_vm1  ;;  %vm14154_vm2 = vcmask 7168  }
0x1403   : > { %v8014_v25 = vsel %vm14136_vm1, %v8007_v36, %v8008_v59  ;;  %v8616_v42 = vunpack.c.l.b16 %v8507_v16  ;;  %v8617_v51 = vunpack.c.h.b16 %v8507_v16  ;;  %7796 = vst [vmem:[#allocation5 + $0xc8] sm:$0xcc] %v7786_v33  ;;  %v9601_v36 = vld [vmem:[#allocation5 + $0xf4] sm:$0xf0]  ;;  %v13444_v6 = vor.u32 %v9568_v1, %v9361_v2  ;;  %vm14145_vm13 = vmmov %vm14142_vm10 }
0x1404   : > { %v8015_v8 = vsel %vm14138_vm8, %v13255_v23, %v8014_v25  ;;  %v7423_v46 = vpop.permute.xlu2 %7422  ;;  %v9488_v40 = vor.u32 %v9601_v36, %v9487_v19  ;;  %v7224_v53 = vld [vmem:[#allocation5 + $0x98] sm:$0xee]  ;;  %vm14152_vm14 = vmmov %vm14140_vm5  ;;  %v9583_v19 = vld [vmem:[#allocation5 + $0x6c] sm:$0xf] }
0x1405   : > { %8025 = vst [vmem:[#allocation5 + $0xd8] sm:$0x88] %v8015_v8  ;;  %v7432_v47 = vrot.slane %v7423_v46, 4  ;;  %v8652_v20 = vpack.c.b16 %v8616_v42, %v8616_v42  ;;  %v8653_v44 = vpack.c.b16 %v8617_v51, %v8617_v51  ;;  %vm14153_vm8 = vmmov %vm14140_vm5  ;;  %vm14155_vm5 = vcmask 1039360  }
0x1406   : > { %v7655_v54 = vpop.permute.xlu0 %7654 }
0x1407   : > { %v7438_v63 = vsel %vm14141_vm12, %v7431_v28, %v7432_v47  ;;  %v7664_v12 = vrot.slane %v7655_v54, 4  ;;  %v8695_v45 = vand.u32 %v13429_v52, %v8652_v20  ;;  %v8698_v7 = vand.u32 %v13429_v52, %v8653_v44  ;;  %v8470_v47 = vld [vmem:[#allocation5 + $0x108] sm:$0xee] }
0x1408   : > { %v7429_v23 = vpop.permute.xlu1 %7428  ;;  %v7439_v32 = vsel %vm14142_vm10, %v13258_v55, %v7438_v63  ;;  %vm14157_vm12 = vcmask 449536  }
0x1409   : > { %v7435_v27 = vrot.slane %v7429_v23, 4  ;;  %v7452_v60 = vsel %vm13839_vm11, %v7439_v32, %v7451_v62  ;;  %v7670_v29 = vsel %vm14144_vm9, %v13282_v10, %v7664_v12  ;;  %8727 = vmatpush.bf16.msra.mxu1 %v8695_v45  ;;  %8755 = vmatpush.bf16.msra.mxu3 %v8698_v7  ;;  %vm14146_vm11 = vcmask 56320   ;;  %v9409_v7 = vld [vmem:[#allocation5 + $0x58] sm:$0xf0] }
0x140a   : > { %7453 = vst [vmem:[#allocation5 + $0xa8] sm:$0xcc] %v7452_v60  ;;  %v7671_v9 = vsel %vm14133_vm0, %v10180_v5, %v7670_v29  ;;  %v9595_v22 = vld [vmem:[#allocation5 + $0xcc] sm:$0xf]  ;;  %v9471_v58 = vld [vmem:[#allocation5 + $0xc8] sm:$0xf]  ;;  %vm14147_vm3 = vmmov %vm14146_vm11 }
0x140b   : > { %v7442_v28 = vsel %vm14143_vm7, %v7434_v41, %v7435_v27  ;;  %v7684_v41 = vsel %vm13860_vm6, %v7671_v9, %v7683_v13  ;;  %vm14149_vm6 = vmmov %vm14136_vm1  ;;  %vm14150_vm1 = vcmask 990208   ;;  %vm14159_vm7 = vcmask 457728   ;;  %v9407_v60 = vld [vmem:[#allocation5 + $0x48] sm:$0xf]  ;;  %v9577_v9 = vld [vmem:[#allocation5 + $0x34] sm:$0xf0] }
0x140c   : > { %v7443_v55 = vsel %vm14145_vm13, %v13278_v4, %v7442_v28  ;;  %v9473_v3 = vld [vmem:[#allocation5 + $0xd8] sm:$0xf0]  ;;  %v9597_v61 = vld [vmem:[#allocation5 + $0xd4] sm:$0xf0]  ;;  %7685 = vst [vmem:[#allocation5 + $0xb8] sm:$0x88] %v7684_v41  ;;  %v7211_v10 = vpop.permute.xlu2 %7210  ;;  %9493 = vmatmul.msk.bf16.vlgmr.msra.gmra.mxu1 %vm14146_vm11, %v13444_v6  ;;  %9494 = vmatmul.msk.bf16.vlgmr.msra.gmra.mxu3 %vm14147_vm3, %v13444_v6  ;;  %vm14161_vm9 = vmmov %vm14147_vm3 }
0x140d   : > { %8762 = vmatpush.bf16.msrb.mxu1 %v9488_v40  ;;  %7455 = vst [vmem:[#allocation5 + $0xb8] sm:$0x11] %v7443_v55  ;;  %v9476_v4 = vor.u32 %v9595_v22, %v9473_v3  ;;  %v9472_v31 = vor.u32 %v9597_v61, %v9471_v58  ;;  %v7214_v57 = vrot.slane %v7211_v10, 4  ;;  %v9393_v61 = vld [vmem:[#allocation5 + $0x38] sm:$0xf0] }
0x140e   : > { %v7077_v14 = vpop.permute.xlu0 %7076  ;;  %v9391_v22 = vld [vmem:[#allocation5 + $0x28] sm:$0xf]  ;;  %v9575_v10 = vld [vmem:[#allocation5 + $0x2c] sm:$0xf] }
0x140f   : > { %8791 = vmatpush.bf16.msrb.mxu0 %v9476_v4  ;;  %v7217_v48 = vsel %vm14149_vm6, %v14148_v43, %v7214_v57  ;;  %v7086_v17 = vrot.slane %v7077_v14, 4  ;;  %v9396_v57 = vor.u32 %v9575_v10, %v9393_v61  ;;  %v9377_v14 = vld [vmem:[#allocation5 + $0x18] sm:$0xf0]  ;;  %v9375_v43 = vld [vmem:[#allocation5 + $0x8] sm:$0xf] }
0x1410   : > { %v6892_v5 = vpop.permute.xlu1 %6891  ;;  %v7218_v59 = vsel %vm14150_vm1, %v13294_v49, %v7217_v48  ;;  %v9571_v48 = vld [vmem:[#allocation5 + $0xc] sm:$0xf]  ;;  %vm14163_vm1 = vcmask 1042434  }
0x1411   : > { %8763 = vmatpush.bf16.msrb.mxu1 %v9472_v31  ;;  %v6901_v56 = vrot.slane %v6892_v5, 4  ;;  %v7225_v18 = vsel %vm11068_vm4, %v7218_v59, %v7224_v53  ;;  %v7092_v25 = vsel %vm14153_vm8, %v7085_v34, %v7086_v17  ;;  %v9455_v49 = vld [vmem:[#allocation5 + $0xa8] sm:$0xf]  ;;  %v9591_v33 = vld [vmem:[#allocation5 + $0xac] sm:$0xf]  ;;  %vm14156_vm4 = vmmov %vm14149_vm6  ;;  %v9392_v31 = vor.u32 %v9577_v9, %v9391_v22 }
0x1412   : > { %7226 = vst [vmem:[#allocation5 + $0x98] sm:$0xee] %v7225_v18  ;;  %v7093_v8 = vsel %vm14155_vm5, %v13306_v39, %v7092_v25  ;;  %vm14158_vm10 = vmmov %vm14156_vm4  ;;  %v9573_v5 = vld [vmem:[#allocation5 + $0x14] sm:$0xf0]  ;;  %v9380_v17 = vor.u32 %v9571_v48, %v9377_v14  ;;  %vm14162_vm6 = vcmask 1040384  }
0x1413   : > { %v6907_v24 = vsel %vm14152_vm14, %v14151_v37, %v6901_v56  ;;  %7103 = vst [vmem:[#allocation5 + $0x88] sm:$0x88] %v7093_v8  ;;  %v9376_v56 = vor.u32 %v9573_v5, %v9375_v43  ;;  %vm14164_vm14 = vcmask 1041408  }
0x1414   : > { %v6908_v15 = vsel %vm14154_vm2, %v12838_v50, %v6907_v24  ;;  %v9593_v0 = vld [vmem:[#allocation5 + $0xb4] sm:$0xf0]  ;;  %v9457_v16 = vld [vmem:[#allocation5 + $0xb8] sm:$0xf0]  ;;  %v8457_v42 = vpop.permute.xlu2 %8456 }
0x1415   : > { %6918 = vst [vmem:[#allocation5 + $0x78] sm:$0xcc] %v6908_v15  ;;  %v9456_v51 = vor.u32 %v9593_v0, %v9455_v49  ;;  %v9460_v46 = vor.u32 %v9591_v33, %v9457_v16  ;;  %v8460_v36 = vrot.slane %v8457_v42, 4 }
0x1416   : > { %v8351_v34 = vpop.permute.xlu0 %8350 }
0x1417   : > { %8764 = vmatpush.bf16.msrb.mxu1 %v9456_v51  ;;  %8792 = vmatpush.bf16.msrb.mxu0 %v9460_v46  ;;  %v8463_v50 = vsel %vm14156_vm4, %v8459_v38, %v8460_v36  ;;  %v8357_v20 = vrot.slane %v8351_v34, 4 }
0x1418   : > { %v8464_v39 = vsel %vm14157_vm12, %v13362_v21, %v8463_v50  ;;  %v13504_v34 = vpop.permute.xlu1 %8853 }
0x1419   : > { %v8471_v44 = vsel %vm13926_vm15, %v8464_v39, %v8470_v47  ;;  %v8364_v1 = vsel %vm14158_vm10, %v8356_v30, %v8357_v20  ;;  %v9589_v2 = vld [vmem:[#allocation5 + $0x94] sm:$0xf0]  ;;  %v9441_v23 = vld [vmem:[#allocation5 + $0x98] sm:$0xf0]  ;;  %vm14160_vm15 = vmmov %vm14147_vm3 }
0x141a   : > { %8472 = vst [vmem:[#allocation5 + $0x108] sm:$0xee] %v8471_v44  ;;  %v8365_v54 = vsel %vm14159_vm7, %v13393_v11, %v8364_v1  ;;  %v9439_v63 = vld [vmem:[#allocation5 + $0x88] sm:$0xf]  ;;  %v9587_v38 = vld [vmem:[#allocation5 + $0x8c] sm:$0xf] }
0x141b   : > { %8377 = vst [vmem:[#allocation5 + $0x108] sm:$0x11] %v8365_v54  ;;  %v9440_v27 = vor.u32 %v9589_v2, %v9439_v63  ;;  %v9444_v12 = vor.u32 %v9587_v38, %v9441_v23  ;;  %v9581_v30 = vld [vmem:[#allocation5 + $0x54] sm:$0xf0]  ;;  %v9579_v11 = vld [vmem:[#allocation5 + $0x4c] sm:$0xf] }
0x141c   : > { %v9585_v45 = vld [vmem:[#allocation5 + $0x74] sm:$0xf0]  ;;  %v9425_v21 = vld [vmem:[#allocation5 + $0x78] sm:$0xf0]  ;;  %v9408_v29 = vor.u32 %v9581_v30, %v9407_v60  ;;  %v9412_v55 = vor.u32 %v9579_v11, %v9409_v7  ;;  %v13507_v20 = vpop.permute.xlu2 %8863 }
0x141d   : > { %8765 = vmatpush.bf16.msrb.mxu1 %v9440_v27  ;;  %8793 = vmatpush.bf16.msrb.mxu0 %v9444_v12  ;;  %v9424_v32 = vor.u32 %v9585_v45, %v9423_v35  ;;  %v9428_v62 = vor.u32 %v9583_v19, %v9425_v21 }
0x1421   : > { %8766 = vmatpush.bf16.msrb.mxu1 %v9424_v32  ;;  %8794 = vmatpush.bf16.msrb.mxu0 %v9428_v62 }
0x1422   : > { %v8508_v40 = vld [vmem:[#allocation5 + $0x108] sm:$0xff] }
0x1423   : > { %v8618_v28 = vunpack.c.l.b16 %v8508_v40  ;;  %v8619_v13 = vunpack.c.h.b16 %v8508_v40 }
0x1425   : > { %v8654_v3 = vpack.c.b16 %v8618_v28, %v8618_v28  ;;  %v8655_v41 = vpack.c.b16 %v8619_v13, %v8619_v13  ;;  %8767 = vmatpush.bf16.msrb.mxu1 %v9408_v29  ;;  %8795 = vmatpush.bf16.msrb.mxu0 %v9412_v55 }
0x1427   : > { %v8701_v58 = vand.u32 %v13429_v52, %v8654_v3  ;;  %v8704_v4 = vand.u32 %v13429_v52, %v8655_v41 }
0x1429   : > { %8783 = vmatpush.bf16.msrb.mxu3 %v8701_v58  ;;  %8811 = vmatpush.bf16.msrb.mxu2 %v8704_v4 }
0x142a   : > { %8768 = vmatpush.bf16.msrb.mxu1 %v9392_v31  ;;  %8796 = vmatpush.bf16.msrb.mxu0 %v9396_v57 }
0x142c   : > { %9495 = vmatmul.msk.bf16.vlgmr.msrb.gmra.mxu3 %vm14160_vm15, %v13444_v6  ;;  %9496 = vmatmul.msk.bf16.vlgmr.msrb.gmra.mxu2 %vm14161_vm9, %v13444_v6 }
0x142e   : > { %8769 = vmatpush.bf16.msrb.mxu1 %v9376_v56  ;;  %8797 = vmatpush.bf16.msrb.mxu0 %v9380_v17 }
0x1431   : > { %8770 = vmatmul.bf16.vlgmr.msrb.gmra.mxu1 %v13391_v26  ;;  %8798 = vmatmul.bf16.vlgmr.msrb.gmra.mxu0 %v13391_v26 }
0x1473   : > { %v8715_v52 = vpop.f32.mrf.mxu0 }
0x147a   : > { %v8743_v24 = vpop.f32.mrf.mxu2 }
0x147b   : > { %v8717_v53 = vpop.f32.mrf.mxu0 }
0x1482   : > { %v8745_v0 = vpop.f32.mrf.mxu2 }
0x1489   : > { %v8729_v59 = vpop.f32.mrf.mxu1 }
0x148a   : > { %v8730_v42 = vadd.f32 %v8729_v59, %v8715_v52 }
0x148f   : > { %v8757_v25 = vpop.f32.mrf.mxu3 }
0x1490   : > { %v8758_v38 = vadd.f32 %v8757_v25, %v8743_v24  ;;  %v8966_v25 = vlaneseq }
0x1491   : > { %v8731_v18 = vpop.f32.mrf.mxu1 }
0x1492   : > { %v8732_v37 = vadd.f32 %v8731_v18, %v8717_v53  ;;  %vm8968_vm8 = vcmp.lt.s32.totalorder %v8966_v25, 512 }
0x1494   : > { %v8826_v15 = vadd.f32 1e-08, %v8732_v37  ;;  %v8818_v8 = vmax.f32 %v8732_v37, 0.0 }
0x1496   : > { %10206 = vrcp.f32 %v8826_v15  ;;  %v13501_v49 = vmin.f32 %v8818_v8, 1.0 }
0x1497   : > { %v8759_v16 = vpop.f32.mrf.mxu3 }
0x1498   : > { %v8760_v26 = vadd.f32 %v8759_v16, %v8745_v0 }
0x149a   : > { %v8827_v36 = vadd.f32 1e-08, %v8760_v26  ;;  %v8819_v44 = vmax.f32 %v8760_v26, 0.0 }
0x149c   : > { %v10207_v6 = vpop.eup %10206  ;;  %10208 = vrcp.f32 %v8827_v36  ;;  %v8823_v23 = vmin.f32 %v8819_v44, 1.0 }
0x149d   : > { %v8834_v33 = vmul.f32 108.0, %v10207_v6 }
0x149e   : > { %v8958_v56 = vrot.slane %v8823_v23, 7 }
0x149f   : > { %v8838_v51 = vmul.f32 %v8834_v33, %v13501_v49 }
0x14a0   : > { %v8961_v15 = vsel %vm14162_vm6, %v13501_v49, %v8958_v56 }
0x14a1   : > { %v8842_v46 = vperm.slane %v8838_v51, 0 }
0x14a2   : > { %v10209_v1 = vpop.eup %10208 }
0x14a3   : > { %v8846_v47 = vmul.f32 %v8842_v46, %v8730_v42  ;;  %v8835_v54 = vmul.f32 108.0, %v10209_v1 }
0x14a5   : > { %v8856_v50 = vmul.f32 %v13504_v34, %v8846_v47  ;;  %v8839_v63 = vmul.f32 %v8835_v54, %v8823_v23 }
0x14a7   : > { %v8866_v39 = vadd.f32 %v13507_v20, %v8856_v50  ;;  %v8843_v27 = vperm.slane %v8839_v63, 0 }
0x14a9   : > { %v9497_v2 = vmul.f32 -1.442695, %v8866_v39  ;;  %v8847_v12 = vmul.f32 %v8843_v27, %v8758_v38 }
0x14ab   : > { %10210 = vpow2.f32 %v9497_v2  ;;  %v8857_v35 = vmul.f32 %v13504_v34, %v8847_v12 }
0x14ad   : > { %v13516_v62 = vadd.f32 %v13507_v20, %v8857_v35 }
0x14ae   : > { %v13511_v19 = vpop.f32.mrf.mxu1  ;;  %v13513_v32 = vpop.f32.mrf.mxu0 }
0x14af   : > { %v13518_v30 = vpop.f32.mrf.mxu3  ;;  %v13520_v7 = vpop.f32.mrf.mxu2  ;;  %v9498_v40 = vmul.f32 -1.442695, %v13516_v62 }
0x14b0   : > { %v8786_v49 = vadd.f32 %v13518_v30, %v13511_v19  ;;  %v8814_v23 = vadd.f32 %v13520_v7, %v13513_v32 }
0x14b1   : > { %v10211_v45 = vpop.eup %10210 }
0x14b2   : > { %v8882_v21 = vadd.f32 1.0, %v10211_v45 }
0x14b4   : > { %10212 = vrcp.f32 %v8882_v21  ;;  %v8895_v55 = vand.u32 2147483647, %v8882_v21  ;;  %v8897_v9 = vand.u32 2147483648, %v8882_v21  ;;  %vm8891_vm0 = vweird.f32 %v8882_v21 }
0x14b5   : > { %10214 = vpow2.f32 %v9498_v40 }
0x14b6   : > { %v8773_v13 = vpop.f32.mrf.mxu1  ;;  %v8801_v61 = vpop.f32.mrf.mxu0  ;;  %vm8896_vm3 = vcmp.eq.f32.partialorder %v8895_v55, 8.507059e+37  ;;  %v8898_v48 = vor.u32 1.1754944e-38, %v8897_v9 }
0x14b7   : > { %v8787_v29 = vpop.f32.mrf.mxu3  ;;  %v8815_v41 = vpop.f32.mrf.mxu2 }
0x14b8   : > { %v8788_v3 = vadd.f32 %v8787_v29, %v8773_v13  ;;  %v8816_v10 = vadd.f32 %v8815_v41, %v8801_v61 }
0x14ba   : > { %v10213_v60 = vpop.eup %10212  ;;  %v8820_v31 = vmax.f32 %v8788_v3, 0.0  ;;  %v8828_v57 = vadd.f32 1e-08, %v8788_v3  ;;  %v8821_v14 = vmax.f32 %v8816_v10, 0.0  ;;  %v8829_v43 = vadd.f32 1e-08, %v8816_v10 }
0x14bb   : > { %v8887_v11 = vmul.f32 %v10213_v60, %v8882_v21  ;;  %v10215_v22 = vpop.eup %10214  ;;  %vm8892_vm13 = vweird.f32 %v10213_v60 }
0x14bc   : > { %v8883_v4 = vadd.f32 1.0, %v10215_v22  ;;  %vm8893_vm11 = vmor %vm8891_vm0, %vm8892_vm13  ;;  %v8824_v52 = vmin.f32 %v8820_v31, 1.0  ;;  %v8825_v59 = vmin.f32 %v8821_v14, 1.0 }
0x14bd   : > { %v8888_v28 = vsub.f32 1.0, %v8887_v11 }
0x14be   : > { %10216 = vrcp.f32 %v8883_v4  ;;  %v8959_v37 = vrot.slane %v8824_v52, 6  ;;  %v8960_v24 = vrot.slane %v8825_v59, 5  ;;  %v8912_v36 = vand.u32 2147483648, %v8883_v4 }
0x14bf   : > { %v8889_v58 = vmul.f32 %v10213_v60, %v8888_v28  ;;  %10218 = vrcp.f32 %v8828_v57  ;;  %vm8906_vm5 = vweird.f32 %v8883_v4 }
0x14c0   : > { %10220 = vrcp.f32 %v8829_v43  ;;  %v8963_v8 = vsel %vm14163_vm1, %v8959_v37, %v8960_v24  ;;  %v8913_v63 = vor.u32 1.1754944e-38, %v8912_v36 }
0x14c1   : > { %v8890_v5 = vadd.f32 %v10213_v60, %v8889_v58  ;;  %v8964_v33 = vsel %vm14164_vm14, %v8961_v15, %v8963_v8 }
0x14c2   : > { %8970 = vst.msk [vmem:[%s484_s20] sm:$0xf] %vm8968_vm8, %v8964_v33 }
0x14c3   : > { %v8894_v17 = vsel %vm8893_vm11, %v10213_v60, %v8890_v5 }
0x14c4   : > { %v8899_v53 = vsel %vm8896_vm3, %v8898_v48, %v8894_v17  ;;  %v10217_v6 = vpop.eup %10216 }
0x14c5   : > { %v8946_v18 = vmul.f32 %v8899_v53, %v8866_v39  ;;  %v10219_v0 = vpop.eup %10218  ;;  %v8902_v16 = vmul.f32 %v10217_v6, %v8883_v4  ;;  %vm8907_vm2 = vweird.f32 %v10217_v6  ;;  %v8910_v39 = vand.u32 2147483647, %v8883_v4 }
0x14c6   : > { %v10221_v42 = vpop.eup %10220  ;;  %v8836_v51 = vmul.f32 108.0, %v10219_v0  ;;  %vm8908_vm4 = vmor %vm8906_vm5, %vm8907_vm2 }
0x14c7   : > { %8950 = vst [vmem:[%s13528_s15] sm:$0xff] %v8946_v18  ;;  %v8903_v26 = vsub.f32 1.0, %v8902_v16  ;;  %v8837_v46 = vmul.f32 108.0, %v10221_v42  ;;  %vm8911_vm12 = vcmp.eq.f32.partialorder %v8910_v39, 8.507059e+37 }
0x14c8   : > { %v8840_v47 = vmul.f32 %v8836_v51, %v8824_v52 }
0x14c9   : > { %v8904_v50 = vmul.f32 %v10217_v6, %v8903_v26  ;;  %v8841_v44 = vmul.f32 %v8837_v46, %v8825_v59 }
0x14ca   : > { %v8844_v1 = vperm.slane %v8840_v47, 0 }
0x14cb   : > { %v8905_v2 = vadd.f32 %v10217_v6, %v8904_v50  ;;  %v8845_v54 = vperm.slane %v8841_v44, 0 }
0x14cc   : > { %v8848_v38 = vmul.f32 %v8844_v1, %v8786_v49 }
0x14cd   : > { %v8909_v27 = vsel %vm8908_vm4, %v10217_v6, %v8905_v2  ;;  %v8849_v12 = vmul.f32 %v8845_v54, %v8814_v23 }
0x14ce   : > { %v8914_v45 = vsel %vm8911_vm12, %v8913_v63, %v8909_v27  ;;  %v8858_v21 = vmul.f32 %v13504_v34, %v8848_v38 }
0x14cf   : > { %v8947_v35 = vmul.f32 %v8914_v45, %v13516_v62  ;;  %v8859_v19 = vmul.f32 %v13504_v34, %v8849_v12 }
0x14d0   : > { %v8868_v30 = vadd.f32 %v13507_v20, %v8858_v21 }
0x14d1   : > { %8951 = vst [vmem:[%s13528_s15 + $0x8] sm:$0xff] %v8947_v35  ;;  %v8869_v40 = vadd.f32 %v13507_v20, %v8859_v19 }
0x14d2   : > { %v9499_v32 = vmul.f32 -1.442695, %v8868_v30 }
0x14d3   : > { %v9500_v7 = vmul.f32 -1.442695, %v8869_v40 }
0x14d4   : > { %10222 = vpow2.f32 %v9499_v32 }
0x14d5   : > { %10224 = vpow2.f32 %v9500_v7 }
0x14da   : > { %v10223_v60 = vpop.eup %10222 }
0x14db   : > { %v10225_v11 = vpop.eup %10224  ;;  %v8884_v28 = vadd.f32 1.0, %v10223_v60 }
0x14dc   : > { %v8885_v13 = vadd.f32 1.0, %v10225_v11 }
0x14dd   : > { %10226 = vrcp.f32 %v8884_v28  ;;  %v8927_v3 = vand.u32 2147483648, %v8884_v28  ;;  %v8925_v20 = vand.u32 2147483647, %v8884_v28  ;;  %vm8921_vm15 = vweird.f32 %v8884_v28 }
0x14de   : > { %10228 = vrcp.f32 %v8885_v13  ;;  %v8942_v22 = vand.u32 2147483648, %v8885_v13  ;;  %v8940_v10 = vand.u32 2147483647, %v8885_v13  ;;  %vm8936_vm13 = vweird.f32 %v8885_v13 }
0x14df   : > { %v8928_v31 = vor.u32 1.1754944e-38, %v8927_v3  ;;  %vm8926_vm0 = vcmp.eq.f32.partialorder %v8925_v20, 8.507059e+37 }
0x14e0   : > { %v8943_v14 = vor.u32 1.1754944e-38, %v8942_v22  ;;  %vm8941_vm3 = vcmp.eq.f32.partialorder %v8940_v10, 8.507059e+37 }
0x14e3   : > { %v10227_v29 = vpop.eup %10226 }
0x14e4   : > { %v10229_v55 = vpop.eup %10228  ;;  %v8917_v62 = vmul.f32 %v10227_v29, %v8884_v28  ;;  %vm8922_vm10 = vweird.f32 %v10227_v29 }
0x14e5   : > { %v8932_v9 = vmul.f32 %v10229_v55, %v8885_v13  ;;  %vm8937_vm7 = vweird.f32 %v10229_v55  ;;  %vm8923_vm9 = vmor %vm8921_vm15, %vm8922_vm10 }
0x14e6   : > { %v8918_v34 = vsub.f32 1.0, %v8917_v62  ;;  %vm8938_vm11 = vmor %vm8936_vm13, %vm8937_vm7 }
0x14e7   : > { %v8933_v61 = vsub.f32 1.0, %v8932_v9 }
0x14e8   : > { %v8919_v41 = vmul.f32 %v10227_v29, %v8918_v34 }
0x14e9   : > { %v8934_v58 = vmul.f32 %v10229_v55, %v8933_v61 }
0x14ea   : > { %v8920_v4 = vadd.f32 %v10227_v29, %v8919_v41 }
0x14eb   : > { %v8935_v57 = vadd.f32 %v10229_v55, %v8934_v58 }
0x14ec   : > { %v8924_v5 = vsel %vm8923_vm9, %v10227_v29, %v8920_v4 }
0x14ed   : > { %v8929_v43 = vsel %vm8926_vm0, %v8928_v31, %v8924_v5  ;;  %v8939_v48 = vsel %vm8938_vm11, %v10229_v55, %v8935_v57 }
0x14ee   : > { %v8948_v56 = vmul.f32 %v8929_v43, %v8868_v30  ;;  %v8944_v17 = vsel %vm8941_vm3, %v8943_v14, %v8939_v48 }
0x14ef   : > { %v8949_v52 = vmul.f32 %v8944_v17, %v8869_v40 }
0x14f0   : > { %8952 = vst [vmem:[%s13528_s15 + $0x10] sm:$0xff] %v8948_v56 }
0x14f1   : > { %8953 = vst [vmem:[%s13528_s15 + $0x18] sm:$0xff] %v8949_v52 }
0x14f2 PF: > { %s23_s21 = sadd.s32 1, %s10243_s21  }
0x14f3   : > { %p20_p4 = scmp.ge.s32.totalorder %s23_s21, 4  }
0x14f5   :  { %22 = sbr.rel (!%p20_p4) target bundleno = 6 (0x6), region = 119 }

</bundles_post_ra>
